<compile_context>
chip_gen: v6e
topology: v6e:2x2x1
jax: 0.10.0
libtpu: 0.0.40
codegen_flags: <defaults>
</compile_context>

<pallas_src>
import functools

import numpy as np
import jax
import jax.numpy as jnp
from jax import lax
from jax.experimental import pallas as pl
from jax.experimental.pallas import tpu as pltpu

_EPS = 1e-5
_LRELU = 0.1


# ---------------------------------------------------------------------------
# Bilinear (align_corners=True) interpolation matrix, built at trace time.
# ---------------------------------------------------------------------------
def _interp_matrix(n_in, n_out):
    A = np.zeros((n_out, n_in), np.float32)
    if n_out == 1:
        A[0, 0] = 1.0
        return jnp.asarray(A)
    src = np.arange(n_out, dtype=np.float64) * (n_in - 1) / (n_out - 1)
    i0 = np.clip(np.floor(src).astype(np.int64), 0, n_in - 1)
    i1 = np.clip(i0 + 1, 0, n_in - 1)
    w1 = (src - i0).astype(np.float32)
    np.add.at(A, (np.arange(n_out), i0), 1.0 - w1)
    np.add.at(A, (np.arange(n_out), i1), w1)
    return jnp.asarray(A)


# ---------------------------------------------------------------------------
# Pallas kernels (one per layer; epilogue fuses InstanceNorm + LeakyReLU)
# ---------------------------------------------------------------------------
def _conv_in_lrelu_kernel(w_ref, a_ref, o_ref):
    # w_ref: (Cout, K) bf16 packed conv weight
    # a_ref: (K, S)    bf16 im2col patches for one image (S = Ho*Wo on lanes)
    # o_ref: (Cout, S)      normalized + activated output
    y = jnp.dot(w_ref[...], a_ref[...], preferred_element_type=jnp.float32)
    mean = jnp.mean(y, axis=1, keepdims=True)
    var = jnp.mean(jnp.square(y - mean), axis=1, keepdims=True)
    yn = (y - mean) * lax.rsqrt(var + _EPS)
    o_ref[...] = jnp.maximum(yn, _LRELU * yn).astype(o_ref.dtype)


def conv_gemm_in_lrelu(wm, a, out_dtype):
    # wm: (Cout, K) bf16, a: (N, K, S) bf16 -> (N, Cout, S) out_dtype
    N, K, S = a.shape
    Cout = wm.shape[0]
    return pl.pallas_call(
        _conv_in_lrelu_kernel,
        out_shape=jax.ShapeDtypeStruct((N, Cout, S), out_dtype),
        grid=(N,),
        in_specs=[pl.BlockSpec((Cout, K), lambda n: (0, 0)),
                  pl.BlockSpec((None, K, S), lambda n: (n, 0, 0))],
        out_specs=pl.BlockSpec((None, Cout, S), lambda n: (n, 0, 0)),
        compiler_params=pltpu.CompilerParams(
            dimension_semantics=("parallel",)),
    )(wm, a)


def _deconv_in_lrelu_kernel(b_ref, a_ref, o_ref):
    # b_ref: (4*Cout, 9*Cin) bf16 packed (zero-padded) ConvTranspose weight
    # a_ref: (9*Cin, Sq)     bf16 nine shifted views of the padded input
    # o_ref: (4*Cout, Sq)    f32  parity-major output; IN stats pool parities
    cout = o_ref.shape[0] // 4
    y = jnp.dot(b_ref[...], a_ref[...], preferred_element_type=jnp.float32)
    cnt = 4.0 * y.shape[1]
    parts = [y[p * cout:(p + 1) * cout, :] for p in range(4)]
    mean = sum(jnp.sum(p_, axis=1, keepdims=True) for p_ in parts) / cnt
    var = sum(jnp.sum(jnp.square(p_ - mean), axis=1, keepdims=True)
              for p_ in parts) / cnt
    inv = lax.rsqrt(var + _EPS)
    for p in range(4):
        yn = (parts[p] - mean) * inv
        o_ref[p * cout:(p + 1) * cout, :] = jnp.maximum(
            yn, _LRELU * yn).astype(o_ref.dtype)


def deconv_gemm_in_lrelu(bm, a):
    # bm: (4*Cout, 9*Cin) bf16, a: (N, 9*Cin, Sq) bf16 -> (N, 4*Cout, Sq) f32
    N, K, Sq = a.shape
    R = bm.shape[0]
    return pl.pallas_call(
        _deconv_in_lrelu_kernel,
        out_shape=jax.ShapeDtypeStruct((N, R, Sq), jnp.float32),
        grid=(N,),
        in_specs=[pl.BlockSpec((R, K), lambda n: (0, 0)),
                  pl.BlockSpec((None, K, Sq), lambda n: (n, 0, 0))],
        out_specs=pl.BlockSpec((None, R, Sq), lambda n: (n, 0, 0)),
        compiler_params=pltpu.CompilerParams(
            dimension_semantics=("parallel",)),
    )(bm, a)


def _bilinear_up2_kernel(awt_ref, ah_ref, x_ref, o_ref):
    # awt_ref: (W, Wo) bf16, ah_ref: (Ho, H) bf16, x_ref: (C*H, W) bf16
    # o_ref:   (C, Ho, Wo) f32 ; out[c] = Ah @ (x[c] @ Aw^T)
    c = o_ref.shape[0]
    h = x_ref.shape[0] // c
    t = jnp.dot(x_ref[...], awt_ref[...],
                preferred_element_type=jnp.float32).astype(jnp.bfloat16)
    ah = ah_ref[...]
    for ci in range(c):
        o_ref[ci] = jnp.dot(
            ah, t[ci * h:(ci + 1) * h, :],
            preferred_element_type=jnp.float32).astype(o_ref.dtype)


def bilinear_up2(x):
    # x: (N, C, H, W) f32 -> (N, C, 2H, 2W) f32, bilinear, align_corners=True
    N, C, H, W = x.shape
    Ho, Wo = 2 * H, 2 * W
    ah = _interp_matrix(H, Ho).astype(jnp.bfloat16)        # (Ho, H)
    awt = _interp_matrix(W, Wo).T.astype(jnp.bfloat16)     # (W, Wo)
    xb = x.astype(jnp.bfloat16).reshape(N, C * H, W)
    return pl.pallas_call(
        _bilinear_up2_kernel,
        out_shape=jax.ShapeDtypeStruct((N, C, Ho, Wo), jnp.float32),
        grid=(N,),
        in_specs=[pl.BlockSpec((W, Wo), lambda n: (0, 0)),
                  pl.BlockSpec((Ho, H), lambda n: (0, 0)),
                  pl.BlockSpec((None, C * H, W), lambda n: (n, 0, 0))],
        out_specs=pl.BlockSpec((None, C, Ho, Wo), lambda n: (n, 0, 0, 0)),
        compiler_params=pltpu.CompilerParams(
            dimension_semantics=("parallel",)),
    )(awt, ah, xb)


# ---------------------------------------------------------------------------
# Layer wrappers (bf16 XLA glue around the fused kernels)
# ---------------------------------------------------------------------------
def conv4x4_in_lrelu(x, wm):
    # Conv2d(k=4,s=2,p=1,bias=False) + InstanceNorm2d + LeakyReLU(0.1)
    # x: (N, Cin, H, W), wm: (Cout, 16*Cin) bf16 -> (N, Cout, H/2, W/2) bf16
    N, Cin, H, W = x.shape
    Cout = wm.shape[0]
    Ho, Wo = H // 2, W // 2
    xp = jnp.pad(x.astype(jnp.bfloat16), ((0, 0), (0, 0), (1, 1), (1, 1)))
    taps = [xp[:, :, kh:kh + 2 * Ho:2, kw:kw + 2 * Wo:2]
            for kh in range(4) for kw in range(4)]
    a = jnp.stack(taps, axis=1).reshape(N, 16 * Cin, Ho * Wo)
    y = conv_gemm_in_lrelu(wm, a, jnp.bfloat16)            # (N, Cout, Ho*Wo)
    return y.reshape(N, Cout, Ho, Wo)


def deconv4x4_in_lrelu_cat(x, bm, skip):
    # ConvTranspose2d(k=4,s=2,p=1,bias=False) + InstanceNorm2d + LeakyReLU(0.1),
    # concatenated with `skip` along channels (== PyTorch deconv4x4.forward).
    # x: (N, Cin, H, W), bm: (4*Cout, 9*Cin) bf16, skip: (N, Cs, 2H, 2W)
    N, Cin, H, W = x.shape
    Cout = bm.shape[0] // 4
    xp = jnp.pad(x.astype(jnp.bfloat16), ((0, 0), (0, 0), (1, 1), (1, 1)))
    shifts = [xp[:, :, u:u + H, v:v + W] for u in range(3) for v in range(3)]
    a = jnp.stack(shifts, axis=1).reshape(N, 9 * Cin, H * W)
    y = deconv_gemm_in_lrelu(bm, a)                        # (N, 4*Cout, H*W) f32
    # parity interleave: rows ordered (ph, pw, co), columns (h, w)
    y = (y.reshape(N, 2, 2, Cout, H, W)
          .transpose(0, 3, 4, 1, 5, 2)
          .reshape(N, Cout, 2 * H, 2 * W))
    # TODO(synk): fuse the interleave + skip concat into the kernel epilogue.
    return jnp.concatenate([y, skip.astype(jnp.float32)], axis=1)


# ---------------------------------------------------------------------------
# One-time weight packing (outside jit)
# ---------------------------------------------------------------------------
def pack_params(params):
    packed = {}
    for i in range(1, 6):
        w = params[f"conv{i}"]                             # (Cout, Cin, 4, 4)
        cout, cin = w.shape[0], w.shape[1]
        packed[f"conv{i}"] = (w.transpose(0, 2, 3, 1)
                               .reshape(cout, 16 * cin).astype(jnp.bfloat16))
    for i in range(1, 5):
        w = params[f"deconv{i}"]                           # (Cin, Cout, 4, 4)
        cin, cout = w.shape[0], w.shape[1]
        rows = []
        for ph in range(2):
            for pw in range(2):
                cols = []
                for u in range(3):
                    for v in range(3):
                        r, s = u - ph, v - pw
                        if 0 <= r <= 1 and 0 <= s <= 1:
                            blk = w[:, :, 3 - ph - 2 * r, 3 - pw - 2 * s].T
                        else:
                            blk = jnp.zeros((cout, cin), w.dtype)
                        cols.append(blk)                   # (Cout, Cin)
                rows.append(jnp.concatenate(cols, axis=1))  # (Cout, 9*Cin)
        packed[f"deconv{i}"] = jnp.concatenate(rows, axis=0).astype(jnp.bfloat16)
    return packed


# ---------------------------------------------------------------------------
# AttrEncoder forward (head_layers=0 path)
# ---------------------------------------------------------------------------
def attr_encoder_forward(packed, x):
    # x: (N, in_nc, H, W) f32, NCHW (PyTorch layout)
    feat1 = conv4x4_in_lrelu(x, packed["conv1"])
    feat2 = conv4x4_in_lrelu(feat1, packed["conv2"])
    feat3 = conv4x4_in_lrelu(feat2, packed["conv3"])
    feat4 = conv4x4_in_lrelu(feat3, packed["conv4"])
    feat5 = conv4x4_in_lrelu(feat4, packed["conv5"])
    attr1 = deconv4x4_in_lrelu_cat(feat5, packed["deconv1"], feat4)
    attr2 = deconv4x4_in_lrelu_cat(attr1, packed["deconv2"], feat3)
    attr3 = deconv4x4_in_lrelu_cat(attr2, packed["deconv3"], feat2)
    attr4 = deconv4x4_in_lrelu_cat(attr3, packed["deconv4"], feat1)
    attr5 = bilinear_up2(attr4)
    return attr1, attr2, attr3, attr4, attr5


def init_params(key, nf=16, in_nc=3):
    keys = jax.random.split(key, 9)

    def w(k, shape):
        return 0.05 * jax.random.normal(k, shape, jnp.float32)

    return {
        # Conv2d weights: (out_c, in_c, 4, 4)
        "conv1": w(keys[0], (nf // 2, in_nc, 4, 4)),
        "conv2": w(keys[1], (nf, nf // 2, 4, 4)),
        "conv3": w(keys[2], (nf * 2, nf, 4, 4)),
        "conv4": w(keys[3], (nf * 4, nf * 2, 4, 4)),
        "conv5": w(keys[4], (nf * 8, nf * 4, 4, 4)),
        # ConvTranspose2d weights: (in_c, out_c, 4, 4)
        "deconv1": w(keys[5], (nf * 8, nf * 4, 4, 4)),
        "deconv2": w(keys[6], (nf * 8, nf * 2, 4, 4)),
        "deconv3": w(keys[7], (nf * 4, nf, 4, 4)),
        "deconv4": w(keys[8], (nf * 2, nf // 2, 4, 4)),
    }


# ---------------------------------------------------------------------------
# Pure-XLA reference (for correctness validation only)
# ---------------------------------------------------------------------------
def _ref_in_lrelu(y):
    mean = jnp.mean(y, axis=(2, 3), keepdims=True)
    var = jnp.mean(jnp.square(y - mean), axis=(2, 3), keepdims=True)
    yn = (y - mean) * lax.rsqrt(var + _EPS)
    return jnp.maximum(yn, _LRELU * yn)


def reference_forward(params, x, mirror_bf16):
    # mirror_bf16=True reproduces the kernel's bf16 cast points (isolates
    # structural bugs); False is the exact f32 PyTorch semantics.
    if mirror_bf16:
        q = lambda a: a.astype(jnp.bfloat16).astype(jnp.float32)
    else:
        q = lambda a: a
    dn = ("NCHW", "OIHW", "NCHW")
    prec = lax.Precision.HIGHEST

    def conv(h, w):
        y = lax.conv_general_dilated(q(h), q(w), (2, 2), ((1, 1), (1, 1)),
                                     dimension_numbers=dn, precision=prec)
        return q(_ref_in_lrelu(y))

    def deconv_cat(h, w, skip):
        wt = jnp.flip(w, (2, 3)).transpose(1, 0, 2, 3)
        y = lax.conv_general_dilated(q(h), q(wt), (1, 1), ((2, 2), (2, 2)),
                                     lhs_dilation=(2, 2),
                                     dimension_numbers=dn, precision=prec)
        return jnp.concatenate([_ref_in_lrelu(y), skip], axis=1)

    feat1 = conv(x, params["conv1"])
    feat2 = conv(feat1, params["conv2"])
    feat3 = conv(feat2, params["conv3"])
    feat4 = conv(feat3, params["conv4"])
    feat5 = conv(feat4, params["conv5"])
    attr1 = deconv_cat(feat5, params["deconv1"], feat4)
    attr2 = deconv_cat(attr1, params["deconv2"], feat3)
    attr3 = deconv_cat(attr2, params["deconv3"], feat2)
    attr4 = deconv_cat(attr3, params["deconv4"], feat1)
    _, _, H, W = attr4.shape
    ah, aw = _interp_matrix(H, 2 * H), _interp_matrix(W, 2 * W)
    t = jnp.einsum("jw,nchw->nchj", q(aw), q(attr4), precision=prec)
    attr5 = jnp.einsum("ih,nchj->ncij", q(ah), q(t), precision=prec)
    return attr1, attr2, attr3, attr4, attr5


if __name__ == "__main__":
    key = jax.random.PRNGKey(0)
    k_params, k_x = jax.random.split(key)

    nf, in_nc = 16, 3
    params = init_params(k_params, nf=nf, in_nc=in_nc)
    x = jax.random.normal(k_x, (2, in_nc, 64, 64), jnp.float32)   # NCHW

    packed = pack_params(params)                                   # once, outside jit
    fwd = jax.jit(attr_encoder_forward)
    outs = fwd(packed, x)
    jax.block_until_ready(outs)

    attr1, attr2, attr3, attr4, attr5 = outs
    assert attr1.shape == (2, nf * 8, 4, 4)
    assert attr2.shape == (2, nf * 4, 8, 8)
    assert attr3.shape == (2, nf * 2, 16, 16)
    assert attr4.shape == (2, nf, 32, 32)
    assert attr5.shape == (2, nf, 64, 64)

    # Correctness: (a) vs a reference mirroring the kernel's bf16 cast points
    # (catches structural bugs), (b) vs exact f32 PyTorch semantics (bounds
    # the bf16 precision loss accepted in the perf review).
    ref_m = jax.jit(functools.partial(reference_forward, mirror_bf16=True))(params, x)
    ref_f = jax.jit(functools.partial(reference_forward, mirror_bf16=False))(params, x)
    jax.block_until_ready((ref_m, ref_f))
    for o, rm, rf in zip(outs, ref_m, ref_f):
        rel_m = float(jnp.linalg.norm(o - rm) / (jnp.linalg.norm(rm) + 1e-12))
        rel_f = float(jnp.linalg.norm(o - rf) / (jnp.linalg.norm(rf) + 1e-12))
        assert rel_m < 1e-2, ("mirrored-precision reference mismatch", rel_m)
        assert rel_f < 0.15, ("f32 reference mismatch", rel_f)

    print("KERNEL_OK")
</pallas_src>

<mosaic_0001>
module attributes {stable_mosaic.version = 11 : i64} {
  func.func @_conv_in_lrelu_kernel(%arg0: i32, %arg1: memref<8x48xbf16, #tpu.memory_space<vmem>>, %arg2: memref<1x48x1024xbf16, #tpu.memory_space<vmem>>, %arg3: memref<1x8x1024xbf16, #tpu.memory_space<vmem>>) attributes {dimension_semantics = [#tpu.dimension_semantics<parallel>], iteration_bounds = array<i64: 2>, scalar_prefetch = 0 : i64, scratch_operands = 0 : i64, tpu.core_type = #tpu.core_type<tc>, window_params = [{pipeline_mode = #tpu.pipeline_mode<synchronous>, transform_indices = @transform_0, window_bounds = array<i64: 8, 48>}, {transform_indices = @transform_1, window_bounds = array<i64: 1, 48, 1024>}, {transform_indices = @transform_2, window_bounds = array<i64: 1, 8, 1024>}]} {
    %c0 = arith.constant 0 : index
    %c0_0 = arith.constant 0 : index
    %0 = vector.load %arg1[%c0, %c0_0] : memref<8x48xbf16, #tpu.memory_space<vmem>>, vector<8x48xbf16>
    %c0_1 = arith.constant 0 : index
    %c0_2 = arith.constant 0 : index
    %c0_3 = arith.constant 0 : index
    %1 = vector.load %arg2[%c0_1, %c0_2, %c0_3] : memref<1x48x1024xbf16, #tpu.memory_space<vmem>>, vector<1x48x1024xbf16>
    %2 = vector.shape_cast %1 : vector<1x48x1024xbf16> to vector<48x1024xbf16>
    %cst = arith.constant dense<0.000000e+00> : vector<8x1024xf32>
    %3 = tpu.matmul %0, %2, %cst {dimension_numbers = #tpu.dot_dimension_numbers<[1], [0], [0], [1], [0, 0, 1, 1], [], []>} : vector<8x48xbf16>, vector<48x1024xbf16>, vector<8x1024xf32> -> vector<8x1024xf32>
    %cst_4 = arith.constant dense<0.000000e+00> : vector<8xf32>
    %4 = vector.multi_reduction <add>, %3, %cst_4 [1] : vector<8x1024xf32> to vector<8xf32>
    %5 = vector.shape_cast %4 : vector<8xf32> to vector<8x1xf32>
    %cst_5 = arith.constant 1.024000e+03 : f32
    %6 = vector.broadcast %cst_5 : f32 to vector<8x1xf32>
    %7 = arith.divf %5, %6 : vector<8x1xf32>
    %8 = vector.broadcast %7 : vector<8x1xf32> to vector<8x1024xf32>
    %9 = arith.subf %3, %8 : vector<8x1024xf32>
    %10 = arith.mulf %9, %9 : vector<8x1024xf32>
    %cst_6 = arith.constant dense<0.000000e+00> : vector<8xf32>
    %11 = vector.multi_reduction <add>, %10, %cst_6 [1] : vector<8x1024xf32> to vector<8xf32>
    %12 = vector.shape_cast %11 : vector<8xf32> to vector<8x1xf32>
    %cst_7 = arith.constant 1.024000e+03 : f32
    %13 = vector.broadcast %cst_7 : f32 to vector<8x1xf32>
    %14 = arith.divf %12, %13 : vector<8x1xf32>
    %15 = vector.broadcast %7 : vector<8x1xf32> to vector<8x1024xf32>
    %16 = arith.subf %3, %15 : vector<8x1024xf32>
    %cst_8 = arith.constant 9.99999974E-6 : f32
    %17 = vector.broadcast %cst_8 : f32 to vector<8x1xf32>
    %18 = arith.addf %14, %17 : vector<8x1xf32>
    %19 = math.rsqrt %18 : vector<8x1xf32>
    %20 = vector.broadcast %19 : vector<8x1xf32> to vector<8x1024xf32>
    %21 = arith.mulf %16, %20 : vector<8x1024xf32>
    %cst_9 = arith.constant 1.000000e-01 : f32
    %22 = vector.broadcast %cst_9 : f32 to vector<8x1024xf32>
    %23 = arith.mulf %22, %21 : vector<8x1024xf32>
    %24 = arith.maximumf %21, %23 : vector<8x1024xf32>
    %25 = arith.truncf %24 : vector<8x1024xf32> to vector<8x1024xbf16>
    %c0_10 = arith.constant 0 : index
    %c0_11 = arith.constant 0 : index
    %c0_12 = arith.constant 0 : index
    %26 = vector.load %arg3[%c0_10, %c0_11, %c0_12] : memref<1x8x1024xbf16, #tpu.memory_space<vmem>>, vector<1x8x1024xbf16>
    %27 = vector.shape_cast %26 : vector<1x8x1024xbf16> to vector<8x1024xbf16>
    %28 = vector.shape_cast %25 : vector<8x1024xbf16> to vector<1x8x1024xbf16>
    tpu.vector_store %arg3[%c0_10, %c0_11, %c0_12], %28 {strides = array<i32>} : memref<1x8x1024xbf16, #tpu.memory_space<vmem>>, vector<1x8x1024xbf16>,
    return
  }
  func.func @transform_0(%arg0: i32) -> (i32, i32) {
    %c0_i32 = arith.constant 0 : i32
    %c0_i32_0 = arith.constant 0 : i32
    %c0_i32_1 = arith.constant 0 : i32
    return %c0_i32, %c0_i32_0 : i32, i32
  }
  func.func @transform_1(%arg0: i32) -> (i32, i32, i32) {
    %c0_i32 = arith.constant 0 : i32
    %c0_i32_0 = arith.constant 0 : i32
    %c0_i32_1 = arith.constant 0 : i32
    return %arg0, %c0_i32, %c0_i32_0 : i32, i32, i32
  }
  func.func @transform_2(%arg0: i32) -> (i32, i32, i32) {
    %c0_i32 = arith.constant 0 : i32
    %c0_i32_0 = arith.constant 0 : i32
    %c0_i32_1 = arith.constant 0 : i32
    return %arg0, %c0_i32, %c0_i32_0 : i32, i32, i32
  }
}

module attributes {stable_mosaic.version = 11 : i64} {
  func.func @_conv_in_lrelu_kernel(%arg0: i32, %arg1: memref<16x128xbf16, #tpu.memory_space<vmem>>, %arg2: memref<1x128x256xbf16, #tpu.memory_space<vmem>>, %arg3: memref<1x16x256xbf16, #tpu.memory_space<vmem>>) attributes {dimension_semantics = [#tpu.dimension_semantics<parallel>], iteration_bounds = array<i64: 2>, scalar_prefetch = 0 : i64, scratch_operands = 0 : i64, tpu.core_type = #tpu.core_type<tc>, window_params = [{pipeline_mode = #tpu.pipeline_mode<synchronous>, transform_indices = @transform_0, window_bounds = array<i64: 16, 128>}, {transform_indices = @transform_1, window_bounds = array<i64: 1, 128, 256>}, {transform_indices = @transform_2, window_bounds = array<i64: 1, 16, 256>}]} {
    %c0 = arith.constant 0 : index
    %c0_0 = arith.constant 0 : index
    %0 = vector.load %arg1[%c0, %c0_0] : memref<16x128xbf16, #tpu.memory_space<vmem>>, vector<16x128xbf16>
    %c0_1 = arith.constant 0 : index
    %c0_2 = arith.constant 0 : index
    %c0_3 = arith.constant 0 : index
    %1 = vector.load %arg2[%c0_1, %c0_2, %c0_3] : memref<1x128x256xbf16, #tpu.memory_space<vmem>>, vector<1x128x256xbf16>
    %2 = vector.shape_cast %1 : vector<1x128x256xbf16> to vector<128x256xbf16>
    %cst = arith.constant dense<0.000000e+00> : vector<16x256xf32>
    %3 = tpu.matmul %0, %2, %cst {dimension_numbers = #tpu.dot_dimension_numbers<[1], [0], [0], [1], [0, 0, 1, 1], [], []>} : vector<16x128xbf16>, vector<128x256xbf16>, vector<16x256xf32> -> vector<16x256xf32>
    %cst_4 = arith.constant dense<0.000000e+00> : vector<16xf32>
    %4 = vector.multi_reduction <add>, %3, %cst_4 [1] : vector<16x256xf32> to vector<16xf32>
    %5 = vector.shape_cast %4 : vector<16xf32> to vector<16x1xf32>
    %cst_5 = arith.constant 2.560000e+02 : f32
    %6 = vector.broadcast %cst_5 : f32 to vector<16x1xf32>
    %7 = arith.divf %5, %6 : vector<16x1xf32>
    %8 = vector.broadcast %7 : vector<16x1xf32> to vector<16x256xf32>
    %9 = arith.subf %3, %8 : vector<16x256xf32>
    %10 = arith.mulf %9, %9 : vector<16x256xf32>
    %cst_6 = arith.constant dense<0.000000e+00> : vector<16xf32>
    %11 = vector.multi_reduction <add>, %10, %cst_6 [1] : vector<16x256xf32> to vector<16xf32>
    %12 = vector.shape_cast %11 : vector<16xf32> to vector<16x1xf32>
    %cst_7 = arith.constant 2.560000e+02 : f32
    %13 = vector.broadcast %cst_7 : f32 to vector<16x1xf32>
    %14 = arith.divf %12, %13 : vector<16x1xf32>
    %15 = vector.broadcast %7 : vector<16x1xf32> to vector<16x256xf32>
    %16 = arith.subf %3, %15 : vector<16x256xf32>
    %cst_8 = arith.constant 9.99999974E-6 : f32
    %17 = vector.broadcast %cst_8 : f32 to vector<16x1xf32>
    %18 = arith.addf %14, %17 : vector<16x1xf32>
    %19 = math.rsqrt %18 : vector<16x1xf32>
    %20 = vector.broadcast %19 : vector<16x1xf32> to vector<16x256xf32>
    %21 = arith.mulf %16, %20 : vector<16x256xf32>
    %cst_9 = arith.constant 1.000000e-01 : f32
    %22 = vector.broadcast %cst_9 : f32 to vector<16x256xf32>
    %23 = arith.mulf %22, %21 : vector<16x256xf32>
    %24 = arith.maximumf %21, %23 : vector<16x256xf32>
    %25 = arith.truncf %24 : vector<16x256xf32> to vector<16x256xbf16>
    %c0_10 = arith.constant 0 : index
    %c0_11 = arith.constant 0 : index
    %c0_12 = arith.constant 0 : index
    %26 = vector.load %arg3[%c0_10, %c0_11, %c0_12] : memref<1x16x256xbf16, #tpu.memory_space<vmem>>, vector<1x16x256xbf16>
    %27 = vector.shape_cast %26 : vector<1x16x256xbf16> to vector<16x256xbf16>
    %28 = vector.shape_cast %25 : vector<16x256xbf16> to vector<1x16x256xbf16>
    tpu.vector_store %arg3[%c0_10, %c0_11, %c0_12], %28 {strides = array<i32>} : memref<1x16x256xbf16, #tpu.memory_space<vmem>>, vector<1x16x256xbf16>,
    return
  }
  func.func @transform_0(%arg0: i32) -> (i32, i32) {
    %c0_i32 = arith.constant 0 : i32
    %c0_i32_0 = arith.constant 0 : i32
    %c0_i32_1 = arith.constant 0 : i32
    return %c0_i32, %c0_i32_0 : i32, i32
  }
  func.func @transform_1(%arg0: i32) -> (i32, i32, i32) {
    %c0_i32 = arith.constant 0 : i32
    %c0_i32_0 = arith.constant 0 : i32
    %c0_i32_1 = arith.constant 0 : i32
    return %arg0, %c0_i32, %c0_i32_0 : i32, i32, i32
  }
  func.func @transform_2(%arg0: i32) -> (i32, i32, i32) {
    %c0_i32 = arith.constant 0 : i32
    %c0_i32_0 = arith.constant 0 : i32
    %c0_i32_1 = arith.constant 0 : i32
    return %arg0, %c0_i32, %c0_i32_0 : i32, i32, i32
  }
}

module attributes {stable_mosaic.version = 11 : i64} {
  func.func @_conv_in_lrelu_kernel(%arg0: i32, %arg1: memref<32x256xbf16, #tpu.memory_space<vmem>>, %arg2: memref<1x256x64xbf16, #tpu.memory_space<vmem>>, %arg3: memref<1x32x64xbf16, #tpu.memory_space<vmem>>) attributes {dimension_semantics = [#tpu.dimension_semantics<parallel>], iteration_bounds = array<i64: 2>, scalar_prefetch = 0 : i64, scratch_operands = 0 : i64, tpu.core_type = #tpu.core_type<tc>, window_params = [{pipeline_mode = #tpu.pipeline_mode<synchronous>, transform_indices = @transform_0, window_bounds = array<i64: 32, 256>}, {transform_indices = @transform_1, window_bounds = array<i64: 1, 256, 64>}, {transform_indices = @transform_2, window_bounds = array<i64: 1, 32, 64>}]} {
    %c0 = arith.constant 0 : index
    %c0_0 = arith.constant 0 : index
    %0 = vector.load %arg1[%c0, %c0_0] : memref<32x256xbf16, #tpu.memory_space<vmem>>, vector<32x256xbf16>
    %c0_1 = arith.constant 0 : index
    %c0_2 = arith.constant 0 : index
    %c0_3 = arith.constant 0 : index
    %1 = vector.load %arg2[%c0_1, %c0_2, %c0_3] : memref<1x256x64xbf16, #tpu.memory_space<vmem>>, vector<1x256x64xbf16>
    %2 = vector.shape_cast %1 : vector<1x256x64xbf16> to vector<256x64xbf16>
    %cst = arith.constant dense<0.000000e+00> : vector<32x64xf32>
    %3 = tpu.matmul %0, %2, %cst {dimension_numbers = #tpu.dot_dimension_numbers<[1], [0], [0], [1], [0, 0, 1, 1], [], []>} : vector<32x256xbf16>, vector<256x64xbf16>, vector<32x64xf32> -> vector<32x64xf32>
    %cst_4 = arith.constant dense<0.000000e+00> : vector<32xf32>
    %4 = vector.multi_reduction <add>, %3, %cst_4 [1] : vector<32x64xf32> to vector<32xf32>
    %5 = vector.shape_cast %4 : vector<32xf32> to vector<32x1xf32>
    %cst_5 = arith.constant 6.400000e+01 : f32
    %6 = vector.broadcast %cst_5 : f32 to vector<32x1xf32>
    %7 = arith.divf %5, %6 : vector<32x1xf32>
    %8 = vector.broadcast %7 : vector<32x1xf32> to vector<32x64xf32>
    %9 = arith.subf %3, %8 : vector<32x64xf32>
    %10 = arith.mulf %9, %9 : vector<32x64xf32>
    %cst_6 = arith.constant dense<0.000000e+00> : vector<32xf32>
    %11 = vector.multi_reduction <add>, %10, %cst_6 [1] : vector<32x64xf32> to vector<32xf32>
    %12 = vector.shape_cast %11 : vector<32xf32> to vector<32x1xf32>
    %cst_7 = arith.constant 6.400000e+01 : f32
    %13 = vector.broadcast %cst_7 : f32 to vector<32x1xf32>
    %14 = arith.divf %12, %13 : vector<32x1xf32>
    %15 = vector.broadcast %7 : vector<32x1xf32> to vector<32x64xf32>
    %16 = arith.subf %3, %15 : vector<32x64xf32>
    %cst_8 = arith.constant 9.99999974E-6 : f32
    %17 = vector.broadcast %cst_8 : f32 to vector<32x1xf32>
    %18 = arith.addf %14, %17 : vector<32x1xf32>
    %19 = math.rsqrt %18 : vector<32x1xf32>
    %20 = vector.broadcast %19 : vector<32x1xf32> to vector<32x64xf32>
    %21 = arith.mulf %16, %20 : vector<32x64xf32>
    %cst_9 = arith.constant 1.000000e-01 : f32
    %22 = vector.broadcast %cst_9 : f32 to vector<32x64xf32>
    %23 = arith.mulf %22, %21 : vector<32x64xf32>
    %24 = arith.maximumf %21, %23 : vector<32x64xf32>
    %25 = arith.truncf %24 : vector<32x64xf32> to vector<32x64xbf16>
    %c0_10 = arith.constant 0 : index
    %c0_11 = arith.constant 0 : index
    %c0_12 = arith.constant 0 : index
    %26 = vector.load %arg3[%c0_10, %c0_11, %c0_12] : memref<1x32x64xbf16, #tpu.memory_space<vmem>>, vector<1x32x64xbf16>
    %27 = vector.shape_cast %26 : vector<1x32x64xbf16> to vector<32x64xbf16>
    %28 = vector.shape_cast %25 : vector<32x64xbf16> to vector<1x32x64xbf16>
    tpu.vector_store %arg3[%c0_10, %c0_11, %c0_12], %28 {strides = array<i32>} : memref<1x32x64xbf16, #tpu.memory_space<vmem>>, vector<1x32x64xbf16>,
    return
  }
  func.func @transform_0(%arg0: i32) -> (i32, i32) {
    %c0_i32 = arith.constant 0 : i32
    %c0_i32_0 = arith.constant 0 : i32
    %c0_i32_1 = arith.constant 0 : i32
    return %c0_i32, %c0_i32_0 : i32, i32
  }
  func.func @transform_1(%arg0: i32) -> (i32, i32, i32) {
    %c0_i32 = arith.constant 0 : i32
    %c0_i32_0 = arith.constant 0 : i32
    %c0_i32_1 = arith.constant 0 : i32
    return %arg0, %c0_i32, %c0_i32_0 : i32, i32, i32
  }
  func.func @transform_2(%arg0: i32) -> (i32, i32, i32) {
    %c0_i32 = arith.constant 0 : i32
    %c0_i32_0 = arith.constant 0 : i32
    %c0_i32_1 = arith.constant 0 : i32
    return %arg0, %c0_i32, %c0_i32_0 : i32, i32, i32
  }
}

module attributes {stable_mosaic.version = 11 : i64} {
  func.func @_conv_in_lrelu_kernel(%arg0: i32, %arg1: memref<64x512xbf16, #tpu.memory_space<vmem>>, %arg2: memref<1x512x16xbf16, #tpu.memory_space<vmem>>, %arg3: memref<1x64x16xbf16, #tpu.memory_space<vmem>>) attributes {dimension_semantics = [#tpu.dimension_semantics<parallel>], iteration_bounds = array<i64: 2>, scalar_prefetch = 0 : i64, scratch_operands = 0 : i64, tpu.core_type = #tpu.core_type<tc>, window_params = [{pipeline_mode = #tpu.pipeline_mode<synchronous>, transform_indices = @transform_0, window_bounds = array<i64: 64, 512>}, {transform_indices = @transform_1, window_bounds = array<i64: 1, 512, 16>}, {transform_indices = @transform_2, window_bounds = array<i64: 1, 64, 16>}]} {
    %c0 = arith.constant 0 : index
    %c0_0 = arith.constant 0 : index
    %0 = vector.load %arg1[%c0, %c0_0] : memref<64x512xbf16, #tpu.memory_space<vmem>>, vector<64x512xbf16>
    %c0_1 = arith.constant 0 : index
    %c0_2 = arith.constant 0 : index
    %c0_3 = arith.constant 0 : index
    %1 = vector.load %arg2[%c0_1, %c0_2, %c0_3] : memref<1x512x16xbf16, #tpu.memory_space<vmem>>, vector<1x512x16xbf16>
    %2 = vector.shape_cast %1 : vector<1x512x16xbf16> to vector<512x16xbf16>
    %cst = arith.constant dense<0.000000e+00> : vector<64x16xf32>
    %3 = tpu.matmul %0, %2, %cst {dimension_numbers = #tpu.dot_dimension_numbers<[1], [0], [0], [1], [0, 0, 1, 1], [], []>} : vector<64x512xbf16>, vector<512x16xbf16>, vector<64x16xf32> -> vector<64x16xf32>
    %cst_4 = arith.constant dense<0.000000e+00> : vector<64xf32>
    %4 = vector.multi_reduction <add>, %3, %cst_4 [1] : vector<64x16xf32> to vector<64xf32>
    %5 = vector.shape_cast %4 : vector<64xf32> to vector<64x1xf32>
    %cst_5 = arith.constant 1.600000e+01 : f32
    %6 = vector.broadcast %cst_5 : f32 to vector<64x1xf32>
    %7 = arith.divf %5, %6 : vector<64x1xf32>
    %8 = vector.broadcast %7 : vector<64x1xf32> to vector<64x16xf32>
    %9 = arith.subf %3, %8 : vector<64x16xf32>
    %10 = arith.mulf %9, %9 : vector<64x16xf32>
    %cst_6 = arith.constant dense<0.000000e+00> : vector<64xf32>
    %11 = vector.multi_reduction <add>, %10, %cst_6 [1] : vector<64x16xf32> to vector<64xf32>
    %12 = vector.shape_cast %11 : vector<64xf32> to vector<64x1xf32>
    %cst_7 = arith.constant 1.600000e+01 : f32
    %13 = vector.broadcast %cst_7 : f32 to vector<64x1xf32>
    %14 = arith.divf %12, %13 : vector<64x1xf32>
    %15 = vector.broadcast %7 : vector<64x1xf32> to vector<64x16xf32>
    %16 = arith.subf %3, %15 : vector<64x16xf32>
    %cst_8 = arith.constant 9.99999974E-6 : f32
    %17 = vector.broadcast %cst_8 : f32 to vector<64x1xf32>
    %18 = arith.addf %14, %17 : vector<64x1xf32>
    %19 = math.rsqrt %18 : vector<64x1xf32>
    %20 = vector.broadcast %19 : vector<64x1xf32> to vector<64x16xf32>
    %21 = arith.mulf %16, %20 : vector<64x16xf32>
    %cst_9 = arith.constant 1.000000e-01 : f32
    %22 = vector.broadcast %cst_9 : f32 to vector<64x16xf32>
    %23 = arith.mulf %22, %21 : vector<64x16xf32>
    %24 = arith.maximumf %21, %23 : vector<64x16xf32>
    %25 = arith.truncf %24 : vector<64x16xf32> to vector<64x16xbf16>
    %c0_10 = arith.constant 0 : index
    %c0_11 = arith.constant 0 : index
    %c0_12 = arith.constant 0 : index
    %26 = vector.load %arg3[%c0_10, %c0_11, %c0_12] : memref<1x64x16xbf16, #tpu.memory_space<vmem>>, vector<1x64x16xbf16>
    %27 = vector.shape_cast %26 : vector<1x64x16xbf16> to vector<64x16xbf16>
    %28 = vector.shape_cast %25 : vector<64x16xbf16> to vector<1x64x16xbf16>
    tpu.vector_store %arg3[%c0_10, %c0_11, %c0_12], %28 {strides = array<i32>} : memref<1x64x16xbf16, #tpu.memory_space<vmem>>, vector<1x64x16xbf16>,
    return
  }
  func.func @transform_0(%arg0: i32) -> (i32, i32) {
    %c0_i32 = arith.constant 0 : i32
    %c0_i32_0 = arith.constant 0 : i32
    %c0_i32_1 = arith.constant 0 : i32
    return %c0_i32, %c0_i32_0 : i32, i32
  }
  func.func @transform_1(%arg0: i32) -> (i32, i32, i32) {
    %c0_i32 = arith.constant 0 : i32
    %c0_i32_0 = arith.constant 0 : i32
    %c0_i32_1 = arith.constant 0 : i32
    return %arg0, %c0_i32, %c0_i32_0 : i32, i32, i32
  }
  func.func @transform_2(%arg0: i32) -> (i32, i32, i32) {
    %c0_i32 = arith.constant 0 : i32
    %c0_i32_0 = arith.constant 0 : i32
    %c0_i32_1 = arith.constant 0 : i32
    return %arg0, %c0_i32, %c0_i32_0 : i32, i32, i32
  }
}

module attributes {stable_mosaic.version = 11 : i64} {
  func.func @_conv_in_lrelu_kernel(%arg0: i32, %arg1: memref<128x1024xbf16, #tpu.memory_space<vmem>>, %arg2: memref<1x1024x4xbf16, #tpu.memory_space<vmem>>, %arg3: memref<1x128x4xbf16, #tpu.memory_space<vmem>>) attributes {dimension_semantics = [#tpu.dimension_semantics<parallel>], iteration_bounds = array<i64: 2>, scalar_prefetch = 0 : i64, scratch_operands = 0 : i64, tpu.core_type = #tpu.core_type<tc>, window_params = [{pipeline_mode = #tpu.pipeline_mode<synchronous>, transform_indices = @transform_0, window_bounds = array<i64: 128, 1024>}, {transform_indices = @transform_1, window_bounds = array<i64: 1, 1024, 4>}, {transform_indices = @transform_2, window_bounds = array<i64: 1, 128, 4>}]} {
    %c0 = arith.constant 0 : index
    %c0_0 = arith.constant 0 : index
    %0 = vector.load %arg1[%c0, %c0_0] : memref<128x1024xbf16, #tpu.memory_space<vmem>>, vector<128x1024xbf16>
    %c0_1 = arith.constant 0 : index
    %c0_2 = arith.constant 0 : index
    %c0_3 = arith.constant 0 : index
    %1 = vector.load %arg2[%c0_1, %c0_2, %c0_3] : memref<1x1024x4xbf16, #tpu.memory_space<vmem>>, vector<1x1024x4xbf16>
    %2 = vector.shape_cast %1 : vector<1x1024x4xbf16> to vector<1024x4xbf16>
    %cst = arith.constant dense<0.000000e+00> : vector<128x4xf32>
    %3 = tpu.matmul %0, %2, %cst {dimension_numbers = #tpu.dot_dimension_numbers<[1], [0], [0], [1], [0, 0, 1, 1], [], []>} : vector<128x1024xbf16>, vector<1024x4xbf16>, vector<128x4xf32> -> vector<128x4xf32>
    %cst_4 = arith.constant dense<0.000000e+00> : vector<128xf32>
    %4 = vector.multi_reduction <add>, %3, %cst_4 [1] : vector<128x4xf32> to vector<128xf32>
    %5 = vector.shape_cast %4 : vector<128xf32> to vector<128x1xf32>
    %cst_5 = arith.constant 4.000000e+00 : f32
    %6 = vector.broadcast %cst_5 : f32 to vector<128x1xf32>
    %7 = arith.divf %5, %6 : vector<128x1xf32>
    %8 = vector.broadcast %7 : vector<128x1xf32> to vector<128x4xf32>
    %9 = arith.subf %3, %8 : vector<128x4xf32>
    %10 = arith.mulf %9, %9 : vector<128x4xf32>
    %cst_6 = arith.constant dense<0.000000e+00> : vector<128xf32>
    %11 = vector.multi_reduction <add>, %10, %cst_6 [1] : vector<128x4xf32> to vector<128xf32>
    %12 = vector.shape_cast %11 : vector<128xf32> to vector<128x1xf32>
    %cst_7 = arith.constant 4.000000e+00 : f32
    %13 = vector.broadcast %cst_7 : f32 to vector<128x1xf32>
    %14 = arith.divf %12, %13 : vector<128x1xf32>
    %15 = vector.broadcast %7 : vector<128x1xf32> to vector<128x4xf32>
    %16 = arith.subf %3, %15 : vector<128x4xf32>
    %cst_8 = arith.constant 9.99999974E-6 : f32
    %17 = vector.broadcast %cst_8 : f32 to vector<128x1xf32>
    %18 = arith.addf %14, %17 : vector<128x1xf32>
    %19 = math.rsqrt %18 : vector<128x1xf32>
    %20 = vector.broadcast %19 : vector<128x1xf32> to vector<128x4xf32>
    %21 = arith.mulf %16, %20 : vector<128x4xf32>
    %cst_9 = arith.constant 1.000000e-01 : f32
    %22 = vector.broadcast %cst_9 : f32 to vector<128x4xf32>
    %23 = arith.mulf %22, %21 : vector<128x4xf32>
    %24 = arith.maximumf %21, %23 : vector<128x4xf32>
    %25 = arith.truncf %24 : vector<128x4xf32> to vector<128x4xbf16>
    %c0_10 = arith.constant 0 : index
    %c0_11 = arith.constant 0 : index
    %c0_12 = arith.constant 0 : index
    %26 = vector.load %arg3[%c0_10, %c0_11, %c0_12] : memref<1x128x4xbf16, #tpu.memory_space<vmem>>, vector<1x128x4xbf16>
    %27 = vector.shape_cast %26 : vector<1x128x4xbf16> to vector<128x4xbf16>
    %28 = vector.shape_cast %25 : vector<128x4xbf16> to vector<1x128x4xbf16>
    tpu.vector_store %arg3[%c0_10, %c0_11, %c0_12], %28 {strides = array<i32>} : memref<1x128x4xbf16, #tpu.memory_space<vmem>>, vector<1x128x4xbf16>,
    return
  }
  func.func @transform_0(%arg0: i32) -> (i32, i32) {
    %c0_i32 = arith.constant 0 : i32
    %c0_i32_0 = arith.constant 0 : i32
    %c0_i32_1 = arith.constant 0 : i32
    return %c0_i32, %c0_i32_0 : i32, i32
  }
  func.func @transform_1(%arg0: i32) -> (i32, i32, i32) {
    %c0_i32 = arith.constant 0 : i32
    %c0_i32_0 = arith.constant 0 : i32
    %c0_i32_1 = arith.constant 0 : i32
    return %arg0, %c0_i32, %c0_i32_0 : i32, i32, i32
  }
  func.func @transform_2(%arg0: i32) -> (i32, i32, i32) {
    %c0_i32 = arith.constant 0 : i32
    %c0_i32_0 = arith.constant 0 : i32
    %c0_i32_1 = arith.constant 0 : i32
    return %arg0, %c0_i32, %c0_i32_0 : i32, i32, i32
  }
}

module attributes {stable_mosaic.version = 11 : i64} {
  func.func @_deconv_in_lrelu_kernel(%arg0: i32, %arg1: memref<256x1152xbf16, #tpu.memory_space<vmem>>, %arg2: memref<1x1152x4xbf16, #tpu.memory_space<vmem>>, %arg3: memref<1x256x4xf32, #tpu.memory_space<vmem>>) attributes {dimension_semantics = [#tpu.dimension_semantics<parallel>], iteration_bounds = array<i64: 2>, scalar_prefetch = 0 : i64, scratch_operands = 0 : i64, tpu.core_type = #tpu.core_type<tc>, window_params = [{pipeline_mode = #tpu.pipeline_mode<synchronous>, transform_indices = @transform_0, window_bounds = array<i64: 256, 1152>}, {transform_indices = @transform_1, window_bounds = array<i64: 1, 1152, 4>}, {transform_indices = @transform_2, window_bounds = array<i64: 1, 256, 4>}]} {
    %c0 = arith.constant 0 : index
    %c0_0 = arith.constant 0 : index
    %0 = vector.load %arg1[%c0, %c0_0] : memref<256x1152xbf16, #tpu.memory_space<vmem>>, vector<256x1152xbf16>
    %c0_1 = arith.constant 0 : index
    %c0_2 = arith.constant 0 : index
    %c0_3 = arith.constant 0 : index
    %1 = vector.load %arg2[%c0_1, %c0_2, %c0_3] : memref<1x1152x4xbf16, #tpu.memory_space<vmem>>, vector<1x1152x4xbf16>
    %2 = vector.shape_cast %1 : vector<1x1152x4xbf16> to vector<1152x4xbf16>
    %cst = arith.constant dense<0.000000e+00> : vector<256x4xf32>
    %3 = tpu.matmul %0, %2, %cst {dimension_numbers = #tpu.dot_dimension_numbers<[1], [0], [0], [1], [0, 0, 1, 1], [], []>} : vector<256x1152xbf16>, vector<1152x4xbf16>, vector<256x4xf32> -> vector<256x4xf32>
    %4 = vector.extract_strided_slice %3 {offsets = [0, 0], sizes = [64, 4], strides = [1, 1]} : vector<256x4xf32> to vector<64x4xf32>
    %5 = vector.extract_strided_slice %3 {offsets = [64, 0], sizes = [64, 4], strides = [1, 1]} : vector<256x4xf32> to vector<64x4xf32>
    %6 = vector.extract_strided_slice %3 {offsets = [128, 0], sizes = [64, 4], strides = [1, 1]} : vector<256x4xf32> to vector<64x4xf32>
    %7 = vector.extract_strided_slice %3 {offsets = [192, 0], sizes = [64, 4], strides = [1, 1]} : vector<256x4xf32> to vector<64x4xf32>
    %cst_4 = arith.constant dense<0.000000e+00> : vector<64xf32>
    %8 = vector.multi_reduction <add>, %4, %cst_4 [1] : vector<64x4xf32> to vector<64xf32>
    %9 = vector.shape_cast %8 : vector<64xf32> to vector<64x1xf32>
    %cst_5 = arith.constant 0.000000e+00 : f32
    %10 = vector.broadcast %cst_5 : f32 to vector<64x1xf32>
    %11 = arith.addf %10, %9 : vector<64x1xf32>
    %cst_6 = arith.constant dense<0.000000e+00> : vector<64xf32>
    %12 = vector.multi_reduction <add>, %5, %cst_6 [1] : vector<64x4xf32> to vector<64xf32>
    %13 = vector.shape_cast %12 : vector<64xf32> to vector<64x1xf32>
    %14 = arith.addf %11, %13 : vector<64x1xf32>
    %cst_7 = arith.constant dense<0.000000e+00> : vector<64xf32>
    %15 = vector.multi_reduction <add>, %6, %cst_7 [1] : vector<64x4xf32> to vector<64xf32>
    %16 = vector.shape_cast %15 : vector<64xf32> to vector<64x1xf32>
    %17 = arith.addf %14, %16 : vector<64x1xf32>
    %cst_8 = arith.constant dense<0.000000e+00> : vector<64xf32>
    %18 = vector.multi_reduction <add>, %7, %cst_8 [1] : vector<64x4xf32> to vector<64xf32>
    %19 = vector.shape_cast %18 : vector<64xf32> to vector<64x1xf32>
    %20 = arith.addf %17, %19 : vector<64x1xf32>
    %cst_9 = arith.constant 1.600000e+01 : f32
    %21 = vector.broadcast %cst_9 : f32 to vector<64x1xf32>
    %22 = arith.divf %20, %21 : vector<64x1xf32>
    %23 = vector.broadcast %22 : vector<64x1xf32> to vector<64x4xf32>
    %24 = arith.subf %4, %23 : vector<64x4xf32>
    %25 = arith.mulf %24, %24 : vector<64x4xf32>
    %cst_10 = arith.constant dense<0.000000e+00> : vector<64xf32>
    %26 = vector.multi_reduction <add>, %25, %cst_10 [1] : vector<64x4xf32> to vector<64xf32>
    %27 = vector.shape_cast %26 : vector<64xf32> to vector<64x1xf32>
    %cst_11 = arith.constant 0.000000e+00 : f32
    %28 = vector.broadcast %cst_11 : f32 to vector<64x1xf32>
    %29 = arith.addf %28, %27 : vector<64x1xf32>
    %30 = vector.broadcast %22 : vector<64x1xf32> to vector<64x4xf32>
    %31 = arith.subf %5, %30 : vector<64x4xf32>
    %32 = arith.mulf %31, %31 : vector<64x4xf32>
    %cst_12 = arith.constant dense<0.000000e+00> : vector<64xf32>
    %33 = vector.multi_reduction <add>, %32, %cst_12 [1] : vector<64x4xf32> to vector<64xf32>
    %34 = vector.shape_cast %33 : vector<64xf32> to vector<64x1xf32>
    %35 = arith.addf %29, %34 : vector<64x1xf32>
    %36 = vector.broadcast %22 : vector<64x1xf32> to vector<64x4xf32>
    %37 = arith.subf %6, %36 : vector<64x4xf32>
    %38 = arith.mulf %37, %37 : vector<64x4xf32>
    %cst_13 = arith.constant dense<0.000000e+00> : vector<64xf32>
    %39 = vector.multi_reduction <add>, %38, %cst_13 [1] : vector<64x4xf32> to vector<64xf32>
    %40 = vector.shape_cast %39 : vector<64xf32> to vector<64x1xf32>
    %41 = arith.addf %35, %40 : vector<64x1xf32>
    %42 = vector.broadcast %22 : vector<64x1xf32> to vector<64x4xf32>
    %43 = arith.subf %7, %42 : vector<64x4xf32>
    %44 = arith.mulf %43, %43 : vector<64x4xf32>
    %cst_14 = arith.constant dense<0.000000e+00> : vector<64xf32>
    %45 = vector.multi_reduction <add>, %44, %cst_14 [1] : vector<64x4xf32> to vector<64xf32>
    %46 = vector.shape_cast %45 : vector<64xf32> to vector<64x1xf32>
    %47 = arith.addf %41, %46 : vector<64x1xf32>
    %cst_15 = arith.constant 1.600000e+01 : f32
    %48 = vector.broadcast %cst_15 : f32 to vector<64x1xf32>
    %49 = arith.divf %47, %48 : vector<64x1xf32>
    %cst_16 = arith.constant 9.99999974E-6 : f32
    %50 = vector.broadcast %cst_16 : f32 to vector<64x1xf32>
    %51 = arith.addf %49, %50 : vector<64x1xf32>
    %52 = math.rsqrt %51 : vector<64x1xf32>
    %53 = vector.broadcast %22 : vector<64x1xf32> to vector<64x4xf32>
    %54 = arith.subf %4, %53 : vector<64x4xf32>
    %55 = vector.broadcast %52 : vector<64x1xf32> to vector<64x4xf32>
    %56 = arith.mulf %54, %55 : vector<64x4xf32>
    %cst_17 = arith.constant 1.000000e-01 : f32
    %57 = vector.broadcast %cst_17 : f32 to vector<64x4xf32>
    %58 = arith.mulf %57, %56 : vector<64x4xf32>
    %59 = arith.maximumf %56, %58 : vector<64x4xf32>
    %c0_18 = arith.constant 0 : index
    %c0_19 = arith.constant 0 : index
    %c0_20 = arith.constant 0 : index
    %60 = vector.load %arg3[%c0_18, %c0_19, %c0_20] : memref<1x256x4xf32, #tpu.memory_space<vmem>>, vector<1x64x4xf32>
    %61 = vector.shape_cast %60 : vector<1x64x4xf32> to vector<64x4xf32>
    %62 = vector.shape_cast %59 : vector<64x4xf32> to vector<1x64x4xf32>
    tpu.vector_store %arg3[%c0_18, %c0_19, %c0_20], %62 {strides = array<i32>} : memref<1x256x4xf32, #tpu.memory_space<vmem>>, vector<1x64x4xf32>,
    %63 = vector.broadcast %22 : vector<64x1xf32> to vector<64x4xf32>
    %64 = arith.subf %5, %63 : vector<64x4xf32>
    %65 = vector.broadcast %52 : vector<64x1xf32> to vector<64x4xf32>
    %66 = arith.mulf %64, %65 : vector<64x4xf32>
    %cst_21 = arith.constant 1.000000e-01 : f32
    %67 = vector.broadcast %cst_21 : f32 to vector<64x4xf32>
    %68 = arith.mulf %67, %66 : vector<64x4xf32>
    %69 = arith.maximumf %66, %68 : vector<64x4xf32>
    %c0_22 = arith.constant 0 : index
    %c64 = arith.constant 64 : index
    %c0_23 = arith.constant 0 : index
    %70 = vector.load %arg3[%c0_22, %c64, %c0_23] : memref<1x256x4xf32, #tpu.memory_space<vmem>>, vector<1x64x4xf32>
    %71 = vector.shape_cast %70 : vector<1x64x4xf32> to vector<64x4xf32>
    %72 = vector.shape_cast %69 : vector<64x4xf32> to vector<1x64x4xf32>
    tpu.vector_store %arg3[%c0_22, %c64, %c0_23], %72 {strides = array<i32>} : memref<1x256x4xf32, #tpu.memory_space<vmem>>, vector<1x64x4xf32>,
    %73 = vector.broadcast %22 : vector<64x1xf32> to vector<64x4xf32>
    %74 = arith.subf %6, %73 : vector<64x4xf32>
    %75 = vector.broadcast %52 : vector<64x1xf32> to vector<64x4xf32>
    %76 = arith.mulf %74, %75 : vector<64x4xf32>
    %cst_24 = arith.constant 1.000000e-01 : f32
    %77 = vector.broadcast %cst_24 : f32 to vector<64x4xf32>
    %78 = arith.mulf %77, %76 : vector<64x4xf32>
    %79 = arith.maximumf %76, %78 : vector<64x4xf32>
    %c0_25 = arith.constant 0 : index
    %c128 = arith.constant 128 : index
    %c0_26 = arith.constant 0 : index
    %80 = vector.load %arg3[%c0_25, %c128, %c0_26] : memref<1x256x4xf32, #tpu.memory_space<vmem>>, vector<1x64x4xf32>
    %81 = vector.shape_cast %80 : vector<1x64x4xf32> to vector<64x4xf32>
    %82 = vector.shape_cast %79 : vector<64x4xf32> to vector<1x64x4xf32>
    tpu.vector_store %arg3[%c0_25, %c128, %c0_26], %82 {strides = array<i32>} : memref<1x256x4xf32, #tpu.memory_space<vmem>>, vector<1x64x4xf32>,
    %83 = vector.broadcast %22 : vector<64x1xf32> to vector<64x4xf32>
    %84 = arith.subf %7, %83 : vector<64x4xf32>
    %85 = vector.broadcast %52 : vector<64x1xf32> to vector<64x4xf32>
    %86 = arith.mulf %84, %85 : vector<64x4xf32>
    %cst_27 = arith.constant 1.000000e-01 : f32
    %87 = vector.broadcast %cst_27 : f32 to vector<64x4xf32>
    %88 = arith.mulf %87, %86 : vector<64x4xf32>
    %89 = arith.maximumf %86, %88 : vector<64x4xf32>
    %c0_28 = arith.constant 0 : index
    %c192 = arith.constant 192 : index
    %c0_29 = arith.constant 0 : index
    %90 = vector.load %arg3[%c0_28, %c192, %c0_29] : memref<1x256x4xf32, #tpu.memory_space<vmem>>, vector<1x64x4xf32>
    %91 = vector.shape_cast %90 : vector<1x64x4xf32> to vector<64x4xf32>
    %92 = vector.shape_cast %89 : vector<64x4xf32> to vector<1x64x4xf32>
    tpu.vector_store %arg3[%c0_28, %c192, %c0_29], %92 {strides = array<i32>} : memref<1x256x4xf32, #tpu.memory_space<vmem>>, vector<1x64x4xf32>,
    return
  }
  func.func @transform_0(%arg0: i32) -> (i32, i32) {
    %c0_i32 = arith.constant 0 : i32
    %c0_i32_0 = arith.constant 0 : i32
    %c0_i32_1 = arith.constant 0 : i32
    return %c0_i32, %c0_i32_0 : i32, i32
  }
  func.func @transform_1(%arg0: i32) -> (i32, i32, i32) {
    %c0_i32 = arith.constant 0 : i32
    %c0_i32_0 = arith.constant 0 : i32
    %c0_i32_1 = arith.constant 0 : i32
    return %arg0, %c0_i32, %c0_i32_0 : i32, i32, i32
  }
  func.func @transform_2(%arg0: i32) -> (i32, i32, i32) {
    %c0_i32 = arith.constant 0 : i32
    %c0_i32_0 = arith.constant 0 : i32
    %c0_i32_1 = arith.constant 0 : i32
    return %arg0, %c0_i32, %c0_i32_0 : i32, i32, i32
  }
}

module attributes {stable_mosaic.version = 11 : i64} {
  func.func @_deconv_in_lrelu_kernel(%arg0: i32, %arg1: memref<128x1152xbf16, #tpu.memory_space<vmem>>, %arg2: memref<1x1152x16xbf16, #tpu.memory_space<vmem>>, %arg3: memref<1x128x16xf32, #tpu.memory_space<vmem>>) attributes {dimension_semantics = [#tpu.dimension_semantics<parallel>], iteration_bounds = array<i64: 2>, scalar_prefetch = 0 : i64, scratch_operands = 0 : i64, tpu.core_type = #tpu.core_type<tc>, window_params = [{pipeline_mode = #tpu.pipeline_mode<synchronous>, transform_indices = @transform_0, window_bounds = array<i64: 128, 1152>}, {transform_indices = @transform_1, window_bounds = array<i64: 1, 1152, 16>}, {transform_indices = @transform_2, window_bounds = array<i64: 1, 128, 16>}]} {
    %c0 = arith.constant 0 : index
    %c0_0 = arith.constant 0 : index
    %0 = vector.load %arg1[%c0, %c0_0] : memref<128x1152xbf16, #tpu.memory_space<vmem>>, vector<128x1152xbf16>
    %c0_1 = arith.constant 0 : index
    %c0_2 = arith.constant 0 : index
    %c0_3 = arith.constant 0 : index
    %1 = vector.load %arg2[%c0_1, %c0_2, %c0_3] : memref<1x1152x16xbf16, #tpu.memory_space<vmem>>, vector<1x1152x16xbf16>
    %2 = vector.shape_cast %1 : vector<1x1152x16xbf16> to vector<1152x16xbf16>
    %cst = arith.constant dense<0.000000e+00> : vector<128x16xf32>
    %3 = tpu.matmul %0, %2, %cst {dimension_numbers = #tpu.dot_dimension_numbers<[1], [0], [0], [1], [0, 0, 1, 1], [], []>} : vector<128x1152xbf16>, vector<1152x16xbf16>, vector<128x16xf32> -> vector<128x16xf32>
    %4 = vector.extract_strided_slice %3 {offsets = [0, 0], sizes = [32, 16], strides = [1, 1]} : vector<128x16xf32> to vector<32x16xf32>
    %5 = vector.extract_strided_slice %3 {offsets = [32, 0], sizes = [32, 16], strides = [1, 1]} : vector<128x16xf32> to vector<32x16xf32>
    %6 = vector.extract_strided_slice %3 {offsets = [64, 0], sizes = [32, 16], strides = [1, 1]} : vector<128x16xf32> to vector<32x16xf32>
    %7 = vector.extract_strided_slice %3 {offsets = [96, 0], sizes = [32, 16], strides = [1, 1]} : vector<128x16xf32> to vector<32x16xf32>
    %cst_4 = arith.constant dense<0.000000e+00> : vector<32xf32>
    %8 = vector.multi_reduction <add>, %4, %cst_4 [1] : vector<32x16xf32> to vector<32xf32>
    %9 = vector.shape_cast %8 : vector<32xf32> to vector<32x1xf32>
    %cst_5 = arith.constant 0.000000e+00 : f32
    %10 = vector.broadcast %cst_5 : f32 to vector<32x1xf32>
    %11 = arith.addf %10, %9 : vector<32x1xf32>
    %cst_6 = arith.constant dense<0.000000e+00> : vector<32xf32>
    %12 = vector.multi_reduction <add>, %5, %cst_6 [1] : vector<32x16xf32> to vector<32xf32>
    %13 = vector.shape_cast %12 : vector<32xf32> to vector<32x1xf32>
    %14 = arith.addf %11, %13 : vector<32x1xf32>
    %cst_7 = arith.constant dense<0.000000e+00> : vector<32xf32>
    %15 = vector.multi_reduction <add>, %6, %cst_7 [1] : vector<32x16xf32> to vector<32xf32>
    %16 = vector.shape_cast %15 : vector<32xf32> to vector<32x1xf32>
    %17 = arith.addf %14, %16 : vector<32x1xf32>
    %cst_8 = arith.constant dense<0.000000e+00> : vector<32xf32>
    %18 = vector.multi_reduction <add>, %7, %cst_8 [1] : vector<32x16xf32> to vector<32xf32>
    %19 = vector.shape_cast %18 : vector<32xf32> to vector<32x1xf32>
    %20 = arith.addf %17, %19 : vector<32x1xf32>
    %cst_9 = arith.constant 6.400000e+01 : f32
    %21 = vector.broadcast %cst_9 : f32 to vector<32x1xf32>
    %22 = arith.divf %20, %21 : vector<32x1xf32>
    %23 = vector.broadcast %22 : vector<32x1xf32> to vector<32x16xf32>
    %24 = arith.subf %4, %23 : vector<32x16xf32>
    %25 = arith.mulf %24, %24 : vector<32x16xf32>
    %cst_10 = arith.constant dense<0.000000e+00> : vector<32xf32>
    %26 = vector.multi_reduction <add>, %25, %cst_10 [1] : vector<32x16xf32> to vector<32xf32>
    %27 = vector.shape_cast %26 : vector<32xf32> to vector<32x1xf32>
    %cst_11 = arith.constant 0.000000e+00 : f32
    %28 = vector.broadcast %cst_11 : f32 to vector<32x1xf32>
    %29 = arith.addf %28, %27 : vector<32x1xf32>
    %30 = vector.broadcast %22 : vector<32x1xf32> to vector<32x16xf32>
    %31 = arith.subf %5, %30 : vector<32x16xf32>
    %32 = arith.mulf %31, %31 : vector<32x16xf32>
    %cst_12 = arith.constant dense<0.000000e+00> : vector<32xf32>
    %33 = vector.multi_reduction <add>, %32, %cst_12 [1] : vector<32x16xf32> to vector<32xf32>
    %34 = vector.shape_cast %33 : vector<32xf32> to vector<32x1xf32>
    %35 = arith.addf %29, %34 : vector<32x1xf32>
    %36 = vector.broadcast %22 : vector<32x1xf32> to vector<32x16xf32>
    %37 = arith.subf %6, %36 : vector<32x16xf32>
    %38 = arith.mulf %37, %37 : vector<32x16xf32>
    %cst_13 = arith.constant dense<0.000000e+00> : vector<32xf32>
    %39 = vector.multi_reduction <add>, %38, %cst_13 [1] : vector<32x16xf32> to vector<32xf32>
    %40 = vector.shape_cast %39 : vector<32xf32> to vector<32x1xf32>
    %41 = arith.addf %35, %40 : vector<32x1xf32>
    %42 = vector.broadcast %22 : vector<32x1xf32> to vector<32x16xf32>
    %43 = arith.subf %7, %42 : vector<32x16xf32>
    %44 = arith.mulf %43, %43 : vector<32x16xf32>
    %cst_14 = arith.constant dense<0.000000e+00> : vector<32xf32>
    %45 = vector.multi_reduction <add>, %44, %cst_14 [1] : vector<32x16xf32> to vector<32xf32>
    %46 = vector.shape_cast %45 : vector<32xf32> to vector<32x1xf32>
    %47 = arith.addf %41, %46 : vector<32x1xf32>
    %cst_15 = arith.constant 6.400000e+01 : f32
    %48 = vector.broadcast %cst_15 : f32 to vector<32x1xf32>
    %49 = arith.divf %47, %48 : vector<32x1xf32>
    %cst_16 = arith.constant 9.99999974E-6 : f32
    %50 = vector.broadcast %cst_16 : f32 to vector<32x1xf32>
    %51 = arith.addf %49, %50 : vector<32x1xf32>
    %52 = math.rsqrt %51 : vector<32x1xf32>
    %53 = vector.broadcast %22 : vector<32x1xf32> to vector<32x16xf32>
    %54 = arith.subf %4, %53 : vector<32x16xf32>
    %55 = vector.broadcast %52 : vector<32x1xf32> to vector<32x16xf32>
    %56 = arith.mulf %54, %55 : vector<32x16xf32>
    %cst_17 = arith.constant 1.000000e-01 : f32
    %57 = vector.broadcast %cst_17 : f32 to vector<32x16xf32>
    %58 = arith.mulf %57, %56 : vector<32x16xf32>
    %59 = arith.maximumf %56, %58 : vector<32x16xf32>
    %c0_18 = arith.constant 0 : index
    %c0_19 = arith.constant 0 : index
    %c0_20 = arith.constant 0 : index
    %60 = vector.load %arg3[%c0_18, %c0_19, %c0_20] : memref<1x128x16xf32, #tpu.memory_space<vmem>>, vector<1x32x16xf32>
    %61 = vector.shape_cast %60 : vector<1x32x16xf32> to vector<32x16xf32>
    %62 = vector.shape_cast %59 : vector<32x16xf32> to vector<1x32x16xf32>
    tpu.vector_store %arg3[%c0_18, %c0_19, %c0_20], %62 {strides = array<i32>} : memref<1x128x16xf32, #tpu.memory_space<vmem>>, vector<1x32x16xf32>,
    %63 = vector.broadcast %22 : vector<32x1xf32> to vector<32x16xf32>
    %64 = arith.subf %5, %63 : vector<32x16xf32>
    %65 = vector.broadcast %52 : vector<32x1xf32> to vector<32x16xf32>
    %66 = arith.mulf %64, %65 : vector<32x16xf32>
    %cst_21 = arith.constant 1.000000e-01 : f32
    %67 = vector.broadcast %cst_21 : f32 to vector<32x16xf32>
    %68 = arith.mulf %67, %66 : vector<32x16xf32>
    %69 = arith.maximumf %66, %68 : vector<32x16xf32>
    %c0_22 = arith.constant 0 : index
    %c32 = arith.constant 32 : index
    %c0_23 = arith.constant 0 : index
    %70 = vector.load %arg3[%c0_22, %c32, %c0_23] : memref<1x128x16xf32, #tpu.memory_space<vmem>>, vector<1x32x16xf32>
    %71 = vector.shape_cast %70 : vector<1x32x16xf32> to vector<32x16xf32>
    %72 = vector.shape_cast %69 : vector<32x16xf32> to vector<1x32x16xf32>
    tpu.vector_store %arg3[%c0_22, %c32, %c0_23], %72 {strides = array<i32>} : memref<1x128x16xf32, #tpu.memory_space<vmem>>, vector<1x32x16xf32>,
    %73 = vector.broadcast %22 : vector<32x1xf32> to vector<32x16xf32>
    %74 = arith.subf %6, %73 : vector<32x16xf32>
    %75 = vector.broadcast %52 : vector<32x1xf32> to vector<32x16xf32>
    %76 = arith.mulf %74, %75 : vector<32x16xf32>
    %cst_24 = arith.constant 1.000000e-01 : f32
    %77 = vector.broadcast %cst_24 : f32 to vector<32x16xf32>
    %78 = arith.mulf %77, %76 : vector<32x16xf32>
    %79 = arith.maximumf %76, %78 : vector<32x16xf32>
    %c0_25 = arith.constant 0 : index
    %c64 = arith.constant 64 : index
    %c0_26 = arith.constant 0 : index
    %80 = vector.load %arg3[%c0_25, %c64, %c0_26] : memref<1x128x16xf32, #tpu.memory_space<vmem>>, vector<1x32x16xf32>
    %81 = vector.shape_cast %80 : vector<1x32x16xf32> to vector<32x16xf32>
    %82 = vector.shape_cast %79 : vector<32x16xf32> to vector<1x32x16xf32>
    tpu.vector_store %arg3[%c0_25, %c64, %c0_26], %82 {strides = array<i32>} : memref<1x128x16xf32, #tpu.memory_space<vmem>>, vector<1x32x16xf32>,
    %83 = vector.broadcast %22 : vector<32x1xf32> to vector<32x16xf32>
    %84 = arith.subf %7, %83 : vector<32x16xf32>
    %85 = vector.broadcast %52 : vector<32x1xf32> to vector<32x16xf32>
    %86 = arith.mulf %84, %85 : vector<32x16xf32>
    %cst_27 = arith.constant 1.000000e-01 : f32
    %87 = vector.broadcast %cst_27 : f32 to vector<32x16xf32>
    %88 = arith.mulf %87, %86 : vector<32x16xf32>
    %89 = arith.maximumf %86, %88 : vector<32x16xf32>
    %c0_28 = arith.constant 0 : index
    %c96 = arith.constant 96 : index
    %c0_29 = arith.constant 0 : index
    %90 = vector.load %arg3[%c0_28, %c96, %c0_29] : memref<1x128x16xf32, #tpu.memory_space<vmem>>, vector<1x32x16xf32>
    %91 = vector.shape_cast %90 : vector<1x32x16xf32> to vector<32x16xf32>
    %92 = vector.shape_cast %89 : vector<32x16xf32> to vector<1x32x16xf32>
    tpu.vector_store %arg3[%c0_28, %c96, %c0_29], %92 {strides = array<i32>} : memref<1x128x16xf32, #tpu.memory_space<vmem>>, vector<1x32x16xf32>,
    return
  }
  func.func @transform_0(%arg0: i32) -> (i32, i32) {
    %c0_i32 = arith.constant 0 : i32
    %c0_i32_0 = arith.constant 0 : i32
    %c0_i32_1 = arith.constant 0 : i32
    return %c0_i32, %c0_i32_0 : i32, i32
  }
  func.func @transform_1(%arg0: i32) -> (i32, i32, i32) {
    %c0_i32 = arith.constant 0 : i32
    %c0_i32_0 = arith.constant 0 : i32
    %c0_i32_1 = arith.constant 0 : i32
    return %arg0, %c0_i32, %c0_i32_0 : i32, i32, i32
  }
  func.func @transform_2(%arg0: i32) -> (i32, i32, i32) {
    %c0_i32 = arith.constant 0 : i32
    %c0_i32_0 = arith.constant 0 : i32
    %c0_i32_1 = arith.constant 0 : i32
    return %arg0, %c0_i32, %c0_i32_0 : i32, i32, i32
  }
}

module attributes {stable_mosaic.version = 11 : i64} {
  func.func @_deconv_in_lrelu_kernel(%arg0: i32, %arg1: memref<64x576xbf16, #tpu.memory_space<vmem>>, %arg2: memref<1x576x64xbf16, #tpu.memory_space<vmem>>, %arg3: memref<1x64x64xf32, #tpu.memory_space<vmem>>) attributes {dimension_semantics = [#tpu.dimension_semantics<parallel>], iteration_bounds = array<i64: 2>, scalar_prefetch = 0 : i64, scratch_operands = 0 : i64, tpu.core_type = #tpu.core_type<tc>, window_params = [{pipeline_mode = #tpu.pipeline_mode<synchronous>, transform_indices = @transform_0, window_bounds = array<i64: 64, 576>}, {transform_indices = @transform_1, window_bounds = array<i64: 1, 576, 64>}, {transform_indices = @transform_2, window_bounds = array<i64: 1, 64, 64>}]} {
    %c0 = arith.constant 0 : index
    %c0_0 = arith.constant 0 : index
    %0 = vector.load %arg1[%c0, %c0_0] : memref<64x576xbf16, #tpu.memory_space<vmem>>, vector<64x576xbf16>
    %c0_1 = arith.constant 0 : index
    %c0_2 = arith.constant 0 : index
    %c0_3 = arith.constant 0 : index
    %1 = vector.load %arg2[%c0_1, %c0_2, %c0_3] : memref<1x576x64xbf16, #tpu.memory_space<vmem>>, vector<1x576x64xbf16>
    %2 = vector.shape_cast %1 : vector<1x576x64xbf16> to vector<576x64xbf16>
    %cst = arith.constant dense<0.000000e+00> : vector<64x64xf32>
    %3 = tpu.matmul %0, %2, %cst {dimension_numbers = #tpu.dot_dimension_numbers<[1], [0], [0], [1], [0, 0, 1, 1], [], []>} : vector<64x576xbf16>, vector<576x64xbf16>, vector<64x64xf32> -> vector<64x64xf32>
    %4 = vector.extract_strided_slice %3 {offsets = [0, 0], sizes = [16, 64], strides = [1, 1]} : vector<64x64xf32> to vector<16x64xf32>
    %5 = vector.extract_strided_slice %3 {offsets = [16, 0], sizes = [16, 64], strides = [1, 1]} : vector<64x64xf32> to vector<16x64xf32>
    %6 = vector.extract_strided_slice %3 {offsets = [32, 0], sizes = [16, 64], strides = [1, 1]} : vector<64x64xf32> to vector<16x64xf32>
    %7 = vector.extract_strided_slice %3 {offsets = [48, 0], sizes = [16, 64], strides = [1, 1]} : vector<64x64xf32> to vector<16x64xf32>
    %cst_4 = arith.constant dense<0.000000e+00> : vector<16xf32>
    %8 = vector.multi_reduction <add>, %4, %cst_4 [1] : vector<16x64xf32> to vector<16xf32>
    %9 = vector.shape_cast %8 : vector<16xf32> to vector<16x1xf32>
    %cst_5 = arith.constant 0.000000e+00 : f32
    %10 = vector.broadcast %cst_5 : f32 to vector<16x1xf32>
    %11 = arith.addf %10, %9 : vector<16x1xf32>
    %cst_6 = arith.constant dense<0.000000e+00> : vector<16xf32>
    %12 = vector.multi_reduction <add>, %5, %cst_6 [1] : vector<16x64xf32> to vector<16xf32>
    %13 = vector.shape_cast %12 : vector<16xf32> to vector<16x1xf32>
    %14 = arith.addf %11, %13 : vector<16x1xf32>
    %cst_7 = arith.constant dense<0.000000e+00> : vector<16xf32>
    %15 = vector.multi_reduction <add>, %6, %cst_7 [1] : vector<16x64xf32> to vector<16xf32>
    %16 = vector.shape_cast %15 : vector<16xf32> to vector<16x1xf32>
    %17 = arith.addf %14, %16 : vector<16x1xf32>
    %cst_8 = arith.constant dense<0.000000e+00> : vector<16xf32>
    %18 = vector.multi_reduction <add>, %7, %cst_8 [1] : vector<16x64xf32> to vector<16xf32>
    %19 = vector.shape_cast %18 : vector<16xf32> to vector<16x1xf32>
    %20 = arith.addf %17, %19 : vector<16x1xf32>
    %cst_9 = arith.constant 2.560000e+02 : f32
    %21 = vector.broadcast %cst_9 : f32 to vector<16x1xf32>
    %22 = arith.divf %20, %21 : vector<16x1xf32>
    %23 = vector.broadcast %22 : vector<16x1xf32> to vector<16x64xf32>
    %24 = arith.subf %4, %23 : vector<16x64xf32>
    %25 = arith.mulf %24, %24 : vector<16x64xf32>
    %cst_10 = arith.constant dense<0.000000e+00> : vector<16xf32>
    %26 = vector.multi_reduction <add>, %25, %cst_10 [1] : vector<16x64xf32> to vector<16xf32>
    %27 = vector.shape_cast %26 : vector<16xf32> to vector<16x1xf32>
    %cst_11 = arith.constant 0.000000e+00 : f32
    %28 = vector.broadcast %cst_11 : f32 to vector<16x1xf32>
    %29 = arith.addf %28, %27 : vector<16x1xf32>
    %30 = vector.broadcast %22 : vector<16x1xf32> to vector<16x64xf32>
    %31 = arith.subf %5, %30 : vector<16x64xf32>
    %32 = arith.mulf %31, %31 : vector<16x64xf32>
    %cst_12 = arith.constant dense<0.000000e+00> : vector<16xf32>
    %33 = vector.multi_reduction <add>, %32, %cst_12 [1] : vector<16x64xf32> to vector<16xf32>
    %34 = vector.shape_cast %33 : vector<16xf32> to vector<16x1xf32>
    %35 = arith.addf %29, %34 : vector<16x1xf32>
    %36 = vector.broadcast %22 : vector<16x1xf32> to vector<16x64xf32>
    %37 = arith.subf %6, %36 : vector<16x64xf32>
    %38 = arith.mulf %37, %37 : vector<16x64xf32>
    %cst_13 = arith.constant dense<0.000000e+00> : vector<16xf32>
    %39 = vector.multi_reduction <add>, %38, %cst_13 [1] : vector<16x64xf32> to vector<16xf32>
    %40 = vector.shape_cast %39 : vector<16xf32> to vector<16x1xf32>
    %41 = arith.addf %35, %40 : vector<16x1xf32>
    %42 = vector.broadcast %22 : vector<16x1xf32> to vector<16x64xf32>
    %43 = arith.subf %7, %42 : vector<16x64xf32>
    %44 = arith.mulf %43, %43 : vector<16x64xf32>
    %cst_14 = arith.constant dense<0.000000e+00> : vector<16xf32>
    %45 = vector.multi_reduction <add>, %44, %cst_14 [1] : vector<16x64xf32> to vector<16xf32>
    %46 = vector.shape_cast %45 : vector<16xf32> to vector<16x1xf32>
    %47 = arith.addf %41, %46 : vector<16x1xf32>
    %cst_15 = arith.constant 2.560000e+02 : f32
    %48 = vector.broadcast %cst_15 : f32 to vector<16x1xf32>
    %49 = arith.divf %47, %48 : vector<16x1xf32>
    %cst_16 = arith.constant 9.99999974E-6 : f32
    %50 = vector.broadcast %cst_16 : f32 to vector<16x1xf32>
    %51 = arith.addf %49, %50 : vector<16x1xf32>
    %52 = math.rsqrt %51 : vector<16x1xf32>
    %53 = vector.broadcast %22 : vector<16x1xf32> to vector<16x64xf32>
    %54 = arith.subf %4, %53 : vector<16x64xf32>
    %55 = vector.broadcast %52 : vector<16x1xf32> to vector<16x64xf32>
    %56 = arith.mulf %54, %55 : vector<16x64xf32>
    %cst_17 = arith.constant 1.000000e-01 : f32
    %57 = vector.broadcast %cst_17 : f32 to vector<16x64xf32>
    %58 = arith.mulf %57, %56 : vector<16x64xf32>
    %59 = arith.maximumf %56, %58 : vector<16x64xf32>
    %c0_18 = arith.constant 0 : index
    %c0_19 = arith.constant 0 : index
    %c0_20 = arith.constant 0 : index
    %60 = vector.load %arg3[%c0_18, %c0_19, %c0_20] : memref<1x64x64xf32, #tpu.memory_space<vmem>>, vector<1x16x64xf32>
    %61 = vector.shape_cast %60 : vector<1x16x64xf32> to vector<16x64xf32>
    %62 = vector.shape_cast %59 : vector<16x64xf32> to vector<1x16x64xf32>
    tpu.vector_store %arg3[%c0_18, %c0_19, %c0_20], %62 {strides = array<i32>} : memref<1x64x64xf32, #tpu.memory_space<vmem>>, vector<1x16x64xf32>,
    %63 = vector.broadcast %22 : vector<16x1xf32> to vector<16x64xf32>
    %64 = arith.subf %5, %63 : vector<16x64xf32>
    %65 = vector.broadcast %52 : vector<16x1xf32> to vector<16x64xf32>
    %66 = arith.mulf %64, %65 : vector<16x64xf32>
    %cst_21 = arith.constant 1.000000e-01 : f32
    %67 = vector.broadcast %cst_21 : f32 to vector<16x64xf32>
    %68 = arith.mulf %67, %66 : vector<16x64xf32>
    %69 = arith.maximumf %66, %68 : vector<16x64xf32>
    %c0_22 = arith.constant 0 : index
    %c16 = arith.constant 16 : index
    %c0_23 = arith.constant 0 : index
    %70 = vector.load %arg3[%c0_22, %c16, %c0_23] : memref<1x64x64xf32, #tpu.memory_space<vmem>>, vector<1x16x64xf32>
    %71 = vector.shape_cast %70 : vector<1x16x64xf32> to vector<16x64xf32>
    %72 = vector.shape_cast %69 : vector<16x64xf32> to vector<1x16x64xf32>
    tpu.vector_store %arg3[%c0_22, %c16, %c0_23], %72 {strides = array<i32>} : memref<1x64x64xf32, #tpu.memory_space<vmem>>, vector<1x16x64xf32>,
    %73 = vector.broadcast %22 : vector<16x1xf32> to vector<16x64xf32>
    %74 = arith.subf %6, %73 : vector<16x64xf32>
    %75 = vector.broadcast %52 : vector<16x1xf32> to vector<16x64xf32>
    %76 = arith.mulf %74, %75 : vector<16x64xf32>
    %cst_24 = arith.constant 1.000000e-01 : f32
    %77 = vector.broadcast %cst_24 : f32 to vector<16x64xf32>
    %78 = arith.mulf %77, %76 : vector<16x64xf32>
    %79 = arith.maximumf %76, %78 : vector<16x64xf32>
    %c0_25 = arith.constant 0 : index
    %c32 = arith.constant 32 : index
    %c0_26 = arith.constant 0 : index
    %80 = vector.load %arg3[%c0_25, %c32, %c0_26] : memref<1x64x64xf32, #tpu.memory_space<vmem>>, vector<1x16x64xf32>
    %81 = vector.shape_cast %80 : vector<1x16x64xf32> to vector<16x64xf32>
    %82 = vector.shape_cast %79 : vector<16x64xf32> to vector<1x16x64xf32>
    tpu.vector_store %arg3[%c0_25, %c32, %c0_26], %82 {strides = array<i32>} : memref<1x64x64xf32, #tpu.memory_space<vmem>>, vector<1x16x64xf32>,
    %83 = vector.broadcast %22 : vector<16x1xf32> to vector<16x64xf32>
    %84 = arith.subf %7, %83 : vector<16x64xf32>
    %85 = vector.broadcast %52 : vector<16x1xf32> to vector<16x64xf32>
    %86 = arith.mulf %84, %85 : vector<16x64xf32>
    %cst_27 = arith.constant 1.000000e-01 : f32
    %87 = vector.broadcast %cst_27 : f32 to vector<16x64xf32>
    %88 = arith.mulf %87, %86 : vector<16x64xf32>
    %89 = arith.maximumf %86, %88 : vector<16x64xf32>
    %c0_28 = arith.constant 0 : index
    %c48 = arith.constant 48 : index
    %c0_29 = arith.constant 0 : index
    %90 = vector.load %arg3[%c0_28, %c48, %c0_29] : memref<1x64x64xf32, #tpu.memory_space<vmem>>, vector<1x16x64xf32>
    %91 = vector.shape_cast %90 : vector<1x16x64xf32> to vector<16x64xf32>
    %92 = vector.shape_cast %89 : vector<16x64xf32> to vector<1x16x64xf32>
    tpu.vector_store %arg3[%c0_28, %c48, %c0_29], %92 {strides = array<i32>} : memref<1x64x64xf32, #tpu.memory_space<vmem>>, vector<1x16x64xf32>,
    return
  }
  func.func @transform_0(%arg0: i32) -> (i32, i32) {
    %c0_i32 = arith.constant 0 : i32
    %c0_i32_0 = arith.constant 0 : i32
    %c0_i32_1 = arith.constant 0 : i32
    return %c0_i32, %c0_i32_0 : i32, i32
  }
  func.func @transform_1(%arg0: i32) -> (i32, i32, i32) {
    %c0_i32 = arith.constant 0 : i32
    %c0_i32_0 = arith.constant 0 : i32
    %c0_i32_1 = arith.constant 0 : i32
    return %arg0, %c0_i32, %c0_i32_0 : i32, i32, i32
  }
  func.func @transform_2(%arg0: i32) -> (i32, i32, i32) {
    %c0_i32 = arith.constant 0 : i32
    %c0_i32_0 = arith.constant 0 : i32
    %c0_i32_1 = arith.constant 0 : i32
    return %arg0, %c0_i32, %c0_i32_0 : i32, i32, i32
  }
}

module attributes {stable_mosaic.version = 11 : i64} {
  func.func @_deconv_in_lrelu_kernel(%arg0: i32, %arg1: memref<32x288xbf16, #tpu.memory_space<vmem>>, %arg2: memref<1x288x256xbf16, #tpu.memory_space<vmem>>, %arg3: memref<1x32x256xf32, #tpu.memory_space<vmem>>) attributes {dimension_semantics = [#tpu.dimension_semantics<parallel>], iteration_bounds = array<i64: 2>, scalar_prefetch = 0 : i64, scratch_operands = 0 : i64, tpu.core_type = #tpu.core_type<tc>, window_params = [{pipeline_mode = #tpu.pipeline_mode<synchronous>, transform_indices = @transform_0, window_bounds = array<i64: 32, 288>}, {transform_indices = @transform_1, window_bounds = array<i64: 1, 288, 256>}, {transform_indices = @transform_2, window_bounds = array<i64: 1, 32, 256>}]} {
    %c0 = arith.constant 0 : index
    %c0_0 = arith.constant 0 : index
    %0 = vector.load %arg1[%c0, %c0_0] : memref<32x288xbf16, #tpu.memory_space<vmem>>, vector<32x288xbf16>
    %c0_1 = arith.constant 0 : index
    %c0_2 = arith.constant 0 : index
    %c0_3 = arith.constant 0 : index
    %1 = vector.load %arg2[%c0_1, %c0_2, %c0_3] : memref<1x288x256xbf16, #tpu.memory_space<vmem>>, vector<1x288x256xbf16>
    %2 = vector.shape_cast %1 : vector<1x288x256xbf16> to vector<288x256xbf16>
    %cst = arith.constant dense<0.000000e+00> : vector<32x256xf32>
    %3 = tpu.matmul %0, %2, %cst {dimension_numbers = #tpu.dot_dimension_numbers<[1], [0], [0], [1], [0, 0, 1, 1], [], []>} : vector<32x288xbf16>, vector<288x256xbf16>, vector<32x256xf32> -> vector<32x256xf32>
    %4 = vector.extract_strided_slice %3 {offsets = [0, 0], sizes = [8, 256], strides = [1, 1]} : vector<32x256xf32> to vector<8x256xf32>
    %5 = vector.extract_strided_slice %3 {offsets = [8, 0], sizes = [8, 256], strides = [1, 1]} : vector<32x256xf32> to vector<8x256xf32>
    %6 = vector.extract_strided_slice %3 {offsets = [16, 0], sizes = [8, 256], strides = [1, 1]} : vector<32x256xf32> to vector<8x256xf32>
    %7 = vector.extract_strided_slice %3 {offsets = [24, 0], sizes = [8, 256], strides = [1, 1]} : vector<32x256xf32> to vector<8x256xf32>
    %cst_4 = arith.constant dense<0.000000e+00> : vector<8xf32>
    %8 = vector.multi_reduction <add>, %4, %cst_4 [1] : vector<8x256xf32> to vector<8xf32>
    %9 = vector.shape_cast %8 : vector<8xf32> to vector<8x1xf32>
    %cst_5 = arith.constant 0.000000e+00 : f32
    %10 = vector.broadcast %cst_5 : f32 to vector<8x1xf32>
    %11 = arith.addf %10, %9 : vector<8x1xf32>
    %cst_6 = arith.constant dense<0.000000e+00> : vector<8xf32>
    %12 = vector.multi_reduction <add>, %5, %cst_6 [1] : vector<8x256xf32> to vector<8xf32>
    %13 = vector.shape_cast %12 : vector<8xf32> to vector<8x1xf32>
    %14 = arith.addf %11, %13 : vector<8x1xf32>
    %cst_7 = arith.constant dense<0.000000e+00> : vector<8xf32>
    %15 = vector.multi_reduction <add>, %6, %cst_7 [1] : vector<8x256xf32> to vector<8xf32>
    %16 = vector.shape_cast %15 : vector<8xf32> to vector<8x1xf32>
    %17 = arith.addf %14, %16 : vector<8x1xf32>
    %cst_8 = arith.constant dense<0.000000e+00> : vector<8xf32>
    %18 = vector.multi_reduction <add>, %7, %cst_8 [1] : vector<8x256xf32> to vector<8xf32>
    %19 = vector.shape_cast %18 : vector<8xf32> to vector<8x1xf32>
    %20 = arith.addf %17, %19 : vector<8x1xf32>
    %cst_9 = arith.constant 1.024000e+03 : f32
    %21 = vector.broadcast %cst_9 : f32 to vector<8x1xf32>
    %22 = arith.divf %20, %21 : vector<8x1xf32>
    %23 = vector.broadcast %22 : vector<8x1xf32> to vector<8x256xf32>
    %24 = arith.subf %4, %23 : vector<8x256xf32>
    %25 = arith.mulf %24, %24 : vector<8x256xf32>
    %cst_10 = arith.constant dense<0.000000e+00> : vector<8xf32>
    %26 = vector.multi_reduction <add>, %25, %cst_10 [1] : vector<8x256xf32> to vector<8xf32>
    %27 = vector.shape_cast %26 : vector<8xf32> to vector<8x1xf32>
    %cst_11 = arith.constant 0.000000e+00 : f32
    %28 = vector.broadcast %cst_11 : f32 to vector<8x1xf32>
    %29 = arith.addf %28, %27 : vector<8x1xf32>
    %30 = vector.broadcast %22 : vector<8x1xf32> to vector<8x256xf32>
    %31 = arith.subf %5, %30 : vector<8x256xf32>
    %32 = arith.mulf %31, %31 : vector<8x256xf32>
    %cst_12 = arith.constant dense<0.000000e+00> : vector<8xf32>
    %33 = vector.multi_reduction <add>, %32, %cst_12 [1] : vector<8x256xf32> to vector<8xf32>
    %34 = vector.shape_cast %33 : vector<8xf32> to vector<8x1xf32>
    %35 = arith.addf %29, %34 : vector<8x1xf32>
    %36 = vector.broadcast %22 : vector<8x1xf32> to vector<8x256xf32>
    %37 = arith.subf %6, %36 : vector<8x256xf32>
    %38 = arith.mulf %37, %37 : vector<8x256xf32>
    %cst_13 = arith.constant dense<0.000000e+00> : vector<8xf32>
    %39 = vector.multi_reduction <add>, %38, %cst_13 [1] : vector<8x256xf32> to vector<8xf32>
    %40 = vector.shape_cast %39 : vector<8xf32> to vector<8x1xf32>
    %41 = arith.addf %35, %40 : vector<8x1xf32>
    %42 = vector.broadcast %22 : vector<8x1xf32> to vector<8x256xf32>
    %43 = arith.subf %7, %42 : vector<8x256xf32>
    %44 = arith.mulf %43, %43 : vector<8x256xf32>
    %cst_14 = arith.constant dense<0.000000e+00> : vector<8xf32>
    %45 = vector.multi_reduction <add>, %44, %cst_14 [1] : vector<8x256xf32> to vector<8xf32>
    %46 = vector.shape_cast %45 : vector<8xf32> to vector<8x1xf32>
    %47 = arith.addf %41, %46 : vector<8x1xf32>
    %cst_15 = arith.constant 1.024000e+03 : f32
    %48 = vector.broadcast %cst_15 : f32 to vector<8x1xf32>
    %49 = arith.divf %47, %48 : vector<8x1xf32>
    %cst_16 = arith.constant 9.99999974E-6 : f32
    %50 = vector.broadcast %cst_16 : f32 to vector<8x1xf32>
    %51 = arith.addf %49, %50 : vector<8x1xf32>
    %52 = math.rsqrt %51 : vector<8x1xf32>
    %53 = vector.broadcast %22 : vector<8x1xf32> to vector<8x256xf32>
    %54 = arith.subf %4, %53 : vector<8x256xf32>
    %55 = vector.broadcast %52 : vector<8x1xf32> to vector<8x256xf32>
    %56 = arith.mulf %54, %55 : vector<8x256xf32>
    %cst_17 = arith.constant 1.000000e-01 : f32
    %57 = vector.broadcast %cst_17 : f32 to vector<8x256xf32>
    %58 = arith.mulf %57, %56 : vector<8x256xf32>
    %59 = arith.maximumf %56, %58 : vector<8x256xf32>
    %c0_18 = arith.constant 0 : index
    %c0_19 = arith.constant 0 : index
    %c0_20 = arith.constant 0 : index
    %60 = vector.load %arg3[%c0_18, %c0_19, %c0_20] : memref<1x32x256xf32, #tpu.memory_space<vmem>>, vector<1x8x256xf32>
    %61 = vector.shape_cast %60 : vector<1x8x256xf32> to vector<8x256xf32>
    %62 = vector.shape_cast %59 : vector<8x256xf32> to vector<1x8x256xf32>
    tpu.vector_store %arg3[%c0_18, %c0_19, %c0_20], %62 {strides = array<i32>} : memref<1x32x256xf32, #tpu.memory_space<vmem>>, vector<1x8x256xf32>,
    %63 = vector.broadcast %22 : vector<8x1xf32> to vector<8x256xf32>
    %64 = arith.subf %5, %63 : vector<8x256xf32>
    %65 = vector.broadcast %52 : vector<8x1xf32> to vector<8x256xf32>
    %66 = arith.mulf %64, %65 : vector<8x256xf32>
    %cst_21 = arith.constant 1.000000e-01 : f32
    %67 = vector.broadcast %cst_21 : f32 to vector<8x256xf32>
    %68 = arith.mulf %67, %66 : vector<8x256xf32>
    %69 = arith.maximumf %66, %68 : vector<8x256xf32>
    %c0_22 = arith.constant 0 : index
    %c8 = arith.constant 8 : index
    %c0_23 = arith.constant 0 : index
    %70 = vector.load %arg3[%c0_22, %c8, %c0_23] : memref<1x32x256xf32, #tpu.memory_space<vmem>>, vector<1x8x256xf32>
    %71 = vector.shape_cast %70 : vector<1x8x256xf32> to vector<8x256xf32>
    %72 = vector.shape_cast %69 : vector<8x256xf32> to vector<1x8x256xf32>
    tpu.vector_store %arg3[%c0_22, %c8, %c0_23], %72 {strides = array<i32>} : memref<1x32x256xf32, #tpu.memory_space<vmem>>, vector<1x8x256xf32>,
    %73 = vector.broadcast %22 : vector<8x1xf32> to vector<8x256xf32>
    %74 = arith.subf %6, %73 : vector<8x256xf32>
    %75 = vector.broadcast %52 : vector<8x1xf32> to vector<8x256xf32>
    %76 = arith.mulf %74, %75 : vector<8x256xf32>
    %cst_24 = arith.constant 1.000000e-01 : f32
    %77 = vector.broadcast %cst_24 : f32 to vector<8x256xf32>
    %78 = arith.mulf %77, %76 : vector<8x256xf32>
    %79 = arith.maximumf %76, %78 : vector<8x256xf32>
    %c0_25 = arith.constant 0 : index
    %c16 = arith.constant 16 : index
    %c0_26 = arith.constant 0 : index
    %80 = vector.load %arg3[%c0_25, %c16, %c0_26] : memref<1x32x256xf32, #tpu.memory_space<vmem>>, vector<1x8x256xf32>
    %81 = vector.shape_cast %80 : vector<1x8x256xf32> to vector<8x256xf32>
    %82 = vector.shape_cast %79 : vector<8x256xf32> to vector<1x8x256xf32>
    tpu.vector_store %arg3[%c0_25, %c16, %c0_26], %82 {strides = array<i32>} : memref<1x32x256xf32, #tpu.memory_space<vmem>>, vector<1x8x256xf32>,
    %83 = vector.broadcast %22 : vector<8x1xf32> to vector<8x256xf32>
    %84 = arith.subf %7, %83 : vector<8x256xf32>
    %85 = vector.broadcast %52 : vector<8x1xf32> to vector<8x256xf32>
    %86 = arith.mulf %84, %85 : vector<8x256xf32>
    %cst_27 = arith.constant 1.000000e-01 : f32
    %87 = vector.broadcast %cst_27 : f32 to vector<8x256xf32>
    %88 = arith.mulf %87, %86 : vector<8x256xf32>
    %89 = arith.maximumf %86, %88 : vector<8x256xf32>
    %c0_28 = arith.constant 0 : index
    %c24 = arith.constant 24 : index
    %c0_29 = arith.constant 0 : index
    %90 = vector.load %arg3[%c0_28, %c24, %c0_29] : memref<1x32x256xf32, #tpu.memory_space<vmem>>, vector<1x8x256xf32>
    %91 = vector.shape_cast %90 : vector<1x8x256xf32> to vector<8x256xf32>
    %92 = vector.shape_cast %89 : vector<8x256xf32> to vector<1x8x256xf32>
    tpu.vector_store %arg3[%c0_28, %c24, %c0_29], %92 {strides = array<i32>} : memref<1x32x256xf32, #tpu.memory_space<vmem>>, vector<1x8x256xf32>,
    return
  }
  func.func @transform_0(%arg0: i32) -> (i32, i32) {
    %c0_i32 = arith.constant 0 : i32
    %c0_i32_0 = arith.constant 0 : i32
    %c0_i32_1 = arith.constant 0 : i32
    return %c0_i32, %c0_i32_0 : i32, i32
  }
  func.func @transform_1(%arg0: i32) -> (i32, i32, i32) {
    %c0_i32 = arith.constant 0 : i32
    %c0_i32_0 = arith.constant 0 : i32
    %c0_i32_1 = arith.constant 0 : i32
    return %arg0, %c0_i32, %c0_i32_0 : i32, i32, i32
  }
  func.func @transform_2(%arg0: i32) -> (i32, i32, i32) {
    %c0_i32 = arith.constant 0 : i32
    %c0_i32_0 = arith.constant 0 : i32
    %c0_i32_1 = arith.constant 0 : i32
    return %arg0, %c0_i32, %c0_i32_0 : i32, i32, i32
  }
}

module attributes {stable_mosaic.version = 11 : i64} {
  func.func @_bilinear_up2_kernel(%arg0: i32, %arg1: memref<32x64xbf16, #tpu.memory_space<vmem>>, %arg2: memref<64x32xbf16, #tpu.memory_space<vmem>>, %arg3: memref<1x512x32xbf16, #tpu.memory_space<vmem>>, %arg4: memref<1x16x64x64xf32, #tpu.memory_space<vmem>>) attributes {dimension_semantics = [#tpu.dimension_semantics<parallel>], iteration_bounds = array<i64: 2>, scalar_prefetch = 0 : i64, scratch_operands = 0 : i64, tpu.core_type = #tpu.core_type<tc>, window_params = [{pipeline_mode = #tpu.pipeline_mode<synchronous>, transform_indices = @transform_0, window_bounds = array<i64: 32, 64>}, {pipeline_mode = #tpu.pipeline_mode<synchronous>, transform_indices = @transform_1, window_bounds = array<i64: 64, 32>}, {transform_indices = @transform_2, window_bounds = array<i64: 1, 512, 32>}, {transform_indices = @transform_3, window_bounds = array<i64: 1, 16, 64, 64>}]} {
    %c0 = arith.constant 0 : index
    %c0_0 = arith.constant 0 : index
    %c0_1 = arith.constant 0 : index
    %0 = vector.load %arg3[%c0, %c0_0, %c0_1] : memref<1x512x32xbf16, #tpu.memory_space<vmem>>, vector<1x512x32xbf16>
    %1 = vector.shape_cast %0 : vector<1x512x32xbf16> to vector<512x32xbf16>
    %c0_2 = arith.constant 0 : index
    %c0_3 = arith.constant 0 : index
    %2 = vector.load %arg1[%c0_2, %c0_3] : memref<32x64xbf16, #tpu.memory_space<vmem>>, vector<32x64xbf16>
    %cst = arith.constant dense<0.000000e+00> : vector<512x64xf32>
    %3 = tpu.matmul %1, %2, %cst {dimension_numbers = #tpu.dot_dimension_numbers<[1], [0], [0], [1], [0, 0, 1, 1], [], []>} : vector<512x32xbf16>, vector<32x64xbf16>, vector<512x64xf32> -> vector<512x64xf32>
    %4 = arith.truncf %3 : vector<512x64xf32> to vector<512x64xbf16>
    %c0_4 = arith.constant 0 : index
    %c0_5 = arith.constant 0 : index
    %5 = vector.load %arg2[%c0_4, %c0_5] : memref<64x32xbf16, #tpu.memory_space<vmem>>, vector<64x32xbf16>
    %6 = vector.extract_strided_slice %4 {offsets = [0, 0], sizes = [32, 64], strides = [1, 1]} : vector<512x64xbf16> to vector<32x64xbf16>
    %cst_6 = arith.constant dense<0.000000e+00> : vector<64x64xf32>
    %7 = tpu.matmul %5, %6, %cst_6 {dimension_numbers = #tpu.dot_dimension_numbers<[1], [0], [0], [1], [0, 0, 1, 1], [], []>} : vector<64x32xbf16>, vector<32x64xbf16>, vector<64x64xf32> -> vector<64x64xf32>
    %c0_7 = arith.constant 0 : index
    %c0_8 = arith.constant 0 : index
    %c0_9 = arith.constant 0 : index
    %c0_10 = arith.constant 0 : index
    %8 = vector.load %arg4[%c0_7, %c0_8, %c0_9, %c0_10] : memref<1x16x64x64xf32, #tpu.memory_space<vmem>>, vector<1x1x64x64xf32>
    %9 = vector.shape_cast %8 : vector<1x1x64x64xf32> to vector<64x64xf32>
    %10 = vector.shape_cast %7 : vector<64x64xf32> to vector<1x1x64x64xf32>
    tpu.vector_store %arg4[%c0_7, %c0_8, %c0_9, %c0_10], %10 {strides = array<i32>} : memref<1x16x64x64xf32, #tpu.memory_space<vmem>>, vector<1x1x64x64xf32>,
    %11 = vector.extract_strided_slice %4 {offsets = [32, 0], sizes = [32, 64], strides = [1, 1]} : vector<512x64xbf16> to vector<32x64xbf16>
    %cst_11 = arith.constant dense<0.000000e+00> : vector<64x64xf32>
    %12 = tpu.matmul %5, %11, %cst_11 {dimension_numbers = #tpu.dot_dimension_numbers<[1], [0], [0], [1], [0, 0, 1, 1], [], []>} : vector<64x32xbf16>, vector<32x64xbf16>, vector<64x64xf32> -> vector<64x64xf32>
    %c0_12 = arith.constant 0 : index
    %c1 = arith.constant 1 : index
    %c0_13 = arith.constant 0 : index
    %c0_14 = arith.constant 0 : index
    %13 = vector.load %arg4[%c0_12, %c1, %c0_13, %c0_14] : memref<1x16x64x64xf32, #tpu.memory_space<vmem>>, vector<1x1x64x64xf32>
    %14 = vector.shape_cast %13 : vector<1x1x64x64xf32> to vector<64x64xf32>
    %15 = vector.shape_cast %12 : vector<64x64xf32> to vector<1x1x64x64xf32>
    tpu.vector_store %arg4[%c0_12, %c1, %c0_13, %c0_14], %15 {strides = array<i32>} : memref<1x16x64x64xf32, #tpu.memory_space<vmem>>, vector<1x1x64x64xf32>,
    %16 = vector.extract_strided_slice %4 {offsets = [64, 0], sizes = [32, 64], strides = [1, 1]} : vector<512x64xbf16> to vector<32x64xbf16>
    %cst_15 = arith.constant dense<0.000000e+00> : vector<64x64xf32>
    %17 = tpu.matmul %5, %16, %cst_15 {dimension_numbers = #tpu.dot_dimension_numbers<[1], [0], [0], [1], [0, 0, 1, 1], [], []>} : vector<64x32xbf16>, vector<32x64xbf16>, vector<64x64xf32> -> vector<64x64xf32>
    %c0_16 = arith.constant 0 : index
    %c2 = arith.constant 2 : index
    %c0_17 = arith.constant 0 : index
    %c0_18 = arith.constant 0 : index
    %18 = vector.load %arg4[%c0_16, %c2, %c0_17, %c0_18] : memref<1x16x64x64xf32, #tpu.memory_space<vmem>>, vector<1x1x64x64xf32>
    %19 = vector.shape_cast %18 : vector<1x1x64x64xf32> to vector<64x64xf32>
    %20 = vector.shape_cast %17 : vector<64x64xf32> to vector<1x1x64x64xf32>
    tpu.vector_store %arg4[%c0_16, %c2, %c0_17, %c0_18], %20 {strides = array<i32>} : memref<1x16x64x64xf32, #tpu.memory_space<vmem>>, vector<1x1x64x64xf32>,
    %21 = vector.extract_strided_slice %4 {offsets = [96, 0], sizes = [32, 64], strides = [1, 1]} : vector<512x64xbf16> to vector<32x64xbf16>
    %cst_19 = arith.constant dense<0.000000e+00> : vector<64x64xf32>
    %22 = tpu.matmul %5, %21, %cst_19 {dimension_numbers = #tpu.dot_dimension_numbers<[1], [0], [0], [1], [0, 0, 1, 1], [], []>} : vector<64x32xbf16>, vector<32x64xbf16>, vector<64x64xf32> -> vector<64x64xf32>
    %c0_20 = arith.constant 0 : index
    %c3 = arith.constant 3 : index
    %c0_21 = arith.constant 0 : index
    %c0_22 = arith.constant 0 : index
    %23 = vector.load %arg4[%c0_20, %c3, %c0_21, %c0_22] : memref<1x16x64x64xf32, #tpu.memory_space<vmem>>, vector<1x1x64x64xf32>
    %24 = vector.shape_cast %23 : vector<1x1x64x64xf32> to vector<64x64xf32>
    %25 = vector.shape_cast %22 : vector<64x64xf32> to vector<1x1x64x64xf32>
    tpu.vector_store %arg4[%c0_20, %c3, %c0_21, %c0_22], %25 {strides = array<i32>} : memref<1x16x64x64xf32, #tpu.memory_space<vmem>>, vector<1x1x64x64xf32>,
    %26 = vector.extract_strided_slice %4 {offsets = [128, 0], sizes = [32, 64], strides = [1, 1]} : vector<512x64xbf16> to vector<32x64xbf16>
    %cst_23 = arith.constant dense<0.000000e+00> : vector<64x64xf32>
    %27 = tpu.matmul %5, %26, %cst_23 {dimension_numbers = #tpu.dot_dimension_numbers<[1], [0], [0], [1], [0, 0, 1, 1], [], []>} : vector<64x32xbf16>, vector<32x64xbf16>, vector<64x64xf32> -> vector<64x64xf32>
    %c0_24 = arith.constant 0 : index
    %c4 = arith.constant 4 : index
    %c0_25 = arith.constant 0 : index
    %c0_26 = arith.constant 0 : index
    %28 = vector.load %arg4[%c0_24, %c4, %c0_25, %c0_26] : memref<1x16x64x64xf32, #tpu.memory_space<vmem>>, vector<1x1x64x64xf32>
    %29 = vector.shape_cast %28 : vector<1x1x64x64xf32> to vector<64x64xf32>
    %30 = vector.shape_cast %27 : vector<64x64xf32> to vector<1x1x64x64xf32>
    tpu.vector_store %arg4[%c0_24, %c4, %c0_25, %c0_26], %30 {strides = array<i32>} : memref<1x16x64x64xf32, #tpu.memory_space<vmem>>, vector<1x1x64x64xf32>,
    %31 = vector.extract_strided_slice %4 {offsets = [160, 0], sizes = [32, 64], strides = [1, 1]} : vector<512x64xbf16> to vector<32x64xbf16>
    %cst_27 = arith.constant dense<0.000000e+00> : vector<64x64xf32>
    %32 = tpu.matmul %5, %31, %cst_27 {dimension_numbers = #tpu.dot_dimension_numbers<[1], [0], [0], [1], [0, 0, 1, 1], [], []>} : vector<64x32xbf16>, vector<32x64xbf16>, vector<64x64xf32> -> vector<64x64xf32>
    %c0_28 = arith.constant 0 : index
    %c5 = arith.constant 5 : index
    %c0_29 = arith.constant 0 : index
    %c0_30 = arith.constant 0 : index
    %33 = vector.load %arg4[%c0_28, %c5, %c0_29, %c0_30] : memref<1x16x64x64xf32, #tpu.memory_space<vmem>>, vector<1x1x64x64xf32>
    %34 = vector.shape_cast %33 : vector<1x1x64x64xf32> to vector<64x64xf32>
    %35 = vector.shape_cast %32 : vector<64x64xf32> to vector<1x1x64x64xf32>
    tpu.vector_store %arg4[%c0_28, %c5, %c0_29, %c0_30], %35 {strides = array<i32>} : memref<1x16x64x64xf32, #tpu.memory_space<vmem>>, vector<1x1x64x64xf32>,
    %36 = vector.extract_strided_slice %4 {offsets = [192, 0], sizes = [32, 64], strides = [1, 1]} : vector<512x64xbf16> to vector<32x64xbf16>
    %cst_31 = arith.constant dense<0.000000e+00> : vector<64x64xf32>
    %37 = tpu.matmul %5, %36, %cst_31 {dimension_numbers = #tpu.dot_dimension_numbers<[1], [0], [0], [1], [0, 0, 1, 1], [], []>} : vector<64x32xbf16>, vector<32x64xbf16>, vector<64x64xf32> -> vector<64x64xf32>
    %c0_32 = arith.constant 0 : index
    %c6 = arith.constant 6 : index
    %c0_33 = arith.constant 0 : index
    %c0_34 = arith.constant 0 : index
    %38 = vector.load %arg4[%c0_32, %c6, %c0_33, %c0_34] : memref<1x16x64x64xf32, #tpu.memory_space<vmem>>, vector<1x1x64x64xf32>
    %39 = vector.shape_cast %38 : vector<1x1x64x64xf32> to vector<64x64xf32>
    %40 = vector.shape_cast %37 : vector<64x64xf32> to vector<1x1x64x64xf32>
    tpu.vector_store %arg4[%c0_32, %c6, %c0_33, %c0_34], %40 {strides = array<i32>} : memref<1x16x64x64xf32, #tpu.memory_space<vmem>>, vector<1x1x64x64xf32>,
    %41 = vector.extract_strided_slice %4 {offsets = [224, 0], sizes = [32, 64], strides = [1, 1]} : vector<512x64xbf16> to vector<32x64xbf16>
    %cst_35 = arith.constant dense<0.000000e+00> : vector<64x64xf32>
    %42 = tpu.matmul %5, %41, %cst_35 {dimension_numbers = #tpu.dot_dimension_numbers<[1], [0], [0], [1], [0, 0, 1, 1], [], []>} : vector<64x32xbf16>, vector<32x64xbf16>, vector<64x64xf32> -> vector<64x64xf32>
    %c0_36 = arith.constant 0 : index
    %c7 = arith.constant 7 : index
    %c0_37 = arith.constant 0 : index
    %c0_38 = arith.constant 0 : index
    %43 = vector.load %arg4[%c0_36, %c7, %c0_37, %c0_38] : memref<1x16x64x64xf32, #tpu.memory_space<vmem>>, vector<1x1x64x64xf32>
    %44 = vector.shape_cast %43 : vector<1x1x64x64xf32> to vector<64x64xf32>
    %45 = vector.shape_cast %42 : vector<64x64xf32> to vector<1x1x64x64xf32>
    tpu.vector_store %arg4[%c0_36, %c7, %c0_37, %c0_38], %45 {strides = array<i32>} : memref<1x16x64x64xf32, #tpu.memory_space<vmem>>, vector<1x1x64x64xf32>,
    %46 = vector.extract_strided_slice %4 {offsets = [256, 0], sizes = [32, 64], strides = [1, 1]} : vector<512x64xbf16> to vector<32x64xbf16>
    %cst_39 = arith.constant dense<0.000000e+00> : vector<64x64xf32>
    %47 = tpu.matmul %5, %46, %cst_39 {dimension_numbers = #tpu.dot_dimension_numbers<[1], [0], [0], [1], [0, 0, 1, 1], [], []>} : vector<64x32xbf16>, vector<32x64xbf16>, vector<64x64xf32> -> vector<64x64xf32>
    %c0_40 = arith.constant 0 : index
    %c8 = arith.constant 8 : index
    %c0_41 = arith.constant 0 : index
    %c0_42 = arith.constant 0 : index
    %48 = vector.load %arg4[%c0_40, %c8, %c0_41, %c0_42] : memref<1x16x64x64xf32, #tpu.memory_space<vmem>>, vector<1x1x64x64xf32>
    %49 = vector.shape_cast %48 : vector<1x1x64x64xf32> to vector<64x64xf32>
    %50 = vector.shape_cast %47 : vector<64x64xf32> to vector<1x1x64x64xf32>
    tpu.vector_store %arg4[%c0_40, %c8, %c0_41, %c0_42], %50 {strides = array<i32>} : memref<1x16x64x64xf32, #tpu.memory_space<vmem>>, vector<1x1x64x64xf32>,
    %51 = vector.extract_strided_slice %4 {offsets = [288, 0], sizes = [32, 64], strides = [1, 1]} : vector<512x64xbf16> to vector<32x64xbf16>
    %cst_43 = arith.constant dense<0.000000e+00> : vector<64x64xf32>
    %52 = tpu.matmul %5, %51, %cst_43 {dimension_numbers = #tpu.dot_dimension_numbers<[1], [0], [0], [1], [0, 0, 1, 1], [], []>} : vector<64x32xbf16>, vector<32x64xbf16>, vector<64x64xf32> -> vector<64x64xf32>
    %c0_44 = arith.constant 0 : index
    %c9 = arith.constant 9 : index
    %c0_45 = arith.constant 0 : index
    %c0_46 = arith.constant 0 : index
    %53 = vector.load %arg4[%c0_44, %c9, %c0_45, %c0_46] : memref<1x16x64x64xf32, #tpu.memory_space<vmem>>, vector<1x1x64x64xf32>
    %54 = vector.shape_cast %53 : vector<1x1x64x64xf32> to vector<64x64xf32>
    %55 = vector.shape_cast %52 : vector<64x64xf32> to vector<1x1x64x64xf32>
    tpu.vector_store %arg4[%c0_44, %c9, %c0_45, %c0_46], %55 {strides = array<i32>} : memref<1x16x64x64xf32, #tpu.memory_space<vmem>>, vector<1x1x64x64xf32>,
    %56 = vector.extract_strided_slice %4 {offsets = [320, 0], sizes = [32, 64], strides = [1, 1]} : vector<512x64xbf16> to vector<32x64xbf16>
    %cst_47 = arith.constant dense<0.000000e+00> : vector<64x64xf32>
    %57 = tpu.matmul %5, %56, %cst_47 {dimension_numbers = #tpu.dot_dimension_numbers<[1], [0], [0], [1], [0, 0, 1, 1], [], []>} : vector<64x32xbf16>, vector<32x64xbf16>, vector<64x64xf32> -> vector<64x64xf32>
    %c0_48 = arith.constant 0 : index
    %c10 = arith.constant 10 : index
    %c0_49 = arith.constant 0 : index
    %c0_50 = arith.constant 0 : index
    %58 = vector.load %arg4[%c0_48, %c10, %c0_49, %c0_50] : memref<1x16x64x64xf32, #tpu.memory_space<vmem>>, vector<1x1x64x64xf32>
    %59 = vector.shape_cast %58 : vector<1x1x64x64xf32> to vector<64x64xf32>
    %60 = vector.shape_cast %57 : vector<64x64xf32> to vector<1x1x64x64xf32>
    tpu.vector_store %arg4[%c0_48, %c10, %c0_49, %c0_50], %60 {strides = array<i32>} : memref<1x16x64x64xf32, #tpu.memory_space<vmem>>, vector<1x1x64x64xf32>,
    %61 = vector.extract_strided_slice %4 {offsets = [352, 0], sizes = [32, 64], strides = [1, 1]} : vector<512x64xbf16> to vector<32x64xbf16>
    %cst_51 = arith.constant dense<0.000000e+00> : vector<64x64xf32>
    %62 = tpu.matmul %5, %61, %cst_51 {dimension_numbers = #tpu.dot_dimension_numbers<[1], [0], [0], [1], [0, 0, 1, 1], [], []>} : vector<64x32xbf16>, vector<32x64xbf16>, vector<64x64xf32> -> vector<64x64xf32>
    %c0_52 = arith.constant 0 : index
    %c11 = arith.constant 11 : index
    %c0_53 = arith.constant 0 : index
    %c0_54 = arith.constant 0 : index
    %63 = vector.load %arg4[%c0_52, %c11, %c0_53, %c0_54] : memref<1x16x64x64xf32, #tpu.memory_space<vmem>>, vector<1x1x64x64xf32>
    %64 = vector.shape_cast %63 : vector<1x1x64x64xf32> to vector<64x64xf32>
    %65 = vector.shape_cast %62 : vector<64x64xf32> to vector<1x1x64x64xf32>
    tpu.vector_store %arg4[%c0_52, %c11, %c0_53, %c0_54], %65 {strides = array<i32>} : memref<1x16x64x64xf32, #tpu.memory_space<vmem>>, vector<1x1x64x64xf32>,
    %66 = vector.extract_strided_slice %4 {offsets = [384, 0], sizes = [32, 64], strides = [1, 1]} : vector<512x64xbf16> to vector<32x64xbf16>
    %cst_55 = arith.constant dense<0.000000e+00> : vector<64x64xf32>
    %67 = tpu.matmul %5, %66, %cst_55 {dimension_numbers = #tpu.dot_dimension_numbers<[1], [0], [0], [1], [0, 0, 1, 1], [], []>} : vector<64x32xbf16>, vector<32x64xbf16>, vector<64x64xf32> -> vector<64x64xf32>
    %c0_56 = arith.constant 0 : index
    %c12 = arith.constant 12 : index
    %c0_57 = arith.constant 0 : index
    %c0_58 = arith.constant 0 : index
    %68 = vector.load %arg4[%c0_56, %c12, %c0_57, %c0_58] : memref<1x16x64x64xf32, #tpu.memory_space<vmem>>, vector<1x1x64x64xf32>
    %69 = vector.shape_cast %68 : vector<1x1x64x64xf32> to vector<64x64xf32>
    %70 = vector.shape_cast %67 : vector<64x64xf32> to vector<1x1x64x64xf32>
    tpu.vector_store %arg4[%c0_56, %c12, %c0_57, %c0_58], %70 {strides = array<i32>} : memref<1x16x64x64xf32, #tpu.memory_space<vmem>>, vector<1x1x64x64xf32>,
    %71 = vector.extract_strided_slice %4 {offsets = [416, 0], sizes = [32, 64], strides = [1, 1]} : vector<512x64xbf16> to vector<32x64xbf16>
    %cst_59 = arith.constant dense<0.000000e+00> : vector<64x64xf32>
    %72 = tpu.matmul %5, %71, %cst_59 {dimension_numbers = #tpu.dot_dimension_numbers<[1], [0], [0], [1], [0, 0, 1, 1], [], []>} : vector<64x32xbf16>, vector<32x64xbf16>, vector<64x64xf32> -> vector<64x64xf32>
    %c0_60 = arith.constant 0 : index
    %c13 = arith.constant 13 : index
    %c0_61 = arith.constant 0 : index
    %c0_62 = arith.constant 0 : index
    %73 = vector.load %arg4[%c0_60, %c13, %c0_61, %c0_62] : memref<1x16x64x64xf32, #tpu.memory_space<vmem>>, vector<1x1x64x64xf32>
    %74 = vector.shape_cast %73 : vector<1x1x64x64xf32> to vector<64x64xf32>
    %75 = vector.shape_cast %72 : vector<64x64xf32> to vector<1x1x64x64xf32>
    tpu.vector_store %arg4[%c0_60, %c13, %c0_61, %c0_62], %75 {strides = array<i32>} : memref<1x16x64x64xf32, #tpu.memory_space<vmem>>, vector<1x1x64x64xf32>,
    %76 = vector.extract_strided_slice %4 {offsets = [448, 0], sizes = [32, 64], strides = [1, 1]} : vector<512x64xbf16> to vector<32x64xbf16>
    %cst_63 = arith.constant dense<0.000000e+00> : vector<64x64xf32>
    %77 = tpu.matmul %5, %76, %cst_63 {dimension_numbers = #tpu.dot_dimension_numbers<[1], [0], [0], [1], [0, 0, 1, 1], [], []>} : vector<64x32xbf16>, vector<32x64xbf16>, vector<64x64xf32> -> vector<64x64xf32>
    %c0_64 = arith.constant 0 : index
    %c14 = arith.constant 14 : index
    %c0_65 = arith.constant 0 : index
    %c0_66 = arith.constant 0 : index
    %78 = vector.load %arg4[%c0_64, %c14, %c0_65, %c0_66] : memref<1x16x64x64xf32, #tpu.memory_space<vmem>>, vector<1x1x64x64xf32>
    %79 = vector.shape_cast %78 : vector<1x1x64x64xf32> to vector<64x64xf32>
    %80 = vector.shape_cast %77 : vector<64x64xf32> to vector<1x1x64x64xf32>
    tpu.vector_store %arg4[%c0_64, %c14, %c0_65, %c0_66], %80 {strides = array<i32>} : memref<1x16x64x64xf32, #tpu.memory_space<vmem>>, vector<1x1x64x64xf32>,
    %81 = vector.extract_strided_slice %4 {offsets = [480, 0], sizes = [32, 64], strides = [1, 1]} : vector<512x64xbf16> to vector<32x64xbf16>
    %cst_67 = arith.constant dense<0.000000e+00> : vector<64x64xf32>
    %82 = tpu.matmul %5, %81, %cst_67 {dimension_numbers = #tpu.dot_dimension_numbers<[1], [0], [0], [1], [0, 0, 1, 1], [], []>} : vector<64x32xbf16>, vector<32x64xbf16>, vector<64x64xf32> -> vector<64x64xf32>
    %c0_68 = arith.constant 0 : index
    %c15 = arith.constant 15 : index
    %c0_69 = arith.constant 0 : index
    %c0_70 = arith.constant 0 : index
    %83 = vector.load %arg4[%c0_68, %c15, %c0_69, %c0_70] : memref<1x16x64x64xf32, #tpu.memory_space<vmem>>, vector<1x1x64x64xf32>
    %84 = vector.shape_cast %83 : vector<1x1x64x64xf32> to vector<64x64xf32>
    %85 = vector.shape_cast %82 : vector<64x64xf32> to vector<1x1x64x64xf32>
    tpu.vector_store %arg4[%c0_68, %c15, %c0_69, %c0_70], %85 {strides = array<i32>} : memref<1x16x64x64xf32, #tpu.memory_space<vmem>>, vector<1x1x64x64xf32>,
    return
  }
  func.func @transform_0(%arg0: i32) -> (i32, i32) {
    %c0_i32 = arith.constant 0 : i32
    %c0_i32_0 = arith.constant 0 : i32
    %c0_i32_1 = arith.constant 0 : i32
    return %c0_i32, %c0_i32_0 : i32, i32
  }
  func.func @transform_1(%arg0: i32) -> (i32, i32) {
    %c0_i32 = arith.constant 0 : i32
    %c0_i32_0 = arith.constant 0 : i32
    %c0_i32_1 = arith.constant 0 : i32
    return %c0_i32, %c0_i32_0 : i32, i32
  }
  func.func @transform_2(%arg0: i32) -> (i32, i32, i32) {
    %c0_i32 = arith.constant 0 : i32
    %c0_i32_0 = arith.constant 0 : i32
    %c0_i32_1 = arith.constant 0 : i32
    return %arg0, %c0_i32, %c0_i32_0 : i32, i32, i32
  }
  func.func @transform_3(%arg0: i32) -> (i32, i32, i32, i32) {
    %c0_i32 = arith.constant 0 : i32
    %c0_i32_0 = arith.constant 0 : i32
    %c0_i32_1 = arith.constant 0 : i32
    %c0_i32_2 = arith.constant 0 : i32
    return %arg0, %c0_i32, %c0_i32_0, %c0_i32_1 : i32, i32, i32, i32
  }
}

</mosaic_0001>

<bundles_post_ra>
// kernel: attr_encoder_forward.10
= control target key start
LH: loop header
LB: loop body
LE: loop exit
PB: predicated region body
PF: predicated region fallthrough
CT: control target
= control target key end

     0   :  { %s695_s9 = smov 0   ;;  %s753_s0 = inlined_call_operand.vmem [shape: bf16[8,48], index: 0, kind: input, shape index: {}]   ;;  %s754_s1 = inlined_call_operand.vmem [shape: bf16[2,48,1024], index: 1, kind: input, shape index: {}]   ;;  %s755_s2 = inlined_call_operand.vmem [shape: bf16[2,8,1024], index: 2, kind: output, shape index: {}]  }
   0x1 LB: > { %s612_s10 = sadd.s32 4294967295, %s677_s9   ;;  %p616_p0 = scmp.ge.s32.totalorder %s677_s9, 1  ;;  %s677_s9 = sphi %s695_s9, %s12_s9  }
   0x2   : > { %p112_p1 = scmp.lt.s32.totalorder %s677_s9, 3 }
   0x4   : > { %p113_p2 = pnand %p616_p0, %p112_p1 }
   0x5   : > { %p134_p3 = scmp.lt.s32.totalorder (!%p113_p2), %s612_s10, 1 }
   0x6   : > { %116 = sbr.rel (%p113_p2) target bundleno = 569 (0x239), region = 28 }
   0xb   : > { %v679_v0 = vmov 0   ;;  %s757_s10 = smov (!%p134_p3, %s612_s10), 1  ;;  %v145_v35 = vld [vmem:[%s753_s0] sm:$0xf]  ;;  %vm290_vm0 = vcmask 392192  }
   0xc   : > { %326 = vmatprep.mubr.bf16.mxu0 %v679_v0  ;;  %367 = vmatprep.mubr.bf16.mxu1 %v679_v0  ;;  %s659_s11 = smul.u32 192, %s757_s10  ;;  %s654_s17 = sshll.u32 %s757_s10, 5 }
   0xd   : > { %s143_s20 = scalar_lea.vmem %s755_s2, %s654_s17 }
   0xe   : > { %s711_s14 = scalar_lea.vmem %s754_s1, %s659_s11 }
   0xf   : > { %v162_v1 = vld [vmem:[%s711_s14 + $0x80] sm:$0xff]  ;;  %v163_v3 = vld [vmem:[%s711_s14 + $0x88] sm:$0xff]  ;;  %v164_v23 = vld [vmem:[%s711_s14 + $0x90] sm:$0xff] }
  0x10   : > { %v166_v2 = vld [vmem:[%s711_s14 + $0xa0] sm:$0xff]  ;;  %v167_v5 = vld [vmem:[%s711_s14 + $0xa8] sm:$0xff]  ;;  %v168_v24 = vld [vmem:[%s711_s14 + $0xb0] sm:$0xff] }
  0x11   : > { %v637_v4 = vcombine.high %v162_v1, %v166_v2  ;;  %v636_v6 = vcombine.low %v162_v1, %v166_v2  ;;  %v154_v7 = vld [vmem:[%s711_s14 + $0x40] sm:$0xff]  ;;  %v639_v9 = vcombine.high %v163_v3, %v167_v5  ;;  %v638_v10 = vcombine.low %v163_v3, %v167_v5  ;;  %v155_v12 = vld [vmem:[%s711_s14 + $0x48] sm:$0xff]  ;;  %v165_v25 = vld [vmem:[%s711_s14 + $0x98] sm:$0xff] }
  0x12   : > { %v158_v8 = vld [vmem:[%s711_s14 + $0x60] sm:$0xff]  ;;  %v159_v13 = vld [vmem:[%s711_s14 + $0x68] sm:$0xff]  ;;  %v169_v26 = vld [vmem:[%s711_s14 + $0xb8] sm:$0xff]  ;;  %v641_v29 = vcombine.high %v164_v23, %v168_v24  ;;  %v640_v36 = vcombine.low %v164_v23, %v168_v24 }
  0x13   : > { %v629_v11 = vcombine.high %v154_v7, %v158_v8  ;;  %v146_v14 = vld [vmem:[%s711_s14] sm:$0xff]  ;;  %304 = vmatprep.subr.bf16.mxu0 %v637_v4  ;;  %v631_v15 = vcombine.high %v155_v12, %v159_v13  ;;  %v147_v17 = vld [vmem:[%s711_s14 + $0x8] sm:$0xff]  ;;  %345 = vmatprep.subr.bf16.mxu1 %v639_v9  ;;  %v628_v19 = vcombine.low %v154_v7, %v158_v8  ;;  %v156_v31 = vld [vmem:[%s711_s14 + $0x50] sm:$0xff] }
  0x14   : > { %v150_v16 = vld [vmem:[%s711_s14 + $0x20] sm:$0xff]  ;;  %v151_v18 = vld [vmem:[%s711_s14 + $0x28] sm:$0xff]  ;;  %305 = vmatpush1.bf16.msra.mxu0 %v636_v6  ;;  %346 = vmatpush1.bf16.msra.mxu1 %v638_v10  ;;  %v630_v20 = vcombine.low %v155_v12, %v159_v13  ;;  %v643_v30 = vcombine.high %v165_v25, %v169_v26  ;;  %v160_v32 = vld [vmem:[%s711_s14 + $0x70] sm:$0xff]  ;;  %v642_v37 = vcombine.low %v165_v25, %v169_v26 }
  0x15   : > { %306 = vmatprep.subr.bf16.mxu0 %v629_v11  ;;  %v621_v21 = vcombine.high %v146_v14, %v150_v16  ;;  %347 = vmatprep.subr.bf16.mxu1 %v631_v15  ;;  %v623_v22 = vcombine.high %v147_v17, %v151_v18  ;;  %v620_v27 = vcombine.low %v146_v14, %v150_v16  ;;  %v157_v33 = vld [vmem:[%s711_s14 + $0x58] sm:$0xff]  ;;  %v148_v40 = vld [vmem:[%s711_s14 + $0x10] sm:$0xff] }
  0x16   : > { %v622_v28 = vcombine.low %v147_v17, %v151_v18  ;;  %v161_v34 = vld [vmem:[%s711_s14 + $0x78] sm:$0xff]  ;;  %v633_v38 = vcombine.high %v156_v31, %v160_v32  ;;  %v152_v41 = vld [vmem:[%s711_s14 + $0x30] sm:$0xff]  ;;  %v632_v44 = vcombine.low %v156_v31, %v160_v32 }
  0x17   : > { %v635_v39 = vcombine.high %v157_v33, %v161_v34  ;;  %v149_v42 = vld [vmem:[%s711_s14 + $0x18] sm:$0xff]  ;;  %v634_v45 = vcombine.low %v157_v33, %v161_v34  ;;  %v625_v46 = vcombine.high %v148_v40, %v152_v41  ;;  %v624_v48 = vcombine.low %v148_v40, %v152_v41 }
  0x18   : > { %307 = vmatpush1.bf16.msra.mxu0 %v628_v19  ;;  %348 = vmatpush1.bf16.msra.mxu1 %v630_v20  ;;  %v153_v43 = vld [vmem:[%s711_s14 + $0x38] sm:$0xff] }
  0x19   : > { %308 = vmatprep.subr.bf16.mxu0 %v621_v21  ;;  %349 = vmatprep.subr.bf16.mxu1 %v623_v22  ;;  %v627_v47 = vcombine.high %v149_v42, %v153_v43  ;;  %v626_v49 = vcombine.low %v149_v42, %v153_v43 }
  0x1c   : > { %309 = vmatpush1.bf16.msra.mxu0 %v620_v27  ;;  %350 = vmatpush1.bf16.msra.mxu1 %v622_v28 }
  0x1d   : > { %386 = vmatprep.subr.bf16.mxu0 %v641_v29  ;;  %427 = vmatprep.subr.bf16.mxu1 %v643_v30 }
  0x1f   : > { %644 = vmatmul.mubr.msk.bf16.vlgmr.msra.gmra.mxu0 %vm290_vm0, %v145_v35  ;;  %645 = vmatmul.mubr.msk.bf16.vlgmr.msra.gmra.mxu1 %vm290_vm0, %v145_v35 }
  0x20   : > { %387 = vmatpush1.bf16.msra.mxu0 %v640_v36  ;;  %428 = vmatpush1.bf16.msra.mxu1 %v642_v37 }
  0x21   : > { %388 = vmatprep.subr.bf16.mxu0 %v633_v38  ;;  %429 = vmatprep.subr.bf16.mxu1 %v635_v39 }
  0x22   : > { %408 = vmatprep.mubr.bf16.mxu0 %v679_v0  ;;  %449 = vmatprep.mubr.bf16.mxu1 %v679_v0 }
  0x24   : > { %389 = vmatpush1.bf16.msra.mxu0 %v632_v44  ;;  %430 = vmatpush1.bf16.msra.mxu1 %v634_v45 }
  0x25   : > { %390 = vmatprep.subr.bf16.mxu0 %v625_v46  ;;  %431 = vmatprep.subr.bf16.mxu1 %v627_v47 }
  0x28   : > { %391 = vmatpush1.bf16.msra.mxu0 %v624_v48  ;;  %432 = vmatpush1.bf16.msra.mxu1 %v626_v49 }
  0x2b   : > { %646 = vmatmul.mubr.msk.bf16.vlgmr.msra.gmra.mxu0 %vm290_vm0, %v145_v35  ;;  %647 = vmatmul.mubr.msk.bf16.vlgmr.msra.gmra.mxu1 %vm290_vm0, %v145_v35 }
  0xdf   : > { %v328_v50 = vpop.f32.mrf.mxu0  ;;  %v369_v51 = vpop.f32.mrf.mxu1 }
  0xe1   : > { %v330_v52 = vpop.f32.mrf.mxu0  ;;  %v371_v54 = vpop.f32.mrf.mxu1 }
  0xe2   : > { %v458_v53 = vadd.f32 %v330_v52, %v328_v50 }
  0xe3   : > { %v332_v55 = vpop.f32.mrf.mxu0  ;;  %v373_v56 = vpop.f32.mrf.mxu1 }
  0xe4   : > { %v459_v58 = vadd.f32 %v458_v53, %v369_v51 }
  0xe5   : > { %v333_v57 = vpop.f32.mrf.mxu0  ;;  %v374_v59 = vpop.f32.mrf.mxu1 }
  0xe6   : > { %v460_v60 = vadd.f32 %v459_v58, %v371_v54 }
  0xeb   : > { %v410_v61 = vpop.f32.mrf.mxu0  ;;  %v451_v63 = vpop.f32.mrf.mxu1 }
  0xec   : > { %v461_v62 = vadd.f32 %v460_v60, %v410_v61 }
  0xed   : > { %v412_v0 = vpop.f32.mrf.mxu0  ;;  %v453_v2 = vpop.f32.mrf.mxu1 }
  0xee   : > { %v462_v1 = vadd.f32 %v461_v62, %v412_v0 }
  0xef   : > { %v414_v3 = vpop.f32.mrf.mxu0  ;;  %v455_v4 = vpop.f32.mrf.mxu1 }
  0xf0   : > { %v463_v5 = vadd.f32 %v462_v1, %v451_v63 }
  0xf1   : > { %v415_v6 = vpop.f32.mrf.mxu0  ;;  %v456_v7 = vpop.f32.mrf.mxu1 }
  0xf2   : > { %v464_v8 = vadd.f32 %v463_v5, %v453_v2 }
  0xf4   : > { %465 = vadd.xlane.f32.xlu0 %v464_v8 }
 0x17d   : > { %v466_v9 = vpop.xlane.xlu0 %465 }
 0x17e   : > { %v468_v10 = vmul.f32 0.0009765625, %v466_v9 }
 0x180   : > { %v469_v11 = vsub.f32 %v328_v50, %v468_v10  ;;  %v470_v12 = vsub.f32 %v330_v52, %v468_v10  ;;  %v471_v13 = vsub.f32 %v369_v51, %v468_v10  ;;  %v472_v14 = vsub.f32 %v371_v54, %v468_v10 }
 0x181   : > { %v473_v17 = vsub.f32 %v410_v61, %v468_v10  ;;  %v474_v20 = vsub.f32 %v412_v0, %v468_v10  ;;  %v475_v23 = vsub.f32 %v451_v63, %v468_v10  ;;  %v476_v26 = vsub.f32 %v453_v2, %v468_v10 }
 0x182   : > { %v477_v15 = vmul.f32 %v469_v11, %v469_v11  ;;  %v478_v16 = vmul.f32 %v470_v12, %v470_v12  ;;  %v479_v18 = vmul.f32 %v471_v13, %v471_v13  ;;  %v480_v21 = vmul.f32 %v472_v14, %v472_v14 }
 0x183   : > { %v481_v24 = vmul.f32 %v473_v17, %v473_v17  ;;  %v482_v27 = vmul.f32 %v474_v20, %v474_v20  ;;  %v483_v29 = vmul.f32 %v475_v23, %v475_v23  ;;  %v484_v31 = vmul.f32 %v476_v26, %v476_v26 }
 0x184   : > { %v485_v19 = vadd.f32 %v478_v16, %v477_v15 }
 0x186   : > { %v486_v22 = vadd.f32 %v485_v19, %v479_v18 }
 0x188   : > { %v487_v25 = vadd.f32 %v486_v22, %v480_v21 }
 0x18a   : > { %v488_v28 = vadd.f32 %v487_v25, %v481_v24 }
 0x18c   : > { %v489_v30 = vadd.f32 %v488_v28, %v482_v27 }
 0x18e   : > { %v490_v32 = vadd.f32 %v489_v30, %v483_v29 }
 0x190   : > { %v491_v33 = vadd.f32 %v490_v32, %v484_v31 }
 0x192   : > { %492 = vadd.xlane.f32.xlu0 %v491_v33 }
 0x21b   : > { %v493_v34 = vpop.xlane.xlu0 %492 }
 0x21c   : > { %v494_v35 = vmul.f32 0.0009765625, %v493_v34 }
 0x21e   : > { %v495_v36 = vadd.f32 1e-05, %v494_v35 }
 0x220   : > { %669 = vrsqrt.f32 %v495_v36 }
 0x22d   : > { %v670_v37 = vpop.eup %669 }
 0x22e   : > { %v497_v38 = vmul.f32 %v670_v37, %v469_v11  ;;  %v498_v39 = vmul.f32 %v670_v37, %v470_v12  ;;  %v499_v40 = vmul.f32 %v670_v37, %v471_v13  ;;  %v500_v41 = vmul.f32 %v670_v37, %v472_v14 }
 0x22f   : > { %v501_v42 = vmul.f32 %v670_v37, %v473_v17  ;;  %v502_v43 = vmul.f32 %v670_v37, %v474_v20  ;;  %v503_v44 = vmul.f32 %v670_v37, %v475_v23  ;;  %v504_v45 = vmul.f32 %v670_v37, %v476_v26 }
 0x230   : > { %v505_v46 = vmul.f32 0.1, %v497_v38  ;;  %v506_v47 = vmul.f32 0.1, %v498_v39  ;;  %v507_v48 = vmul.f32 0.1, %v499_v40 }
 0x231   : > { %v508_v49 = vmul.f32 0.1, %v500_v41  ;;  %v509_v50 = vmul.f32 0.1, %v501_v42  ;;  %v510_v51 = vmul.f32 0.1, %v502_v43 }
 0x232   : > { %v511_v52 = vmul.f32 0.1, %v503_v44  ;;  %v512_v53 = vmul.f32 0.1, %v504_v45  ;;  %v513_v54 = vmax.f32 %v497_v38, %v505_v46  ;;  %v514_v55 = vmax.f32 %v498_v39, %v506_v47 }
 0x233   : > { %v515_v56 = vmax.f32 %v499_v40, %v507_v48  ;;  %v516_v57 = vmax.f32 %v500_v41, %v508_v49  ;;  %v517_v58 = vmax.f32 %v501_v42, %v509_v50  ;;  %v518_v59 = vmax.f32 %v502_v43, %v510_v51 }
 0x234   : > { %v519_v60 = vmax.f32 %v503_v44, %v511_v52  ;;  %v520_v61 = vmax.f32 %v504_v45, %v512_v53  ;;  %v655_v62 = vpack.c.bf16 %v514_v55, %v513_v54 }
 0x235   : > { %v656_v63 = vpack.c.bf16 %v516_v57, %v515_v56  ;;  %v657_v0 = vpack.c.bf16 %v518_v59, %v517_v58 }
 0x236   : > { %v658_v1 = vpack.c.bf16 %v520_v61, %v519_v60  ;;  %553 = vst [vmem:[%s143_s20] sm:$0xff] %v655_v62 }
 0x237   : > { %554 = vst [vmem:[%s143_s20 + $0x8] sm:$0xff] %v656_v63  ;;  %555 = vst [vmem:[%s143_s20 + $0x10] sm:$0xff] %v657_v0 }
 0x238   : > { %556 = vst [vmem:[%s143_s20 + $0x18] sm:$0xff] %v658_v1 }
 0x239 PF: > { %s12_s9 = sadd.s32 1, %s677_s9  }
 0x23a   : > { %p9_p4 = scmp.ge.s32.totalorder %s12_s9, 4  }
 0x23c   :  { %11 = sbr.rel (!%p9_p4) target bundleno = 1 (0x1), region = 58 }

// kernel: attr_encoder_forward.11
= control target key start
LH: loop header
LB: loop body
LE: loop exit
PB: predicated region body
PF: predicated region fallthrough
CT: control target
= control target key end

     0   :  { %s498_s9 = smov 0   ;;  %s522_s0 = inlined_call_operand.vmem [shape: bf16[16,128], index: 0, kind: input, shape index: {}]   ;;  %s523_s1 = inlined_call_operand.vmem [shape: bf16[2,128,256], index: 1, kind: input, shape index: {}]   ;;  %s524_s2 = inlined_call_operand.vmem [shape: bf16[2,16,256], index: 2, kind: output, shape index: {}]  }
   0x1 LB: > { %s402_s10 = sadd.s32 4294967295, %s480_s9   ;;  %p406_p0 = scmp.ge.s32.totalorder %s480_s9, 1  ;;  %s480_s9 = sphi %s498_s9, %s12_s9  }
   0x2   : > { %p112_p1 = scmp.lt.s32.totalorder %s480_s9, 3 }
   0x4   : > { %p113_p2 = pnand %p406_p0, %p112_p1 }
   0x5   : > { %p134_p3 = scmp.lt.s32.totalorder (!%p113_p2), %s402_s10, 1 }
   0x6   : > { %116 = sbr.rel (%p113_p2) target bundleno = 559 (0x22f), region = 28 }
   0xb   : > { %v482_v0 = vmov 0   ;;  %s526_s10 = smov (!%p134_p3, %s402_s10), 1  ;;  %v469_v17 = vld [vmem:[%s522_s0] sm:$0xff]  }
   0xc   : > { %281 = vmatprep.mubr.bf16.mxu0 %v482_v0  ;;  %s432_s11 = sshll.u32 %s526_s10, 7  ;;  %s433_s17 = sshll.u32 %s526_s10, 4 }
   0xd   : > { %s138_s14 = scalar_lea.vmem %s523_s1, %s432_s11  ;;  %s143_s20 = scalar_lea.vmem %s524_s2, %s433_s17 }
   0xe   : > { %v445_v1 = vld [vmem:[%s138_s14 + $0x74] ss:$8 sps:$4 sm:$0xff]   ;;  %v447_v2 = vld [vmem:[%s138_s14 + $0x70] ss:$8 sps:$4 sm:$0xff]   ;;  %v448_v3 = vld [vmem:[%s138_s14 + $0x64] ss:$8 sps:$4 sm:$0xff]  }
   0xf   : > { %249 = vmatprep.subr.bf16.mxu0 %v445_v1  ;;  %v450_v4 = vld [vmem:[%s138_s14 + $0x60] ss:$8 sps:$4 sm:$0xff]   ;;  %v451_v5 = vld [vmem:[%s138_s14 + $0x54] ss:$8 sps:$4 sm:$0xff]   ;;  %v453_v6 = vld [vmem:[%s138_s14 + $0x50] ss:$8 sps:$4 sm:$0xff]  }
  0x10   : > { %250 = vmatpush1.bf16.msra.mxu0 %v447_v2  ;;  %v454_v7 = vld [vmem:[%s138_s14 + $0x44] ss:$8 sps:$4 sm:$0xff]   ;;  %v456_v8 = vld [vmem:[%s138_s14 + $0x40] ss:$8 sps:$4 sm:$0xff]   ;;  %v457_v9 = vld [vmem:[%s138_s14 + $0x34] ss:$8 sps:$4 sm:$0xff]  }
  0x11   : > { %251 = vmatprep.subr.bf16.mxu0 %v448_v3  ;;  %v459_v10 = vld [vmem:[%s138_s14 + $0x30] ss:$8 sps:$4 sm:$0xff]   ;;  %v460_v11 = vld [vmem:[%s138_s14 + $0x24] ss:$8 sps:$4 sm:$0xff]   ;;  %v462_v12 = vld [vmem:[%s138_s14 + $0x20] ss:$8 sps:$4 sm:$0xff]  }
  0x12   : > { %v463_v13 = vld [vmem:[%s138_s14 + $0x14] ss:$8 sps:$4 sm:$0xff]   ;;  %v465_v14 = vld [vmem:[%s138_s14 + $0x10] ss:$8 sps:$4 sm:$0xff]   ;;  %v466_v15 = vld [vmem:[%s138_s14 + $0x4] ss:$8 sps:$4 sm:$0xff]  }
  0x13   : > { %v468_v16 = vld [vmem:[%s138_s14] ss:$8 sps:$4 sm:$0xff]  }
  0x14   : > { %252 = vmatpush1.bf16.msra.mxu0 %v450_v4 }
  0x15   : > { %253 = vmatprep.subr.bf16.mxu0 %v451_v5 }
  0x18   : > { %254 = vmatpush1.bf16.msra.mxu0 %v453_v6 }
  0x19   : > { %255 = vmatprep.subr.bf16.mxu0 %v454_v7 }
  0x1c   : > { %256 = vmatpush1.bf16.msra.mxu0 %v456_v8 }
  0x1d   : > { %257 = vmatprep.subr.bf16.mxu0 %v457_v9 }
  0x20   : > { %258 = vmatpush1.bf16.msra.mxu0 %v459_v10 }
  0x21   : > { %259 = vmatprep.subr.bf16.mxu0 %v460_v11 }
  0x24   : > { %260 = vmatpush1.bf16.msra.mxu0 %v462_v12 }
  0x25   : > { %261 = vmatprep.subr.bf16.mxu0 %v463_v13 }
  0x28   : > { %262 = vmatpush1.bf16.msra.mxu0 %v465_v14 }
  0x29   : > { %263 = vmatprep.subr.bf16.mxu0 %v466_v15 }
  0x2c   : > { %264 = vmatpush1.bf16.msra.mxu0 %v468_v16 }
  0x2f   : > { %282 = vmatmul.mubr.bf16.vlgmr.msra.gmra.mxu0 %v469_v17 }
  0xef   : > { %v283_v18 = vpop.f32.mrf.mxu0 }
  0xf1   : > { %v285_v19 = vpop.f32.mrf.mxu0 }
  0xf2   : > { %v292_v20 = vadd.f32 %v285_v19, %v283_v18 }
  0xf3   : > { %v287_v21 = vpop.f32.mrf.mxu0 }
  0xf4   : > { %293 = vadd.xlane.f32.xlu0 %v292_v20 }
  0xf5   : > { %v289_v22 = vpop.f32.mrf.mxu0 }
  0xf6   : > { %v295_v23 = vadd.f32 %v289_v22, %v287_v21 }
  0xf8   : > { %296 = vadd.xlane.f32.xlu0 %v295_v23 }
 0x17d   : > { %v294_v24 = vpop.xlane.xlu0 %293 }
 0x17e   : > { %v299_v25 = vmul.f32 0.00390625, %v294_v24 }
 0x180   : > { %v301_v26 = vsub.f32 %v283_v18, %v299_v25  ;;  %v302_v27 = vsub.f32 %v285_v19, %v299_v25 }
 0x181   : > { %v297_v28 = vpop.xlane.xlu0 %296 }
 0x182   : > { %v300_v29 = vmul.f32 0.00390625, %v297_v28  ;;  %v305_v30 = vmul.f32 %v301_v26, %v301_v26  ;;  %v306_v31 = vmul.f32 %v302_v27, %v302_v27 }
 0x184   : > { %v303_v32 = vsub.f32 %v287_v21, %v300_v29  ;;  %v304_v33 = vsub.f32 %v289_v22, %v300_v29  ;;  %v309_v34 = vadd.f32 %v306_v31, %v305_v30 }
 0x186   : > { %310 = vadd.xlane.f32.xlu1 %v309_v34  ;;  %v307_v35 = vmul.f32 %v303_v32, %v303_v32  ;;  %v308_v36 = vmul.f32 %v304_v33, %v304_v33 }
 0x188   : > { %v312_v37 = vadd.f32 %v308_v36, %v307_v35 }
 0x18a   : > { %313 = vadd.xlane.f32.xlu1 %v312_v37 }
 0x20f   : > { %v311_v38 = vpop.xlane.xlu1 %310 }
 0x210   : > { %v315_v39 = vmul.f32 0.00390625, %v311_v38 }
 0x212   : > { %v317_v40 = vadd.f32 1e-05, %v315_v39 }
 0x213   : > { %v314_v41 = vpop.xlane.xlu1 %313 }
 0x214   : > { %470 = vrsqrt.f32 %v317_v40  ;;  %v316_v42 = vmul.f32 0.00390625, %v314_v41 }
 0x216   : > { %v318_v43 = vadd.f32 1e-05, %v316_v42 }
 0x218   : > { %472 = vrsqrt.f32 %v318_v43 }
 0x221   : > { %v471_v44 = vpop.eup %470 }
 0x222   : > { %v321_v45 = vmul.f32 %v471_v44, %v301_v26  ;;  %v322_v46 = vmul.f32 %v471_v44, %v302_v27 }
 0x224   : > { %v325_v47 = vmul.f32 0.1, %v321_v45  ;;  %v326_v48 = vmul.f32 0.1, %v322_v46 }
 0x225   : > { %v473_v49 = vpop.eup %472 }
 0x226   : > { %v329_v50 = vmax.f32 %v321_v45, %v325_v47  ;;  %v330_v51 = vmax.f32 %v322_v46, %v326_v48  ;;  %v323_v52 = vmul.f32 %v473_v49, %v303_v32  ;;  %v324_v53 = vmul.f32 %v473_v49, %v304_v33 }
 0x228   : > { %v434_v54 = vpack.c.bf16 %v330_v51, %v329_v50  ;;  %v327_v55 = vmul.f32 0.1, %v323_v52  ;;  %v328_v56 = vmul.f32 0.1, %v324_v53 }
 0x22a   : > { %345 = vst [vmem:[%s143_s20] sm:$0xff] %v434_v54  ;;  %v331_v57 = vmax.f32 %v323_v52, %v327_v55  ;;  %v332_v58 = vmax.f32 %v324_v53, %v328_v56 }
 0x22c   : > { %v435_v59 = vpack.c.bf16 %v332_v58, %v331_v57 }
 0x22e   : > { %346 = vst [vmem:[%s143_s20 + $0x8] sm:$0xff] %v435_v59 }
 0x22f PF: > { %s12_s9 = sadd.s32 1, %s480_s9  }
 0x230   : > { %p9_p4 = scmp.ge.s32.totalorder %s12_s9, 4  }
 0x232   :  { %11 = sbr.rel (!%p9_p4) target bundleno = 1 (0x1), region = 58 }

// kernel: attr_encoder_forward.12
= control target key start
LH: loop header
LB: loop body
LE: loop exit
PB: predicated region body
PF: predicated region fallthrough
CT: control target
= control target key end

     0   :  { %s630_s9 = smov 0   ;;  %s693_s0 = inlined_call_operand.vmem [shape: bf16[32,256], index: 0, kind: input, shape index: {}]   ;;  %s694_s1 = inlined_call_operand.vmem [shape: bf16[2,256,64], index: 1, kind: input, shape index: {}]   ;;  %s695_s2 = inlined_call_operand.vmem [shape: bf16[2,32,64], index: 2, kind: output, shape index: {}]  }
   0x1 LB: > { %s484_s10 = sadd.s32 4294967295, %s613_s9   ;;  %p488_p0 = scmp.ge.s32.totalorder %s613_s9, 1  ;;  %s613_s9 = sphi %s630_s9, %s12_s9  }
   0x2   : > { %p112_p1 = scmp.lt.s32.totalorder %s613_s9, 3 }
   0x4   : > { %p113_p2 = pnand %p488_p0, %p112_p1 }
   0x5   : > { %p134_p3 = scmp.lt.s32.totalorder (!%p113_p2), %s484_s10, 1 }
   0x6   : > { %116 = sbr.rel (%p113_p2) target bundleno = 563 (0x233), region = 28 }
   0xb   : > { %v595_v0 = vld [vmem:[%s693_s0 + $0x4] ss:$8 sps:$4 sm:$0xff]   ;;  %s697_s10 = smov (!%p134_p3, %s484_s10), 1  ;;  %v598_v1 = vld [vmem:[%s693_s0 + $0x14] ss:$8 sps:$4 sm:$0xff]   ;;  %vm346_vm0 = vcmask 523264  }
   0xc   : > { %329 = vmatprep.mubr.bf16.mxu0 %v595_v0  ;;  %s519_s15 = sshll.u32 %s697_s10, 7  ;;  %337 = vmatprep.mubr.bf16.mxu1 %v598_v1  ;;  %v593_v18 = vld [vmem:[%s693_s0] ss:$8 sps:$4 sm:$0xff]   ;;  %v596_v19 = vld [vmem:[%s693_s0 + $0x10] ss:$8 sps:$4 sm:$0xff]   ;;  %s520_s23 = sshll.u32 %s697_s10, 4 }
   0xd   : > { %s650_s18 = scalar_lea.vmem %s694_s1, %s519_s15  ;;  %s143_s26 = scalar_lea.vmem %s695_s2, %s520_s23  ;;  %vm424_vm1 = vcmask 519168  }
   0xe   : > { %v577_v2 = vld [vmem:[%s650_s18 + $0x78] sm:$0xff]   ;;  %v579_v4 = vld [vmem:[%s650_s18 + $0x70] sm:$0xff]   ;;  %v581_v6 = vld [vmem:[%s650_s18 + $0x68] sm:$0xff]  }
   0xf   : > { %v578_v3 = vld [vmem:[%s650_s18 + $0x38] sm:$0xff]   ;;  %525 = vmatprep.subr.bf16.mxu0 %v577_v2  ;;  %553 = vmatprep.subr.bf16.mxu1 %v577_v2  ;;  %v580_v5 = vld [vmem:[%s650_s18 + $0x30] sm:$0xff]   ;;  %v582_v7 = vld [vmem:[%s650_s18 + $0x28] sm:$0xff]  }
  0x10   : > { %526 = vmatpush3.bf16.msra.mxu0 %v578_v3  ;;  %561 = vmatpush3.bf16.msra.mxu1 %v578_v3  ;;  %v583_v8 = vld [vmem:[%s650_s18 + $0x60] sm:$0xff]   ;;  %v585_v10 = vld [vmem:[%s650_s18 + $0x58] sm:$0xff]   ;;  %v587_v12 = vld [vmem:[%s650_s18 + $0x50] sm:$0xff]  }
  0x11   : > { %527 = vmatprep.subr.bf16.mxu0 %v579_v4  ;;  %554 = vmatprep.subr.bf16.mxu1 %v579_v4  ;;  %v584_v9 = vld [vmem:[%s650_s18 + $0x20] sm:$0xff]   ;;  %v586_v11 = vld [vmem:[%s650_s18 + $0x18] sm:$0xff]   ;;  %v588_v13 = vld [vmem:[%s650_s18 + $0x10] sm:$0xff]  }
  0x12   : > { %v589_v14 = vld [vmem:[%s650_s18 + $0x48] sm:$0xff]   ;;  %v591_v16 = vld [vmem:[%s650_s18 + $0x40] sm:$0xff]  }
  0x13   : > { %v590_v15 = vld [vmem:[%s650_s18 + $0x8] sm:$0xff]   ;;  %v592_v17 = vld [vmem:[%s650_s18] sm:$0xff]  }
  0x14   : > { %528 = vmatpush3.bf16.msra.mxu0 %v580_v5  ;;  %562 = vmatpush3.bf16.msra.mxu1 %v580_v5 }
  0x15   : > { %529 = vmatprep.subr.bf16.mxu0 %v581_v6  ;;  %555 = vmatprep.subr.bf16.mxu1 %v581_v6 }
  0x18   : > { %530 = vmatpush3.bf16.msra.mxu0 %v582_v7  ;;  %563 = vmatpush3.bf16.msra.mxu1 %v582_v7 }
  0x19   : > { %531 = vmatprep.subr.bf16.mxu0 %v583_v8  ;;  %556 = vmatprep.subr.bf16.mxu1 %v583_v8 }
  0x1c   : > { %532 = vmatpush3.bf16.msra.mxu0 %v584_v9  ;;  %564 = vmatpush3.bf16.msra.mxu1 %v584_v9 }
  0x1d   : > { %533 = vmatprep.subr.bf16.mxu0 %v585_v10  ;;  %557 = vmatprep.subr.bf16.mxu1 %v585_v10 }
  0x20   : > { %534 = vmatpush3.bf16.msra.mxu0 %v586_v11  ;;  %565 = vmatpush3.bf16.msra.mxu1 %v586_v11 }
  0x21   : > { %535 = vmatprep.subr.bf16.mxu0 %v587_v12  ;;  %558 = vmatprep.subr.bf16.mxu1 %v587_v12 }
  0x24   : > { %536 = vmatpush3.bf16.msra.mxu0 %v588_v13  ;;  %566 = vmatpush3.bf16.msra.mxu1 %v588_v13 }
  0x25   : > { %537 = vmatprep.subr.bf16.mxu0 %v589_v14  ;;  %559 = vmatprep.subr.bf16.mxu1 %v589_v14 }
  0x28   : > { %538 = vmatpush3.bf16.msra.mxu0 %v590_v15  ;;  %567 = vmatpush3.bf16.msra.mxu1 %v590_v15 }
  0x29   : > { %539 = vmatprep.subr.bf16.mxu0 %v591_v16  ;;  %560 = vmatprep.subr.bf16.mxu1 %v591_v16 }
  0x2c   : > { %540 = vmatpush3.bf16.msra.mxu0 %v592_v17  ;;  %568 = vmatpush3.bf16.msra.mxu1 %v592_v17 }
  0x2f   : > { %330 = vmatmul.mubr.bf16.vlgmr.msra.gmra.mxu0 %v593_v18  ;;  %338 = vmatmul.mubr.bf16.vlgmr.msra.gmra.mxu1 %v596_v19 }
  0xef   : > { %v541_v20 = vpop.f32.mrf.mxu0  ;;  %v547_v21 = vpop.f32.mrf.mxu1 }
  0xf1   : > { %v542_v22 = vpop.f32.mrf.mxu0  ;;  %v548_v23 = vpop.f32.mrf.mxu1 }
  0xf2   : > { %v543_v24 = vadd.f32 %v542_v22, %v541_v20  ;;  %v549_v25 = vadd.f32 %v548_v23, %v547_v21 }
  0xf3   : > { %v544_v26 = vpop.f32.mrf.mxu0  ;;  %v550_v27 = vpop.f32.mrf.mxu1 }
  0xf4   : > { %v353_v28 = vsel %vm346_vm0, %v549_v25, 0.0  ;;  %v347_v29 = vsel %vm346_vm0, %v543_v24, 0.0 }
  0xf5   : > { %v551_v30 = vpop.f32.mrf.mxu1  ;;  %354 = vadd.xlane.f32.xlu1 %v353_v28  ;;  %v545_v31 = vpop.f32.mrf.mxu0  ;;  %348 = vadd.xlane.f32.xlu0 %v347_v29 }
  0xf6   : > { %v552_v32 = vadd.f32 %v551_v30, %v550_v27  ;;  %v546_v33 = vadd.f32 %v545_v31, %v544_v26 }
  0xf8   : > { %v356_v34 = vsel %vm346_vm0, %v552_v32, 0.0  ;;  %v350_v35 = vsel %vm346_vm0, %v546_v33, 0.0 }
  0xf9   : > { %357 = vadd.xlane.f32.xlu1 %v356_v34  ;;  %351 = vadd.xlane.f32.xlu0 %v350_v35 }
 0x17e   : > { %v355_v36 = vpop.xlane.xlu1 %354  ;;  %v349_v37 = vpop.xlane.xlu0 %348 }
 0x17f   : > { %v362_v38 = vmul.f32 0.015625, %v355_v36  ;;  %v360_v39 = vmul.f32 0.015625, %v349_v37 }
 0x181   : > { %v366_v40 = vsub.f32 %v549_v25, %v362_v38  ;;  %v364_v41 = vsub.f32 %v543_v24, %v360_v39 }
 0x182   : > { %v358_v42 = vpop.xlane.xlu1 %357  ;;  %v352_v43 = vpop.xlane.xlu0 %351 }
 0x183   : > { %v363_v44 = vmul.f32 0.015625, %v358_v42  ;;  %v361_v45 = vmul.f32 0.015625, %v352_v43  ;;  %v368_v46 = vmul.f32 %v364_v41, %v364_v41  ;;  %v370_v50 = vmul.f32 %v366_v40, %v366_v40 }
 0x185   : > { %v367_v47 = vsub.f32 %v552_v32, %v363_v44  ;;  %v365_v48 = vsub.f32 %v546_v33, %v361_v45  ;;  %v372_v49 = vsel %vm346_vm0, %v368_v46, 0.0  ;;  %v378_v52 = vsel %vm346_vm0, %v370_v50, 0.0 }
 0x186   : > { %373 = vadd.xlane.f32.xlu0 %v372_v49 }
 0x187   : > { %v369_v51 = vmul.f32 %v365_v48, %v365_v48  ;;  %v371_v54 = vmul.f32 %v367_v47, %v367_v47 }
 0x189   : > { %v375_v53 = vsel %vm346_vm0, %v369_v51, 0.0  ;;  %v381_v55 = vsel %vm346_vm0, %v371_v54, 0.0 }
 0x18a   : > { %379 = vadd.xlane.f32.xlu0 %v378_v52  ;;  %376 = vadd.xlane.f32.xlu1 %v375_v53 }
 0x18e   : > { %382 = vadd.xlane.f32.xlu1 %v381_v55 }
 0x20f   : > { %v374_v56 = vpop.xlane.xlu0 %373 }
 0x210   : > { %v384_v57 = vmul.f32 0.015625, %v374_v56 }
 0x212   : > { %v388_v58 = vadd.f32 1e-05, %v384_v57 }
 0x213   : > { %v377_v59 = vpop.xlane.xlu1 %376  ;;  %v380_v60 = vpop.xlane.xlu0 %379 }
 0x214   : > { %599 = vrsqrt.f32 %v388_v58  ;;  %v385_v61 = vmul.f32 0.015625, %v377_v59  ;;  %v386_v62 = vmul.f32 0.015625, %v380_v60 }
 0x216   : > { %v389_v63 = vadd.f32 1e-05, %v385_v61  ;;  %v390_v0 = vadd.f32 1e-05, %v386_v62 }
 0x217   : > { %v383_v1 = vpop.xlane.xlu1 %382 }
 0x218   : > { %601 = vrsqrt.f32 %v389_v63  ;;  %v387_v2 = vmul.f32 0.015625, %v383_v1 }
 0x219   : > { %603 = vrsqrt.f32 %v390_v0 }
 0x21a   : > { %v391_v3 = vadd.f32 1e-05, %v387_v2 }
 0x21c   : > { %605 = vrsqrt.f32 %v391_v3 }
 0x221   : > { %v600_v4 = vpop.eup %599 }
 0x222   : > { %v396_v5 = vmul.f32 %v600_v4, %v364_v41 }
 0x224   : > { %v400_v6 = vmul.f32 0.1, %v396_v5 }
 0x225   : > { %v602_v7 = vpop.eup %601 }
 0x226   : > { %v604_v8 = vpop.eup %603  ;;  %v404_v9 = vmax.f32 %v396_v5, %v400_v6  ;;  %v397_v10 = vmul.f32 %v602_v7, %v365_v48 }
 0x227   : > { %v398_v11 = vmul.f32 %v604_v8, %v366_v40 }
 0x228   : > { %v521_v12 = vpack.c.bf16 %v404_v9, %v404_v9  ;;  %v401_v13 = vmul.f32 0.1, %v397_v10 }
 0x229   : > { %v606_v14 = vpop.eup %605  ;;  %v402_v15 = vmul.f32 0.1, %v398_v11 }
 0x22a   : > { %425 = vst.msk [vmem:[%s143_s26] sm:$0xf] %vm424_vm1, %v521_v12  ;;  %v405_v16 = vmax.f32 %v397_v10, %v401_v13  ;;  %v399_v17 = vmul.f32 %v606_v14, %v367_v47 }
 0x22b   : > { %v406_v18 = vmax.f32 %v398_v11, %v402_v15 }
 0x22c   : > { %v522_v19 = vpack.c.bf16 %v405_v16, %v405_v16  ;;  %v403_v20 = vmul.f32 0.1, %v399_v17 }
 0x22d   : > { %v523_v21 = vpack.c.bf16 %v406_v18, %v406_v18 }
 0x22e   : > { %426 = vst.msk [vmem:[%s143_s26 + $0x4] sm:$0xf] %vm424_vm1, %v522_v19  ;;  %v407_v22 = vmax.f32 %v399_v17, %v403_v20 }
 0x22f   : > { %427 = vst.msk [vmem:[%s143_s26 + $0x8] sm:$0xf] %vm424_vm1, %v523_v21 }
 0x230   : > { %v524_v23 = vpack.c.bf16 %v407_v22, %v407_v22 }
 0x232   : > { %428 = vst.msk [vmem:[%s143_s26 + $0xc] sm:$0xf] %vm424_vm1, %v524_v23 }
 0x233 PF: > { %s12_s9 = sadd.s32 1, %s613_s9  }
 0x234   : > { %p9_p4 = scmp.ge.s32.totalorder %s12_s9, 4  }
 0x236   :  { %11 = sbr.rel (!%p9_p4) target bundleno = 1 (0x1), region = 58 }

// kernel: attr_encoder_forward.13
= control target key start
LH: loop header
LB: loop body
LE: loop exit
PB: predicated region body
PF: predicated region fallthrough
CT: control target
= control target key end

     0   :  { %s1105_s9 = smov 0   ;;  %s1286_s0 = inlined_call_operand.vmem [shape: bf16[64,512], index: 0, kind: input, shape index: {}]   ;;  %s1287_s1 = inlined_call_operand.vmem [shape: bf16[2,512,16], index: 1, kind: input, shape index: {}]   ;;  %s1288_s2 = inlined_call_operand.vmem [shape: bf16[2,64,16], index: 2, kind: output, shape index: {}]  }
   0x1 LB: > { %s845_s10 = sadd.s32 4294967295, %s1088_s9   ;;  %p849_p0 = scmp.ge.s32.totalorder %s1088_s9, 1  ;;  %s1088_s9 = sphi %s1105_s9, %s12_s9  }
   0x2   : > { %p112_p1 = scmp.lt.s32.totalorder %s1088_s9, 3 }
   0x4   : > { %p113_p2 = pnand %p849_p0, %p112_p1 }
   0x5   : > { %p134_p3 = scmp.lt.s32.totalorder (!%p113_p2), %s845_s10, 1 }
   0x6   : > { %116 = sbr.rel (%p113_p2) target bundleno = 587 (0x24b), region = 28 }
   0xb   : > { %v1044_v0 = vld [vmem:[%s1286_s0 + $0x4] ss:$16 sps:$4 sm:$0xff]   ;;  %s1290_s10 = smov (!%p134_p3, %s845_s10), 1  ;;  %v1047_v1 = vld [vmem:[%s1286_s0 + $0xc] ss:$16 sps:$4 sm:$0xff]   ;;  %vm627_vm0 = vcmask 130048  }
   0xc   : > { %529 = vmatprep.mubr.bf16.mxu0 %v1044_v0  ;;  %s912_s15 = sshll.u32 %s1290_s10, 8  ;;  %594 = vmatprep.mubr.bf16.mxu1 %v1047_v1  ;;  %v1042_v32 = vld [vmem:[%s1286_s0] ss:$16 sps:$4 sm:$0xff]   ;;  %v1045_v34 = vld [vmem:[%s1286_s0 + $0x8] ss:$16 sps:$4 sm:$0xff]   ;;  %s913_s21 = sshll.u32 %s1290_s10, 5 }
   0xd   : > { %s1125_s18 = scalar_lea.vmem %s1287_s1, %s912_s15  ;;  %v1048_v36 = vld [vmem:[%s1286_s0 + $0x24] ss:$16 sps:$4 sm:$0xff]   ;;  %v1050_v37 = vld [vmem:[%s1286_s0 + $0x2c] ss:$16 sps:$4 sm:$0xff]   ;;  %v1052_v38 = vld [vmem:[%s1286_s0 + $0x20] ss:$16 sps:$4 sm:$0xff]   ;;  %s1259_s24 = scalar_lea.vmem %s1288_s2, %s913_s21 }
   0xe   : > { %v1010_v2 = vld [vmem:[%s1125_s18 + $0x78] sm:$0xff]   ;;  %v1014_v6 = vld [vmem:[%s1125_s18 + $0x70] sm:$0xff]   ;;  %v1018_v10 = vld [vmem:[%s1125_s18 + $0x68] sm:$0xff]   ;;  %vm781_vm1 = vcmask 125952  }
   0xf   : > { %v1011_v3 = vld [vmem:[%s1125_s18 + $0xf8] sm:$0xff]   ;;  %922 = vmatprep.subr.bf16.mxu0 %v1010_v2  ;;  %v1015_v7 = vld [vmem:[%s1125_s18 + $0xf0] sm:$0xff]   ;;  %v1019_v11 = vld [vmem:[%s1125_s18 + $0xe8] sm:$0xff]  }
  0x10   : > { %v1012_v4 = vld [vmem:[%s1125_s18 + $0x38] sm:$0xff]   ;;  %962 = vmatprep.subr.bf16.mxu1 %v1011_v3  ;;  %v1016_v8 = vld [vmem:[%s1125_s18 + $0x30] sm:$0xff]   ;;  %v1020_v12 = vld [vmem:[%s1125_s18 + $0x28] sm:$0xff]  }
  0x11   : > { %v1013_v5 = vld [vmem:[%s1125_s18 + $0xb8] sm:$0xff]   ;;  %923 = vmatpush3.bf16.msra.mxu0 %v1012_v4  ;;  %v1017_v9 = vld [vmem:[%s1125_s18 + $0xb0] sm:$0xff]   ;;  %v1021_v13 = vld [vmem:[%s1125_s18 + $0xa8] sm:$0xff]  }
  0x12   : > { %963 = vmatpush3.bf16.msra.mxu1 %v1013_v5  ;;  %924 = vmatprep.subr.bf16.mxu0 %v1014_v6  ;;  %v1022_v14 = vld [vmem:[%s1125_s18 + $0x60] sm:$0xff]   ;;  %v1026_v18 = vld [vmem:[%s1125_s18 + $0x58] sm:$0xff]   ;;  %v1030_v22 = vld [vmem:[%s1125_s18 + $0x50] sm:$0xff]  }
  0x13   : > { %964 = vmatprep.subr.bf16.mxu1 %v1015_v7  ;;  %v1023_v15 = vld [vmem:[%s1125_s18 + $0xe0] sm:$0xff]   ;;  %v1027_v19 = vld [vmem:[%s1125_s18 + $0xd8] sm:$0xff]   ;;  %v1031_v23 = vld [vmem:[%s1125_s18 + $0xd0] sm:$0xff]  }
  0x14   : > { %v1024_v16 = vld [vmem:[%s1125_s18 + $0x20] sm:$0xff]   ;;  %v1028_v20 = vld [vmem:[%s1125_s18 + $0x18] sm:$0xff]   ;;  %v1032_v24 = vld [vmem:[%s1125_s18 + $0x10] sm:$0xff]  }
  0x15   : > { %925 = vmatpush3.bf16.msra.mxu0 %v1016_v8  ;;  %v1025_v17 = vld [vmem:[%s1125_s18 + $0xa0] sm:$0xff]   ;;  %v1029_v21 = vld [vmem:[%s1125_s18 + $0x98] sm:$0xff]   ;;  %v1033_v25 = vld [vmem:[%s1125_s18 + $0x90] sm:$0xff]  }
  0x16   : > { %965 = vmatpush3.bf16.msra.mxu1 %v1017_v9  ;;  %926 = vmatprep.subr.bf16.mxu0 %v1018_v10  ;;  %v1034_v26 = vld [vmem:[%s1125_s18 + $0x48] sm:$0xff]   ;;  %v1038_v30 = vld [vmem:[%s1125_s18 + $0x40] sm:$0xff]  }
  0x17   : > { %966 = vmatprep.subr.bf16.mxu1 %v1019_v11  ;;  %v1035_v27 = vld [vmem:[%s1125_s18 + $0xc8] sm:$0xff]   ;;  %v1039_v31 = vld [vmem:[%s1125_s18 + $0xc0] sm:$0xff]  }
  0x18   : > { %v1036_v28 = vld [vmem:[%s1125_s18 + $0x8] sm:$0xff]   ;;  %v1040_v33 = vld [vmem:[%s1125_s18] sm:$0xff]  }
  0x19   : > { %927 = vmatpush3.bf16.msra.mxu0 %v1020_v12  ;;  %v1037_v29 = vld [vmem:[%s1125_s18 + $0x88] sm:$0xff]   ;;  %v1041_v35 = vld [vmem:[%s1125_s18 + $0x80] sm:$0xff]  }
  0x1a   : > { %967 = vmatpush3.bf16.msra.mxu1 %v1021_v13  ;;  %928 = vmatprep.subr.bf16.mxu0 %v1022_v14  ;;  %v1053_v39 = vld [vmem:[%s1286_s0 + $0x28] ss:$16 sps:$4 sm:$0xff]   ;;  %v1054_v40 = vld [vmem:[%s1286_s0 + $0x44] ss:$16 sps:$4 sm:$0xff]   ;;  %v1056_v41 = vld [vmem:[%s1286_s0 + $0x4c] ss:$16 sps:$4 sm:$0xff]  }
  0x1b   : > { %968 = vmatprep.subr.bf16.mxu1 %v1023_v15  ;;  %v1058_v42 = vld [vmem:[%s1286_s0 + $0x40] ss:$16 sps:$4 sm:$0xff]   ;;  %v1059_v43 = vld [vmem:[%s1286_s0 + $0x48] ss:$16 sps:$4 sm:$0xff]   ;;  %v1060_v44 = vld [vmem:[%s1286_s0 + $0x64] ss:$16 sps:$4 sm:$0xff]  }
  0x1c   : > { %v1062_v45 = vld [vmem:[%s1286_s0 + $0x6c] ss:$16 sps:$4 sm:$0xff]   ;;  %v1064_v46 = vld [vmem:[%s1286_s0 + $0x60] ss:$16 sps:$4 sm:$0xff]   ;;  %v1065_v47 = vld [vmem:[%s1286_s0 + $0x68] ss:$16 sps:$4 sm:$0xff]  }
  0x1d   : > { %929 = vmatpush3.bf16.msra.mxu0 %v1024_v16 }
  0x1e   : > { %969 = vmatpush3.bf16.msra.mxu1 %v1025_v17  ;;  %930 = vmatprep.subr.bf16.mxu0 %v1026_v18 }
  0x1f   : > { %970 = vmatprep.subr.bf16.mxu1 %v1027_v19 }
  0x21   : > { %931 = vmatpush3.bf16.msra.mxu0 %v1028_v20 }
  0x22   : > { %971 = vmatpush3.bf16.msra.mxu1 %v1029_v21  ;;  %932 = vmatprep.subr.bf16.mxu0 %v1030_v22 }
  0x23   : > { %972 = vmatprep.subr.bf16.mxu1 %v1031_v23 }
  0x25   : > { %933 = vmatpush3.bf16.msra.mxu0 %v1032_v24 }
  0x26   : > { %973 = vmatpush3.bf16.msra.mxu1 %v1033_v25  ;;  %934 = vmatprep.subr.bf16.mxu0 %v1034_v26 }
  0x27   : > { %974 = vmatprep.subr.bf16.mxu1 %v1035_v27 }
  0x29   : > { %935 = vmatpush3.bf16.msra.mxu0 %v1036_v28 }
  0x2a   : > { %975 = vmatpush3.bf16.msra.mxu1 %v1037_v29  ;;  %936 = vmatprep.subr.bf16.mxu0 %v1038_v30 }
  0x2b   : > { %976 = vmatprep.subr.bf16.mxu1 %v1039_v31 }
  0x2d   : > { %937 = vmatpush3.bf16.msra.mxu0 %v1040_v33 }
  0x2e   : > { %977 = vmatpush3.bf16.msra.mxu1 %v1041_v35 }
  0x30   : > { %530 = vmatmul.mubr.bf16.vlgmr.msra.gmra.mxu0 %v1042_v32 }
  0x31   : > { %595 = vmatmul.mubr.bf16.vlgmr.msra.gmra.mxu1 %v1045_v34  ;;  %537 = vmatprep.mubr.bf16.mxu0 %v1048_v36 }
  0x32   : > { %602 = vmatprep.mubr.bf16.mxu1 %v1050_v37 }
  0x38   : > { %538 = vmatmul.mubr.bf16.gmra.mxu0 %v1052_v38 }
  0x39   : > { %603 = vmatmul.mubr.bf16.gmra.mxu1 %v1053_v39  ;;  %545 = vmatprep.mubr.bf16.mxu0 %v1054_v40 }
  0x3a   : > { %610 = vmatprep.mubr.bf16.mxu1 %v1056_v41 }
  0x40   : > { %546 = vmatmul.mubr.bf16.gmra.mxu0 %v1058_v42 }
  0x41   : > { %611 = vmatmul.mubr.bf16.gmra.mxu1 %v1059_v43  ;;  %553 = vmatprep.mubr.bf16.mxu0 %v1060_v44 }
  0x42   : > { %618 = vmatprep.mubr.bf16.mxu1 %v1062_v45 }
  0x48   : > { %554 = vmatmul.mubr.bf16.gmra.mxu0 %v1064_v46 }
  0x49   : > { %619 = vmatmul.mubr.bf16.gmra.mxu1 %v1065_v47 }
  0xf0   : > { %v938_v48 = vpop.f32.mrf.mxu0 }
  0xf1   : > { %v978_v49 = vpop.f32.mrf.mxu1 }
  0xf2   : > { %v939_v50 = vpop.f32.mrf.mxu0 }
  0xf3   : > { %v940_v51 = vadd.f32 %v939_v50, %v938_v48  ;;  %v979_v52 = vpop.f32.mrf.mxu1 }
  0xf4   : > { %v980_v53 = vadd.f32 %v979_v52, %v978_v49  ;;  %v941_v54 = vpop.f32.mrf.mxu0 }
  0xf5   : > { %v981_v55 = vpop.f32.mrf.mxu1 }
  0xf6   : > { %v942_v56 = vpop.f32.mrf.mxu0  ;;  %v1201_v57 = vadd.f32 %v980_v53, %v940_v51 }
  0xf7   : > { %v943_v58 = vadd.f32 %v942_v56, %v941_v54  ;;  %v982_v59 = vpop.f32.mrf.mxu1 }
  0xf8   : > { %v983_v60 = vadd.f32 %v982_v59, %v981_v55  ;;  %v944_v61 = vpop.f32.mrf.mxu0  ;;  %v628_v62 = vsel %vm627_vm0, %v1201_v57, 0.0 }
  0xf9   : > { %v984_v63 = vpop.f32.mrf.mxu1  ;;  %629 = vadd.xlane.f32.xlu0 %v628_v62 }
  0xfa   : > { %v945_v0 = vpop.f32.mrf.mxu0  ;;  %v600_v1 = vadd.f32 %v983_v60, %v943_v58 }
  0xfb   : > { %v946_v2 = vadd.f32 %v945_v0, %v944_v61  ;;  %v985_v3 = vpop.f32.mrf.mxu1 }
  0xfc   : > { %v986_v4 = vadd.f32 %v985_v3, %v984_v63  ;;  %v947_v5 = vpop.f32.mrf.mxu0  ;;  %v631_v6 = vsel %vm627_vm0, %v600_v1, 0.0 }
  0xfd   : > { %v987_v7 = vpop.f32.mrf.mxu1  ;;  %632 = vadd.xlane.f32.xlu0 %v631_v6 }
  0xfe   : > { %v948_v8 = vpop.f32.mrf.mxu0  ;;  %v605_v9 = vadd.f32 %v986_v4, %v946_v2 }
  0xff   : > { %v949_v10 = vadd.f32 %v948_v8, %v947_v5  ;;  %v988_v11 = vpop.f32.mrf.mxu1 }
 0x100   : > { %v989_v12 = vadd.f32 %v988_v11, %v987_v7  ;;  %v950_v13 = vpop.f32.mrf.mxu0  ;;  %v634_v14 = vsel %vm627_vm0, %v605_v9, 0.0 }
 0x101   : > { %v990_v15 = vpop.f32.mrf.mxu1  ;;  %635 = vadd.xlane.f32.xlu1 %v634_v14 }
 0x102   : > { %v951_v16 = vpop.f32.mrf.mxu0  ;;  %v608_v17 = vadd.f32 %v989_v12, %v949_v10 }
 0x103   : > { %v952_v18 = vadd.f32 %v951_v16, %v950_v13  ;;  %v991_v19 = vpop.f32.mrf.mxu1 }
 0x104   : > { %v992_v20 = vadd.f32 %v991_v19, %v990_v15  ;;  %v953_v21 = vpop.f32.mrf.mxu0  ;;  %v637_v22 = vsel %vm627_vm0, %v608_v17, 0.0 }
 0x105   : > { %v993_v23 = vpop.f32.mrf.mxu1  ;;  %638 = vadd.xlane.f32.xlu1 %v637_v22 }
 0x106   : > { %v954_v24 = vpop.f32.mrf.mxu0  ;;  %v613_v25 = vadd.f32 %v992_v20, %v952_v18 }
 0x107   : > { %v955_v26 = vadd.f32 %v954_v24, %v953_v21  ;;  %v994_v27 = vpop.f32.mrf.mxu1 }
 0x108   : > { %v995_v28 = vadd.f32 %v994_v27, %v993_v23  ;;  %v956_v29 = vpop.f32.mrf.mxu0  ;;  %v640_v30 = vsel %vm627_vm0, %v613_v25, 0.0 }
 0x109   : > { %v996_v31 = vpop.f32.mrf.mxu1  ;;  %641 = vadd.xlane.f32.xlu0 %v640_v30 }
 0x10a   : > { %v957_v32 = vpop.f32.mrf.mxu0  ;;  %v616_v33 = vadd.f32 %v995_v28, %v955_v26 }
 0x10b   : > { %v958_v34 = vadd.f32 %v957_v32, %v956_v29  ;;  %v997_v35 = vpop.f32.mrf.mxu1 }
 0x10c   : > { %v998_v36 = vadd.f32 %v997_v35, %v996_v31  ;;  %v959_v37 = vpop.f32.mrf.mxu0  ;;  %v643_v38 = vsel %vm627_vm0, %v616_v33, 0.0 }
 0x10d   : > { %v999_v39 = vpop.f32.mrf.mxu1  ;;  %644 = vadd.xlane.f32.xlu1 %v643_v38 }
 0x10e   : > { %v960_v40 = vpop.f32.mrf.mxu0  ;;  %v621_v41 = vadd.f32 %v998_v36, %v958_v34 }
 0x10f   : > { %v961_v42 = vadd.f32 %v960_v40, %v959_v37  ;;  %v1000_v43 = vpop.f32.mrf.mxu1 }
 0x110   : > { %v1001_v44 = vadd.f32 %v1000_v43, %v999_v39  ;;  %v646_v45 = vsel %vm627_vm0, %v621_v41, 0.0 }
 0x111   : > { %647 = vadd.xlane.f32.xlu0 %v646_v45 }
 0x112   : > { %v624_v46 = vadd.f32 %v1001_v44, %v961_v42 }
 0x114   : > { %v649_v47 = vsel %vm627_vm0, %v624_v46, 0.0 }
 0x115   : > { %650 = vadd.xlane.f32.xlu1 %v649_v47 }
 0x182   : > { %v630_v48 = vpop.xlane.xlu0 %629 }
 0x183   : > { %v653_v49 = vmul.f32 0.0625, %v630_v48 }
 0x185   : > { %v1213_v50 = vsub.f32 %v1201_v57, %v653_v49 }
 0x186   : > { %v633_v51 = vpop.xlane.xlu0 %632 }
 0x187   : > { %v654_v52 = vmul.f32 0.0625, %v633_v51  ;;  %v669_v53 = vmul.f32 %v1213_v50, %v1213_v50 }
 0x189   : > { %v1217_v54 = vsub.f32 %v600_v1, %v654_v52  ;;  %v677_v55 = vsel %vm627_vm0, %v669_v53, 0.0 }
 0x18a   : > { %v636_v56 = vpop.xlane.xlu1 %635  ;;  %678 = vadd.xlane.f32.xlu0 %v677_v55 }
 0x18b   : > { %v655_v58 = vmul.f32 0.0625, %v636_v56  ;;  %v670_v59 = vmul.f32 %v1217_v54, %v1217_v54 }
 0x18d   : > { %v1222_v60 = vsub.f32 %v605_v9, %v655_v58  ;;  %v680_v57 = vsel %vm627_vm0, %v670_v59, 0.0 }
 0x18e   : > { %v639_v61 = vpop.xlane.xlu1 %638  ;;  %681 = vadd.xlane.f32.xlu1 %v680_v57 }
 0x18f   : > { %v656_v62 = vmul.f32 0.0625, %v639_v61  ;;  %v671_v63 = vmul.f32 %v1222_v60, %v1222_v60 }
 0x191   : > { %v1227_v0 = vsub.f32 %v608_v17, %v656_v62  ;;  %v683_v1 = vsel %vm627_vm0, %v671_v63, 0.0 }
 0x192   : > { %684 = vadd.xlane.f32.xlu0 %v683_v1  ;;  %v642_v2 = vpop.xlane.xlu0 %641 }
 0x193   : > { %v657_v3 = vmul.f32 0.0625, %v642_v2  ;;  %v672_v4 = vmul.f32 %v1227_v0, %v1227_v0 }
 0x195   : > { %v1232_v5 = vsub.f32 %v613_v25, %v657_v3  ;;  %v686_v6 = vsel %vm627_vm0, %v672_v4, 0.0 }
 0x196   : > { %v645_v7 = vpop.xlane.xlu1 %644  ;;  %687 = vadd.xlane.f32.xlu1 %v686_v6 }
 0x197   : > { %v658_v8 = vmul.f32 0.0625, %v645_v7  ;;  %v673_v9 = vmul.f32 %v1232_v5, %v1232_v5 }
 0x199   : > { %v1237_v10 = vsub.f32 %v616_v33, %v658_v8  ;;  %v689_v11 = vsel %vm627_vm0, %v673_v9, 0.0 }
 0x19a   : > { %690 = vadd.xlane.f32.xlu0 %v689_v11  ;;  %v648_v12 = vpop.xlane.xlu0 %647 }
 0x19b   : > { %v659_v13 = vmul.f32 0.0625, %v648_v12  ;;  %v674_v14 = vmul.f32 %v1237_v10, %v1237_v10 }
 0x19d   : > { %v1242_v15 = vsub.f32 %v621_v41, %v659_v13  ;;  %v692_v16 = vsel %vm627_vm0, %v674_v14, 0.0 }
 0x19e   : > { %v651_v17 = vpop.xlane.xlu1 %650  ;;  %693 = vadd.xlane.f32.xlu1 %v692_v16 }
 0x19f   : > { %v660_v18 = vmul.f32 0.0625, %v651_v17  ;;  %v675_v19 = vmul.f32 %v1242_v15, %v1242_v15 }
 0x1a1   : > { %v1247_v20 = vsub.f32 %v624_v46, %v660_v18  ;;  %v695_v21 = vsel %vm627_vm0, %v675_v19, 0.0 }
 0x1a2   : > { %696 = vadd.xlane.f32.xlu0 %v695_v21 }
 0x1a3   : > { %v676_v22 = vmul.f32 %v1247_v20, %v1247_v20 }
 0x1a5   : > { %v698_v23 = vsel %vm627_vm0, %v676_v22, 0.0 }
 0x1a6   : > { %699 = vadd.xlane.f32.xlu1 %v698_v23 }
 0x213   : > { %v679_v24 = vpop.xlane.xlu0 %678 }
 0x214   : > { %v701_v25 = vmul.f32 0.0625, %v679_v24 }
 0x216   : > { %v709_v26 = vadd.f32 1e-05, %v701_v25 }
 0x217   : > { %v682_v27 = vpop.xlane.xlu1 %681 }
 0x218   : > { %1066 = vrsqrt.f32 %v709_v26  ;;  %v702_v28 = vmul.f32 0.0625, %v682_v27 }
 0x21a   : > { %v710_v29 = vadd.f32 1e-05, %v702_v28 }
 0x21b   : > { %v685_v30 = vpop.xlane.xlu0 %684 }
 0x21c   : > { %1068 = vrsqrt.f32 %v710_v29  ;;  %v703_v31 = vmul.f32 0.0625, %v685_v30 }
 0x21e   : > { %v711_v32 = vadd.f32 1e-05, %v703_v31 }
 0x21f   : > { %v688_v33 = vpop.xlane.xlu1 %687 }
 0x220   : > { %1070 = vrsqrt.f32 %v711_v32  ;;  %v704_v34 = vmul.f32 0.0625, %v688_v33 }
 0x222   : > { %v712_v35 = vadd.f32 1e-05, %v704_v34 }
 0x223   : > { %v691_v36 = vpop.xlane.xlu0 %690 }
 0x224   : > { %1072 = vrsqrt.f32 %v712_v35  ;;  %v705_v37 = vmul.f32 0.0625, %v691_v36 }
 0x225   : > { %v1067_v38 = vpop.eup %1066 }
 0x226   : > { %v725_v39 = vmul.f32 %v1067_v38, %v1213_v50  ;;  %v713_v40 = vadd.f32 1e-05, %v705_v37 }
 0x227   : > { %v694_v41 = vpop.xlane.xlu1 %693 }
 0x228   : > { %v733_v42 = vmul.f32 0.1, %v725_v39  ;;  %1074 = vrsqrt.f32 %v713_v40  ;;  %v706_v43 = vmul.f32 0.0625, %v694_v41 }
 0x229   : > { %v1069_v44 = vpop.eup %1068 }
 0x22a   : > { %v741_v45 = vmax.f32 %v725_v39, %v733_v42  ;;  %v726_v46 = vmul.f32 %v1069_v44, %v1217_v54  ;;  %v714_v47 = vadd.f32 1e-05, %v706_v43 }
 0x22b   : > { %v697_v48 = vpop.xlane.xlu0 %696 }
 0x22c   : > { %v914_v49 = vpack.c.bf16 %v741_v45, %v741_v45  ;;  %v734_v50 = vmul.f32 0.1, %v726_v46  ;;  %1076 = vrsqrt.f32 %v714_v47  ;;  %v707_v51 = vmul.f32 0.0625, %v697_v48 }
 0x22d   : > { %v1071_v52 = vpop.eup %1070 }
 0x22e   : > { %782 = vst.msk [vmem:[%s1259_s24] sm:$0xf] %vm781_vm1, %v914_v49  ;;  %v742_v53 = vmax.f32 %v726_v46, %v734_v50  ;;  %v727_v54 = vmul.f32 %v1071_v52, %v1222_v60  ;;  %v715_v55 = vadd.f32 1e-05, %v707_v51 }
 0x22f   : > { %v700_v56 = vpop.xlane.xlu1 %699 }
 0x230   : > { %v915_v58 = vpack.c.bf16 %v742_v53, %v742_v53  ;;  %v735_v59 = vmul.f32 0.1, %v727_v54  ;;  %1078 = vrsqrt.f32 %v715_v55  ;;  %v708_v57 = vmul.f32 0.0625, %v700_v56 }
 0x231   : > { %v1073_v61 = vpop.eup %1072 }
 0x232   : > { %783 = vst.msk [vmem:[%s1259_s24 + $0x4] sm:$0xf] %vm781_vm1, %v915_v58  ;;  %v743_v62 = vmax.f32 %v727_v54, %v735_v59  ;;  %v728_v63 = vmul.f32 %v1073_v61, %v1227_v0  ;;  %v716_v1 = vadd.f32 1e-05, %v708_v57 }
 0x234   : > { %v916_v2 = vpack.c.bf16 %v743_v62, %v743_v62  ;;  %v736_v3 = vmul.f32 0.1, %v728_v63  ;;  %1080 = vrsqrt.f32 %v716_v1 }
 0x235   : > { %v1075_v60 = vpop.eup %1074 }
 0x236   : > { %784 = vst.msk [vmem:[%s1259_s24 + $0x8] sm:$0xf] %vm781_vm1, %v916_v2  ;;  %v744_v4 = vmax.f32 %v728_v63, %v736_v3  ;;  %v729_v6 = vmul.f32 %v1075_v60, %v1232_v5 }
 0x238   : > { %v917_v7 = vpack.c.bf16 %v744_v4, %v744_v4  ;;  %v737_v8 = vmul.f32 0.1, %v729_v6 }
 0x239   : > { %v1077_v9 = vpop.eup %1076 }
 0x23a   : > { %785 = vst.msk [vmem:[%s1259_s24 + $0xc] sm:$0xf] %vm781_vm1, %v917_v7  ;;  %v745_v11 = vmax.f32 %v729_v6, %v737_v8  ;;  %v730_v0 = vmul.f32 %v1077_v9, %v1237_v10 }
 0x23c   : > { %v918_v12 = vpack.c.bf16 %v745_v11, %v745_v11  ;;  %v738_v13 = vmul.f32 0.1, %v730_v0 }
 0x23d   : > { %v1079_v14 = vpop.eup %1078 }
 0x23e   : > { %786 = vst.msk [vmem:[%s1259_s24 + $0x10] sm:$0xf] %vm781_vm1, %v918_v12  ;;  %v746_v16 = vmax.f32 %v730_v0, %v738_v13  ;;  %v731_v17 = vmul.f32 %v1079_v14, %v1242_v15 }
 0x240   : > { %v919_v5 = vpack.c.bf16 %v746_v16, %v746_v16  ;;  %v739_v18 = vmul.f32 0.1, %v731_v17 }
 0x241   : > { %v1081_v19 = vpop.eup %1080 }
 0x242   : > { %787 = vst.msk [vmem:[%s1259_s24 + $0x14] sm:$0xf] %vm781_vm1, %v919_v5  ;;  %v747_v21 = vmax.f32 %v731_v17, %v739_v18  ;;  %v732_v22 = vmul.f32 %v1081_v19, %v1247_v20 }
 0x244   : > { %v920_v23 = vpack.c.bf16 %v747_v21, %v747_v21  ;;  %v740_v24 = vmul.f32 0.1, %v732_v22 }
 0x246   : > { %788 = vst.msk [vmem:[%s1259_s24 + $0x18] sm:$0xf] %vm781_vm1, %v920_v23  ;;  %v748_v10 = vmax.f32 %v732_v22, %v740_v24 }
 0x248   : > { %v921_v25 = vpack.c.bf16 %v748_v10, %v748_v10 }
 0x24a   : > { %789 = vst.msk [vmem:[%s1259_s24 + $0x1c] sm:$0xf] %vm781_vm1, %v921_v25 }
 0x24b PF: > { %s12_s9 = sadd.s32 1, %s1088_s9  }
 0x24c   : > { %p9_p4 = scmp.ge.s32.totalorder %s12_s9, 4  }
 0x24e   :  { %11 = sbr.rel (!%p9_p4) target bundleno = 1 (0x1), region = 58 }

// kernel: attr_encoder_forward.14
= control target key start
LH: loop header
LB: loop body
LE: loop exit
PB: predicated region body
PF: predicated region fallthrough
CT: control target
= control target key end

     0   :  { %s2363_s9 = smov 0   ;;  %s3054_s0 = inlined_call_operand.vmem [shape: bf16[128,1024], index: 0, kind: input, shape index: {}]   ;;  %s3055_s1 = inlined_call_operand.vmem [shape: bf16[2,1024,4], index: 1, kind: input, shape index: {}]   ;;  %s3056_s2 = inlined_call_operand.vmem [shape: bf16[2,128,4], index: 2, kind: output, shape index: {}]  }
   0x1 LB: > { %s1807_s10 = sadd.s32 4294967295, %s2346_s9   ;;  %p1811_p0 = scmp.ge.s32.totalorder %s2346_s9, 1  ;;  %s2346_s9 = sphi %s2363_s9, %s12_s9  }
   0x2   : > { %p112_p1 = scmp.lt.s32.totalorder %s2346_s9, 3 }
   0x4   : > { %p113_p2 = pnand %p1811_p0, %p112_p1 }
   0x6   : > { %116 = sbr.rel (%p113_p2) target bundleno = 686 (0x2ae), region = 28 }
   0xb   : > { %p134_p3 = scmp.lt.s32.totalorder %s1807_s10, 1  ;;  %v2374_v0 = vld [vmem:[%s3054_s0] sm:$0xff]  ;;  %v2384_v2 = vld [vmem:[%s3054_s0 + $0x8] sm:$0xff]  ;;  %vm1429_vm0 = vcmask 31744   ;;  %vm1735_vm1 = vcmask 27648  }
   0xc   : > { %v2379_v1 = vld [vmem:[%s3054_s0 + $0x20] sm:$0xff]  ;;  %v2391_v4 = vld [vmem:[%s3054_s0 + $0x28] sm:$0xff] }
   0xd   : > { %v1817_v3 = vcombine.high %v2374_v0, %v2379_v1  ;;  %s3084_s10 = smov (!%p134_p3, %s1807_s10), 1  ;;  %v1819_v5 = vcombine.high %v2384_v2, %v2391_v4  ;;  %v153_v35 = vld [vmem:[%s3054_s0 + $0x40] sm:$0xff]  ;;  %v154_v38 = vld [vmem:[%s3054_s0 + $0x48] sm:$0xff]  ;;  %v1816_v42 = vcombine.low %v2374_v0, %v2379_v1  ;;  %v1818_v43 = vcombine.low %v2384_v2, %v2391_v4 }
   0xe   : > { %s1962_s19 = sshll.u32 %s3084_s10, 9  ;;  %v157_v36 = vld [vmem:[%s3054_s0 + $0x60] sm:$0xff]  ;;  %v158_v39 = vld [vmem:[%s3054_s0 + $0x68] sm:$0xff]  ;;  %s1963_s14 = sshll.u32 %s3084_s10, 6 }
   0xf   : > { %1073 = vmatprep.mubr.bf16.mxu0 %v1817_v3  ;;  %1170 = vmatprep.mubr.bf16.mxu1 %v1819_v5  ;;  %s2401_s22 = scalar_lea.vmem %s3055_s1, %s1962_s19  ;;  %v1825_v46 = vcombine.high %v153_v35, %v157_v36  ;;  %v1827_v48 = vcombine.high %v154_v38, %v158_v39  ;;  %v161_v50 = vld [vmem:[%s3054_s0 + $0x80] sm:$0xff]  ;;  %v162_v53 = vld [vmem:[%s3054_s0 + $0x88] sm:$0xff]  ;;  %v1824_v57 = vcombine.low %v153_v35, %v157_v36  ;;  %s3003_s17 = scalar_lea.vmem %s3056_s2, %s1963_s14 }
  0x10   : > { %v2244_v6 = vld [vmem:[%s2401_s22 + $0x78] sm:$0xff]   ;;  %v2248_v10 = vld [vmem:[%s2401_s22 + $0x70] sm:$0xff]   ;;  %v2252_v14 = vld [vmem:[%s2401_s22 + $0x68] sm:$0xff]   ;;  %v1826_v59 = vcombine.low %v154_v38, %v158_v39 }
  0x11   : > { %v2245_v7 = vld [vmem:[%s2401_s22 + $0xf8] sm:$0xff]   ;;  %1980 = vmatprep.subr.bf16.mxu0 %v2244_v6  ;;  %v2249_v11 = vld [vmem:[%s2401_s22 + $0xf0] sm:$0xff]   ;;  %v2253_v15 = vld [vmem:[%s2401_s22 + $0xe8] sm:$0xff]  }
  0x12   : > { %v2246_v8 = vld [vmem:[%s2401_s22 + $0x38] sm:$0xff]   ;;  %2044 = vmatprep.subr.bf16.mxu1 %v2245_v7  ;;  %v2250_v12 = vld [vmem:[%s2401_s22 + $0x30] sm:$0xff]   ;;  %v2254_v16 = vld [vmem:[%s2401_s22 + $0x28] sm:$0xff]  }
  0x13   : > { %v2247_v9 = vld [vmem:[%s2401_s22 + $0xb8] sm:$0xff]   ;;  %1981 = vmatpush3.bf16.msra.mxu0 %v2246_v8  ;;  %v2251_v13 = vld [vmem:[%s2401_s22 + $0xb0] sm:$0xff]   ;;  %v2255_v17 = vld [vmem:[%s2401_s22 + $0xa8] sm:$0xff]  }
  0x14   : > { %2045 = vmatpush3.bf16.msra.mxu1 %v2247_v9  ;;  %1982 = vmatprep.subr.bf16.mxu0 %v2248_v10  ;;  %v2256_v18 = vld [vmem:[%s2401_s22 + $0x60] sm:$0xff]   ;;  %v2260_v22 = vld [vmem:[%s2401_s22 + $0x58] sm:$0xff]   ;;  %v2264_v26 = vld [vmem:[%s2401_s22 + $0x50] sm:$0xff]  }
  0x15   : > { %2046 = vmatprep.subr.bf16.mxu1 %v2249_v11  ;;  %v2257_v19 = vld [vmem:[%s2401_s22 + $0xe0] sm:$0xff]   ;;  %v2261_v23 = vld [vmem:[%s2401_s22 + $0xd8] sm:$0xff]   ;;  %v2265_v27 = vld [vmem:[%s2401_s22 + $0xd0] sm:$0xff]  }
  0x16   : > { %v2258_v20 = vld [vmem:[%s2401_s22 + $0x20] sm:$0xff]   ;;  %v2262_v24 = vld [vmem:[%s2401_s22 + $0x18] sm:$0xff]   ;;  %v2266_v28 = vld [vmem:[%s2401_s22 + $0x10] sm:$0xff]  }
  0x17   : > { %1983 = vmatpush3.bf16.msra.mxu0 %v2250_v12  ;;  %v2259_v21 = vld [vmem:[%s2401_s22 + $0xa0] sm:$0xff]   ;;  %v2263_v25 = vld [vmem:[%s2401_s22 + $0x98] sm:$0xff]   ;;  %v2267_v29 = vld [vmem:[%s2401_s22 + $0x90] sm:$0xff]  }
  0x18   : > { %2047 = vmatpush3.bf16.msra.mxu1 %v2251_v13  ;;  %1984 = vmatprep.subr.bf16.mxu0 %v2252_v14  ;;  %v2268_v30 = vld [vmem:[%s2401_s22 + $0x48] sm:$0xff]   ;;  %v2272_v34 = vld [vmem:[%s2401_s22 + $0x40] sm:$0xff]   ;;  %v2276_v44 = vld [vmem:[%s2401_s22 + $0x178] sm:$0xff]  }
  0x19   : > { %2048 = vmatprep.subr.bf16.mxu1 %v2253_v15  ;;  %v2269_v31 = vld [vmem:[%s2401_s22 + $0xc8] sm:$0xff]   ;;  %v2273_v37 = vld [vmem:[%s2401_s22 + $0xc0] sm:$0xff]   ;;  %v2277_v45 = vld [vmem:[%s2401_s22 + $0x138] sm:$0xff]  }
  0x1a   : > { %v2270_v32 = vld [vmem:[%s2401_s22 + $0x8] sm:$0xff]   ;;  %v2274_v40 = vld [vmem:[%s2401_s22] sm:$0xff]   ;;  %v2278_v47 = vld [vmem:[%s2401_s22 + $0x1f8] sm:$0xff]  }
  0x1b   : > { %1985 = vmatpush3.bf16.msra.mxu0 %v2254_v16  ;;  %v2271_v33 = vld [vmem:[%s2401_s22 + $0x88] sm:$0xff]   ;;  %v2275_v41 = vld [vmem:[%s2401_s22 + $0x80] sm:$0xff]   ;;  %v2279_v49 = vld [vmem:[%s2401_s22 + $0x1b8] sm:$0xff]  }
  0x1c   : > { %2049 = vmatpush3.bf16.msra.mxu1 %v2255_v17  ;;  %1986 = vmatprep.subr.bf16.mxu0 %v2256_v18  ;;  %v165_v51 = vld [vmem:[%s3054_s0 + $0xa0] sm:$0xff]  ;;  %v2280_v52 = vld [vmem:[%s2401_s22 + $0x170] sm:$0xff]   ;;  %v166_v54 = vld [vmem:[%s3054_s0 + $0xa8] sm:$0xff] }
  0x1d   : > { %2050 = vmatprep.subr.bf16.mxu1 %v2257_v19  ;;  %v2281_v55 = vld [vmem:[%s2401_s22 + $0x130] sm:$0xff]   ;;  %v1833_v60 = vcombine.high %v161_v50, %v165_v51  ;;  %v2284_v61 = vld [vmem:[%s2401_s22 + $0x168] sm:$0xff]   ;;  %v1835_v62 = vcombine.high %v162_v53, %v166_v54  ;;  %v169_v2 = vld [vmem:[%s3054_s0 + $0xc0] sm:$0xff]  ;;  %v1832_v9 = vcombine.low %v161_v50, %v165_v51  ;;  %v1834_v11 = vcombine.low %v162_v53, %v166_v54 }
  0x1e   : > { %v2282_v56 = vld [vmem:[%s2401_s22 + $0x1f0] sm:$0xff]   ;;  %v2285_v63 = vld [vmem:[%s2401_s22 + $0x128] sm:$0xff]   ;;  %v173_v3 = vld [vmem:[%s3054_s0 + $0xe0] sm:$0xff] }
  0x1f   : > { %1987 = vmatpush3.bf16.msra.mxu0 %v2258_v20  ;;  %v2283_v58 = vld [vmem:[%s2401_s22 + $0x1b0] sm:$0xff]   ;;  %v2286_v0 = vld [vmem:[%s2401_s22 + $0x1e8] sm:$0xff]   ;;  %v2288_v6 = vld [vmem:[%s2401_s22 + $0x160] sm:$0xff]   ;;  %v1841_v12 = vcombine.high %v169_v2, %v173_v3 }
  0x20   : > { %2051 = vmatpush3.bf16.msra.mxu1 %v2259_v21  ;;  %1988 = vmatprep.subr.bf16.mxu0 %v2260_v22  ;;  %v2287_v1 = vld [vmem:[%s2401_s22 + $0x1a8] sm:$0xff]   ;;  %v2289_v7 = vld [vmem:[%s2401_s22 + $0x120] sm:$0xff]   ;;  %v2292_v14 = vld [vmem:[%s2401_s22 + $0x158] sm:$0xff]  }
  0x21   : > { %2052 = vmatprep.subr.bf16.mxu1 %v2261_v23  ;;  %v170_v4 = vld [vmem:[%s3054_s0 + $0xc8] sm:$0xff]  ;;  %v2290_v8 = vld [vmem:[%s2401_s22 + $0x1e0] sm:$0xff]   ;;  %v2293_v15 = vld [vmem:[%s2401_s22 + $0x118] sm:$0xff]   ;;  %v1840_v23 = vcombine.low %v169_v2, %v173_v3 }
  0x22   : > { %v174_v5 = vld [vmem:[%s3054_s0 + $0xe8] sm:$0xff]  ;;  %v2291_v10 = vld [vmem:[%s2401_s22 + $0x1a0] sm:$0xff]   ;;  %v2294_v16 = vld [vmem:[%s2401_s22 + $0x1d8] sm:$0xff]  }
  0x23   : > { %1989 = vmatpush3.bf16.msra.mxu0 %v2262_v24  ;;  %v1843_v13 = vcombine.high %v170_v4, %v174_v5  ;;  %v177_v17 = vld [vmem:[%s3054_s0 + $0x100] sm:$0xff]  ;;  %v2295_v18 = vld [vmem:[%s2401_s22 + $0x198] sm:$0xff]   ;;  %v178_v20 = vld [vmem:[%s3054_s0 + $0x108] sm:$0xff] }
  0x24   : > { %2053 = vmatpush3.bf16.msra.mxu1 %v2263_v25  ;;  %1990 = vmatprep.subr.bf16.mxu0 %v2264_v26  ;;  %v181_v19 = vld [vmem:[%s3054_s0 + $0x120] sm:$0xff]  ;;  %v182_v21 = vld [vmem:[%s3054_s0 + $0x128] sm:$0xff]  ;;  %v2296_v22 = vld [vmem:[%s2401_s22 + $0x150] sm:$0xff]   ;;  %v1842_v25 = vcombine.low %v170_v4, %v174_v5 }
  0x25   : > { %2054 = vmatprep.subr.bf16.mxu1 %v2265_v27  ;;  %v2297_v24 = vld [vmem:[%s2401_s22 + $0x110] sm:$0xff]   ;;  %v1849_v26 = vcombine.high %v177_v17, %v181_v19  ;;  %v2301_v35 = vld [vmem:[%s2401_s22 + $0x108] sm:$0xff]   ;;  %v1850_v39 = vcombine.low %v178_v20, %v182_v21  ;;  %v201_v54 = vld [vmem:[%s3054_s0 + $0x1c0] sm:$0xff] }
  0x26   : > { %v2298_v27 = vld [vmem:[%s2401_s22 + $0x1d0] sm:$0xff]   ;;  %v2302_v36 = vld [vmem:[%s2401_s22 + $0x1c8] sm:$0xff]  }
  0x27   : > { %1991 = vmatpush3.bf16.msra.mxu0 %v2266_v28  ;;  %v1851_v28 = vcombine.high %v178_v20, %v182_v21  ;;  %v2303_v38 = vld [vmem:[%s2401_s22 + $0x188] sm:$0xff]  }
  0x28   : > { %2055 = vmatpush3.bf16.msra.mxu1 %v2267_v29  ;;  %1992 = vmatprep.subr.bf16.mxu0 %v2268_v30  ;;  %v2299_v29 = vld [vmem:[%s2401_s22 + $0x190] sm:$0xff]   ;;  %v185_v30 = vld [vmem:[%s3054_s0 + $0x140] sm:$0xff] }
  0x29   : > { %2056 = vmatprep.subr.bf16.mxu1 %v2269_v31  ;;  %v189_v31 = vld [vmem:[%s3054_s0 + $0x160] sm:$0xff] }
  0x2a   : > { %v1856_v50 = vcombine.low %v185_v30, %v189_v31 }
  0x2b   : > { %1993 = vmatpush3.bf16.msra.mxu0 %v2270_v32  ;;  %v186_v32 = vld [vmem:[%s3054_s0 + $0x148] sm:$0xff] }
  0x2c   : > { %2057 = vmatpush3.bf16.msra.mxu1 %v2271_v33  ;;  %1994 = vmatprep.subr.bf16.mxu0 %v2272_v34  ;;  %v190_v33 = vld [vmem:[%s3054_s0 + $0x168] sm:$0xff] }
  0x2d   : > { %2058 = vmatprep.subr.bf16.mxu1 %v2273_v37  ;;  %v2300_v34 = vld [vmem:[%s2401_s22 + $0x148] sm:$0xff]   ;;  %v1848_v37 = vcombine.low %v177_v17, %v181_v19  ;;  %v1858_v51 = vcombine.low %v186_v32, %v190_v33  ;;  %v168_v17 = vld [vmem:[%s3054_s0 + $0xb8] sm:$0xff] }
  0x2f   : > { %1995 = vmatpush3.bf16.msra.mxu0 %v2274_v40  ;;  %v1857_v40 = vcombine.high %v185_v30, %v189_v31  ;;  %v179_v30 = vld [vmem:[%s3054_s0 + $0x110] sm:$0xff] }
  0x30   : > { %2059 = vmatpush3.bf16.msra.mxu1 %v2275_v41  ;;  %2108 = vmatprep.subr.bf16.mxu0 %v2276_v44  ;;  %v1859_v41 = vcombine.high %v186_v32, %v190_v33  ;;  %v2306_v44 = vld [vmem:[%s2401_s22 + $0x1c0] sm:$0xff]   ;;  %v183_v31 = vld [vmem:[%s3054_s0 + $0x130] sm:$0xff]  ;;  %v180_v32 = vld [vmem:[%s3054_s0 + $0x118] sm:$0xff] }
  0x31   : > { %2172 = vmatprep.subr.bf16.mxu1 %v2278_v47  ;;  %v197_v47 = vld [vmem:[%s3054_s0 + $0x1a0] sm:$0xff]  ;;  %v184_v33 = vld [vmem:[%s3054_s0 + $0x138] sm:$0xff] }
  0x32   : > { %1074 = vmatmul.mubr.bf16.vlgmr.msra.gmra.mxu0 %v1816_v42  ;;  %v2304_v42 = vld [vmem:[%s2401_s22 + $0x140] sm:$0xff]  }
  0x33   : > { %1171 = vmatmul.mubr.bf16.vlgmr.msra.gmra.mxu1 %v1818_v43  ;;  %2109 = vmatpush3.bf16.msra.mxu0 %v2277_v45  ;;  %v2305_v43 = vld [vmem:[%s2401_s22 + $0x100] sm:$0xff]  }
  0x34   : > { %1081 = vmatprep.mubr.bf16.mxu0 %v1825_v46  ;;  %2173 = vmatpush3.bf16.msra.mxu1 %v2279_v49  ;;  %v2307_v45 = vld [vmem:[%s2401_s22 + $0x180] sm:$0xff]   ;;  %v198_v49 = vld [vmem:[%s3054_s0 + $0x1a8] sm:$0xff] }
  0x35   : > { %1178 = vmatprep.mubr.bf16.mxu1 %v1827_v48  ;;  %2110 = vmatprep.subr.bf16.mxu0 %v2280_v52  ;;  %v193_v46 = vld [vmem:[%s3054_s0 + $0x180] sm:$0xff]  ;;  %v194_v48 = vld [vmem:[%s3054_s0 + $0x188] sm:$0xff] }
  0x36   : > { %2174 = vmatprep.subr.bf16.mxu1 %v2282_v56  ;;  %v1865_v52 = vcombine.high %v193_v46, %v197_v47  ;;  %v1867_v53 = vcombine.high %v194_v48, %v198_v49  ;;  %v202_v56 = vld [vmem:[%s3054_s0 + $0x1c8] sm:$0xff] }
  0x37   : > { %2111 = vmatpush3.bf16.msra.mxu0 %v2281_v55  ;;  %v205_v55 = vld [vmem:[%s3054_s0 + $0x1e0] sm:$0xff] }
  0x38   : > { %2175 = vmatpush3.bf16.msra.mxu1 %v2283_v58  ;;  %2112 = vmatprep.subr.bf16.mxu0 %v2284_v61  ;;  %v1864_v58 = vcombine.low %v193_v46, %v197_v47  ;;  %v1872_v2 = vcombine.low %v201_v54, %v205_v55  ;;  %v195_v46 = vld [vmem:[%s3054_s0 + $0x190] sm:$0xff] }
  0x39   : > { %2176 = vmatprep.subr.bf16.mxu1 %v2286_v0  ;;  %v148_v0 = vld [vmem:[%s3054_s0 + $0x18] sm:$0xff]  ;;  %v199_v47 = vld [vmem:[%s3054_s0 + $0x1b0] sm:$0xff] }
  0x3a   : > { %1082 = vmatmul.mubr.bf16.gmra.mxu0 %v1824_v57  ;;  %v206_v57 = vld [vmem:[%s3054_s0 + $0x1e8] sm:$0xff] }
  0x3b   : > { %1179 = vmatmul.mubr.bf16.gmra.mxu1 %v1826_v59  ;;  %1089 = vmatprep.mubr.bf16.mxu0 %v1833_v60  ;;  %v1866_v59 = vcombine.low %v194_v48, %v198_v49  ;;  %v1873_v60 = vcombine.high %v201_v54, %v205_v55  ;;  %v1875_v61 = vcombine.high %v202_v56, %v206_v57  ;;  %v196_v48 = vld [vmem:[%s3054_s0 + $0x198] sm:$0xff]  ;;  %v203_v54 = vld [vmem:[%s3054_s0 + $0x1d0] sm:$0xff] }
  0x3c   : > { %1186 = vmatprep.mubr.bf16.mxu1 %v1835_v62  ;;  %2113 = vmatpush3.bf16.msra.mxu0 %v2285_v63  ;;  %v147_v62 = vld [vmem:[%s3054_s0 + $0x10] sm:$0xff]  ;;  %v1874_v3 = vcombine.low %v202_v56, %v206_v57  ;;  %v200_v49 = vld [vmem:[%s3054_s0 + $0x1b8] sm:$0xff] }
  0x3d   : > { %2114 = vmatprep.subr.bf16.mxu0 %v2288_v6  ;;  %2177 = vmatpush3.bf16.msra.mxu1 %v2287_v1  ;;  %v151_v63 = vld [vmem:[%s3054_s0 + $0x30] sm:$0xff]  ;;  %v152_v1 = vld [vmem:[%s3054_s0 + $0x38] sm:$0xff] }
  0x3e   : > { %2178 = vmatprep.subr.bf16.mxu1 %v2290_v8  ;;  %v1821_v4 = vcombine.high %v147_v62, %v151_v63  ;;  %v1823_v5 = vcombine.high %v148_v0, %v152_v1  ;;  %v155_v6 = vld [vmem:[%s3054_s0 + $0x50] sm:$0xff]  ;;  %v156_v8 = vld [vmem:[%s3054_s0 + $0x58] sm:$0xff] }
  0x3f   : > { %v207_v55 = vld [vmem:[%s3054_s0 + $0x1f0] sm:$0xff]  ;;  %v204_v56 = vld [vmem:[%s3054_s0 + $0x1d8] sm:$0xff] }
  0x40   : > { %2115 = vmatpush3.bf16.msra.mxu0 %v2289_v7  ;;  %v159_v7 = vld [vmem:[%s3054_s0 + $0x70] sm:$0xff]  ;;  %v208_v57 = vld [vmem:[%s3054_s0 + $0x1f8] sm:$0xff] }
  0x41   : > { %2179 = vmatpush3.bf16.msra.mxu1 %v2291_v10  ;;  %2116 = vmatprep.subr.bf16.mxu0 %v2292_v14  ;;  %v1820_v10 = vcombine.low %v147_v62, %v151_v63  ;;  %v163_v14 = vld [vmem:[%s3054_s0 + $0x90] sm:$0xff]  ;;  %v1876_v62 = vcombine.low %v203_v54, %v207_v55  ;;  %v1878_v63 = vcombine.low %v204_v56, %v208_v57 }
  0x42   : > { %1090 = vmatmul.mubr.bf16.gmra.mxu0 %v1832_v9  ;;  %2180 = vmatprep.subr.bf16.mxu1 %v2294_v16  ;;  %v160_v9 = vld [vmem:[%s3054_s0 + $0x78] sm:$0xff] }
  0x43   : > { %1187 = vmatmul.mubr.bf16.gmra.mxu1 %v1834_v11  ;;  %1097 = vmatprep.mubr.bf16.mxu0 %v1841_v12  ;;  %v1822_v11 = vcombine.low %v148_v0, %v152_v1  ;;  %v1829_v12 = vcombine.high %v155_v6, %v159_v7  ;;  %v164_v16 = vld [vmem:[%s3054_s0 + $0x98] sm:$0xff]  ;;  %v1830_v19 = vcombine.low %v156_v8, %v160_v9 }
  0x44   : > { %1194 = vmatprep.mubr.bf16.mxu1 %v1843_v13  ;;  %2117 = vmatpush3.bf16.msra.mxu0 %v2293_v15  ;;  %v1831_v13 = vcombine.high %v156_v8, %v160_v9  ;;  %v167_v15 = vld [vmem:[%s3054_s0 + $0xb0] sm:$0xff]  ;;  %v1839_v21 = vcombine.high %v164_v16, %v168_v17 }
  0x45   : > { %2181 = vmatpush3.bf16.msra.mxu1 %v2295_v18  ;;  %2118 = vmatprep.subr.bf16.mxu0 %v2296_v22  ;;  %v1828_v18 = vcombine.low %v155_v6, %v159_v7  ;;  %v1837_v20 = vcombine.high %v163_v14, %v167_v15  ;;  %v171_v22 = vld [vmem:[%s3054_s0 + $0xd0] sm:$0xff] }
  0x46   : > { %2182 = vmatprep.subr.bf16.mxu1 %v2298_v27  ;;  %v1838_v27 = vcombine.low %v164_v16, %v168_v17 }
  0x48   : > { %2119 = vmatpush3.bf16.msra.mxu0 %v2297_v24  ;;  %v172_v24 = vld [vmem:[%s3054_s0 + $0xd8] sm:$0xff] }
  0x49   : > { %2183 = vmatpush3.bf16.msra.mxu1 %v2299_v29  ;;  %2120 = vmatprep.subr.bf16.mxu0 %v2300_v34 }
  0x4a   : > { %1098 = vmatmul.mubr.bf16.gmra.mxu0 %v1840_v23  ;;  %2184 = vmatprep.subr.bf16.mxu1 %v2302_v36  ;;  %v175_v23 = vld [vmem:[%s3054_s0 + $0xf0] sm:$0xff]  ;;  %v1853_v36 = vcombine.high %v179_v30, %v183_v31 }
  0x4b   : > { %1195 = vmatmul.mubr.bf16.gmra.mxu1 %v1842_v25  ;;  %1105 = vmatprep.mubr.bf16.mxu0 %v1849_v26  ;;  %v176_v25 = vld [vmem:[%s3054_s0 + $0xf8] sm:$0xff]  ;;  %v1836_v26 = vcombine.low %v163_v14, %v167_v15  ;;  %v1844_v34 = vcombine.low %v171_v22, %v175_v23 }
  0x4c   : > { %1202 = vmatprep.mubr.bf16.mxu1 %v1851_v28  ;;  %2121 = vmatpush3.bf16.msra.mxu0 %v2301_v35  ;;  %v1845_v28 = vcombine.high %v171_v22, %v175_v23  ;;  %v1847_v29 = vcombine.high %v172_v24, %v176_v25  ;;  %v1846_v35 = vcombine.low %v172_v24, %v176_v25 }
  0x4d   : > { %2185 = vmatpush3.bf16.msra.mxu1 %v2303_v38  ;;  %2122 = vmatprep.subr.bf16.mxu0 %v2304_v42  ;;  %v187_v38 = vld [vmem:[%s3054_s0 + $0x150] sm:$0xff]  ;;  %v1852_v42 = vcombine.low %v179_v30, %v183_v31 }
  0x4e   : > { %2186 = vmatprep.subr.bf16.mxu1 %v2306_v44 }
  0x50   : > { %2123 = vmatpush3.bf16.msra.mxu0 %v2305_v43  ;;  %v1854_v43 = vcombine.low %v180_v32, %v184_v33 }
  0x51   : > { %2187 = vmatpush3.bf16.msra.mxu1 %v2307_v45 }
  0x52   : > { %1106 = vmatmul.mubr.bf16.gmra.mxu0 %v1848_v37  ;;  %v1855_v37 = vcombine.high %v180_v32, %v184_v33 }
  0x53   : > { %1203 = vmatmul.mubr.bf16.gmra.mxu1 %v1850_v39  ;;  %1113 = vmatprep.mubr.bf16.mxu0 %v1857_v40  ;;  %v191_v39 = vld [vmem:[%s3054_s0 + $0x170] sm:$0xff]  ;;  %v188_v40 = vld [vmem:[%s3054_s0 + $0x158] sm:$0xff] }
  0x54   : > { %1210 = vmatprep.mubr.bf16.mxu1 %v1859_v41  ;;  %v192_v41 = vld [vmem:[%s3054_s0 + $0x178] sm:$0xff]  ;;  %v1861_v44 = vcombine.high %v187_v38, %v191_v39 }
  0x55   : > { %v1863_v45 = vcombine.high %v188_v40, %v192_v41 }
  0x5a   : > { %1114 = vmatmul.mubr.bf16.gmra.mxu0 %v1856_v50  ;;  %v1860_v50 = vcombine.low %v187_v38, %v191_v39 }
  0x5b   : > { %1211 = vmatmul.mubr.bf16.gmra.mxu1 %v1858_v51  ;;  %1121 = vmatprep.mubr.bf16.mxu0 %v1865_v52  ;;  %v1862_v51 = vcombine.low %v188_v40, %v192_v41  ;;  %v1869_v52 = vcombine.high %v195_v46, %v199_v47 }
  0x5c   : > { %1218 = vmatprep.mubr.bf16.mxu1 %v1867_v53  ;;  %v1871_v53 = vcombine.high %v196_v48, %v200_v49 }
  0x62   : > { %1122 = vmatmul.mubr.bf16.gmra.mxu0 %v1864_v58  ;;  %v1868_v58 = vcombine.low %v195_v46, %v199_v47 }
  0x63   : > { %1219 = vmatmul.mubr.bf16.gmra.mxu1 %v1866_v59  ;;  %1129 = vmatprep.mubr.bf16.mxu0 %v1873_v60  ;;  %v1870_v59 = vcombine.low %v196_v48, %v200_v49  ;;  %v1877_v60 = vcombine.high %v203_v54, %v207_v55 }
  0x64   : > { %1226 = vmatprep.mubr.bf16.mxu1 %v1875_v61  ;;  %v1879_v61 = vcombine.high %v204_v56, %v208_v57 }
  0x6a   : > { %1130 = vmatmul.mubr.bf16.gmra.mxu0 %v1872_v2 }
  0x6b   : > { %1227 = vmatmul.mubr.bf16.gmra.mxu1 %v1874_v3  ;;  %1267 = vmatprep.mubr.bf16.mxu0 %v1821_v4 }
  0x6c   : > { %1364 = vmatprep.mubr.bf16.mxu1 %v1823_v5 }
  0x72   : > { %1268 = vmatmul.mubr.bf16.vlgmr.msra.gmra.mxu0 %v1820_v10 }
  0x73   : > { %1365 = vmatmul.mubr.bf16.vlgmr.msra.gmra.mxu1 %v1822_v11  ;;  %1275 = vmatprep.mubr.bf16.mxu0 %v1829_v12 }
  0x74   : > { %1372 = vmatprep.mubr.bf16.mxu1 %v1831_v13 }
  0x7a   : > { %1276 = vmatmul.mubr.bf16.gmra.mxu0 %v1828_v18 }
  0x7b   : > { %1373 = vmatmul.mubr.bf16.gmra.mxu1 %v1830_v19  ;;  %1283 = vmatprep.mubr.bf16.mxu0 %v1837_v20 }
  0x7c   : > { %1380 = vmatprep.mubr.bf16.mxu1 %v1839_v21 }
  0x82   : > { %1284 = vmatmul.mubr.bf16.gmra.mxu0 %v1836_v26 }
  0x83   : > { %1381 = vmatmul.mubr.bf16.gmra.mxu1 %v1838_v27  ;;  %1291 = vmatprep.mubr.bf16.mxu0 %v1845_v28 }
  0x84   : > { %1388 = vmatprep.mubr.bf16.mxu1 %v1847_v29 }
  0x8a   : > { %1292 = vmatmul.mubr.bf16.gmra.mxu0 %v1844_v34 }
  0x8b   : > { %1389 = vmatmul.mubr.bf16.gmra.mxu1 %v1846_v35  ;;  %1299 = vmatprep.mubr.bf16.mxu0 %v1853_v36 }
  0x8c   : > { %1396 = vmatprep.mubr.bf16.mxu1 %v1855_v37 }
  0x92   : > { %1300 = vmatmul.mubr.bf16.gmra.mxu0 %v1852_v42 }
  0x93   : > { %1397 = vmatmul.mubr.bf16.gmra.mxu1 %v1854_v43  ;;  %1307 = vmatprep.mubr.bf16.mxu0 %v1861_v44 }
  0x94   : > { %1404 = vmatprep.mubr.bf16.mxu1 %v1863_v45 }
  0x9a   : > { %1308 = vmatmul.mubr.bf16.gmra.mxu0 %v1860_v50 }
  0x9b   : > { %1405 = vmatmul.mubr.bf16.gmra.mxu1 %v1862_v51  ;;  %1315 = vmatprep.mubr.bf16.mxu0 %v1869_v52 }
  0x9c   : > { %1412 = vmatprep.mubr.bf16.mxu1 %v1871_v53 }
  0xa2   : > { %1316 = vmatmul.mubr.bf16.gmra.mxu0 %v1868_v58 }
  0xa3   : > { %1413 = vmatmul.mubr.bf16.gmra.mxu1 %v1870_v59  ;;  %1323 = vmatprep.mubr.bf16.mxu0 %v1877_v60 }
  0xa4   : > { %1420 = vmatprep.mubr.bf16.mxu1 %v1879_v61 }
  0xaa   : > { %1324 = vmatmul.mubr.bf16.gmra.mxu0 %v1876_v62 }
  0xab   : > { %1421 = vmatmul.mubr.bf16.gmra.mxu1 %v1878_v63 }
  0xf2   : > { %v2651_v0 = vpop.f32.mrf.mxu0 }
  0xf3   : > { %v2653_v1 = vpop.f32.mrf.mxu1 }
  0xf4   : > { %v1997_v2 = vpop.f32.mrf.mxu0 }
  0xf5   : > { %v2061_v3 = vpop.f32.mrf.mxu1  ;;  %v1998_v63 = vadd.f32 %v1997_v2, %v2651_v0 }
  0xf6   : > { %v2655_v4 = vpop.f32.mrf.mxu0 }
  0xf7   : > { %v2657_v5 = vpop.f32.mrf.mxu1 }
  0xf8   : > { %v2659_v6 = vpop.f32.mrf.mxu0 }
  0xf9   : > { %v2661_v7 = vpop.f32.mrf.mxu1 }
  0xfa   : > { %v2663_v8 = vpop.f32.mrf.mxu0 }
  0xfb   : > { %v2665_v9 = vpop.f32.mrf.mxu1 }
  0xfc   : > { %v2667_v10 = vpop.f32.mrf.mxu0 }
  0xfd   : > { %v2669_v11 = vpop.f32.mrf.mxu1 }
  0xfe   : > { %v2671_v12 = vpop.f32.mrf.mxu0  ;;  %v2068_v2 = vadd.f32 %v2669_v11, %v2665_v9 }
  0xff   : > { %v2673_v13 = vpop.f32.mrf.mxu1 }
 0x100   : > { %v2675_v14 = vpop.f32.mrf.mxu0 }
 0x101   : > { %v2677_v15 = vpop.f32.mrf.mxu1 }
 0x102   : > { %v2679_v16 = vpop.f32.mrf.mxu0  ;;  %v2071_v9 = vadd.f32 %v2677_v15, %v2673_v13 }
 0x103   : > { %v2681_v17 = vpop.f32.mrf.mxu1 }
 0x104   : > { %v2683_v18 = vpop.f32.mrf.mxu0 }
 0x105   : > { %v2685_v19 = vpop.f32.mrf.mxu1 }
 0x106   : > { %v2687_v20 = vpop.f32.mrf.mxu0 }
 0x107   : > { %v2689_v21 = vpop.f32.mrf.mxu1 }
 0x108   : > { %v2691_v22 = vpop.f32.mrf.mxu0 }
 0x109   : > { %v2693_v23 = vpop.f32.mrf.mxu1 }
 0x10a   : > { %v2695_v24 = vpop.f32.mrf.mxu0 }
 0x10b   : > { %v2697_v25 = vpop.f32.mrf.mxu1 }
 0x10c   : > { %v2699_v26 = vpop.f32.mrf.mxu0 }
 0x10d   : > { %v2701_v27 = vpop.f32.mrf.mxu1 }
 0x10e   : > { %v2703_v28 = vpop.f32.mrf.mxu0 }
 0x10f   : > { %v2705_v29 = vpop.f32.mrf.mxu1 }
 0x110   : > { %v2707_v30 = vpop.f32.mrf.mxu0 }
 0x111   : > { %v2709_v31 = vpop.f32.mrf.mxu1 }
 0x112   : > { %v2711_v32 = vpop.f32.mrf.mxu0 }
 0x113   : > { %v2713_v33 = vpop.f32.mrf.mxu1 }
 0x114   : > { %v2715_v34 = vpop.f32.mrf.mxu0 }
 0x115   : > { %v2717_v35 = vpop.f32.mrf.mxu1 }
 0x116   : > { %v2719_v36 = vpop.f32.mrf.mxu0 }
 0x117   : > { %v2721_v37 = vpop.f32.mrf.mxu1 }
 0x118   : > { %v2723_v38 = vpop.f32.mrf.mxu0 }
 0x119   : > { %v2725_v39 = vpop.f32.mrf.mxu1 }
 0x11a   : > { %v2727_v40 = vpop.f32.mrf.mxu0 }
 0x11b   : > { %v2729_v41 = vpop.f32.mrf.mxu1 }
 0x11c   : > { %v2731_v42 = vpop.f32.mrf.mxu0 }
 0x11d   : > { %v2733_v43 = vpop.f32.mrf.mxu1 }
 0x11e   : > { %v2735_v44 = vpop.f32.mrf.mxu0 }
 0x11f   : > { %v2737_v45 = vpop.f32.mrf.mxu1 }
 0x120   : > { %v2739_v46 = vpop.f32.mrf.mxu0 }
 0x121   : > { %v2741_v47 = vpop.f32.mrf.mxu1 }
 0x122   : > { %v2743_v48 = vpop.f32.mrf.mxu0 }
 0x123   : > { %v2745_v49 = vpop.f32.mrf.mxu1 }
 0x124   : > { %3057 = vst [vmem:[#allocation2_spill] sm:$0xff] %v2745_v49  ;;  %v2747_v50 = vpop.f32.mrf.mxu0 }
 0x125   : > { %v2749_v51 = vpop.f32.mrf.mxu1 }
 0x126   : > { %3058 = vst [vmem:[#allocation3_spill] sm:$0xff] %v2749_v51  ;;  %v2751_v52 = vpop.f32.mrf.mxu0 }
 0x127   : > { %3059 = vst [vmem:[#allocation4_spill] sm:$0xff] %v2751_v52  ;;  %v2753_v53 = vpop.f32.mrf.mxu1 }
 0x128   : > { %3060 = vst [vmem:[#allocation5_spill] sm:$0xff] %v2753_v53  ;;  %v2755_v54 = vpop.f32.mrf.mxu0  ;;  %v2062_v53 = vadd.f32 %v2061_v3, %v2653_v1  ;;  %v2004_v1 = vadd.f32 %v2667_v10, %v2663_v8  ;;  %v2007_v8 = vadd.f32 %v2675_v14, %v2671_v12  ;;  %v2074_v12 = vadd.f32 %v2685_v19, %v2681_v17 }
 0x129   : > { %3061 = vst [vmem:[#allocation6_spill] sm:$0xff] %v2755_v54  ;;  %v2757_v55 = vpop.f32.mrf.mxu1  ;;  %v2077_v17 = vadd.f32 %v2693_v23, %v2689_v21 }
 0x12a   : > { %3062 = vst [vmem:[#allocation7_spill] sm:$0xff] %v2757_v55  ;;  %v2759_v56 = vpop.f32.mrf.mxu0  ;;  %v1184_v13 = vadd.f32 %v2071_v9, %v2007_v8 }
 0x12b   : > { %3063 = vst [vmem:[#allocation8_spill] sm:$0xff] %v2759_v56  ;;  %v2761_v57 = vpop.f32.mrf.mxu1 }
 0x12c   : > { %3064 = vst [vmem:[#allocation9_spill] sm:$0xff] %v2761_v57  ;;  %v2763_v58 = vpop.f32.mrf.mxu0  ;;  %v1173_v57 = vadd.f32 %v2062_v53, %v1998_v63 }
 0x12d   : > { %3065 = vst [vmem:[#allocation10_spill] sm:$0xff] %v2763_v58  ;;  %v2765_v59 = vpop.f32.mrf.mxu1  ;;  %v2001_v58 = vadd.f32 %v2659_v6, %v2655_v4 }
 0x12e   : > { %3066 = vst [vmem:[#allocation11_spill] sm:$0xff] %v2765_v59  ;;  %v2767_v60 = vpop.f32.mrf.mxu0 }
 0x12f   : > { %3067 = vst [vmem:[#allocation12_spill] sm:$0xff] %v2767_v60  ;;  %v2769_v61 = vpop.f32.mrf.mxu1  ;;  %v2065_v60 = vadd.f32 %v2661_v7, %v2657_v5 }
 0x130   : > { %3068 = vst [vmem:[#allocation13_spill] sm:$0xff] %v2769_v61  ;;  %v2771_v62 = vpop.f32.mrf.mxu0 }
 0x131   : > { %3069 = vst [vmem:[#allocation14_spill] sm:$0xff] %v2771_v62  ;;  %v2775_v54 = vpop.f32.mrf.mxu1  ;;  %v1176_v53 = vadd.f32 %v2065_v60, %v2001_v58 }
 0x132   : > { %v2124_v55 = vpop.f32.mrf.mxu0 }
 0x133   : > { %v2188_v56 = vpop.f32.mrf.mxu1 }
 0x134   : > { %v2125_v52 = vpop.f32.mrf.mxu0 }
 0x135   : > { %v2126_v59 = vadd.f32 %v2125_v52, %v2124_v55  ;;  %v2189_v61 = vpop.f32.mrf.mxu1 }
 0x136   : > { %v2127_v51 = vpop.f32.mrf.mxu0  ;;  %v2190_v49 = vadd.f32 %v2189_v61, %v2188_v56 }
 0x137   : > { %v1270_v62 = vadd.f32 %v2126_v59, %v1173_v57  ;;  %v2191_v0 = vpop.f32.mrf.mxu1  ;;  %v1181_v57 = vadd.f32 %v2068_v2, %v2004_v1 }
 0x138   : > { %v2128_v3 = vpop.f32.mrf.mxu0 }
 0x139   : > { %v2129_v63 = vadd.f32 %v2128_v3, %v2127_v51  ;;  %v2192_v4 = vpop.f32.mrf.mxu1  ;;  %v2785_v6 = vadd.f32 %v2190_v49, %v1270_v62 }
 0x13a   : > { %v2130_v5 = vpop.f32.mrf.mxu0  ;;  %v2193_v52 = vadd.f32 %v2192_v4, %v2191_v0  ;;  %v2010_v0 = vadd.f32 %v2683_v18, %v2679_v16  ;;  %v2013_v16 = vadd.f32 %v2691_v22, %v2687_v20  ;;  %v2080_v20 = vadd.f32 %v2701_v27, %v2697_v25 }
 0x13b   : > { %v1273_v7 = vadd.f32 %v2129_v63, %v1176_v53  ;;  %v2194_v55 = vpop.f32.mrf.mxu1  ;;  %v1430_v56 = vsel %vm1429_vm0, %v2785_v6, 0.0  ;;  %v2083_v25 = vadd.f32 %v2709_v31, %v2705_v29 }
 0x13c   : > { %v2131_v59 = vpop.f32.mrf.mxu0  ;;  %1431 = vadd.xlane.f32.xlu0 %v1430_v56  ;;  %v1192_v21 = vadd.f32 %v2077_v17, %v2013_v16 }
 0x13d   : > { %v2132_v10 = vadd.f32 %v2131_v59, %v2130_v5  ;;  %v2195_v11 = vpop.f32.mrf.mxu1  ;;  %v2793_v49 = vadd.f32 %v2193_v52, %v1273_v7  ;;  %v1189_v7 = vadd.f32 %v2074_v12, %v2010_v0 }
 0x13e   : > { %v2133_v51 = vpop.f32.mrf.mxu0  ;;  %v2196_v60 = vadd.f32 %v2195_v11, %v2194_v55 }
 0x13f   : > { %v1278_v58 = vadd.f32 %v2132_v10, %v1181_v57  ;;  %v2197_v61 = vpop.f32.mrf.mxu1  ;;  %v1433_v62 = vsel %vm1429_vm0, %v2793_v49, 0.0  ;;  %v2016_v10 = vadd.f32 %v2699_v26, %v2695_v24  ;;  %v2019_v24 = vadd.f32 %v2707_v30, %v2703_v28 }
 0x140   : > { %v2134_v14 = vpop.f32.mrf.mxu0  ;;  %1434 = vadd.xlane.f32.xlu0 %v1433_v62  ;;  %v2086_v28 = vadd.f32 %v2717_v35, %v2713_v33  ;;  %v2089_v33 = vadd.f32 %v2725_v39, %v2721_v37 }
 0x141   : > { %v2135_v15 = vadd.f32 %v2134_v14, %v2133_v51  ;;  %v2198_v1 = vpop.f32.mrf.mxu1  ;;  %v2801_v2 = vadd.f32 %v2196_v60, %v1278_v58  ;;  %v1197_v12 = vadd.f32 %v2080_v20, %v2016_v10  ;;  %v1200_v29 = vadd.f32 %v2083_v25, %v2019_v24 }
 0x142   : > { %v2136_v3 = vpop.f32.mrf.mxu0  ;;  %v2199_v63 = vadd.f32 %v2198_v1, %v2197_v61 }
 0x143   : > { %v1281_v53 = vadd.f32 %v2135_v15, %v1184_v13  ;;  %v2200_v4 = vpop.f32.mrf.mxu1  ;;  %v1436_v5 = vsel %vm1429_vm0, %v2801_v2, 0.0 }
 0x144   : > { %v2137_v52 = vpop.f32.mrf.mxu0  ;;  %1437 = vadd.xlane.f32.xlu1 %v1436_v5 }
 0x145   : > { %v2138_v18 = vadd.f32 %v2137_v52, %v2136_v3  ;;  %v2201_v19 = vpop.f32.mrf.mxu1  ;;  %v2809_v55 = vadd.f32 %v2199_v63, %v1281_v53 }
 0x146   : > { %v2139_v56 = vpop.f32.mrf.mxu0  ;;  %v2202_v59 = vadd.f32 %v2201_v19, %v2200_v4  ;;  %v2022_v4 = vadd.f32 %v2715_v34, %v2711_v32  ;;  %v2025_v32 = vadd.f32 %v2723_v38, %v2719_v36  ;;  %v2092_v36 = vadd.f32 %v2733_v43, %v2729_v41 }
 0x147   : > { %v1286_v57 = vadd.f32 %v2138_v18, %v1189_v7  ;;  %v2203_v8 = vpop.f32.mrf.mxu1  ;;  %v1439_v9 = vsel %vm1429_vm0, %v2809_v55, 0.0  ;;  %v2095_v41 = vadd.f32 %v2741_v47, %v2737_v45 }
 0x148   : > { %v2140_v22 = vpop.f32.mrf.mxu0  ;;  %1440 = vadd.xlane.f32.xlu1 %v1439_v9  ;;  %v1208_v37 = vadd.f32 %v2089_v33, %v2025_v32 }
 0x149   : > { %v2141_v23 = vadd.f32 %v2140_v22, %v2139_v56  ;;  %v2204_v11 = vpop.f32.mrf.mxu1  ;;  %v2817_v51 = vadd.f32 %v2202_v59, %v1286_v57  ;;  %v1205_v56 = vadd.f32 %v2086_v28, %v2022_v4 }
 0x14a   : > { %v2142_v58 = vpop.f32.mrf.mxu0  ;;  %v2205_v61 = vadd.f32 %v2204_v11, %v2203_v8 }
 0x14b   : > { %v1289_v60 = vadd.f32 %v2141_v23, %v1192_v21  ;;  %v2206_v62 = vpop.f32.mrf.mxu1  ;;  %v1442_v0 = vsel %vm1429_vm0, %v2817_v51, 0.0  ;;  %v2028_v21 = vadd.f32 %v2731_v42, %v2727_v40  ;;  %v2031_v40 = vadd.f32 %v2739_v46, %v2735_v44 }
 0x14c   : > { %v2143_v14 = vpop.f32.mrf.mxu0  ;;  %1443 = vadd.xlane.f32.xlu0 %v1442_v0 }
 0x14d   : > { %v2144_v26 = vadd.f32 %v2143_v14, %v2142_v58  ;;  %v2207_v27 = vpop.f32.mrf.mxu1  ;;  %v2825_v13 = vadd.f32 %v2205_v61, %v1289_v60  ;;  %v1216_v45 = vadd.f32 %v2095_v41, %v2031_v40 }
 0x14e   : > { %v2145_v15 = vpop.f32.mrf.mxu0  ;;  %v2208_v3 = vadd.f32 %v2207_v27, %v2206_v62 }
 0x14f   : > { %v1294_v1 = vadd.f32 %v2144_v26, %v1197_v12  ;;  %v2209_v53 = vpop.f32.mrf.mxu1  ;;  %v1445_v63 = vsel %vm1429_vm0, %v2825_v13, 0.0  ;;  %v1213_v12 = vadd.f32 %v2092_v36, %v2028_v21  ;;  %v3077_v21 = vld [vmem:[#allocation10_spill] sm:$0xff] }
 0x150   : > { %v2146_v30 = vpop.f32.mrf.mxu0  ;;  %1446 = vadd.xlane.f32.xlu1 %v1445_v63  ;;  %v3071_v63 = vld [vmem:[#allocation3_spill] sm:$0xff] }
 0x151   : > { %v2147_v31 = vadd.f32 %v2146_v30, %v2145_v15  ;;  %v2210_v5 = vpop.f32.mrf.mxu1  ;;  %v2833_v7 = vadd.f32 %v2208_v3, %v1294_v1  ;;  %v2034_v3 = vadd.f32 %v2747_v50, %v2743_v48  ;;  %v3072_v48 = vld [vmem:[#allocation4_spill] sm:$0xff]  ;;  %v3073_v50 = vld [vmem:[#allocation6_spill] sm:$0xff] }
 0x152   : > { %v2148_v52 = vpop.f32.mrf.mxu0  ;;  %v2211_v17 = vadd.f32 %v2210_v5, %v2209_v53  ;;  %v3070_v53 = vld [vmem:[#allocation2_spill] sm:$0xff] }
 0x153   : > { %v1297_v16 = vadd.f32 %v2147_v31, %v1200_v29  ;;  %v2212_v18 = vpop.f32.mrf.mxu1  ;;  %v1448_v19 = vsel %vm1429_vm0, %v2833_v7, 0.0  ;;  %v2098_v44 = vadd.f32 %v3071_v63, %v3070_v53 }
 0x154   : > { %v2149_v57 = vpop.f32.mrf.mxu0  ;;  %1449 = vadd.xlane.f32.xlu0 %v1448_v19  ;;  %v3074_v19 = vld [vmem:[#allocation5_spill] sm:$0xff] }
 0x155   : > { %v2150_v34 = vadd.f32 %v2149_v57, %v2148_v52  ;;  %v2213_v35 = vpop.f32.mrf.mxu1  ;;  %v2841_v59 = vadd.f32 %v2211_v17, %v1297_v16  ;;  %v1221_v16 = vadd.f32 %v2098_v44, %v2034_v3 }
 0x156   : > { %v2151_v8 = vpop.f32.mrf.mxu0  ;;  %v2214_v10 = vadd.f32 %v2213_v35, %v2212_v18  ;;  %v2037_v18 = vadd.f32 %v3073_v50, %v3072_v48 }
 0x157   : > { %v1302_v9 = vadd.f32 %v2150_v34, %v1205_v56  ;;  %v2215_v20 = vpop.f32.mrf.mxu1  ;;  %v1451_v22 = vsel %vm1429_vm0, %v2841_v59, 0.0  ;;  %v3075_v56 = vld [vmem:[#allocation7_spill] sm:$0xff] }
 0x158   : > { %v2152_v38 = vpop.f32.mrf.mxu0  ;;  %1452 = vadd.xlane.f32.xlu1 %v1451_v22  ;;  %v2101_v57 = vadd.f32 %v3075_v56, %v3074_v19  ;;  %v3076_v22 = vld [vmem:[#allocation8_spill] sm:$0xff] }
 0x159   : > { %v2153_v39 = vadd.f32 %v2152_v38, %v2151_v8  ;;  %v2216_v23 = vpop.f32.mrf.mxu1  ;;  %v2849_v11 = vadd.f32 %v2214_v10, %v1302_v9  ;;  %v2040_v36 = vadd.f32 %v3077_v21, %v3076_v22  ;;  %v3078_v38 = vld [vmem:[#allocation9_spill] sm:$0xff] }
 0x15a   : > { %v2154_v58 = vpop.f32.mrf.mxu0  ;;  %v2217_v61 = vadd.f32 %v2216_v23, %v2215_v20 }
 0x15b   : > { %v1305_v60 = vadd.f32 %v2153_v39, %v1208_v37  ;;  %v2218_v62 = vpop.f32.mrf.mxu1  ;;  %v1454_v0 = vsel %vm1429_vm0, %v2849_v11, 0.0  ;;  %v3079_v37 = vld [vmem:[#allocation11_spill] sm:$0xff] }
 0x15c   : > { %v2155_v14 = vpop.f32.mrf.mxu0  ;;  %1455 = vadd.xlane.f32.xlu0 %v1454_v0  ;;  %v2104_v39 = vadd.f32 %v3079_v37, %v3078_v38 }
 0x15d   : > { %v2156_v42 = vadd.f32 %v2155_v14, %v2154_v58  ;;  %v2219_v43 = vpop.f32.mrf.mxu1  ;;  %v2857_v24 = vadd.f32 %v2217_v61, %v1305_v60  ;;  %v1224_v58 = vadd.f32 %v2101_v57, %v2037_v18 }
 0x15e   : > { %v2157_v25 = vpop.f32.mrf.mxu0  ;;  %v2220_v27 = vadd.f32 %v2219_v43, %v2218_v62 }
 0x15f   : > { %v1310_v26 = vadd.f32 %v2156_v42, %v1213_v12  ;;  %v2221_v15 = vpop.f32.mrf.mxu1  ;;  %v1457_v1 = vsel %vm1429_vm0, %v2857_v24, 0.0  ;;  %v1229_v42 = vadd.f32 %v2104_v39, %v2040_v36 }
 0x160   : > { %v2158_v46 = vpop.f32.mrf.mxu0  ;;  %1458 = vadd.xlane.f32.xlu1 %v1457_v1 }
 0x161   : > { %v2159_v47 = vadd.f32 %v2158_v46, %v2157_v25  ;;  %v2222_v4 = vpop.f32.mrf.mxu1  ;;  %v2865_v28 = vadd.f32 %v2220_v27, %v1310_v26  ;;  %v3080_v25 = vld [vmem:[#allocation12_spill] sm:$0xff]  ;;  %v3081_v26 = vld [vmem:[#allocation14_spill] sm:$0xff] }
 0x162   : > { %v2160_v30 = vpop.f32.mrf.mxu0  ;;  %v2223_v31 = vadd.f32 %v2222_v4, %v2221_v15  ;;  %v2043_v27 = vadd.f32 %v3081_v26, %v3080_v25  ;;  %v3082_v15 = vld [vmem:[#allocation13_spill] sm:$0xff] }
 0x163   : > { %v1313_v29 = vadd.f32 %v2159_v47, %v1216_v45  ;;  %v2224_v5 = vpop.f32.mrf.mxu1  ;;  %v1460_v52 = vsel %vm1429_vm0, %v2865_v28, 0.0  ;;  %v2107_v1 = vadd.f32 %v2775_v54, %v3082_v15 }
 0x164   : > { %v2161_v17 = vpop.f32.mrf.mxu0  ;;  %1461 = vadd.xlane.f32.xlu0 %v1460_v52 }
 0x165   : > { %v2162_v32 = vadd.f32 %v2161_v17, %v2160_v30  ;;  %v2225_v33 = vpop.f32.mrf.mxu1  ;;  %v2873_v34 = vadd.f32 %v2223_v31, %v1313_v29  ;;  %v1232_v29 = vadd.f32 %v2107_v1, %v2043_v27 }
 0x166   : > { %v2163_v35 = vpop.f32.mrf.mxu0  ;;  %v2226_v9 = vadd.f32 %v2225_v33, %v2224_v5 }
 0x167   : > { %v1318_v8 = vadd.f32 %v2162_v32, %v1221_v16  ;;  %v2227_v10 = vpop.f32.mrf.mxu1  ;;  %v1463_v20 = vsel %vm1429_vm0, %v2873_v34, 0.0 }
 0x168   : > { %v2164_v23 = vpop.f32.mrf.mxu0  ;;  %1464 = vadd.xlane.f32.xlu1 %v1463_v20 }
 0x169   : > { %v2165_v60 = vadd.f32 %v2164_v23, %v2163_v35  ;;  %v2228_v61 = vpop.f32.mrf.mxu1  ;;  %v2881_v62 = vadd.f32 %v2226_v9, %v1318_v8 }
 0x16a   : > { %v2166_v0 = vpop.f32.mrf.mxu0  ;;  %v2229_v14 = vadd.f32 %v2228_v61, %v2227_v10 }
 0x16b   : > { %v1321_v12 = vadd.f32 %v2165_v60, %v1224_v58  ;;  %v2230_v40 = vpop.f32.mrf.mxu1  ;;  %v1466_v41 = vsel %vm1429_vm0, %v2881_v62, 0.0 }
 0x16c   : > { %v2167_v43 = vpop.f32.mrf.mxu0  ;;  %1467 = vadd.xlane.f32.xlu0 %v1466_v41 }
 0x16d   : > { %v2168_v3 = vadd.f32 %v2167_v43, %v2166_v0  ;;  %v2231_v53 = vpop.f32.mrf.mxu1  ;;  %v2889_v63 = vadd.f32 %v2229_v14, %v1321_v12 }
 0x16e   : > { %v2169_v44 = vpop.f32.mrf.mxu0  ;;  %v2232_v45 = vadd.f32 %v2231_v53, %v2230_v40 }
 0x16f   : > { %v1326_v46 = vadd.f32 %v2168_v3, %v1229_v42  ;;  %v2233_v47 = vpop.f32.mrf.mxu1  ;;  %v1469_v4 = vsel %vm1429_vm0, %v2889_v63, 0.0 }
 0x170   : > { %v2170_v30 = vpop.f32.mrf.mxu0  ;;  %1470 = vadd.xlane.f32.xlu1 %v1469_v4 }
 0x171   : > { %v2171_v31 = vadd.f32 %v2170_v30, %v2169_v44  ;;  %v2234_v5 = vpop.f32.mrf.mxu1  ;;  %v2893_v52 = vadd.f32 %v2232_v45, %v1326_v46 }
 0x172   : > { %v2235_v54 = vadd.f32 %v2234_v5, %v2233_v47 }
 0x173   : > { %v1329_v16 = vadd.f32 %v2171_v31, %v1232_v29  ;;  %v1472_v17 = vsel %vm1429_vm0, %v2893_v52, 0.0 }
 0x174   : > { %1473 = vadd.xlane.f32.xlu0 %v1472_v17 }
 0x175   : > { %v2897_v48 = vadd.f32 %v2235_v54, %v1329_v16 }
 0x177   : > { %v1475_v50 = vsel %vm1429_vm0, %v2897_v48, 0.0 }
 0x178   : > { %1476 = vadd.xlane.f32.xlu1 %v1475_v50 }
 0x1c5   : > { %v1432_v18 = vpop.xlane.xlu0 %1431 }
 0x1c6   : > { %v1479_v19 = vmul.f32 0.25, %v1432_v18 }
 0x1c8   : > { %v2902_v56 = vsub.f32 %v2785_v6, %v1479_v19 }
 0x1c9   : > { %v1435_v57 = vpop.xlane.xlu0 %1434 }
 0x1ca   : > { %v1480_v32 = vmul.f32 0.25, %v1435_v57  ;;  %v1511_v33 = vmul.f32 %v2902_v56, %v2902_v56 }
 0x1cc   : > { %v2907_v35 = vsub.f32 %v2793_v49, %v1480_v32  ;;  %v1527_v8 = vsel %vm1429_vm0, %v1511_v33, 0.0 }
 0x1cd   : > { %v1438_v9 = vpop.xlane.xlu1 %1437  ;;  %1528 = vadd.xlane.f32.xlu0 %v1527_v8 }
 0x1ce   : > { %v1481_v10 = vmul.f32 0.25, %v1438_v9  ;;  %v1512_v20 = vmul.f32 %v2907_v35, %v2907_v35 }
 0x1d0   : > { %v2913_v22 = vsub.f32 %v2801_v2, %v1481_v10  ;;  %v1530_v6 = vsel %vm1429_vm0, %v1512_v20, 0.0 }
 0x1d1   : > { %v1441_v21 = vpop.xlane.xlu1 %1440  ;;  %1531 = vadd.xlane.f32.xlu1 %v1530_v6 }
 0x1d2   : > { %v1482_v36 = vmul.f32 0.25, %v1441_v21  ;;  %v1513_v49 = vmul.f32 %v2913_v22, %v2913_v22 }
 0x1d4   : > { %v2919_v38 = vsub.f32 %v2809_v55, %v1482_v36  ;;  %v1533_v37 = vsel %vm1429_vm0, %v1513_v49, 0.0 }
 0x1d5   : > { %1534 = vadd.xlane.f32.xlu0 %v1533_v37  ;;  %v1444_v39 = vpop.xlane.xlu0 %1443 }
 0x1d6   : > { %v1483_v23 = vmul.f32 0.25, %v1444_v39  ;;  %v1514_v2 = vmul.f32 %v2919_v38, %v2919_v38 }
 0x1d8   : > { %v2925_v58 = vsub.f32 %v2817_v51, %v1483_v23  ;;  %v1536_v60 = vsel %vm1429_vm0, %v1514_v2, 0.0 }
 0x1d9   : > { %v1447_v61 = vpop.xlane.xlu1 %1446  ;;  %1537 = vadd.xlane.f32.xlu1 %v1536_v60 }
 0x1da   : > { %v1484_v0 = vmul.f32 0.25, %v1447_v61  ;;  %v1515_v55 = vmul.f32 %v2925_v58, %v2925_v58 }
 0x1dc   : > { %v2931_v12 = vsub.f32 %v2825_v13, %v1484_v0  ;;  %v1539_v14 = vsel %vm1429_vm0, %v1515_v55, 0.0 }
 0x1dd   : > { %1540 = vadd.xlane.f32.xlu0 %v1539_v14  ;;  %v1450_v40 = vpop.xlane.xlu0 %1449 }
 0x1de   : > { %v1485_v41 = vmul.f32 0.25, %v1450_v40  ;;  %v1516_v51 = vmul.f32 %v2931_v12, %v2931_v12 }
 0x1e0   : > { %v2937_v42 = vsub.f32 %v2833_v7, %v1485_v41  ;;  %v1542_v43 = vsel %vm1429_vm0, %v1516_v51, 0.0 }
 0x1e1   : > { %v1453_v25 = vpop.xlane.xlu1 %1452  ;;  %1543 = vadd.xlane.f32.xlu1 %v1542_v43 }
 0x1e2   : > { %v1486_v26 = vmul.f32 0.25, %v1453_v25  ;;  %v1517_v13 = vmul.f32 %v2937_v42, %v2937_v42 }
 0x1e4   : > { %v2943_v27 = vsub.f32 %v2841_v59, %v1486_v26  ;;  %v1545_v15 = vsel %vm1429_vm0, %v1517_v13, 0.0 }
 0x1e5   : > { %1546 = vadd.xlane.f32.xlu0 %v1545_v15  ;;  %v1456_v1 = vpop.xlane.xlu0 %1455 }
 0x1e6   : > { %v1487_v3 = vmul.f32 0.25, %v1456_v1  ;;  %v1518_v7 = vmul.f32 %v2943_v27, %v2943_v27 }
 0x1e8   : > { %v2949_v53 = vsub.f32 %v2849_v11, %v1487_v3  ;;  %v1548_v44 = vsel %vm1429_vm0, %v1518_v7, 0.0 }
 0x1e9   : > { %v1459_v46 = vpop.xlane.xlu1 %1458  ;;  %1549 = vadd.xlane.f32.xlu1 %v1548_v44 }
 0x1ea   : > { %v1488_v45 = vmul.f32 0.25, %v1459_v46  ;;  %v1519_v59 = vmul.f32 %v2949_v53, %v2949_v53 }
 0x1ec   : > { %v2955_v47 = vsub.f32 %v2857_v24, %v1488_v45  ;;  %v1551_v4 = vsel %vm1429_vm0, %v1519_v59, 0.0 }
 0x1ed   : > { %1552 = vadd.xlane.f32.xlu0 %v1551_v4  ;;  %v1462_v30 = vpop.xlane.xlu0 %1461 }
 0x1ee   : > { %v1489_v29 = vmul.f32 0.25, %v1462_v30  ;;  %v1520_v11 = vmul.f32 %v2955_v47, %v2955_v47 }
 0x1f0   : > { %v2961_v31 = vsub.f32 %v2865_v28, %v1489_v29  ;;  %v1554_v5 = vsel %vm1429_vm0, %v1520_v11, 0.0 }
 0x1f1   : > { %v1465_v16 = vpop.xlane.xlu1 %1464  ;;  %1555 = vadd.xlane.f32.xlu1 %v1554_v5 }
 0x1f2   : > { %v1490_v54 = vmul.f32 0.25, %v1465_v16  ;;  %v1521_v24 = vmul.f32 %v2961_v31, %v2961_v31 }
 0x1f4   : > { %v2967_v17 = vsub.f32 %v2873_v34, %v1490_v54  ;;  %v1557_v50 = vsel %vm1429_vm0, %v1521_v24, 0.0 }
 0x1f5   : > { %1558 = vadd.xlane.f32.xlu0 %v1557_v50  ;;  %v1468_v18 = vpop.xlane.xlu0 %1467 }
 0x1f6   : > { %v1491_v19 = vmul.f32 0.25, %v1468_v18  ;;  %v1522_v28 = vmul.f32 %v2967_v17, %v2967_v17 }
 0x1f8   : > { %v2973_v57 = vsub.f32 %v2881_v62, %v1491_v19  ;;  %v1560_v32 = vsel %vm1429_vm0, %v1522_v28, 0.0 }
 0x1f9   : > { %v1471_v33 = vpop.xlane.xlu1 %1470  ;;  %1561 = vadd.xlane.f32.xlu1 %v1560_v32 }
 0x1fa   : > { %v1492_v8 = vmul.f32 0.25, %v1471_v33  ;;  %v1523_v34 = vmul.f32 %v2973_v57, %v2973_v57 }
 0x1fc   : > { %v2979_v9 = vsub.f32 %v2889_v63, %v1492_v8  ;;  %v1563_v10 = vsel %vm1429_vm0, %v1523_v34, 0.0 }
 0x1fd   : > { %1564 = vadd.xlane.f32.xlu0 %v1563_v10  ;;  %v1474_v20 = vpop.xlane.xlu0 %1473 }
 0x1fe   : > { %v1493_v6 = vmul.f32 0.25, %v1474_v20  ;;  %v1524_v62 = vmul.f32 %v2979_v9, %v2979_v9 }
 0x200   : > { %v2985_v21 = vsub.f32 %v2893_v52, %v1493_v6  ;;  %v1566_v36 = vsel %vm1429_vm0, %v1524_v62, 0.0 }
 0x201   : > { %v1477_v49 = vpop.xlane.xlu1 %1476  ;;  %1567 = vadd.xlane.f32.xlu1 %v1566_v36 }
 0x202   : > { %v1494_v37 = vmul.f32 0.25, %v1477_v49  ;;  %v1525_v63 = vmul.f32 %v2985_v21, %v2985_v21 }
 0x204   : > { %v2991_v39 = vsub.f32 %v2897_v48, %v1494_v37  ;;  %v1569_v23 = vsel %vm1429_vm0, %v1525_v63, 0.0 }
 0x205   : > { %1570 = vadd.xlane.f32.xlu0 %v1569_v23 }
 0x206   : > { %v1526_v2 = vmul.f32 %v2991_v39, %v2991_v39 }
 0x208   : > { %v1572_v52 = vsel %vm1429_vm0, %v1526_v2, 0.0 }
 0x209   : > { %1573 = vadd.xlane.f32.xlu1 %v1572_v52 }
 0x256   : > { %v1529_v60 = vpop.xlane.xlu0 %1528 }
 0x257   : > { %v1575_v61 = vmul.f32 0.25, %v1529_v60 }
 0x259   : > { %v1591_v0 = vadd.f32 1e-05, %v1575_v61 }
 0x25a   : > { %v1532_v55 = vpop.xlane.xlu1 %1531 }
 0x25b   : > { %2308 = vrsqrt.f32 %v1591_v0  ;;  %v1576_v14 = vmul.f32 0.25, %v1532_v55 }
 0x25d   : > { %v1592_v40 = vadd.f32 1e-05, %v1576_v14 }
 0x25e   : > { %v1535_v41 = vpop.xlane.xlu0 %1534 }
 0x25f   : > { %2310 = vrsqrt.f32 %v1592_v40  ;;  %v1577_v48 = vmul.f32 0.25, %v1535_v41 }
 0x261   : > { %v1593_v51 = vadd.f32 1e-05, %v1577_v48 }
 0x262   : > { %v1538_v43 = vpop.xlane.xlu1 %1537 }
 0x263   : > { %2312 = vrsqrt.f32 %v1593_v51  ;;  %v1578_v25 = vmul.f32 0.25, %v1538_v43 }
 0x265   : > { %v1594_v26 = vadd.f32 1e-05, %v1578_v25 }
 0x266   : > { %v1541_v13 = vpop.xlane.xlu0 %1540 }
 0x267   : > { %2314 = vrsqrt.f32 %v1594_v26  ;;  %v1579_v15 = vmul.f32 0.25, %v1541_v13 }
 0x268   : > { %v2309_v1 = vpop.eup %2308 }
 0x269   : > { %v1623_v3 = vmul.f32 %v2309_v1, %v2902_v56  ;;  %v1595_v7 = vadd.f32 1e-05, %v1579_v15 }
 0x26a   : > { %v1544_v44 = vpop.xlane.xlu1 %1543 }
 0x26b   : > { %v1639_v46 = vmul.f32 0.1, %v1623_v3  ;;  %2316 = vrsqrt.f32 %v1595_v7  ;;  %v1580_v45 = vmul.f32 0.25, %v1544_v44 }
 0x26c   : > { %v2311_v59 = vpop.eup %2310 }
 0x26d   : > { %v1655_v4 = vmax.f32 %v1623_v3, %v1639_v46  ;;  %v1624_v30 = vmul.f32 %v2311_v59, %v2907_v35  ;;  %v1596_v29 = vadd.f32 1e-05, %v1580_v45 }
 0x26e   : > { %v1547_v11 = vpop.xlane.xlu0 %1546 }
 0x26f   : > { %v1964_v56 = vpack.c.bf16 %v1655_v4, %v1655_v4  ;;  %v1640_v5 = vmul.f32 0.1, %v1624_v30  ;;  %2318 = vrsqrt.f32 %v1596_v29  ;;  %v1581_v16 = vmul.f32 0.25, %v1547_v11 }
 0x270   : > { %v2313_v54 = vpop.eup %2312 }
 0x271   : > { %1736 = vst.msk [vmem:[%s3003_s17] sm:$0xf] %vm1735_vm1, %v1964_v56  ;;  %v1656_v24 = vmax.f32 %v1624_v30, %v1640_v5  ;;  %v1625_v35 = vmul.f32 %v2313_v54, %v2913_v22  ;;  %v1597_v50 = vadd.f32 1e-05, %v1581_v16 }
 0x272   : > { %v1550_v18 = vpop.xlane.xlu1 %1549 }
 0x273   : > { %v1965_v19 = vpack.c.bf16 %v1656_v24, %v1656_v24  ;;  %v1641_v28 = vmul.f32 0.1, %v1625_v35  ;;  %2320 = vrsqrt.f32 %v1597_v50  ;;  %v1582_v32 = vmul.f32 0.25, %v1550_v18 }
 0x274   : > { %v2315_v33 = vpop.eup %2314 }
 0x275   : > { %1737 = vst.msk [vmem:[%s3003_s17 + $0x4] sm:$0xf] %vm1735_vm1, %v1965_v19  ;;  %v1657_v8 = vmax.f32 %v1625_v35, %v1641_v28  ;;  %v1626_v34 = vmul.f32 %v2315_v33, %v2919_v38  ;;  %v1598_v10 = vadd.f32 1e-05, %v1582_v32 }
 0x276   : > { %v1553_v20 = vpop.xlane.xlu0 %1552 }
 0x277   : > { %v1966_v6 = vpack.c.bf16 %v1657_v8, %v1657_v8  ;;  %v1642_v62 = vmul.f32 0.1, %v1626_v34  ;;  %2322 = vrsqrt.f32 %v1598_v10  ;;  %v1583_v22 = vmul.f32 0.25, %v1553_v20 }
 0x278   : > { %v2317_v36 = vpop.eup %2316 }
 0x279   : > { %1738 = vst.msk [vmem:[%s3003_s17 + $0x8] sm:$0xf] %vm1735_vm1, %v1966_v6  ;;  %v1658_v49 = vmax.f32 %v1626_v34, %v1642_v62  ;;  %v1627_v37 = vmul.f32 %v2317_v36, %v2925_v58  ;;  %v1599_v63 = vadd.f32 1e-05, %v1583_v22 }
 0x27a   : > { %v1556_v23 = vpop.xlane.xlu1 %1555 }
 0x27b   : > { %v1967_v2 = vpack.c.bf16 %v1658_v49, %v1658_v49  ;;  %v1643_v52 = vmul.f32 0.1, %v1627_v37  ;;  %2324 = vrsqrt.f32 %v1599_v63  ;;  %v1584_v38 = vmul.f32 0.25, %v1556_v23 }
 0x27c   : > { %v2319_v60 = vpop.eup %2318 }
 0x27d   : > { %1739 = vst.msk [vmem:[%s3003_s17 + $0xc] sm:$0xf] %vm1735_vm1, %v1967_v2  ;;  %v1659_v61 = vmax.f32 %v1627_v37, %v1643_v52  ;;  %v1628_v0 = vmul.f32 %v2319_v60, %v2931_v12  ;;  %v1600_v55 = vadd.f32 1e-05, %v1584_v38 }
 0x27e   : > { %v1559_v14 = vpop.xlane.xlu0 %1558 }
 0x27f   : > { %v1968_v40 = vpack.c.bf16 %v1659_v61, %v1659_v61  ;;  %v1644_v41 = vmul.f32 0.1, %v1628_v0  ;;  %2326 = vrsqrt.f32 %v1600_v55  ;;  %v1585_v58 = vmul.f32 0.25, %v1559_v14 }
 0x280   : > { %v2321_v48 = vpop.eup %2320 }
 0x281   : > { %1740 = vst.msk [vmem:[%s3003_s17 + $0x10] sm:$0xf] %vm1735_vm1, %v1968_v40  ;;  %v1660_v51 = vmax.f32 %v1628_v0, %v1644_v41  ;;  %v1629_v43 = vmul.f32 %v2321_v48, %v2937_v42  ;;  %v1601_v25 = vadd.f32 1e-05, %v1585_v58 }
 0x282   : > { %v1562_v26 = vpop.xlane.xlu1 %1561 }
 0x283   : > { %v1969_v13 = vpack.c.bf16 %v1660_v51, %v1660_v51  ;;  %v1645_v15 = vmul.f32 0.1, %v1629_v43  ;;  %2328 = vrsqrt.f32 %v1601_v25  ;;  %v1586_v12 = vmul.f32 0.25, %v1562_v26 }
 0x284   : > { %v2323_v1 = vpop.eup %2322 }
 0x285   : > { %1741 = vst.msk [vmem:[%s3003_s17 + $0x14] sm:$0xf] %vm1735_vm1, %v1969_v13  ;;  %v1661_v3 = vmax.f32 %v1629_v43, %v1645_v15  ;;  %v1630_v7 = vmul.f32 %v2323_v1, %v2943_v27  ;;  %v1602_v44 = vadd.f32 1e-05, %v1586_v12 }
 0x286   : > { %v1565_v46 = vpop.xlane.xlu0 %1564 }
 0x287   : > { %v1970_v45 = vpack.c.bf16 %v1661_v3, %v1661_v3  ;;  %v1646_v59 = vmul.f32 0.1, %v1630_v7  ;;  %2330 = vrsqrt.f32 %v1602_v44  ;;  %v1587_v42 = vmul.f32 0.25, %v1565_v46 }
 0x288   : > { %v2325_v4 = vpop.eup %2324 }
 0x289   : > { %1742 = vst.msk [vmem:[%s3003_s17 + $0x18] sm:$0xf] %vm1735_vm1, %v1970_v45  ;;  %v1662_v30 = vmax.f32 %v1630_v7, %v1646_v59  ;;  %v1631_v29 = vmul.f32 %v2325_v4, %v2949_v53  ;;  %v1603_v11 = vadd.f32 1e-05, %v1587_v42 }
 0x28a   : > { %v1568_v56 = vpop.xlane.xlu1 %1567 }
 0x28b   : > { %v1971_v5 = vpack.c.bf16 %v1662_v30, %v1662_v30  ;;  %v1647_v16 = vmul.f32 0.1, %v1631_v29  ;;  %2332 = vrsqrt.f32 %v1603_v11  ;;  %v1588_v27 = vmul.f32 0.25, %v1568_v56 }
 0x28c   : > { %v2327_v54 = vpop.eup %2326 }
 0x28d   : > { %1743 = vst.msk [vmem:[%s3003_s17 + $0x1c] sm:$0xf] %vm1735_vm1, %v1971_v5  ;;  %v1663_v24 = vmax.f32 %v1631_v29, %v1647_v16  ;;  %v1632_v35 = vmul.f32 %v2327_v54, %v2955_v47  ;;  %v1604_v50 = vadd.f32 1e-05, %v1588_v27 }
 0x28e   : > { %v1571_v18 = vpop.xlane.xlu0 %1570 }
 0x28f   : > { %v1972_v19 = vpack.c.bf16 %v1663_v24, %v1663_v24  ;;  %v1648_v28 = vmul.f32 0.1, %v1632_v35  ;;  %2334 = vrsqrt.f32 %v1604_v50  ;;  %v1589_v53 = vmul.f32 0.25, %v1571_v18 }
 0x290   : > { %v2329_v32 = vpop.eup %2328 }
 0x291   : > { %1744 = vst.msk [vmem:[%s3003_s17 + $0x20] sm:$0xf] %vm1735_vm1, %v1972_v19  ;;  %v1664_v33 = vmax.f32 %v1632_v35, %v1648_v28  ;;  %v1633_v8 = vmul.f32 %v2329_v32, %v2961_v31  ;;  %v1605_v34 = vadd.f32 1e-05, %v1589_v53 }
 0x292   : > { %v1574_v10 = vpop.xlane.xlu1 %1573 }
 0x293   : > { %v1973_v20 = vpack.c.bf16 %v1664_v33, %v1664_v33  ;;  %v1649_v6 = vmul.f32 0.1, %v1633_v8  ;;  %2336 = vrsqrt.f32 %v1605_v34  ;;  %v1590_v47 = vmul.f32 0.25, %v1574_v10 }
 0x294   : > { %v2331_v62 = vpop.eup %2330 }
 0x295   : > { %1745 = vst.msk [vmem:[%s3003_s17 + $0x24] sm:$0xf] %vm1735_vm1, %v1973_v20  ;;  %v1665_v22 = vmax.f32 %v1633_v8, %v1649_v6  ;;  %v1634_v36 = vmul.f32 %v2331_v62, %v2967_v17  ;;  %v1606_v49 = vadd.f32 1e-05, %v1590_v47 }
 0x297   : > { %v1974_v37 = vpack.c.bf16 %v1665_v22, %v1665_v22  ;;  %v1650_v63 = vmul.f32 0.1, %v1634_v36  ;;  %2338 = vrsqrt.f32 %v1606_v49 }
 0x298   : > { %v2333_v31 = vpop.eup %2332 }
 0x299   : > { %1746 = vst.msk [vmem:[%s3003_s17 + $0x28] sm:$0xf] %vm1735_vm1, %v1974_v37  ;;  %v1666_v23 = vmax.f32 %v1634_v36, %v1650_v63  ;;  %v1635_v2 = vmul.f32 %v2333_v31, %v2973_v57 }
 0x29b   : > { %v1975_v52 = vpack.c.bf16 %v1666_v23, %v1666_v23  ;;  %v1651_v38 = vmul.f32 0.1, %v1635_v2 }
 0x29c   : > { %v2335_v60 = vpop.eup %2334 }
 0x29d   : > { %1747 = vst.msk [vmem:[%s3003_s17 + $0x2c] sm:$0xf] %vm1735_vm1, %v1975_v52  ;;  %v1667_v61 = vmax.f32 %v1635_v2, %v1651_v38  ;;  %v1636_v17 = vmul.f32 %v2335_v60, %v2979_v9 }
 0x29f   : > { %v1976_v0 = vpack.c.bf16 %v1667_v61, %v1667_v61  ;;  %v1652_v55 = vmul.f32 0.1, %v1636_v17 }
 0x2a0   : > { %v2337_v14 = vpop.eup %2336 }
 0x2a1   : > { %1748 = vst.msk [vmem:[%s3003_s17 + $0x30] sm:$0xf] %vm1735_vm1, %v1976_v0  ;;  %v1668_v40 = vmax.f32 %v1636_v17, %v1652_v55  ;;  %v1637_v41 = vmul.f32 %v2337_v14, %v2985_v21 }
 0x2a3   : > { %v1977_v57 = vpack.c.bf16 %v1668_v40, %v1668_v40  ;;  %v1653_v58 = vmul.f32 0.1, %v1637_v41 }
 0x2a4   : > { %v2339_v48 = vpop.eup %2338 }
 0x2a5   : > { %1749 = vst.msk [vmem:[%s3003_s17 + $0x34] sm:$0xf] %vm1735_vm1, %v1977_v57  ;;  %v1669_v51 = vmax.f32 %v1637_v41, %v1653_v58  ;;  %v1638_v43 = vmul.f32 %v2339_v48, %v2991_v39 }
 0x2a7   : > { %v1978_v25 = vpack.c.bf16 %v1669_v51, %v1669_v51  ;;  %v1654_v26 = vmul.f32 0.1, %v1638_v43 }
 0x2a9   : > { %1750 = vst.msk [vmem:[%s3003_s17 + $0x38] sm:$0xf] %vm1735_vm1, %v1978_v25  ;;  %v1670_v9 = vmax.f32 %v1638_v43, %v1654_v26 }
 0x2ab   : > { %v1979_v13 = vpack.c.bf16 %v1670_v9, %v1670_v9 }
 0x2ad   : > { %1751 = vst.msk [vmem:[%s3003_s17 + $0x3c] sm:$0xf] %vm1735_vm1, %v1979_v13 }
 0x2ae PF: > { %s12_s9 = sadd.s32 1, %s2346_s9  }
 0x2af   : > { %p9_p4 = scmp.ge.s32.totalorder %s12_s9, 4  }
 0x2b1   :  { %11 = sbr.rel (!%p9_p4) target bundleno = 1 (0x1), region = 58 }

// kernel: attr_encoder_forward.15
= control target key start
LH: loop header
LB: loop body
LE: loop exit
PB: predicated region body
PF: predicated region fallthrough
CT: control target
= control target key end

     0   :  { %s4050_s9 = smov 0   ;;  %s5430_s0 = inlined_call_operand.vmem [shape: bf16[256,1152], index: 0, kind: input, shape index: {}]   ;;  %s5431_s1 = inlined_call_operand.vmem [shape: bf16[2,1152,4], index: 1, kind: input, shape index: {}]   ;;  %s5432_s2 = inlined_call_operand.vmem [shape: f32[2,256,4], index: 2, kind: output, shape index: {}]  }
   0x1 LB: > { %s2959_s10 = sadd.s32 4294967295, %s4033_s9   ;;  %p2963_p0 = scmp.ge.s32.totalorder %s4033_s9, 1  ;;  %s4033_s9 = sphi %s4050_s9, %s12_s9  }
   0x2   : > { %p112_p1 = scmp.lt.s32.totalorder %s4033_s9, 3 }
   0x4   : > { %p113_p2 = pnand %p2963_p0, %p112_p1 }
   0x6   : > { %116 = sbr.rel (%p113_p2) target bundleno = 900 (0x384), region = 28 }
   0xb   : > { %p134_p3 = scmp.lt.s32.totalorder %s2959_s10, 1  ;;  %v3749_v0 = vld [vmem:[%s5430_s0 + $0x4] ss:$36 sps:$4 sm:$0xff]   ;;  %v3759_v23 = vld [vmem:[%s5430_s0 + $0x4c] ss:$36 sps:$4 sm:$0xff]   ;;  %vm2422_vm0 = vcmask 31744  }
   0xc   : > { %v3752_v1 = vld [vmem:[%s5430_s0 + $0x364] ss:$36 sps:$4 sm:$0xff]   ;;  %1649 = vmatprep.mubr.bf16.mxu0 %v3749_v0  ;;  %v3761_v25 = vld [vmem:[%s5430_s0 + $0x3ac] ss:$36 sps:$4 sm:$0xff]   ;;  %v3771_v33 = vld [vmem:[%s5430_s0 + $0x94] ss:$36 sps:$4 sm:$0xff]  }
   0xd   : > { %s5471_s10 = smov (!%p134_p3, %s2959_s10), 1  ;;  %1745 = vmatprep.mubr.bf16.mxu1 %v3752_v1  ;;  %v3747_v18 = vld [vmem:[%s5430_s0] ss:$36 sps:$4 sm:$0xff]   ;;  %v3763_v30 = vld [vmem:[%s5430_s0 + $0x48] ss:$36 sps:$4 sm:$0xff]  }
   0xe   : > { %s3722_s15 = smul.u32 576, %s5471_s10  ;;  %v3750_v21 = vld [vmem:[%s5430_s0 + $0x360] ss:$36 sps:$4 sm:$0xff]   ;;  %v3764_v31 = vld [vmem:[%s5430_s0 + $0x3a8] ss:$36 sps:$4 sm:$0xff]   ;;  %s3185_s22 = sshll.u32 %s5471_s10, 8 }
   0xf   : > { %v3773_v37 = vld [vmem:[%s5430_s0 + $0x3f4] ss:$36 sps:$4 sm:$0xff]   ;;  %v3781_v45 = vld [vmem:[%s5430_s0 + $0xdc] ss:$36 sps:$4 sm:$0xff]   ;;  %v3793_v54 = vld [vmem:[%s5430_s0 + $0x124] ss:$36 sps:$4 sm:$0xff]   ;;  %s5334_s10 = scalar_lea.vmem %s5432_s2, %s3185_s22 }
  0x10   : > { %s4070_s18 = scalar_lea.vmem %s5431_s1, %s3722_s15  ;;  %v3775_v40 = vld [vmem:[%s5430_s0 + $0x90] ss:$36 sps:$4 sm:$0xff]   ;;  %v3783_v47 = vld [vmem:[%s5430_s0 + $0x43c] ss:$36 sps:$4 sm:$0xff]   ;;  %v3795_v60 = vld [vmem:[%s5430_s0 + $0x8] ss:$36 sps:$4 sm:$0xff]  }
  0x11   : > { %v3731_v2 = vld [vmem:[%s4070_s18 + $0x78] sm:$0xff]   ;;  %v3733_v4 = vld [vmem:[%s4070_s18 + $0x70] sm:$0xff]   ;;  %v3735_v6 = vld [vmem:[%s4070_s18 + $0x68] sm:$0xff]  }
  0x12   : > { %v3732_v3 = vld [vmem:[%s4070_s18 + $0x38] sm:$0xff]   ;;  %3186 = vmatprep.subr.bf16.mxu0 %v3731_v2  ;;  %3706 = vmatprep.subr.bf16.mxu1 %v3731_v2  ;;  %v3734_v5 = vld [vmem:[%s4070_s18 + $0x30] sm:$0xff]   ;;  %v3736_v7 = vld [vmem:[%s4070_s18 + $0x28] sm:$0xff]  }
  0x13   : > { %3187 = vmatpush3.bf16.msra.mxu0 %v3732_v3  ;;  %3714 = vmatpush3.bf16.msra.mxu1 %v3732_v3  ;;  %v3737_v8 = vld [vmem:[%s4070_s18 + $0x60] sm:$0xff]   ;;  %v3739_v10 = vld [vmem:[%s4070_s18 + $0x58] sm:$0xff]   ;;  %v3741_v12 = vld [vmem:[%s4070_s18 + $0x50] sm:$0xff]  }
  0x14   : > { %3188 = vmatprep.subr.bf16.mxu0 %v3733_v4  ;;  %3707 = vmatprep.subr.bf16.mxu1 %v3733_v4  ;;  %v3738_v9 = vld [vmem:[%s4070_s18 + $0x20] sm:$0xff]   ;;  %v3740_v11 = vld [vmem:[%s4070_s18 + $0x18] sm:$0xff]   ;;  %v3742_v13 = vld [vmem:[%s4070_s18 + $0x10] sm:$0xff]  }
  0x15   : > { %v3743_v14 = vld [vmem:[%s4070_s18 + $0x48] sm:$0xff]   ;;  %v3745_v16 = vld [vmem:[%s4070_s18 + $0x40] sm:$0xff]   ;;  %v3753_v19 = vld [vmem:[%s4070_s18 + $0xf8] sm:$0xff]  }
  0x16   : > { %v3744_v15 = vld [vmem:[%s4070_s18 + $0x8] sm:$0xff]   ;;  %v3746_v17 = vld [vmem:[%s4070_s18] sm:$0xff]   ;;  %v3754_v20 = vld [vmem:[%s4070_s18 + $0x178] sm:$0xff]  }
  0x17   : > { %3189 = vmatpush3.bf16.msra.mxu0 %v3734_v5  ;;  %3715 = vmatpush3.bf16.msra.mxu1 %v3734_v5  ;;  %v3755_v22 = vld [vmem:[%s4070_s18 + $0xb8] sm:$0xff]   ;;  %v3757_v26 = vld [vmem:[%s4070_s18 + $0xf0] sm:$0xff]   ;;  %v3765_v32 = vld [vmem:[%s4070_s18 + $0xe8] sm:$0xff]  }
  0x18   : > { %3190 = vmatprep.subr.bf16.mxu0 %v3735_v6  ;;  %3708 = vmatprep.subr.bf16.mxu1 %v3735_v6  ;;  %v3756_v24 = vld [vmem:[%s4070_s18 + $0x138] sm:$0xff]   ;;  %v3768_v27 = vld [vmem:[%s4070_s18 + $0x170] sm:$0xff]   ;;  %v3788_v34 = vld [vmem:[%s4070_s18 + $0x168] sm:$0xff]  }
  0x19   : > { %v3758_v28 = vld [vmem:[%s4070_s18 + $0xb0] sm:$0xff]   ;;  %v3766_v35 = vld [vmem:[%s4070_s18 + $0xa8] sm:$0xff]   ;;  %v3767_v36 = vld [vmem:[%s4070_s18 + $0xe0] sm:$0xff]  }
  0x1a   : > { %v3770_v29 = vld [vmem:[%s4070_s18 + $0x130] sm:$0xff]   ;;  %v3790_v38 = vld [vmem:[%s4070_s18 + $0x128] sm:$0xff]   ;;  %v3769_v39 = vld [vmem:[%s4070_s18 + $0xa0] sm:$0xff]  }
  0x1b   : > { %3191 = vmatpush3.bf16.msra.mxu0 %v3736_v7  ;;  %3716 = vmatpush3.bf16.msra.mxu1 %v3736_v7  ;;  %v3776_v41 = vld [vmem:[%s5430_s0 + $0x3f0] ss:$36 sps:$4 sm:$0xff]   ;;  %v3777_v42 = vld [vmem:[%s4070_s18 + $0xd8] sm:$0xff]   ;;  %v3801_v46 = vld [vmem:[%s4070_s18 + $0x160] sm:$0xff]  }
  0x1c   : > { %3192 = vmatprep.subr.bf16.mxu0 %v3737_v8  ;;  %3709 = vmatprep.subr.bf16.mxu1 %v3737_v8  ;;  %v3778_v43 = vld [vmem:[%s4070_s18 + $0x98] sm:$0xff]   ;;  %v3779_v44 = vld [vmem:[%s4070_s18 + $0xd0] sm:$0xff]   ;;  %v3802_v48 = vld [vmem:[%s4070_s18 + $0x120] sm:$0xff]  }
  0x1d   : > { %v3780_v49 = vld [vmem:[%s4070_s18 + $0x90] sm:$0xff]   ;;  %v3785_v50 = vld [vmem:[%s5430_s0 + $0xd8] ss:$36 sps:$4 sm:$0xff]   ;;  %v3787_v52 = vld [vmem:[%s4070_s18 + $0xc8] sm:$0xff]  }
  0x1e   : > { %v3786_v51 = vld [vmem:[%s5430_s0 + $0x438] ss:$36 sps:$4 sm:$0xff]   ;;  %v3789_v53 = vld [vmem:[%s4070_s18 + $0x88] sm:$0xff]   ;;  %v3791_v55 = vld [vmem:[%s4070_s18 + $0xc0] sm:$0xff]  }
  0x1f   : > { %3193 = vmatpush3.bf16.msra.mxu0 %v3738_v9  ;;  %3717 = vmatpush3.bf16.msra.mxu1 %v3738_v9  ;;  %v3815_v56 = vld [vmem:[%s4070_s18 + $0x158] sm:$0xff]   ;;  %v3797_v58 = vld [vmem:[%s5430_s0 + $0xc] ss:$36 sps:$4 sm:$0xff]   ;;  %v3792_v59 = vld [vmem:[%s4070_s18 + $0x80] sm:$0xff]  }
  0x20   : > { %3194 = vmatprep.subr.bf16.mxu0 %v3739_v10  ;;  %3710 = vmatprep.subr.bf16.mxu1 %v3739_v10  ;;  %v3816_v57 = vld [vmem:[%s4070_s18 + $0x118] sm:$0xff]   ;;  %v3798_v61 = vld [vmem:[%s5430_s0 + $0x120] ss:$36 sps:$4 sm:$0xff]   ;;  %v3825_v0 = vld [vmem:[%s4070_s18 + $0x150] sm:$0xff]  }
  0x21   : > { %v3799_v62 = vld [vmem:[%s4070_s18 + $0x1f8] sm:$0xff]   ;;  %v3826_v1 = vld [vmem:[%s4070_s18 + $0x110] sm:$0xff]   ;;  %v3807_v6 = vld [vmem:[%s5430_s0 + $0x168] ss:$36 sps:$4 sm:$0xff]  }
  0x22   : > { %v3800_v63 = vld [vmem:[%s4070_s18 + $0x1b8] sm:$0xff]   ;;  %v3803_v2 = vld [vmem:[%s5430_s0 + $0x16c] ss:$36 sps:$4 sm:$0xff]  }
  0x23   : > { %3195 = vmatpush3.bf16.msra.mxu0 %v3740_v11  ;;  %3718 = vmatpush3.bf16.msra.mxu1 %v3740_v11  ;;  %v3805_v3 = vld [vmem:[%s5430_s0 + $0x54] ss:$36 sps:$4 sm:$0xff]   ;;  %v3833_v8 = vld [vmem:[%s4070_s18 + $0x1e8] sm:$0xff]   ;;  %v3811_v10 = vld [vmem:[%s5430_s0 + $0x9c] ss:$36 sps:$4 sm:$0xff]  }
  0x24   : > { %3196 = vmatprep.subr.bf16.mxu0 %v3741_v12  ;;  %3711 = vmatprep.subr.bf16.mxu1 %v3741_v12  ;;  %v3817_v4 = vld [vmem:[%s4070_s18 + $0x1f0] sm:$0xff]   ;;  %v3841_v11 = vld [vmem:[%s4070_s18 + $0x148] sm:$0xff]  }
  0x25   : > { %v3818_v5 = vld [vmem:[%s4070_s18 + $0x1b0] sm:$0xff]   ;;  %v3842_v12 = vld [vmem:[%s4070_s18 + $0x108] sm:$0xff]  }
  0x26   : > { %v3808_v7 = vld [vmem:[%s5430_s0 + $0x50] ss:$36 sps:$4 sm:$0xff]  }
  0x27   : > { %3197 = vmatpush3.bf16.msra.mxu0 %v3742_v13  ;;  %3719 = vmatpush3.bf16.msra.mxu1 %v3742_v13  ;;  %v3809_v9 = vld [vmem:[%s5430_s0 + $0x1b4] ss:$36 sps:$4 sm:$0xff]   ;;  %v3834_v13 = vld [vmem:[%s4070_s18 + $0x1a8] sm:$0xff]  }
  0x28   : > { %3198 = vmatprep.subr.bf16.mxu0 %v3743_v14  ;;  %3712 = vmatprep.subr.bf16.mxu1 %v3743_v14  ;;  %v3849_v14 = vld [vmem:[%s4070_s18 + $0x1e0] sm:$0xff]  }
  0x2b   : > { %3199 = vmatpush3.bf16.msra.mxu0 %v3744_v15  ;;  %3720 = vmatpush3.bf16.msra.mxu1 %v3744_v15  ;;  %v3813_v15 = vld [vmem:[%s5430_s0 + $0x1b0] ss:$36 sps:$4 sm:$0xff]  }
  0x2c   : > { %3200 = vmatprep.subr.bf16.mxu0 %v3745_v16  ;;  %3713 = vmatprep.subr.bf16.mxu1 %v3745_v16  ;;  %v3814_v16 = vld [vmem:[%s5430_s0 + $0x98] ss:$36 sps:$4 sm:$0xff]  }
  0x2f   : > { %3201 = vmatpush3.bf16.msra.mxu0 %v3746_v17  ;;  %3721 = vmatpush3.bf16.msra.mxu1 %v3746_v17  ;;  %v3850_v17 = vld [vmem:[%s4070_s18 + $0x1a0] sm:$0xff]  }
  0x30   : > { %3298 = vmatprep.subr.bf16.mxu1 %v3753_v19  ;;  %3410 = vmatprep.subr.bf16.mxu0 %v3754_v20  ;;  %v3851_v19 = vld [vmem:[%s4070_s18 + $0x140] sm:$0xff]  }
  0x31   : > { %v3852_v20 = vld [vmem:[%s4070_s18 + $0x100] sm:$0xff]  }
  0x32   : > { %1650 = vmatmul.mubr.bf16.vlgmr.msra.gmra.mxu0 %v3747_v18  ;;  %1746 = vmatmul.mubr.bf16.vlgmr.msra.gmra.mxu1 %v3750_v21  ;;  %v3819_v18 = vld [vmem:[%s5430_s0 + $0x1fc] ss:$36 sps:$4 sm:$0xff]   ;;  %v3821_v21 = vld [vmem:[%s5430_s0 + $0xe4] ss:$36 sps:$4 sm:$0xff]  }
  0x33   : > { %3299 = vmatpush3.bf16.msra.mxu1 %v3755_v22  ;;  %3411 = vmatpush3.bf16.msra.mxu0 %v3756_v24  ;;  %v3823_v22 = vld [vmem:[%s5430_s0 + $0x1f8] ss:$36 sps:$4 sm:$0xff]  }
  0x34   : > { %3300 = vmatprep.subr.bf16.mxu1 %v3757_v26  ;;  %1657 = vmatprep.mubr.bf16.mxu0 %v3759_v23  ;;  %v3824_v23 = vld [vmem:[%s5430_s0 + $0xe0] ss:$36 sps:$4 sm:$0xff]   ;;  %v3865_v24 = vld [vmem:[%s4070_s18 + $0x238] sm:$0xff]  }
  0x35   : > { %1753 = vmatprep.mubr.bf16.mxu1 %v3761_v25  ;;  %3412 = vmatprep.subr.bf16.mxu0 %v3768_v27  ;;  %v3827_v25 = vld [vmem:[%s5430_s0 + $0x244] ss:$36 sps:$4 sm:$0xff]   ;;  %v3866_v26 = vld [vmem:[%s4070_s18 + $0x1d8] sm:$0xff]  }
  0x36   : > { %v3867_v27 = vld [vmem:[%s4070_s18 + $0x198] sm:$0xff]  }
  0x37   : > { %3301 = vmatpush3.bf16.msra.mxu1 %v3758_v28  ;;  %3413 = vmatpush3.bf16.msra.mxu0 %v3770_v29  ;;  %v3829_v28 = vld [vmem:[%s5430_s0 + $0x12c] ss:$36 sps:$4 sm:$0xff]   ;;  %v3831_v29 = vld [vmem:[%s5430_s0 + $0x240] ss:$36 sps:$4 sm:$0xff]  }
  0x38   : > { %3302 = vmatprep.subr.bf16.mxu1 %v3765_v32  ;;  %3414 = vmatprep.subr.bf16.mxu0 %v3788_v34  ;;  %v3881_v32 = vld [vmem:[%s4070_s18 + $0x1d0] sm:$0xff]  }
  0x39   : > { %v3837_v34 = vld [vmem:[%s5430_s0 + $0x174] ss:$36 sps:$4 sm:$0xff]  }
  0x3a   : > { %1658 = vmatmul.mubr.bf16.gmra.mxu0 %v3763_v30  ;;  %1754 = vmatmul.mubr.bf16.gmra.mxu1 %v3764_v31  ;;  %v3832_v30 = vld [vmem:[%s5430_s0 + $0x128] ss:$36 sps:$4 sm:$0xff]  }
  0x3b   : > { %3303 = vmatpush3.bf16.msra.mxu1 %v3766_v35  ;;  %1665 = vmatprep.mubr.bf16.mxu0 %v3771_v33  ;;  %v3835_v31 = vld [vmem:[%s5430_s0 + $0x28c] ss:$36 sps:$4 sm:$0xff]  }
  0x3c   : > { %3304 = vmatprep.subr.bf16.mxu1 %v3767_v36  ;;  %1761 = vmatprep.mubr.bf16.mxu1 %v3773_v37  ;;  %v3882_v33 = vld [vmem:[%s4070_s18 + $0x190] sm:$0xff]   ;;  %v3839_v35 = vld [vmem:[%s5430_s0 + $0x288] ss:$36 sps:$4 sm:$0xff]  }
  0x3d   : > { %3415 = vmatpush3.bf16.msra.mxu0 %v3790_v38  ;;  %v3840_v36 = vld [vmem:[%s5430_s0 + $0x170] ss:$36 sps:$4 sm:$0xff]   ;;  %v3845_v38 = vld [vmem:[%s5430_s0 + $0x1bc] ss:$36 sps:$4 sm:$0xff]  }
  0x3e   : > { %3416 = vmatprep.subr.bf16.mxu0 %v3801_v46  ;;  %v3843_v37 = vld [vmem:[%s5430_s0 + $0x2d4] ss:$36 sps:$4 sm:$0xff]   ;;  %v3912_v46 = vld [vmem:[%s4070_s18 + $0x180] sm:$0xff]  }
  0x3f   : > { %3305 = vmatpush3.bf16.msra.mxu1 %v3769_v39  ;;  %v3896_v39 = vld [vmem:[%s4070_s18 + $0x1c8] sm:$0xff]  }
  0x40   : > { %3306 = vmatprep.subr.bf16.mxu1 %v3777_v42  ;;  %v3848_v42 = vld [vmem:[%s5430_s0 + $0x1b8] ss:$36 sps:$4 sm:$0xff]  }
  0x41   : > { %3417 = vmatpush3.bf16.msra.mxu0 %v3802_v48  ;;  %v3858_v48 = vld [vmem:[%s5430_s0 + $0x200] ss:$36 sps:$4 sm:$0xff]  }
  0x42   : > { %1666 = vmatmul.mubr.bf16.gmra.mxu0 %v3775_v40  ;;  %1762 = vmatmul.mubr.bf16.gmra.mxu1 %v3776_v41  ;;  %v3897_v40 = vld [vmem:[%s4070_s18 + $0x188] sm:$0xff]   ;;  %v3847_v41 = vld [vmem:[%s5430_s0 + $0x2d0] ss:$36 sps:$4 sm:$0xff]  }
  0x43   : > { %3307 = vmatpush3.bf16.msra.mxu1 %v3778_v43  ;;  %1673 = vmatprep.mubr.bf16.mxu0 %v3781_v45  ;;  %v3853_v43 = vld [vmem:[%s5430_s0 + $0x31c] ss:$36 sps:$4 sm:$0xff]  }
  0x44   : > { %3308 = vmatprep.subr.bf16.mxu1 %v3779_v44  ;;  %1769 = vmatprep.mubr.bf16.mxu1 %v3783_v47  ;;  %v3855_v44 = vld [vmem:[%s5430_s0 + $0x204] ss:$36 sps:$4 sm:$0xff]   ;;  %v3857_v47 = vld [vmem:[%s5430_s0 + $0x318] ss:$36 sps:$4 sm:$0xff]  }
  0x45   : > { %3418 = vmatprep.subr.bf16.mxu0 %v3815_v56  ;;  %v3911_v45 = vld [vmem:[%s4070_s18 + $0x1c0] sm:$0xff]   ;;  %v3895_v56 = vld [vmem:[%s4070_s18 + $0x228] sm:$0xff]  }
  0x46   : > { %3419 = vmatpush3.bf16.msra.mxu0 %v3816_v57  ;;  %v3872_v57 = vld [vmem:[%s5430_s0 + $0x290] ss:$36 sps:$4 sm:$0xff]  }
  0x47   : > { %3309 = vmatpush3.bf16.msra.mxu1 %v3780_v49  ;;  %3420 = vmatprep.subr.bf16.mxu0 %v3825_v0  ;;  %v3859_v49 = vld [vmem:[%s5430_s0 + $0x24c] ss:$36 sps:$4 sm:$0xff]   ;;  %v3925_v0 = vld [vmem:[%s4070_s18 + $0x218] sm:$0xff]  }
  0x48   : > { %3310 = vmatprep.subr.bf16.mxu1 %v3787_v52  ;;  %v3864_v52 = vld [vmem:[%s5430_s0 + $0x248] ss:$36 sps:$4 sm:$0xff]  }
  0x4a   : > { %1674 = vmatmul.mubr.bf16.gmra.mxu0 %v3785_v50  ;;  %1770 = vmatmul.mubr.bf16.gmra.mxu1 %v3786_v51  ;;  %v3863_v50 = vld [vmem:[%s5430_s0 + $0x14] ss:$36 sps:$4 sm:$0xff]  }
  0x4b   : > { %3311 = vmatpush3.bf16.msra.mxu1 %v3789_v53  ;;  %1681 = vmatprep.mubr.bf16.mxu0 %v3793_v54  ;;  %v3861_v51 = vld [vmem:[%s5430_s0 + $0x10] ss:$36 sps:$4 sm:$0xff]   ;;  %v3870_v54 = vld [vmem:[%s5430_s0 + $0x5c] ss:$36 sps:$4 sm:$0xff]  }
  0x4c   : > { %3312 = vmatprep.subr.bf16.mxu1 %v3791_v55  ;;  %1810 = vmatprep.mubr.bf16.mxu1 %v3797_v58  ;;  %v3868_v53 = vld [vmem:[%s5430_s0 + $0x294] ss:$36 sps:$4 sm:$0xff]  }
  0x4d   : > { %3421 = vmatpush3.bf16.msra.mxu0 %v3826_v1  ;;  %v3880_v55 = vld [vmem:[%s4070_s18 + $0x230] sm:$0xff]   ;;  %v3873_v58 = vld [vmem:[%s5430_s0 + $0x58] ss:$36 sps:$4 sm:$0xff]   ;;  %v3883_v1 = vld [vmem:[%s5430_s0 + $0x324] ss:$36 sps:$4 sm:$0xff]  }
  0x4e   : > { %3422 = vmatprep.subr.bf16.mxu0 %v3841_v11  ;;  %v3894_v11 = vld [vmem:[%s5430_s0 + $0x130] ss:$36 sps:$4 sm:$0xff]  }
  0x4f   : > { %3313 = vmatpush3.bf16.msra.mxu1 %v3792_v59  ;;  %v3874_v59 = vld [vmem:[%s5430_s0 + $0x2dc] ss:$36 sps:$4 sm:$0xff]  }
  0x50   : > { %3522 = vmatprep.subr.bf16.mxu1 %v3799_v62  ;;  %v3878_v62 = vld [vmem:[%s5430_s0 + $0x2d8] ss:$36 sps:$4 sm:$0xff]  }
  0x51   : > { %3423 = vmatpush3.bf16.msra.mxu0 %v3842_v12  ;;  %v3898_v12 = vld [vmem:[%s5430_s0 + $0x3b4] ss:$36 sps:$4 sm:$0xff]  }
  0x52   : > { %1682 = vmatmul.mubr.bf16.gmra.mxu0 %v3798_v61  ;;  %1811 = vmatmul.mubr.bf16.vlgmr.msra.gmra.mxu1 %v3795_v60  ;;  %v3876_v60 = vld [vmem:[%s5430_s0 + $0xa4] ss:$36 sps:$4 sm:$0xff]  }
  0x53   : > { %3523 = vmatpush3.bf16.msra.mxu1 %v3800_v63  ;;  %1689 = vmatprep.mubr.bf16.mxu0 %v3803_v2  ;;  %v3910_v61 = vld [vmem:[%s4070_s18 + $0x220] sm:$0xff]   ;;  %v3885_v2 = vld [vmem:[%s5430_s0 + $0xec] ss:$36 sps:$4 sm:$0xff]  }
  0x54   : > { %1818 = vmatprep.mubr.bf16.mxu1 %v3805_v3  ;;  %3524 = vmatprep.subr.bf16.mxu1 %v3817_v4  ;;  %v3879_v63 = vld [vmem:[%s5430_s0 + $0xa0] ss:$36 sps:$4 sm:$0xff]   ;;  %v3938_v3 = vld [vmem:[%s4070_s18 + $0x210] sm:$0xff]  }
  0x55   : > { %3424 = vmatprep.subr.bf16.mxu0 %v3851_v19  ;;  %v3887_v4 = vld [vmem:[%s5430_s0 + $0x320] ss:$36 sps:$4 sm:$0xff]  }
  0x56   : > { %3425 = vmatpush3.bf16.msra.mxu0 %v3852_v20  ;;  %v3909_v19 = vld [vmem:[%s5430_s0 + $0x1c0] ss:$36 sps:$4 sm:$0xff]  }
  0x57   : > { %3525 = vmatpush3.bf16.msra.mxu1 %v3818_v5  ;;  %3658 = vmatprep.subr.bf16.mxu0 %v3865_v24  ;;  %v3888_v5 = vld [vmem:[%s5430_s0 + $0xe8] ss:$36 sps:$4 sm:$0xff]  }
  0x58   : > { %3526 = vmatprep.subr.bf16.mxu1 %v3833_v8  ;;  %v3891_v8 = vld [vmem:[%s5430_s0 + $0x134] ss:$36 sps:$4 sm:$0xff]   ;;  %v3913_v20 = vld [vmem:[%s5430_s0 + $0x444] ss:$36 sps:$4 sm:$0xff]  }
  0x5a   : > { %1690 = vmatmul.mubr.bf16.gmra.mxu0 %v3807_v6  ;;  %1819 = vmatmul.mubr.bf16.gmra.mxu1 %v3808_v7  ;;  %v3951_v6 = vld [vmem:[%s4070_s18 + $0x208] sm:$0xff]  }
  0x5b   : > { %1697 = vmatprep.mubr.bf16.mxu0 %v3809_v9  ;;  %1826 = vmatprep.mubr.bf16.mxu1 %v3811_v10  ;;  %v3889_v7 = vld [vmem:[%s5430_s0 + $0x36c] ss:$36 sps:$4 sm:$0xff]   ;;  %v3964_v9 = vld [vmem:[%s4070_s18 + $0x200] sm:$0xff]  }
  0x5c   : > { %3527 = vmatpush3.bf16.msra.mxu1 %v3834_v13  ;;  %v3893_v10 = vld [vmem:[%s5430_s0 + $0x368] ss:$36 sps:$4 sm:$0xff]   ;;  %v3900_v13 = vld [vmem:[%s5430_s0 + $0x17c] ss:$36 sps:$4 sm:$0xff]  }
  0x5d   : > { %3528 = vmatprep.subr.bf16.mxu1 %v3849_v14  ;;  %v3902_v14 = vld [vmem:[%s5430_s0 + $0x3b0] ss:$36 sps:$4 sm:$0xff]  }
  0x60   : > { %3529 = vmatpush3.bf16.msra.mxu1 %v3850_v17  ;;  %v3906_v17 = vld [vmem:[%s5430_s0 + $0x1c4] ss:$36 sps:$4 sm:$0xff]  }
  0x61   : > { %3530 = vmatprep.subr.bf16.mxu1 %v3866_v26  ;;  %v3921_v26 = vld [vmem:[%s5430_s0 + $0x18] ss:$36 sps:$4 sm:$0xff]  }
  0x62   : > { %1698 = vmatmul.mubr.bf16.gmra.mxu0 %v3813_v15  ;;  %1827 = vmatmul.mubr.bf16.gmra.mxu1 %v3814_v16  ;;  %v3903_v15 = vld [vmem:[%s5430_s0 + $0x178] ss:$36 sps:$4 sm:$0xff]  }
  0x63   : > { %1705 = vmatprep.mubr.bf16.mxu0 %v3819_v18  ;;  %1834 = vmatprep.mubr.bf16.mxu1 %v3821_v21  ;;  %v3904_v16 = vld [vmem:[%s5430_s0 + $0x3fc] ss:$36 sps:$4 sm:$0xff]   ;;  %v3915_v21 = vld [vmem:[%s5430_s0 + $0x20c] ss:$36 sps:$4 sm:$0xff]  }
  0x64   : > { %3531 = vmatpush3.bf16.msra.mxu1 %v3867_v27  ;;  %v3908_v18 = vld [vmem:[%s5430_s0 + $0x3f8] ss:$36 sps:$4 sm:$0xff]   ;;  %v3924_v27 = vld [vmem:[%s5430_s0 + $0x250] ss:$36 sps:$4 sm:$0xff]  }
  0x65   : > { %3532 = vmatprep.subr.bf16.mxu1 %v3881_v32  ;;  %v3932_v32 = vld [vmem:[%s5430_s0 + $0x2e4] ss:$36 sps:$4 sm:$0xff]  }
  0x68   : > { %3533 = vmatpush3.bf16.msra.mxu1 %v3882_v33  ;;  %v3934_v33 = vld [vmem:[%s5430_s0 + $0xac] ss:$36 sps:$4 sm:$0xff]  }
  0x69   : > { %3534 = vmatprep.subr.bf16.mxu1 %v3896_v39  ;;  %v3944_v39 = vld [vmem:[%s5430_s0 + $0xf0] ss:$36 sps:$4 sm:$0xff]  }
  0x6a   : > { %1706 = vmatmul.mubr.bf16.gmra.mxu0 %v3823_v22  ;;  %1835 = vmatmul.mubr.bf16.gmra.mxu1 %v3824_v23  ;;  %v3917_v22 = vld [vmem:[%s5430_s0 + $0x440] ss:$36 sps:$4 sm:$0xff]   ;;  %v3918_v23 = vld [vmem:[%s5430_s0 + $0x208] ss:$36 sps:$4 sm:$0xff]  }
  0x6b   : > { %1713 = vmatprep.mubr.bf16.mxu0 %v3827_v25  ;;  %1842 = vmatprep.mubr.bf16.mxu1 %v3829_v28  ;;  %v3923_v25 = vld [vmem:[%s5430_s0 + $0x1c] ss:$36 sps:$4 sm:$0xff]  }
  0x6c   : > { %3535 = vmatpush3.bf16.msra.mxu1 %v3897_v40  ;;  %v3926_v28 = vld [vmem:[%s5430_s0 + $0x29c] ss:$36 sps:$4 sm:$0xff]   ;;  %v3945_v40 = vld [vmem:[%s5430_s0 + $0x374] ss:$36 sps:$4 sm:$0xff]  }
  0x6d   : > { %3536 = vmatprep.subr.bf16.mxu1 %v3911_v45  ;;  %v3954_v45 = vld [vmem:[%s5430_s0 + $0x184] ss:$36 sps:$4 sm:$0xff]  }
  0x70   : > { %3537 = vmatpush3.bf16.msra.mxu1 %v3912_v46 }
  0x72   : > { %1714 = vmatmul.mubr.bf16.gmra.mxu0 %v3831_v29  ;;  %1843 = vmatmul.mubr.bf16.gmra.mxu1 %v3832_v30  ;;  %v3928_v29 = vld [vmem:[%s5430_s0 + $0x64] ss:$36 sps:$4 sm:$0xff]   ;;  %v3930_v30 = vld [vmem:[%s5430_s0 + $0x298] ss:$36 sps:$4 sm:$0xff]  }
  0x73   : > { %1721 = vmatprep.mubr.bf16.mxu0 %v3835_v31  ;;  %1850 = vmatprep.mubr.bf16.mxu1 %v3837_v34  ;;  %v3931_v31 = vld [vmem:[%s5430_s0 + $0x60] ss:$36 sps:$4 sm:$0xff]  }
  0x74   : > { %v3936_v34 = vld [vmem:[%s5430_s0 + $0x2e0] ss:$36 sps:$4 sm:$0xff]  }
  0x7a   : > { %1722 = vmatmul.mubr.bf16.gmra.mxu0 %v3839_v35  ;;  %1851 = vmatmul.mubr.bf16.gmra.mxu1 %v3840_v36  ;;  %v3937_v35 = vld [vmem:[%s5430_s0 + $0xa8] ss:$36 sps:$4 sm:$0xff]  }
  0x7b   : > { %1729 = vmatprep.mubr.bf16.mxu0 %v3843_v37  ;;  %1858 = vmatprep.mubr.bf16.mxu1 %v3845_v38  ;;  %v3939_v36 = vld [vmem:[%s5430_s0 + $0x32c] ss:$36 sps:$4 sm:$0xff]   ;;  %v3941_v37 = vld [vmem:[%s5430_s0 + $0xf4] ss:$36 sps:$4 sm:$0xff]  }
  0x7c   : > { %v3943_v38 = vld [vmem:[%s5430_s0 + $0x328] ss:$36 sps:$4 sm:$0xff]  }
  0x82   : > { %1730 = vmatmul.mubr.bf16.gmra.mxu0 %v3847_v41  ;;  %1859 = vmatmul.mubr.bf16.gmra.mxu1 %v3848_v42  ;;  %v3947_v41 = vld [vmem:[%s5430_s0 + $0x13c] ss:$36 sps:$4 sm:$0xff]   ;;  %v3949_v42 = vld [vmem:[%s5430_s0 + $0x370] ss:$36 sps:$4 sm:$0xff]  }
  0x83   : > { %1737 = vmatprep.mubr.bf16.mxu0 %v3853_v43  ;;  %1866 = vmatprep.mubr.bf16.mxu1 %v3855_v44  ;;  %v3950_v43 = vld [vmem:[%s5430_s0 + $0x138] ss:$36 sps:$4 sm:$0xff]  }
  0x84   : > { %v3952_v44 = vld [vmem:[%s5430_s0 + $0x3bc] ss:$36 sps:$4 sm:$0xff]  }
  0x8a   : > { %1738 = vmatmul.mubr.bf16.gmra.mxu0 %v3857_v47  ;;  %1867 = vmatmul.mubr.bf16.gmra.mxu1 %v3858_v48 }
  0x8b   : > { %1874 = vmatprep.mubr.bf16.mxu1 %v3859_v49  ;;  %1971 = vmatprep.mubr.bf16.mxu0 %v3863_v50 }
  0x92   : > { %1875 = vmatmul.mubr.bf16.gmra.mxu1 %v3864_v52  ;;  %1972 = vmatmul.mubr.bf16.vlgmr.msra.gmra.mxu0 %v3861_v51 }
  0x93   : > { %3659 = vmatpush3.bf16.msra.mxu0 %v3865_v24  ;;  %1882 = vmatprep.mubr.bf16.mxu1 %v3868_v53  ;;  %v3919_v24 = vld [vmem:[%s5430_s0 + $0x254] ss:$36 sps:$4 sm:$0xff]  }
  0x94   : > { %1979 = vmatprep.mubr.bf16.mxu0 %v3870_v54  ;;  %3660 = vmatprep.subr.bf16.mxu0 %v3880_v55  ;;  %v3956_v54 = vld [vmem:[%s5430_s0 + $0x3b8] ss:$36 sps:$4 sm:$0xff]  }
  0x97   : > { %3661 = vmatpush3.bf16.msra.mxu0 %v3880_v55  ;;  %v3957_v55 = vld [vmem:[%s5430_s0 + $0x180] ss:$36 sps:$4 sm:$0xff]  }
  0x98   : > { %3662 = vmatprep.subr.bf16.mxu0 %v3895_v56 }
  0x9a   : > { %1883 = vmatmul.mubr.bf16.gmra.mxu1 %v3872_v57  ;;  %1980 = vmatmul.mubr.bf16.gmra.mxu0 %v3873_v58  ;;  %v3960_v57 = vld [vmem:[%s5430_s0 + $0x1cc] ss:$36 sps:$4 sm:$0xff]  }
  0x9b   : > { %1890 = vmatprep.mubr.bf16.mxu1 %v3874_v59  ;;  %1987 = vmatprep.mubr.bf16.mxu0 %v3876_v60 }
  0x9c   : > { %3663 = vmatpush3.bf16.msra.mxu0 %v3895_v56  ;;  %v3958_v56 = vld [vmem:[%s5430_s0 + $0x404] ss:$36 sps:$4 sm:$0xff]  }
  0x9d   : > { %3664 = vmatprep.subr.bf16.mxu0 %v3910_v61 }
  0xa0   : > { %3665 = vmatpush3.bf16.msra.mxu0 %v3910_v61 }
  0xa1   : > { %3666 = vmatprep.subr.bf16.mxu0 %v3925_v0 }
  0xa2   : > { %1891 = vmatmul.mubr.bf16.gmra.mxu1 %v3878_v62  ;;  %1988 = vmatmul.mubr.bf16.gmra.mxu0 %v3879_v63 }
  0xa3   : > { %1898 = vmatprep.mubr.bf16.mxu1 %v3883_v1  ;;  %1995 = vmatprep.mubr.bf16.mxu0 %v3885_v2 }
  0xa4   : > { %3667 = vmatpush3.bf16.msra.mxu0 %v3925_v0 }
  0xa5   : > { %3668 = vmatprep.subr.bf16.mxu0 %v3938_v3 }
  0xa8   : > { %3669 = vmatpush3.bf16.msra.mxu0 %v3938_v3 }
  0xa9   : > { %3670 = vmatprep.subr.bf16.mxu0 %v3951_v6 }
  0xaa   : > { %1899 = vmatmul.mubr.bf16.gmra.mxu1 %v3887_v4  ;;  %1996 = vmatmul.mubr.bf16.gmra.mxu0 %v3888_v5 }
  0xab   : > { %1906 = vmatprep.mubr.bf16.mxu1 %v3889_v7  ;;  %2003 = vmatprep.mubr.bf16.mxu0 %v3891_v8  ;;  %v3963_v7 = vld [vmem:[%s5430_s0 + $0x1c8] ss:$36 sps:$4 sm:$0xff]  }
  0xac   : > { %3671 = vmatpush3.bf16.msra.mxu0 %v3951_v6  ;;  %v3962_v6 = vld [vmem:[%s5430_s0 + $0x400] ss:$36 sps:$4 sm:$0xff]   ;;  %v3965_v8 = vld [vmem:[%s5430_s0 + $0x44c] ss:$36 sps:$4 sm:$0xff]  }
  0xad   : > { %3672 = vmatprep.subr.bf16.mxu0 %v3964_v9 }
  0xb0   : > { %3673 = vmatpush3.bf16.msra.mxu0 %v3964_v9  ;;  %v3967_v9 = vld [vmem:[%s5430_s0 + $0x214] ss:$36 sps:$4 sm:$0xff]  }
  0xb2   : > { %1907 = vmatmul.mubr.bf16.gmra.mxu1 %v3893_v10  ;;  %2004 = vmatmul.mubr.bf16.gmra.mxu0 %v3894_v11 }
  0xb3   : > { %1914 = vmatprep.mubr.bf16.mxu1 %v3898_v12  ;;  %2011 = vmatprep.mubr.bf16.mxu0 %v3900_v13 }
  0xba   : > { %1915 = vmatmul.mubr.bf16.gmra.mxu1 %v3902_v14  ;;  %2012 = vmatmul.mubr.bf16.gmra.mxu0 %v3903_v15 }
  0xbb   : > { %1922 = vmatprep.mubr.bf16.mxu1 %v3904_v16  ;;  %2019 = vmatprep.mubr.bf16.mxu0 %v3906_v17 }
  0xc2   : > { %1923 = vmatmul.mubr.bf16.gmra.mxu1 %v3908_v18  ;;  %2020 = vmatmul.mubr.bf16.gmra.mxu0 %v3909_v19 }
  0xc3   : > { %1930 = vmatprep.mubr.bf16.mxu1 %v3913_v20  ;;  %2027 = vmatprep.mubr.bf16.mxu0 %v3915_v21 }
  0xca   : > { %1931 = vmatmul.mubr.bf16.gmra.mxu1 %v3917_v22  ;;  %2028 = vmatmul.mubr.bf16.gmra.mxu0 %v3918_v23  ;;  %v3969_v22 = vld [vmem:[%s5430_s0 + $0x448] ss:$36 sps:$4 sm:$0xff]   ;;  %v3970_v23 = vld [vmem:[%s5430_s0 + $0x210] ss:$36 sps:$4 sm:$0xff]  }
  0xcb   : > { %2035 = vmatprep.mubr.bf16.mxu0 %v3919_v24  ;;  %2132 = vmatprep.mubr.bf16.mxu1 %v3923_v25  ;;  %v3973_v24 = vld [vmem:[%s5430_s0 + $0x25c] ss:$36 sps:$4 sm:$0xff]  }
  0xcc   : > { %v3974_v25 = vld [vmem:[%s5430_s0 + $0x20] ss:$36 sps:$4 sm:$0xff]  }
  0xd2   : > { %2036 = vmatmul.mubr.bf16.gmra.mxu0 %v3924_v27  ;;  %2133 = vmatmul.mubr.bf16.vlgmr.msra.gmra.mxu1 %v3921_v26 }
  0xd3   : > { %2043 = vmatprep.mubr.bf16.mxu0 %v3926_v28  ;;  %2140 = vmatprep.mubr.bf16.mxu1 %v3928_v29 }
  0xda   : > { %2044 = vmatmul.mubr.bf16.gmra.mxu0 %v3930_v30  ;;  %2141 = vmatmul.mubr.bf16.gmra.mxu1 %v3931_v31 }
  0xdb   : > { %2051 = vmatprep.mubr.bf16.mxu0 %v3932_v32  ;;  %2148 = vmatprep.mubr.bf16.mxu1 %v3934_v33 }
  0xe2   : > { %2052 = vmatmul.mubr.bf16.gmra.mxu0 %v3936_v34  ;;  %2149 = vmatmul.mubr.bf16.gmra.mxu1 %v3937_v35 }
  0xe3   : > { %2059 = vmatprep.mubr.bf16.mxu0 %v3939_v36  ;;  %2156 = vmatprep.mubr.bf16.mxu1 %v3941_v37 }
  0xea   : > { %2060 = vmatmul.mubr.bf16.gmra.mxu0 %v3943_v38  ;;  %2157 = vmatmul.mubr.bf16.gmra.mxu1 %v3944_v39  ;;  %v3971_v38 = vld [vmem:[%s5430_s0 + $0x258] ss:$36 sps:$4 sm:$0xff]   ;;  %v3975_v39 = vld [vmem:[%s5430_s0 + $0x68] ss:$36 sps:$4 sm:$0xff]  }
  0xeb   : > { %2067 = vmatprep.mubr.bf16.mxu0 %v3945_v40  ;;  %2164 = vmatprep.mubr.bf16.mxu1 %v3947_v41  ;;  %v3978_v40 = vld [vmem:[%s5430_s0 + $0x2a4] ss:$36 sps:$4 sm:$0xff]   ;;  %v3979_v41 = vld [vmem:[%s5430_s0 + $0xb0] ss:$36 sps:$4 sm:$0xff]  }
  0xf2   : > { %v3202_v46 = vpop.f32.mrf.mxu0  ;;  %v3274_v47 = vpop.f32.mrf.mxu1  ;;  %2068 = vmatmul.mubr.bf16.gmra.mxu0 %v3949_v42  ;;  %2165 = vmatmul.mubr.bf16.gmra.mxu1 %v3950_v43 }
  0xf3   : > { %2075 = vmatprep.mubr.bf16.mxu0 %v3952_v44  ;;  %2172 = vmatprep.mubr.bf16.mxu1 %v3954_v45 }
  0xf4   : > { %v3203_v48 = vpop.f32.mrf.mxu0  ;;  %v3275_v49 = vpop.f32.mrf.mxu1 }
  0xf5   : > { %v4444_v50 = vadd.f32 %v3203_v48, %v3202_v46  ;;  %v4446_v51 = vadd.f32 %v3275_v49, %v3274_v47 }
  0xf6   : > { %v3205_v52 = vpop.f32.mrf.mxu0  ;;  %v3277_v53 = vpop.f32.mrf.mxu1 }
  0xf8   : > { %v3206_v58 = vpop.f32.mrf.mxu0  ;;  %v3278_v59 = vpop.f32.mrf.mxu1 }
  0xf9   : > { %v4460_v60 = vadd.f32 %v3206_v58, %v3205_v52  ;;  %v4462_v61 = vadd.f32 %v3278_v59, %v3277_v53  ;;  %v3983_v59 = vld [vmem:[%s5430_s0 + $0x2ec] ss:$36 sps:$4 sm:$0xff]  }
  0xfa   : > { %v3208_v62 = vpop.f32.mrf.mxu0  ;;  %v3280_v63 = vpop.f32.mrf.mxu1  ;;  %2076 = vmatmul.mubr.bf16.gmra.mxu0 %v3956_v54  ;;  %2173 = vmatmul.mubr.bf16.gmra.mxu1 %v3957_v55 }
  0xfb   : > { %2083 = vmatprep.mubr.bf16.mxu0 %v3958_v56  ;;  %2180 = vmatprep.mubr.bf16.mxu1 %v3960_v57  ;;  %v3976_v56 = vld [vmem:[%s5430_s0 + $0x2a0] ss:$36 sps:$4 sm:$0xff]   ;;  %v3980_v57 = vld [vmem:[%s5430_s0 + $0xf8] ss:$36 sps:$4 sm:$0xff]  }
  0xfc   : > { %v3209_v0 = vpop.f32.mrf.mxu0  ;;  %v3281_v1 = vpop.f32.mrf.mxu1 }
  0xfd   : > { %v4464_v2 = vadd.f32 %v3209_v0, %v3208_v62  ;;  %v4466_v3 = vadd.f32 %v3281_v1, %v3280_v63  ;;  %v3984_v62 = vld [vmem:[%s5430_s0 + $0x140] ss:$36 sps:$4 sm:$0xff]  }
  0xfe   : > { %v3211_v4 = vpop.f32.mrf.mxu0  ;;  %v3283_v5 = vpop.f32.mrf.mxu1 }
 0x100   : > { %v3212_v10 = vpop.f32.mrf.mxu0  ;;  %v3284_v11 = vpop.f32.mrf.mxu1 }
 0x101   : > { %v4480_v12 = vadd.f32 %v3212_v10, %v3211_v4  ;;  %v4482_v13 = vadd.f32 %v3284_v11, %v3283_v5 }
 0x102   : > { %v3214_v14 = vpop.f32.mrf.mxu0  ;;  %v3286_v15 = vpop.f32.mrf.mxu1  ;;  %2084 = vmatmul.mubr.bf16.gmra.mxu0 %v3962_v6  ;;  %2181 = vmatmul.mubr.bf16.gmra.mxu1 %v3963_v7 }
 0x103   : > { %2091 = vmatprep.mubr.bf16.mxu0 %v3965_v8  ;;  %2188 = vmatprep.mubr.bf16.mxu1 %v3967_v9 }
 0x104   : > { %v3215_v16 = vpop.f32.mrf.mxu0  ;;  %v3287_v17 = vpop.f32.mrf.mxu1 }
 0x105   : > { %v4484_v18 = vadd.f32 %v3215_v16, %v3214_v14  ;;  %v4486_v19 = vadd.f32 %v3287_v17, %v3286_v15  ;;  %v3981_v15 = vld [vmem:[%s5430_s0 + $0x2e8] ss:$36 sps:$4 sm:$0xff]   ;;  %v3988_v17 = vld [vmem:[%s5430_s0 + $0x334] ss:$36 sps:$4 sm:$0xff]  }
 0x106   : > { %v3217_v20 = vpop.f32.mrf.mxu0  ;;  %v3289_v21 = vpop.f32.mrf.mxu1  ;;  %v3985_v16 = vld [vmem:[%s5430_s0 + $0x188] ss:$36 sps:$4 sm:$0xff]  }
 0x108   : > { %v3218_v26 = vpop.f32.mrf.mxu0  ;;  %v3290_v27 = vpop.f32.mrf.mxu1 }
 0x109   : > { %v4500_v28 = vadd.f32 %v3218_v26, %v3217_v20  ;;  %v4502_v29 = vadd.f32 %v3290_v27, %v3289_v21  ;;  %v3989_v20 = vld [vmem:[%s5430_s0 + $0x1d0] ss:$36 sps:$4 sm:$0xff]  }
 0x10a   : > { %v3220_v30 = vpop.f32.mrf.mxu0  ;;  %v3292_v31 = vpop.f32.mrf.mxu1  ;;  %2092 = vmatmul.mubr.bf16.gmra.mxu0 %v3969_v22  ;;  %2189 = vmatmul.mubr.bf16.gmra.mxu1 %v3970_v23 }
 0x10b   : > { %2196 = vmatprep.mubr.bf16.mxu1 %v3973_v24  ;;  %3674 = vmatprep.mubr.bf16.mxu0 %v3974_v25 }
 0x10c   : > { %v3221_v32 = vpop.f32.mrf.mxu0  ;;  %v3293_v33 = vpop.f32.mrf.mxu1 }
 0x10d   : > { %v4504_v34 = vadd.f32 %v3221_v32, %v3220_v30  ;;  %v4506_v35 = vadd.f32 %v3293_v33, %v3292_v31 }
 0x10e   : > { %v3223_v36 = vpop.f32.mrf.mxu0  ;;  %v3295_v37 = vpop.f32.mrf.mxu1 }
 0x110   : > { %v3224_v42 = vpop.f32.mrf.mxu0  ;;  %v3296_v43 = vpop.f32.mrf.mxu1 }
 0x111   : > { %v4520_v44 = vadd.f32 %v3224_v42, %v3223_v36  ;;  %v4522_v45 = vadd.f32 %v3296_v43, %v3295_v37  ;;  %v3986_v37 = vld [vmem:[%s5430_s0 + $0x330] ss:$36 sps:$4 sm:$0xff]  }
 0x112   : > { %v3226_v46 = vpop.f32.mrf.mxu0  ;;  %v3314_v47 = vpop.f32.mrf.mxu1  ;;  %2197 = vmatmul.mubr.bf16.gmra.mxu1 %v3971_v38  ;;  %3675 = vmatmul.mubr.bf16.vlgmr.msra.gmra.mxu0 %v3975_v39  ;;  %v3990_v38 = vld [vmem:[%s5430_s0 + $0x218] ss:$36 sps:$4 sm:$0xff]  }
 0x113   : > { %2204 = vmatprep.mubr.bf16.mxu1 %v3978_v40  ;;  %3678 = vmatprep.mubr.bf16.mxu0 %v3979_v41  ;;  %v3993_v39 = vld [vmem:[%s5430_s0 + $0x37c] ss:$36 sps:$4 sm:$0xff]  }
 0x114   : > { %v3227_v48 = vpop.f32.mrf.mxu0  ;;  %v3315_v49 = vpop.f32.mrf.mxu1  ;;  %v3994_v40 = vld [vmem:[%s5430_s0 + $0x260] ss:$36 sps:$4 sm:$0xff]  }
 0x115   : > { %v4524_v52 = vadd.f32 %v3227_v48, %v3226_v46  ;;  %v3316_v53 = vadd.f32 %v3315_v49, %v3314_v47 }
 0x116   : > { %v3229_v54 = vpop.f32.mrf.mxu0  ;;  %v3317_v55 = vpop.f32.mrf.mxu1 }
 0x117   : > { %v4533_v58 = vadd.f32 %v3316_v53, %v4444_v50 }
 0x118   : > { %v3230_v63 = vpop.f32.mrf.mxu0  ;;  %v3318_v0 = vpop.f32.mrf.mxu1 }
 0x119   : > { %v4541_v1 = vadd.f32 %v3230_v63, %v3229_v54  ;;  %v3319_v4 = vadd.f32 %v3318_v0, %v3317_v55  ;;  %v3998_v63 = vld [vmem:[%s5430_s0 + $0x3c4] ss:$36 sps:$4 sm:$0xff]   ;;  %v3999_v0 = vld [vmem:[%s5430_s0 + $0x2f0] ss:$36 sps:$4 sm:$0xff]  }
 0x11a   : > { %v3232_v5 = vpop.f32.mrf.mxu0  ;;  %v3320_v6 = vpop.f32.mrf.mxu1  ;;  %2205 = vmatmul.mubr.bf16.gmra.mxu1 %v3976_v56  ;;  %3679 = vmatmul.mubr.bf16.gmra.mxu0 %v3980_v57 }
 0x11b   : > { %v4544_v50 = vadd.f32 %v3319_v4, %v4460_v60  ;;  %2212 = vmatprep.mubr.bf16.mxu1 %v3983_v59  ;;  %3682 = vmatprep.mubr.bf16.mxu0 %v3984_v62  ;;  %v3991_v59 = vld [vmem:[%s5430_s0 + $0x378] ss:$36 sps:$4 sm:$0xff]   ;;  %v3995_v62 = vld [vmem:[%s5430_s0 + $0x2a8] ss:$36 sps:$4 sm:$0xff]  }
 0x11c   : > { %v3233_v7 = vpop.f32.mrf.mxu0  ;;  %v3321_v8 = vpop.f32.mrf.mxu1 }
 0x11d   : > { %v4546_v9 = vadd.f32 %v3233_v7, %v3232_v5  ;;  %v3322_v10 = vadd.f32 %v3321_v8, %v3320_v6 }
 0x11e   : > { %v3235_v11 = vpop.f32.mrf.mxu0  ;;  %v3323_v14 = vpop.f32.mrf.mxu1 }
 0x11f   : > { %v4555_v60 = vadd.f32 %v3322_v10, %v4464_v2 }
 0x120   : > { %v3236_v21 = vpop.f32.mrf.mxu0  ;;  %v3324_v22 = vpop.f32.mrf.mxu1 }
 0x121   : > { %v4563_v23 = vadd.f32 %v3236_v21, %v3235_v11  ;;  %v3325_v24 = vadd.f32 %v3324_v22, %v3323_v14  ;;  %v3996_v21 = vld [vmem:[%s5430_s0 + $0x3c0] ss:$36 sps:$4 sm:$0xff]   ;;  %v4000_v22 = vld [vmem:[%s5430_s0 + $0x338] ss:$36 sps:$4 sm:$0xff]  }
 0x122   : > { %v3238_v25 = vpop.f32.mrf.mxu0  ;;  %v3326_v26 = vpop.f32.mrf.mxu1  ;;  %2213 = vmatmul.mubr.bf16.gmra.mxu1 %v3981_v15  ;;  %3683 = vmatmul.mubr.bf16.gmra.mxu0 %v3985_v16 }
 0x123   : > { %v4566_v2 = vadd.f32 %v3325_v24, %v4480_v12  ;;  %2220 = vmatprep.mubr.bf16.mxu1 %v3988_v17  ;;  %3686 = vmatprep.mubr.bf16.mxu0 %v3989_v20  ;;  %v4003_v24 = vld [vmem:[%s5430_s0 + $0x40c] ss:$36 sps:$4 sm:$0xff]  }
 0x124   : > { %v3239_v27 = vpop.f32.mrf.mxu0  ;;  %v3327_v30 = vpop.f32.mrf.mxu1 }
 0x125   : > { %v4568_v31 = vadd.f32 %v3239_v27, %v3238_v25  ;;  %v3328_v32 = vadd.f32 %v3327_v30, %v3326_v26  ;;  %v4004_v25 = vld [vmem:[%s5430_s0 + $0x380] ss:$36 sps:$4 sm:$0xff]  }
 0x126   : > { %v3241_v33 = vpop.f32.mrf.mxu0  ;;  %v3329_v36 = vpop.f32.mrf.mxu1 }
 0x127   : > { %v4577_v12 = vadd.f32 %v3328_v32, %v4484_v18 }
 0x128   : > { %v3242_v41 = vpop.f32.mrf.mxu0  ;;  %v3330_v42 = vpop.f32.mrf.mxu1 }
 0x129   : > { %v4585_v43 = vadd.f32 %v3242_v41, %v3241_v33  ;;  %v3331_v46 = vadd.f32 %v3330_v42, %v3329_v36 }
 0x12a   : > { %v3244_v47 = vpop.f32.mrf.mxu0  ;;  %v3332_v48 = vpop.f32.mrf.mxu1  ;;  %2221 = vmatmul.mubr.bf16.gmra.mxu1 %v3986_v37  ;;  %3687 = vmatmul.mubr.bf16.gmra.mxu0 %v3990_v38 }
 0x12b   : > { %v4588_v18 = vadd.f32 %v3331_v46, %v4500_v28  ;;  %2228 = vmatprep.mubr.bf16.mxu1 %v3993_v39  ;;  %3690 = vmatprep.mubr.bf16.mxu0 %v3994_v40  ;;  %v4001_v46 = vld [vmem:[%s5430_s0 + $0x408] ss:$36 sps:$4 sm:$0xff]  }
 0x12c   : > { %v3245_v49 = vpop.f32.mrf.mxu0  ;;  %v3333_v53 = vpop.f32.mrf.mxu1 }
 0x12d   : > { %v4590_v54 = vadd.f32 %v3245_v49, %v3244_v47  ;;  %v3334_v55 = vadd.f32 %v3333_v53, %v3332_v48  ;;  %v4005_v47 = vld [vmem:[%s5430_s0 + $0x3c8] ss:$36 sps:$4 sm:$0xff]   ;;  %v4008_v48 = vld [vmem:[%s5430_s0 + $0x454] ss:$36 sps:$4 sm:$0xff]  }
 0x12e   : > { %v3247_v56 = vpop.f32.mrf.mxu0  ;;  %v3335_v57 = vpop.f32.mrf.mxu1  ;;  %v4009_v49 = vld [vmem:[%s5430_s0 + $0x410] ss:$36 sps:$4 sm:$0xff]  }
 0x12f   : > { %v4599_v28 = vadd.f32 %v3334_v55, %v4504_v34 }
 0x130   : > { %v3248_v4 = vpop.f32.mrf.mxu0  ;;  %v3336_v5 = vpop.f32.mrf.mxu1 }
 0x131   : > { %v4607_v6 = vadd.f32 %v3248_v4, %v3247_v56  ;;  %v3337_v7 = vadd.f32 %v3336_v5, %v3335_v57 }
 0x132   : > { %v3250_v8 = vpop.f32.mrf.mxu0  ;;  %v3338_v10 = vpop.f32.mrf.mxu1  ;;  %2229 = vmatmul.mubr.bf16.gmra.mxu1 %v3991_v59  ;;  %3691 = vmatmul.mubr.bf16.gmra.mxu0 %v3995_v62 }
 0x133   : > { %v4610_v34 = vadd.f32 %v3337_v7, %v4520_v44  ;;  %2236 = vmatprep.mubr.bf16.mxu1 %v3998_v63  ;;  %3694 = vmatprep.mubr.bf16.mxu0 %v3999_v0 }
 0x134   : > { %v3251_v11 = vpop.f32.mrf.mxu0  ;;  %v3339_v14 = vpop.f32.mrf.mxu1 }
 0x135   : > { %v4612_v15 = vadd.f32 %v3251_v11, %v3250_v8  ;;  %v3340_v16 = vadd.f32 %v3339_v14, %v3338_v10  ;;  %v4006_v10 = vld [vmem:[%s5430_s0 + $0x450] ss:$36 sps:$4 sm:$0xff]   ;;  %v4010_v11 = vld [vmem:[%s5430_s0 + $0x458] ss:$36 sps:$4 sm:$0xff]  }
 0x136   : > { %v3253_v17 = vpop.f32.mrf.mxu0  ;;  %v3341_v20 = vpop.f32.mrf.mxu1 }
 0x137   : > { %v4621_v44 = vadd.f32 %v3340_v16, %v4524_v52 }
 0x138   : > { %v3254_v26 = vpop.f32.mrf.mxu0  ;;  %v3342_v27 = vpop.f32.mrf.mxu1 }
 0x139   : > { %v4629_v30 = vadd.f32 %v3254_v26, %v3253_v17  ;;  %v3343_v32 = vadd.f32 %v3342_v27, %v3341_v20 }
 0x13a   : > { %v3256_v33 = vpop.f32.mrf.mxu0  ;;  %v3344_v36 = vpop.f32.mrf.mxu1  ;;  %2237 = vmatmul.mubr.bf16.gmra.mxu1 %v3996_v21  ;;  %3695 = vmatmul.mubr.bf16.gmra.mxu0 %v4000_v22 }
 0x13b   : > { %v4632_v52 = vadd.f32 %v3343_v32, %v4541_v1  ;;  %2244 = vmatprep.mubr.bf16.mxu1 %v4003_v24  ;;  %3698 = vmatprep.mubr.bf16.mxu0 %v4004_v25 }
 0x13c   : > { %v3257_v37 = vpop.f32.mrf.mxu0  ;;  %v3345_v38 = vpop.f32.mrf.mxu1 }
 0x13d   : > { %v4634_v39 = vadd.f32 %v3257_v37, %v3256_v33  ;;  %v3346_v40 = vadd.f32 %v3345_v38, %v3344_v36 }
 0x13e   : > { %v3259_v41 = vpop.f32.mrf.mxu0  ;;  %v3347_v42 = vpop.f32.mrf.mxu1 }
 0x13f   : > { %v4643_v1 = vadd.f32 %v3346_v40, %v4546_v9 }
 0x140   : > { %v3260_v53 = vpop.f32.mrf.mxu0  ;;  %v3348_v55 = vpop.f32.mrf.mxu1 }
 0x141   : > { %v4651_v56 = vadd.f32 %v3260_v53, %v3259_v41  ;;  %v3349_v57 = vadd.f32 %v3348_v55, %v3347_v42 }
 0x142   : > { %v3262_v59 = vpop.f32.mrf.mxu0  ;;  %v3350_v62 = vpop.f32.mrf.mxu1  ;;  %2245 = vmatmul.mubr.bf16.gmra.mxu1 %v4001_v46  ;;  %3699 = vmatmul.mubr.bf16.gmra.mxu0 %v4005_v47 }
 0x143   : > { %v4654_v9 = vadd.f32 %v3349_v57, %v4563_v23  ;;  %2252 = vmatprep.mubr.bf16.mxu1 %v4008_v48  ;;  %3702 = vmatprep.mubr.bf16.mxu0 %v4009_v49 }
 0x144   : > { %v3263_v63 = vpop.f32.mrf.mxu0  ;;  %v3351_v0 = vpop.f32.mrf.mxu1 }
 0x145   : > { %v4656_v4 = vadd.f32 %v3263_v63, %v3262_v59  ;;  %v3352_v5 = vadd.f32 %v3351_v0, %v3350_v62 }
 0x146   : > { %v3265_v7 = vpop.f32.mrf.mxu0  ;;  %v3353_v8 = vpop.f32.mrf.mxu1 }
 0x147   : > { %v4665_v23 = vadd.f32 %v3352_v5, %v4568_v31 }
 0x148   : > { %v3266_v14 = vpop.f32.mrf.mxu0  ;;  %v3354_v16 = vpop.f32.mrf.mxu1 }
 0x149   : > { %v4667_v17 = vadd.f32 %v3266_v14, %v3265_v7  ;;  %v3355_v20 = vadd.f32 %v3354_v16, %v3353_v8 }
 0x14a   : > { %v3268_v21 = vpop.f32.mrf.mxu0  ;;  %v3356_v22 = vpop.f32.mrf.mxu1  ;;  %2253 = vmatmul.mubr.bf16.gmra.mxu1 %v4006_v10  ;;  %3703 = vmatmul.mubr.bf16.gmra.mxu0 %v4010_v11 }
 0x14b   : > { %v4670_v24 = vadd.f32 %v3355_v20, %v4585_v43 }
 0x14c   : > { %v3269_v25 = vpop.f32.mrf.mxu0  ;;  %v3357_v26 = vpop.f32.mrf.mxu1 }
 0x14d   : > { %v4672_v27 = vadd.f32 %v3269_v25, %v3268_v21  ;;  %v3358_v32 = vadd.f32 %v3357_v26, %v3356_v22 }
 0x14e   : > { %v3271_v33 = vpop.f32.mrf.mxu0  ;;  %v3359_v31 = vpop.f32.mrf.mxu1 }
 0x14f   : > { %v4675_v36 = vadd.f32 %v3358_v32, %v4590_v54 }
 0x150   : > { %v3272_v37 = vpop.f32.mrf.mxu0  ;;  %v3360_v38 = vpop.f32.mrf.mxu1 }
 0x151   : > { %v4677_v40 = vadd.f32 %v3272_v37, %v3271_v33  ;;  %v3361_v41 = vadd.f32 %v3360_v38, %v3359_v31 }
 0x152   : > { %v3362_v42 = vpop.f32.mrf.mxu1  ;;  %v3426_v46 = vpop.f32.mrf.mxu0 }
 0x153   : > { %v4680_v43 = vadd.f32 %v3361_v41, %v4607_v6 }
 0x154   : > { %v3363_v47 = vpop.f32.mrf.mxu1  ;;  %v3427_v48 = vpop.f32.mrf.mxu0 }
 0x155   : > { %v3364_v49 = vadd.f32 %v3363_v47, %v3362_v42  ;;  %v3428_v53 = vadd.f32 %v3427_v48, %v3426_v46 }
 0x156   : > { %v3365_v55 = vpop.f32.mrf.mxu1  ;;  %v3429_v57 = vpop.f32.mrf.mxu0 }
 0x157   : > { %v4683_v59 = vadd.f32 %v3364_v49, %v4612_v15  ;;  %v4686_v54 = vadd.f32 %v3428_v53, %v4533_v58 }
 0x158   : > { %v3366_v62 = vpop.f32.mrf.mxu1  ;;  %v3430_v63 = vpop.f32.mrf.mxu0 }
 0x159   : > { %v3367_v0 = vadd.f32 %v3366_v62, %v3365_v55  ;;  %v3431_v5 = vadd.f32 %v3430_v63, %v3429_v57 }
 0x15a   : > { %v3368_v7 = vpop.f32.mrf.mxu1  ;;  %v3432_v8 = vpop.f32.mrf.mxu0 }
 0x15b   : > { %v4689_v6 = vadd.f32 %v3367_v0, %v4629_v30  ;;  %v4692_v10 = vadd.f32 %v3431_v5, %v4544_v50 }
 0x15c   : > { %v3369_v11 = vpop.f32.mrf.mxu1  ;;  %v3433_v14 = vpop.f32.mrf.mxu0 }
 0x15d   : > { %v3370_v16 = vadd.f32 %v3369_v11, %v3368_v7  ;;  %v3434_v15 = vadd.f32 %v3433_v14, %v3432_v8 }
 0x15e   : > { %v3371_v20 = vpop.f32.mrf.mxu1  ;;  %v3435_v21 = vpop.f32.mrf.mxu0 }
 0x15f   : > { %v4695_v58 = vadd.f32 %v3370_v16, %v4634_v39  ;;  %v4698_v22 = vadd.f32 %v3434_v15, %v4555_v60 }
 0x160   : > { %v3372_v25 = vpop.f32.mrf.mxu1  ;;  %v3436_v26 = vpop.f32.mrf.mxu0 }
 0x161   : > { %v3373_v32 = vadd.f32 %v3372_v25, %v3371_v20  ;;  %v3437_v30 = vadd.f32 %v3436_v26, %v3435_v21 }
 0x162   : > { %v3374_v33 = vpop.f32.mrf.mxu1  ;;  %v3438_v31 = vpop.f32.mrf.mxu0 }
 0x163   : > { %v4701_v50 = vadd.f32 %v3373_v32, %v4651_v56  ;;  %v4704_v37 = vadd.f32 %v3437_v30, %v4566_v2 }
 0x164   : > { %v3375_v38 = vpop.f32.mrf.mxu1  ;;  %v3439_v41 = vpop.f32.mrf.mxu0 }
 0x165   : > { %v3376_v42 = vadd.f32 %v3375_v38, %v3374_v33  ;;  %v3440_v39 = vadd.f32 %v3439_v41, %v3438_v31 }
 0x166   : > { %v3377_v46 = vpop.f32.mrf.mxu1  ;;  %v3441_v47 = vpop.f32.mrf.mxu0 }
 0x167   : > { %v4707_v60 = vadd.f32 %v3376_v42, %v4656_v4  ;;  %v4710_v48 = vadd.f32 %v3440_v39, %v4577_v12 }
 0x168   : > { %v3378_v49 = vpop.f32.mrf.mxu1  ;;  %v3442_v53 = vpop.f32.mrf.mxu0 }
 0x169   : > { %v3379_v55 = vadd.f32 %v3378_v49, %v3377_v46  ;;  %v3443_v56 = vadd.f32 %v3442_v53, %v3441_v47 }
 0x16a   : > { %v3380_v57 = vpop.f32.mrf.mxu1  ;;  %v3444_v62 = vpop.f32.mrf.mxu0 }
 0x16b   : > { %v4713_v2 = vadd.f32 %v3379_v55, %v4667_v17  ;;  %v4716_v63 = vadd.f32 %v3443_v56, %v4588_v18 }
 0x16c   : > { %v3381_v0 = vpop.f32.mrf.mxu1  ;;  %v3445_v5 = vpop.f32.mrf.mxu0 }
 0x16d   : > { %v3382_v7 = vadd.f32 %v3381_v0, %v3380_v57  ;;  %v3446_v4 = vadd.f32 %v3445_v5, %v3444_v62 }
 0x16e   : > { %v3383_v8 = vpop.f32.mrf.mxu1  ;;  %v3447_v11 = vpop.f32.mrf.mxu0 }
 0x16f   : > { %v4719_v12 = vadd.f32 %v3382_v7, %v4672_v27  ;;  %v4722_v14 = vadd.f32 %v3446_v4, %v4599_v28 }
 0x170   : > { %v3384_v16 = vpop.f32.mrf.mxu1  ;;  %v3448_v15 = vpop.f32.mrf.mxu0 }
 0x171   : > { %v3385_v20 = vadd.f32 %v3384_v16, %v3383_v8  ;;  %v3449_v17 = vadd.f32 %v3448_v15, %v3447_v11 }
 0x172   : > { %v3386_v21 = vpop.f32.mrf.mxu1  ;;  %v3450_v25 = vpop.f32.mrf.mxu0 }
 0x173   : > { %v4725_v18 = vadd.f32 %v3385_v20, %v4677_v40  ;;  %v4728_v26 = vadd.f32 %v3449_v17, %v4610_v34 }
 0x174   : > { %v3387_v32 = vpop.f32.mrf.mxu1  ;;  %v3451_v30 = vpop.f32.mrf.mxu0 }
 0x175   : > { %v3388_v33 = vadd.f32 %v3387_v32, %v3386_v21  ;;  %v3452_v27 = vadd.f32 %v3451_v30, %v3450_v25 }
 0x176   : > { %v3389_v31 = vpop.f32.mrf.mxu1  ;;  %v3453_v38 = vpop.f32.mrf.mxu0 }
 0x177   : > { %v4731_v28 = vadd.f32 %v3388_v33, %v4446_v51  ;;  %v4734_v41 = vadd.f32 %v3452_v27, %v4621_v44 }
 0x178   : > { %v3390_v42 = vpop.f32.mrf.mxu1  ;;  %v3454_v39 = vpop.f32.mrf.mxu0 }
 0x179   : > { %v3391_v46 = vadd.f32 %v3390_v42, %v3389_v31  ;;  %v3455_v40 = vadd.f32 %v3454_v39, %v3453_v38 }
 0x17a   : > { %v3392_v47 = vpop.f32.mrf.mxu1  ;;  %v3456_v49 = vpop.f32.mrf.mxu0 }
 0x17b   : > { %v4737_v34 = vadd.f32 %v3391_v46, %v4462_v61  ;;  %v4740_v53 = vadd.f32 %v3455_v40, %v4632_v52 }
 0x17c   : > { %v3393_v55 = vpop.f32.mrf.mxu1  ;;  %v3457_v56 = vpop.f32.mrf.mxu0 }
 0x17d   : > { %v3394_v57 = vadd.f32 %v3393_v55, %v3392_v47  ;;  %v3458_v51 = vadd.f32 %v3457_v56, %v3456_v49 }
 0x17e   : > { %v3395_v62 = vpop.f32.mrf.mxu1  ;;  %v3459_v0 = vpop.f32.mrf.mxu0 }
 0x17f   : > { %v4743_v44 = vadd.f32 %v3394_v57, %v4466_v3  ;;  %v4746_v5 = vadd.f32 %v3458_v51, %v4643_v1 }
 0x180   : > { %v3396_v7 = vpop.f32.mrf.mxu1  ;;  %v3460_v4 = vpop.f32.mrf.mxu0 }
 0x181   : > { %v3397_v8 = vadd.f32 %v3396_v7, %v3395_v62  ;;  %v3461_v61 = vadd.f32 %v3460_v4, %v3459_v0 }
 0x182   : > { %v3398_v11 = vpop.f32.mrf.mxu1  ;;  %v3462_v16 = vpop.f32.mrf.mxu0 }
 0x183   : > { %v4749_v52 = vadd.f32 %v3397_v8, %v4482_v13  ;;  %v4752_v15 = vadd.f32 %v3461_v61, %v4654_v9 }
 0x184   : > { %v3399_v20 = vpop.f32.mrf.mxu1  ;;  %v3463_v17 = vpop.f32.mrf.mxu0 }
 0x185   : > { %v3400_v21 = vadd.f32 %v3399_v20, %v3398_v11  ;;  %v3464_v3 = vadd.f32 %v3463_v17, %v3462_v16 }
 0x186   : > { %v3401_v25 = vpop.f32.mrf.mxu1  ;;  %v3465_v32 = vpop.f32.mrf.mxu0 }
 0x187   : > { %v4755_v1 = vadd.f32 %v3400_v21, %v4486_v19  ;;  %v4758_v30 = vadd.f32 %v3464_v3, %v4665_v23 }
 0x188   : > { %v3402_v33 = vpop.f32.mrf.mxu1  ;;  %v3466_v27 = vpop.f32.mrf.mxu0 }
 0x189   : > { %v3403_v31 = vadd.f32 %v3402_v33, %v3401_v25  ;;  %v3467_v13 = vadd.f32 %v3466_v27, %v3465_v32 }
 0x18a   : > { %v3404_v38 = vpop.f32.mrf.mxu1  ;;  %v3468_v42 = vpop.f32.mrf.mxu0 }
 0x18b   : > { %v4761_v9 = vadd.f32 %v3403_v31, %v4502_v29  ;;  %v4764_v39 = vadd.f32 %v3467_v13, %v4670_v24 }
 0x18c   : > { %v3405_v46 = vpop.f32.mrf.mxu1  ;;  %v3469_v40 = vpop.f32.mrf.mxu0 }
 0x18d   : > { %v3406_v47 = vadd.f32 %v3405_v46, %v3404_v38  ;;  %v3470_v19 = vadd.f32 %v3469_v40, %v3468_v42 }
 0x18e   : > { %v3407_v49 = vpop.f32.mrf.mxu1  ;;  %v3471_v55 = vpop.f32.mrf.mxu0 }
 0x18f   : > { %v4767_v23 = vadd.f32 %v3406_v47, %v4506_v35  ;;  %v4770_v56 = vadd.f32 %v3470_v19, %v4675_v36 }
 0x190   : > { %v3408_v57 = vpop.f32.mrf.mxu1  ;;  %v3472_v51 = vpop.f32.mrf.mxu0 }
 0x191   : > { %v3409_v62 = vadd.f32 %v3408_v57, %v3407_v49  ;;  %v3473_v29 = vadd.f32 %v3472_v51, %v3471_v55 }
 0x192   : > { %v3474_v0 = vpop.f32.mrf.mxu0  ;;  %v4772_v7 = vpop.f32.mrf.mxu1 }
 0x193   : > { %v4775_v24 = vadd.f32 %v3409_v62, %v4522_v45  ;;  %v4778_v4 = vadd.f32 %v3473_v29, %v4680_v43 }
 0x194   : > { %v3475_v8 = vpop.f32.mrf.mxu0  ;;  %v4780_v61 = vpop.f32.mrf.mxu1 }
 0x195   : > { %v3476_v35 = vadd.f32 %v3475_v8, %v3474_v0 }
 0x196   : > { %v3477_v11 = vpop.f32.mrf.mxu0  ;;  %v4782_v36 = vpop.f32.mrf.mxu1 }
 0x197   : > { %v4785_v16 = vadd.f32 %v3476_v35, %v4683_v59 }
 0x198   : > { %v3478_v20 = vpop.f32.mrf.mxu0  ;;  %v4787_v17 = vpop.f32.mrf.mxu1 }
 0x199   : > { %v3479_v21 = vadd.f32 %v3478_v20, %v3477_v11 }
 0x19a   : > { %v3480_v3 = vpop.f32.mrf.mxu0  ;;  %v4789_v45 = vpop.f32.mrf.mxu1 }
 0x19b   : > { %v4792_v43 = vadd.f32 %v3479_v21, %v4689_v6 }
 0x19c   : > { %v3481_v25 = vpop.f32.mrf.mxu0  ;;  %v4794_v32 = vpop.f32.mrf.mxu1 }
 0x19d   : > { %5438 = vst [vmem:[#allocation2_spill] sm:$0xff] %v4792_v43  ;;  %v3482_v33 = vadd.f32 %v3481_v25, %v3480_v3 }
 0x19e   : > { %v3483_v27 = vpop.f32.mrf.mxu0  ;;  %v4796_v31 = vpop.f32.mrf.mxu1 }
 0x19f   : > { %v4799_v59 = vadd.f32 %v3482_v33, %v4695_v58 }
 0x1a0   : > { %v3484_v13 = vpop.f32.mrf.mxu0  ;;  %v4801_v38 = vpop.f32.mrf.mxu1 }
 0x1a1   : > { %v3485_v42 = vadd.f32 %v3484_v13, %v3483_v27 }
 0x1a2   : > { %v3486_v46 = vpop.f32.mrf.mxu0  ;;  %v4803_v40 = vpop.f32.mrf.mxu1 }
 0x1a3   : > { %v4806_v6 = vadd.f32 %v3485_v42, %v4701_v50 }
 0x1a4   : > { %v3487_v47 = vpop.f32.mrf.mxu0  ;;  %v4808_v19 = vpop.f32.mrf.mxu1 }
 0x1a5   : > { %v3488_v49 = vadd.f32 %v3487_v47, %v3486_v46 }
 0x1a6   : > { %v3489_v55 = vpop.f32.mrf.mxu0  ;;  %v4810_v57 = vpop.f32.mrf.mxu1 }
 0x1a7   : > { %v4813_v58 = vadd.f32 %v3488_v49, %v4707_v60 }
 0x1a8   : > { %v3490_v51 = vpop.f32.mrf.mxu0  ;;  %v4815_v62 = vpop.f32.mrf.mxu1 }
 0x1a9   : > { %5439 = vst [vmem:[#allocation3_spill] sm:$0xff] %v4813_v58  ;;  %v3491_v29 = vadd.f32 %v3490_v51, %v3489_v55 }
 0x1aa   : > { %v3492_v0 = vpop.f32.mrf.mxu0  ;;  %v4817_v8 = vpop.f32.mrf.mxu1 }
 0x1ab   : > { %v4820_v50 = vadd.f32 %v3491_v29, %v4713_v2 }
 0x1ac   : > { %v3493_v35 = vpop.f32.mrf.mxu0  ;;  %v4822_v11 = vpop.f32.mrf.mxu1 }
 0x1ad   : > { %5440 = vst [vmem:[#allocation4_spill] sm:$0xff] %v4820_v50  ;;  %v3494_v20 = vadd.f32 %v3493_v35, %v3492_v0 }
 0x1ae   : > { %v3495_v21 = vpop.f32.mrf.mxu0  ;;  %v4824_v3 = vpop.f32.mrf.mxu1 }
 0x1af   : > { %v4827_v60 = vadd.f32 %v3494_v20, %v4719_v12 }
 0x1b0   : > { %v3496_v25 = vpop.f32.mrf.mxu0  ;;  %v4829_v33 = vpop.f32.mrf.mxu1 }
 0x1b1   : > { %5441 = vst [vmem:[#allocation5_spill] sm:$0xff] %v4827_v60  ;;  %v3497_v27 = vadd.f32 %v3496_v25, %v3495_v21 }
 0x1b2   : > { %v3498_v13 = vpop.f32.mrf.mxu0  ;;  %v4831_v42 = vpop.f32.mrf.mxu1 }
 0x1b3   : > { %v4834_v2 = vadd.f32 %v3497_v27, %v4725_v18 }
 0x1b4   : > { %v3499_v46 = vpop.f32.mrf.mxu0  ;;  %v4836_v47 = vpop.f32.mrf.mxu1 }
 0x1b5   : > { %5442 = vst [vmem:[#allocation6_spill] sm:$0xff] %v4834_v2  ;;  %v3500_v49 = vadd.f32 %v3499_v46, %v3498_v13 }
 0x1b6   : > { %v3501_v55 = vpop.f32.mrf.mxu0  ;;  %v4838_v51 = vpop.f32.mrf.mxu1 }
 0x1b7   : > { %v4841_v12 = vadd.f32 %v3500_v49, %v4731_v28 }
 0x1b8   : > { %v3502_v29 = vpop.f32.mrf.mxu0  ;;  %v4843_v0 = vpop.f32.mrf.mxu1 }
 0x1b9   : > { %5443 = vst [vmem:[#allocation7_spill] sm:$0xff] %v4841_v12  ;;  %v3503_v35 = vadd.f32 %v3502_v29, %v3501_v55 }
 0x1ba   : > { %v3504_v20 = vpop.f32.mrf.mxu0  ;;  %v4845_v21 = vpop.f32.mrf.mxu1 }
 0x1bb   : > { %v4848_v18 = vadd.f32 %v3503_v35, %v4737_v34 }
 0x1bc   : > { %v3505_v25 = vpop.f32.mrf.mxu0  ;;  %v4850_v27 = vpop.f32.mrf.mxu1 }
 0x1bd   : > { %5444 = vst [vmem:[#allocation8_spill] sm:$0xff] %v4848_v18  ;;  %v3506_v13 = vadd.f32 %v3505_v25, %v3504_v20 }
 0x1be   : > { %v3507_v46 = vpop.f32.mrf.mxu0  ;;  %v4852_v50 = vpop.f32.mrf.mxu1 }
 0x1bf   : > { %v4855_v28 = vadd.f32 %v3506_v13, %v4743_v44 }
 0x1c0   : > { %v3508_v49 = vpop.f32.mrf.mxu0  ;;  %v4857_v12 = vpop.f32.mrf.mxu1 }
 0x1c1   : > { %5445 = vst [vmem:[#allocation9_spill] sm:$0xff] %v4855_v28  ;;  %v3509_v55 = vadd.f32 %v3508_v49, %v3507_v46 }
 0x1c2   : > { %v3510_v29 = vpop.f32.mrf.mxu0  ;;  %v4859_v2 = vpop.f32.mrf.mxu1 }
 0x1c3   : > { %v4862_v34 = vadd.f32 %v3509_v55, %v4749_v52 }
 0x1c4   : > { %v3511_v35 = vpop.f32.mrf.mxu0  ;;  %v4864_v18 = vpop.f32.mrf.mxu1 }
 0x1c5   : > { %5446 = vst [vmem:[#allocation10_spill] sm:$0xff] %v4862_v34  ;;  %v3512_v20 = vadd.f32 %v3511_v35, %v3510_v29  ;;  %v3546_v29 = vadd.f32 %v4794_v32, %v4789_v45 }
 0x1c6   : > { %v3513_v25 = vpop.f32.mrf.mxu0  ;;  %v4866_v58 = vpop.f32.mrf.mxu1 }
 0x1c7   : > { %v4869_v44 = vadd.f32 %v3512_v20, %v4755_v1  ;;  %v3540_v20 = vadd.f32 %v4780_v61, %v4772_v7 }
 0x1c8   : > { %v3514_v13 = vpop.f32.mrf.mxu0  ;;  %v4871_v28 = vpop.f32.mrf.mxu1 }
 0x1c9   : > { %5447 = vst [vmem:[#allocation11_spill] sm:$0xff] %v4869_v44  ;;  %v3515_v46 = vadd.f32 %v3514_v13, %v3513_v25  ;;  %v2135_v61 = vadd.f32 %v3540_v20, %v4686_v54 }
 0x1ca   : > { %v3516_v49 = vpop.f32.mrf.mxu0  ;;  %v4873_v60 = vpop.f32.mrf.mxu1 }
 0x1cb   : > { %v4876_v52 = vadd.f32 %v3515_v46, %v4761_v9  ;;  %v3549_v9 = vadd.f32 %v4801_v38, %v4796_v31 }
 0x1cc   : > { %v3517_v55 = vpop.f32.mrf.mxu0  ;;  %v4878_v34 = vpop.f32.mrf.mxu1 }
 0x1cd   : > { %5448 = vst [vmem:[#allocation12_spill] sm:$0xff] %v4876_v52  ;;  %v3518_v35 = vadd.f32 %v3517_v55, %v3516_v49  ;;  %v2143_v52 = vadd.f32 %v3546_v29, %v4698_v22  ;;  %v3543_v49 = vadd.f32 %v4787_v17, %v4782_v36  ;;  %v3558_v22 = vadd.f32 %v4822_v11, %v4817_v8 }
 0x1ce   : > { %v3519_v43 = vpop.f32.mrf.mxu0  ;;  %v4882_v1 = vpop.f32.mrf.mxu1  ;;  %v2146_v38 = vadd.f32 %v3549_v9, %v4704_v37  ;;  %v3552_v8 = vadd.f32 %v4808_v19, %v4803_v40  ;;  %v3555_v40 = vadd.f32 %v4815_v62, %v4810_v57 }
 0x1cf   : > { %v4887_v25 = vadd.f32 %v3518_v35, %v4767_v23  ;;  %v2138_v54 = vadd.f32 %v3543_v49, %v4692_v10  ;;  %v3561_v35 = vadd.f32 %v4829_v33, %v4824_v3 }
 0x1d0   : > { %v3520_v13 = vpop.f32.mrf.mxu0  ;;  %v4889_v44 = vpop.f32.mrf.mxu1  ;;  %v2151_v49 = vadd.f32 %v3552_v8, %v4710_v48  ;;  %v2154_v62 = vadd.f32 %v3555_v40, %v4716_v63  ;;  %v3573_v48 = vadd.f32 %v4857_v12, %v4852_v50 }
 0x1d1   : > { %v3521_v46 = vadd.f32 %v3520_v13, %v3519_v43  ;;  %v2159_v13 = vadd.f32 %v3558_v22, %v4722_v14  ;;  %v3570_v14 = vadd.f32 %v4850_v27, %v4845_v21 }
 0x1d2   : > { %v4894_v45 = vpop.f32.mrf.mxu1  ;;  %v3676_v32 = vpop.f32.mrf.mxu0 }
 0x1d3   : > { %v4899_v7 = vadd.f32 %v3521_v46, %v4775_v24  ;;  %v4901_v23 = vadd.f32 %v3676_v32, %v2143_v52 }
 0x1d4   : > { %v4904_v55 = vpop.f32.mrf.mxu1  ;;  %v2295_v31 = vpop.f32.mrf.mxu0 }
 0x1d5   : > { %v4908_v43 = vadd.f32 %v2295_v31, %v2135_v61  ;;  %v2429_v36 = vsel %vm2422_vm0, %v4901_v23, 0.0  ;;  %v2162_v61 = vadd.f32 %v3561_v35, %v4728_v26 }
 0x1d6   : > { %v4913_v17 = vpop.f32.mrf.mxu1  ;;  %v3677_v24 = vpop.f32.mrf.mxu0  ;;  %2430 = vadd.xlane.f32.xlu1 %v2429_v36 }
 0x1d7   : > { %v4915_v52 = vadd.f32 %v3677_v24, %v2146_v38  ;;  %v2423_v29 = vsel %vm2422_vm0, %v4908_v43, 0.0  ;;  %v3564_v24 = vadd.f32 %v4836_v47, %v4831_v42  ;;  %v3567_v42 = vadd.f32 %v4843_v0, %v4838_v51 }
 0x1d8   : > { %v4922_v11 = vpop.f32.mrf.mxu1  ;;  %v2298_v37 = vpop.f32.mrf.mxu0  ;;  %2424 = vadd.xlane.f32.xlu0 %v2423_v29 }
 0x1d9   : > { %v4926_v20 = vadd.f32 %v2298_v37, %v2138_v54  ;;  %v2432_v10 = vsel %vm2422_vm0, %v4915_v52, 0.0  ;;  %v2175_v54 = vadd.f32 %v3570_v14, %v4746_v5  ;;  %v3582_v5 = vadd.f32 %v4878_v34, %v4873_v60 }
 0x1da   : > { %v4931_v9 = vpop.f32.mrf.mxu1  ;;  %v3680_v46 = vpop.f32.mrf.mxu0  ;;  %2433 = vadd.xlane.f32.xlu1 %v2432_v10  ;;  %v2167_v35 = vadd.f32 %v3564_v24, %v4734_v41  ;;  %v3576_v41 = vadd.f32 %v4864_v18, %v4859_v2  ;;  %v3579_v2 = vadd.f32 %v4871_v28, %v4866_v58 }
 0x1db   : > { %v4935_v19 = vadd.f32 %v3680_v46, %v2159_v13  ;;  %v2426_v32 = vsel %vm2422_vm0, %v4926_v20, 0.0  ;;  %v2178_v13 = vadd.f32 %v3573_v48, %v4752_v15 }
 0x1dc   : > { %v3593_v3 = vpop.f32.mrf.mxu1  ;;  %v2311_v33 = vpop.f32.mrf.mxu0  ;;  %2427 = vadd.xlane.f32.xlu0 %v2426_v32  ;;  %v2170_v32 = vadd.f32 %v3567_v42, %v4740_v53 }
 0x1dd   : > { %v4945_v38 = vadd.f32 %v2311_v33, %v2151_v49  ;;  %v2441_v36 = vsel %vm2422_vm0, %v4935_v19, 0.0  ;;  %v3585_v33 = vadd.f32 %v4889_v44, %v4882_v1  ;;  %v2191_v49 = vadd.f32 %v3582_v5, %v4770_v56 }
 0x1de   : > { %v4943_v31 = vpop.f32.mrf.mxu1  ;;  %v3681_v22 = vpop.f32.mrf.mxu0  ;;  %v3594_v1 = vadd.f32 %v3593_v3, %v4931_v9  ;;  %v2183_v56 = vadd.f32 %v3576_v41, %v4758_v30  ;;  %v3588_v30 = vadd.f32 %v4904_v55, %v4894_v45  ;;  %v5450_v41 = vld [vmem:[#allocation2_spill] sm:$0xff] }
 0x1df   : > { %v4947_v57 = vadd.f32 %v3681_v22, %v2162_v61  ;;  %v2435_v37 = vsel %vm2422_vm0, %v4945_v38, 0.0  ;;  %v2194_v24 = vadd.f32 %v3585_v33, %v4778_v4 }
 0x1e0   : > { %v3596_v21 = vpop.f32.mrf.mxu1  ;;  %v2314_v27 = vpop.f32.mrf.mxu0  ;;  %2442 = vadd.xlane.f32.xlu0 %v2441_v36 }
 0x1e1   : > { %v4956_v26 = vadd.f32 %v2314_v27, %v2154_v62  ;;  %v2444_v29 = vsel %vm2422_vm0, %v4947_v57, 0.0  ;;  %v3597_v3 = vadd.f32 %v3596_v21, %v4943_v31 }
 0x1e2   : > { %v4961_v63 = vpop.f32.mrf.mxu1  ;;  %v3684_v8 = vpop.f32.mrf.mxu0  ;;  %2445 = vadd.xlane.f32.xlu1 %v2444_v29  ;;  %v2186_v29 = vadd.f32 %v3579_v2, %v4764_v39 }
 0x1e3   : > { %v4965_v47 = vadd.f32 %v3684_v8, %v2175_v54  ;;  %v2438_v10 = vsel %vm2422_vm0, %v4956_v26, 0.0 }
 0x1e4   : > { %v4969_v50 = vpop.f32.mrf.mxu1  ;;  %v2327_v12 = vpop.f32.mrf.mxu0  ;;  %2436 = vadd.xlane.f32.xlu0 %v2435_v37  ;;  %v2207_v37 = vadd.f32 %v3594_v1, %v4799_v59  ;;  %v2199_v59 = vadd.f32 %v3588_v30, %v4785_v16 }
 0x1e5   : > { %v4979_v46 = vadd.f32 %v2327_v12, %v2167_v35  ;;  %v2461_v60 = vsel %vm2422_vm0, %v4965_v47, 0.0  ;;  %v3591_v35 = vadd.f32 %v4922_v11, %v4913_v17  ;;  %v3600_v16 = vadd.f32 %v4969_v50, %v4961_v63 }
 0x1e6   : > { %v4977_v51 = vpop.f32.mrf.mxu1  ;;  %v3685_v0 = vpop.f32.mrf.mxu0  ;;  %2439 = vadd.xlane.f32.xlu1 %v2438_v10  ;;  %v2210_v10 = vadd.f32 %v3597_v3, %v4806_v6  ;;  %v5456_v3 = vld [vmem:[#allocation4_spill] sm:$0xff] }
 0x1e7   : > { %v4981_v40 = vadd.f32 %v3685_v0, %v2178_v13  ;;  %v2455_v62 = vsel %vm2422_vm0, %v4979_v46, 0.0 }
 0x1e8   : > { %v4988_v15 = vpop.f32.mrf.mxu1  ;;  %v2330_v34 = vpop.f32.mrf.mxu0  ;;  %2462 = vadd.xlane.f32.xlu0 %v2461_v60 }
 0x1e9   : > { %v4992_v14 = vadd.f32 %v2330_v34, %v2170_v32  ;;  %v2464_v53 = vsel %vm2422_vm0, %v4981_v40, 0.0  ;;  %v2202_v34 = vadd.f32 %v3591_v35, %v5450_v41  ;;  %v3603_v1 = vadd.f32 %v4988_v15, %v4977_v51 }
 0x1ea   : > { %v3604_v61 = vpop.f32.mrf.mxu1  ;;  %v3688_v22 = vpop.f32.mrf.mxu0  ;;  %2465 = vadd.xlane.f32.xlu1 %v2464_v53 }
 0x1eb   : > { %v4999_v18 = vadd.f32 %v3688_v22, %v2191_v49  ;;  %v2458_v27 = vsel %vm2422_vm0, %v4992_v14, 0.0  ;;  %v5451_v22 = vld [vmem:[#allocation5_spill] sm:$0xff] }
 0x1ec   : > { %v3605_v36 = vpop.f32.mrf.mxu1  ;;  %v2343_v44 = vpop.f32.mrf.mxu0  ;;  %2456 = vadd.xlane.f32.xlu0 %v2455_v62 }
 0x1ed   : > { %v5008_v58 = vadd.f32 %v2343_v44, %v2183_v56  ;;  %v2473_v8 = vsel %vm2422_vm0, %v4999_v18, 0.0  ;;  %v3606_v21 = vadd.f32 %v3605_v36, %v3604_v61 }
 0x1ee   : > { %v3607_v48 = vpop.f32.mrf.mxu1  ;;  %v3689_v54 = vpop.f32.mrf.mxu0  ;;  %2459 = vadd.xlane.f32.xlu1 %v2458_v27 }
 0x1ef   : > { %v5010_v28 = vadd.f32 %v3689_v54, %v2194_v24  ;;  %v2467_v45 = vsel %vm2422_vm0, %v5008_v58, 0.0  ;;  %v2223_v2 = vadd.f32 %v3606_v21, %v5451_v22  ;;  %v5459_v22 = vld [vmem:[#allocation10_spill] sm:$0xff] }
 0x1f0   : > { %v3608_v9 = vpop.f32.mrf.mxu1  ;;  %v2346_v4 = vpop.f32.mrf.mxu0  ;;  %2474 = vadd.xlane.f32.xlu0 %v2473_v8 }
 0x1f1   : > { %5449 = vst [vmem:[#allocation13_spill] sm:$0xff] %v5010_v28  ;;  %v5018_v42 = vadd.f32 %v2346_v4, %v2186_v29  ;;  %v2476_v12 = vsel %vm2422_vm0, %v5010_v28, 0.0  ;;  %v3609_v53 = vadd.f32 %v3608_v9, %v3607_v48  ;;  %v5453_v48 = vld [vmem:[#allocation3_spill] sm:$0xff]  ;;  %v5454_v29 = vld [vmem:[#allocation6_spill] sm:$0xff] }
 0x1f2   : > { %v3610_v5 = vpop.f32.mrf.mxu1  ;;  %v3692_v39 = vpop.f32.mrf.mxu0  ;;  %2477 = vadd.xlane.f32.xlu1 %v2476_v12  ;;  %v2215_v54 = vadd.f32 %v3600_v16, %v5453_v48 }
 0x1f3   : > { %v5025_v13 = vadd.f32 %v3692_v39, %v2207_v37  ;;  %v2470_v0 = vsel %vm2422_vm0, %v5018_v42, 0.0  ;;  %v2226_v8 = vadd.f32 %v3609_v53, %v5454_v29  ;;  %v2218_v37 = vadd.f32 %v3603_v1, %v5456_v3 }
 0x1f4   : > { %v3611_v55 = vpop.f32.mrf.mxu1  ;;  %v2359_v31 = vpop.f32.mrf.mxu0  ;;  %2468 = vadd.xlane.f32.xlu0 %v2467_v45 }
 0x1f5   : > { %v5033_v17 = vadd.f32 %v2359_v31, %v2199_v59  ;;  %v2493_v33 = vsel %vm2422_vm0, %v5025_v13, 0.0  ;;  %v3612_v39 = vadd.f32 %v3611_v55, %v3610_v5  ;;  %v5457_v59 = vld [vmem:[#allocation9_spill] sm:$0xff] }
 0x1f6   : > { %v3613_v32 = vpop.f32.mrf.mxu1  ;;  %v3693_v60 = vpop.f32.mrf.mxu0  ;;  %2471 = vadd.xlane.f32.xlu1 %v2470_v0 }
 0x1f7   : > { %v5035_v11 = vadd.f32 %v3693_v60, %v2210_v10  ;;  %v2487_v63 = vsel %vm2422_vm0, %v5033_v17, 0.0 }
 0x1f8   : > { %v3614_v49 = vpop.f32.mrf.mxu1  ;;  %v2362_v6 = vpop.f32.mrf.mxu0  ;;  %2494 = vadd.xlane.f32.xlu0 %v2493_v33 }
 0x1f9   : > { %v5042_v61 = vadd.f32 %v2362_v6, %v2202_v34  ;;  %v2496_v62 = vsel %vm2422_vm0, %v5035_v11, 0.0  ;;  %v3615_v60 = vadd.f32 %v3614_v49, %v3613_v32  ;;  %v5458_v6 = vld [vmem:[#allocation7_spill] sm:$0xff]  ;;  %v5460_v49 = vld [vmem:[#allocation8_spill] sm:$0xff] }
 0x1fa   : > { %v3616_v36 = vpop.f32.mrf.mxu1  ;;  %v3696_v44 = vpop.f32.mrf.mxu0  ;;  %2497 = vadd.xlane.f32.xlu1 %v2496_v62  ;;  %v2231_v53 = vadd.f32 %v3612_v39, %v5458_v6 }
 0x1fb   : > { %v5049_v56 = vadd.f32 %v3696_v44, %v2223_v2  ;;  %v2490_v30 = vsel %vm2422_vm0, %v5042_v61, 0.0  ;;  %v2234_v44 = vadd.f32 %v3615_v60, %v5460_v49  ;;  %v5462_v60 = vld [vmem:[#allocation12_spill] sm:$0xff] }
 0x1fc   : > { %v3617_v50 = vpop.f32.mrf.mxu1  ;;  %v2375_v24 = vpop.f32.mrf.mxu0  ;;  %2488 = vadd.xlane.f32.xlu0 %v2487_v63 }
 0x1fd   : > { %5452 = vst [vmem:[#allocation2_spill] sm:$0xff] %v5049_v56  ;;  %v3618_v27 = vadd.f32 %v3617_v50, %v3616_v36  ;;  %v5057_v51 = vadd.f32 %v2375_v24, %v2215_v54  ;;  %v2505_v12 = vsel %vm2422_vm0, %v5049_v56, 0.0 }
 0x1fe   : > { %v3619_v9 = vpop.f32.mrf.mxu1  ;;  %v3697_v4 = vpop.f32.mrf.mxu0  ;;  %2491 = vadd.xlane.f32.xlu1 %v2490_v30 }
 0x1ff   : > { %v5059_v15 = vadd.f32 %v3697_v4, %v2226_v8  ;;  %v2239_v10 = vadd.f32 %v3618_v27, %v5457_v59  ;;  %v2499_v5 = vsel %vm2422_vm0, %v5057_v51, 0.0  ;;  %v5461_v4 = vld [vmem:[#allocation11_spill] sm:$0xff] }
 0x200   : > { %v3620_v35 = vpop.f32.mrf.mxu1  ;;  %v2378_v45 = vpop.f32.mrf.mxu0  ;;  %2506 = vadd.xlane.f32.xlu0 %v2505_v12 }
 0x201   : > { %5455 = vst [vmem:[#allocation5_spill] sm:$0xff] %v5059_v15  ;;  %v3621_v31 = vadd.f32 %v3620_v35, %v3619_v9  ;;  %v5064_v21 = vadd.f32 %v2378_v45, %v2218_v37  ;;  %v2508_v0 = vsel %vm2422_vm0, %v5059_v15, 0.0 }
 0x202   : > { %v3622_v41 = vpop.f32.mrf.mxu1  ;;  %v3700_v34 = vpop.f32.mrf.mxu0  ;;  %2509 = vadd.xlane.f32.xlu1 %v2508_v0 }
 0x203   : > { %v5069_v33 = vadd.f32 %v3700_v34, %v2239_v10  ;;  %v2242_v2 = vadd.f32 %v3621_v31, %v5459_v22  ;;  %v2502_v62 = vsel %vm2422_vm0, %v5064_v21, 0.0 }
 0x204   : > { %v3623_v55 = vpop.f32.mrf.mxu1  ;;  %v2391_v16 = vpop.f32.mrf.mxu0  ;;  %2500 = vadd.xlane.f32.xlu0 %v2499_v5 }
 0x205   : > { %v3624_v1 = vadd.f32 %v3623_v55, %v3622_v41  ;;  %v5078_v63 = vadd.f32 %v2391_v16, %v2231_v53  ;;  %v2525_v24 = vsel %vm2422_vm0, %v5069_v33, 0.0 }
 0x206   : > { %v3625_v36 = vpop.f32.mrf.mxu1  ;;  %v3701_v32 = vpop.f32.mrf.mxu0  ;;  %2503 = vadd.xlane.f32.xlu1 %v2502_v62 }
 0x207   : > { %v5080_v50 = vadd.f32 %v3701_v32, %v2242_v2  ;;  %v2247_v3 = vadd.f32 %v3624_v1, %v5461_v4  ;;  %v2519_v37 = vsel %vm2422_vm0, %v5078_v63, 0.0 }
 0x208   : > { %v3626_v27 = vpop.f32.mrf.mxu1  ;;  %v2394_v48 = vpop.f32.mrf.mxu0  ;;  %2526 = vadd.xlane.f32.xlu0 %v2525_v24 }
 0x209   : > { %v5084_v54 = vadd.f32 %v2394_v48, %v2234_v44  ;;  %v2528_v29 = vsel %vm2422_vm0, %v5080_v50, 0.0  ;;  %v3627_v9 = vadd.f32 %v3626_v27, %v3625_v36 }
 0x20a   : > { %v3628_v8 = vpop.f32.mrf.mxu1  ;;  %v3704_v30 = vpop.f32.mrf.mxu0  ;;  %2529 = vadd.xlane.f32.xlu1 %v2528_v29 }
 0x20b   : > { %v2522_v31 = vsel %vm2422_vm0, %v5084_v54, 0.0  ;;  %v2250_v41 = vadd.f32 %v3627_v9, %v5462_v60 }
 0x20c   : > { %v3629_v12 = vpop.f32.mrf.mxu1  ;;  %v2407_v39 = vpop.f32.mrf.mxu0  ;;  %2520 = vadd.xlane.f32.xlu0 %v2519_v37 }
 0x20d   : > { %v3630_v35 = vadd.f32 %v3629_v12, %v3628_v8  ;;  %v5091_v45 = vadd.f32 %v2407_v39, %v2247_v3 }
 0x20e   : > { %v3631_v59 = vpop.f32.mrf.mxu1  ;;  %v3705_v10 = vpop.f32.mrf.mxu0  ;;  %2523 = vadd.xlane.f32.xlu1 %v2522_v31 }
 0x20f   : > { %v2255_v0 = vadd.f32 %v3630_v35, %v4887_v25  ;;  %v2531_v34 = vsel %vm2422_vm0, %v5091_v45, 0.0 }
 0x210   : > { %v3632_v5 = vpop.f32.mrf.mxu1  ;;  %v2410_v55 = vpop.f32.mrf.mxu0  ;;  %2532 = vadd.xlane.f32.xlu0 %v2531_v34 }
 0x211   : > { %v3633_v16 = vadd.f32 %v3632_v5, %v3631_v59  ;;  %v5099_v6 = vadd.f32 %v2410_v55, %v2250_v41  ;;  %v5101_v53 = vadd.f32 %v3704_v30, %v2255_v0 }
 0x213   : > { %5463 = vst [vmem:[#allocation3_spill] sm:$0xff] %v5101_v53  ;;  %v2258_v22 = vadd.f32 %v3633_v16, %v4899_v7  ;;  %v2534_v2 = vsel %vm2422_vm0, %v5099_v6, 0.0  ;;  %v2537_v25 = vsel %vm2422_vm0, %v5101_v53, 0.0 }
 0x214   : > { %2535 = vadd.xlane.f32.xlu1 %v2534_v2  ;;  %2538 = vadd.xlane.f32.xlu0 %v2537_v25 }
 0x215   : > { %v5108_v62 = vadd.f32 %v3705_v10, %v2258_v22 }
 0x217   : > { %5464 = vst [vmem:[#allocation6_spill] sm:$0xff] %v5108_v62  ;;  %v2540_v36 = vsel %vm2422_vm0, %v5108_v62, 0.0 }
 0x218   : > { %2541 = vadd.xlane.f32.xlu1 %v2540_v36 }
 0x25f   : > { %v2431_v32 = vpop.xlane.xlu1 %2430 }
 0x261   : > { %v2425_v49 = vpop.xlane.xlu0 %2424 }
 0x263   : > { %v2434_v1 = vpop.xlane.xlu1 %2433 }
 0x265   : > { %v2428_v44 = vpop.xlane.xlu0 %2427 }
 0x269   : > { %v2443_v24 = vpop.xlane.xlu0 %2442 }
 0x26b   : > { %v2446_v7 = vpop.xlane.xlu1 %2445 }
 0x26d   : > { %v5112_v27 = vpop.xlane.xlu0 %2436 }
 0x26f   : > { %v5114_v48 = vpop.xlane.xlu1 %2439 }
 0x271   : > { %v2463_v29 = vpop.xlane.xlu0 %2462 }
 0x272   : > { %v2481_v5 = vadd.f32 %v2463_v29, %v2431_v32 }
 0x273   : > { %v2466_v8 = vpop.xlane.xlu1 %2465 }
 0x274   : > { %v2482_v16 = vadd.f32 %v2466_v8, %v2434_v1 }
 0x275   : > { %v2457_v30 = vpop.xlane.xlu0 %2456 }
 0x277   : > { %v2460_v9 = vpop.xlane.xlu1 %2459 }
 0x278   : > { %v2480_v28 = vadd.f32 %v2460_v9, %v2428_v44 }
 0x279   : > { %v2475_v4 = vpop.xlane.xlu0 %2474 }
 0x27a   : > { %v5116_v3 = vadd.f32 %v2475_v4, %v2443_v24 }
 0x27b   : > { %v2478_v37 = vpop.xlane.xlu1 %2477 }
 0x27c   : > { %v5118_v12 = vadd.f32 %v2478_v37, %v2446_v7  ;;  %v2479_v37 = vadd.f32 %v2457_v30, %v2425_v49 }
 0x27d   : > { %v2469_v39 = vpop.xlane.xlu0 %2468 }
 0x27f   : > { %v5120_v35 = vpop.xlane.xlu1 %2471 }
 0x281   : > { %v2495_v31 = vpop.xlane.xlu0 %2494 }
 0x282   : > { %v2513_v22 = vadd.f32 %v2495_v31, %v2481_v5 }
 0x283   : > { %v2498_v59 = vpop.xlane.xlu1 %2497 }
 0x284   : > { %v2514_v25 = vadd.f32 %v2498_v59, %v2482_v16 }
 0x285   : > { %v2489_v10 = vpop.xlane.xlu0 %2488 }
 0x286   : > { %v2511_v32 = vadd.f32 %v2489_v10, %v2479_v37  ;;  %v2484_v37 = vadd.f32 %v5120_v35, %v5114_v48 }
 0x287   : > { %v2492_v0 = vpop.xlane.xlu1 %2491 }
 0x288   : > { %v2512_v8 = vadd.f32 %v2492_v0, %v2480_v28 }
 0x289   : > { %v5122_v60 = vpop.xlane.xlu0 %2506 }
 0x28b   : > { %v5124_v41 = vpop.xlane.xlu1 %2509 }
 0x28d   : > { %v2501_v34 = vpop.xlane.xlu0 %2500 }
 0x28f   : > { %v2504_v55 = vpop.xlane.xlu1 %2503 }
 0x291   : > { %v2527_v2 = vpop.xlane.xlu0 %2526 }
 0x292   : > { %v2545_v36 = vadd.f32 %v2527_v2, %v2513_v22 }
 0x293   : > { %v2530_v24 = vpop.xlane.xlu1 %2529 }
 0x294   : > { %v2554_v7 = vmul.f32 0.0625, %v2545_v36  ;;  %v2546_v4 = vadd.f32 %v2530_v24, %v2514_v25 }
 0x295   : > { %v2521_v53 = vpop.xlane.xlu0 %2520 }
 0x296   : > { %v2555_v62 = vmul.f32 0.0625, %v2546_v4  ;;  %v5127_v15 = vsub.f32 %v4901_v23, %v2554_v7  ;;  %v5130_v56 = vsub.f32 %v4965_v47, %v2554_v7  ;;  %v2543_v31 = vadd.f32 %v2521_v53, %v2511_v32 }
 0x297   : > { %v2524_v59 = vpop.xlane.xlu1 %2523  ;;  %v5146_v30 = vsub.f32 %v5025_v13, %v2554_v7  ;;  %v5158_v13 = vsub.f32 %v5069_v33, %v2554_v7 }
 0x298   : > { %v2570_v1 = vmul.f32 %v5127_v15, %v5127_v15  ;;  %v5135_v29 = vsub.f32 %v4915_v52, %v2555_v62  ;;  %v5138_v49 = vsub.f32 %v4981_v40, %v2555_v62  ;;  %v2618_v44 = vmul.f32 %v5130_v56, %v5130_v56 }
 0x299   : > { %v2544_v52 = vadd.f32 %v2524_v59, %v2512_v8  ;;  %v5152_v40 = vsub.f32 %v5035_v11, %v2555_v62  ;;  %v2552_v9 = vmul.f32 0.0625, %v2543_v31  ;;  %v2666_v0 = vmul.f32 %v5146_v30, %v5146_v30  ;;  %v2533_v32 = vpop.xlane.xlu0 %2532 }
 0x29a   : > { %v2582_v23 = vsel %vm2422_vm0, %v2570_v1, 0.0  ;;  %v2571_v47 = vmul.f32 %v5135_v29, %v5135_v29  ;;  %v2619_v53 = vmul.f32 %v5138_v49, %v5138_v49  ;;  %v2630_v10 = vsel %vm2422_vm0, %v2618_v44, 0.0 }
 0x29b   : > { %2583 = vadd.xlane.f32.xlu0 %v2582_v23  ;;  %v2553_v5 = vmul.f32 0.0625, %v2544_v52  ;;  %v2667_v22 = vmul.f32 %v5152_v40, %v5152_v40  ;;  %v5164_v11 = vsub.f32 %v5080_v50, %v2555_v62  ;;  %v2678_v2 = vsel %vm2422_vm0, %v2666_v0, 0.0 }
 0x29c   : > { %v2585_v28 = vsel %vm2422_vm0, %v2571_v47, 0.0  ;;  %v2633_v16 = vsel %vm2422_vm0, %v2619_v53, 0.0  ;;  %v2714_v25 = vmul.f32 %v5158_v13, %v5158_v13  ;;  %v5170_v36 = vsub.f32 %v4908_v43, %v2552_v9 }
 0x29d   : > { %2586 = vadd.xlane.f32.xlu1 %v2585_v28  ;;  %v2681_v33 = vsel %vm2422_vm0, %v2667_v22, 0.0  ;;  %v2715_v24 = vmul.f32 %v5164_v11, %v5164_v11  ;;  %v5176_v7 = vsub.f32 %v4926_v20, %v2553_v5  ;;  %v2483_v50 = vadd.f32 %v2469_v39, %v5112_v27  ;;  %v2536_v31 = vpop.xlane.xlu1 %2535 }
 0x29e   : > { %v2726_v62 = vsel %vm2422_vm0, %v2714_v25, 0.0  ;;  %v2568_v4 = vmul.f32 %v5170_v36, %v5170_v36  ;;  %v5183_v43 = vsub.f32 %v4979_v46, %v2552_v9  ;;  %v5191_v27 = vsub.f32 %v4992_v14, %v2553_v5 }
 0x29f   : > { %2631 = vadd.xlane.f32.xlu0 %v2630_v10  ;;  %v2515_v1 = vadd.f32 %v2501_v34, %v2483_v50  ;;  %v2729_v20 = vsel %vm2422_vm0, %v2715_v24, 0.0  ;;  %v2569_v8 = vmul.f32 %v5176_v7, %v5176_v7  ;;  %v2516_v39 = vadd.f32 %v2504_v55, %v2484_v37 }
 0x2a0   : > { %v2576_v46 = vsel %vm2422_vm0, %v2568_v4, 0.0  ;;  %v2616_v48 = vmul.f32 %v5183_v43, %v5183_v43  ;;  %v5197_v35 = vsub.f32 %v5033_v17, %v2552_v9  ;;  %v2617_v14 = vmul.f32 %v5191_v27, %v5191_v27 }
 0x2a1   : > { %2634 = vadd.xlane.f32.xlu1 %v2633_v16  ;;  %v2547_v59 = vadd.f32 %v2533_v32, %v2515_v1  ;;  %v2548_v34 = vadd.f32 %v2536_v31, %v2516_v39  ;;  %v2579_v23 = vsel %vm2422_vm0, %v2569_v8, 0.0  ;;  %v5203_v55 = vsub.f32 %v5042_v61, %v2553_v5  ;;  %v2542_v4 = vpop.xlane.xlu1 %2541 }
 0x2a2   : > { %v2624_v44 = vsel %vm2422_vm0, %v2616_v48, 0.0  ;;  %v2664_v52 = vmul.f32 %v5197_v35, %v5197_v35  ;;  %v5209_v17 = vsub.f32 %v5078_v63, %v2552_v9  ;;  %v2627_v53 = vsel %vm2422_vm0, %v2617_v14, 0.0 }
 0x2a3   : > { %2679 = vadd.xlane.f32.xlu0 %v2678_v2  ;;  %v2556_v47 = vmul.f32 0.0625, %v2547_v59  ;;  %v2557_v28 = vmul.f32 0.0625, %v2548_v34  ;;  %v2665_v10 = vmul.f32 %v5203_v55, %v5203_v55  ;;  %v5215_v61 = vsub.f32 %v5084_v54, %v2553_v5 }
 0x2a4   : > { %v2672_v0 = vsel %vm2422_vm0, %v2664_v52, 0.0  ;;  %v2712_v16 = vmul.f32 %v5209_v17, %v5209_v17 }
 0x2a5   : > { %2682 = vadd.xlane.f32.xlu1 %v2681_v33  ;;  %v5221_v22 = vsub.f32 %v4945_v38, %v2556_v47  ;;  %v2675_v63 = vsel %vm2422_vm0, %v2665_v10, 0.0  ;;  %v2713_v9 = vmul.f32 %v5215_v61, %v5215_v61  ;;  %v5227_v2 = vsub.f32 %v4956_v26, %v2557_v28  ;;  %v2539_v38 = vpop.xlane.xlu0 %2538 }
 0x2a6   : > { %v2720_v54 = vsel %vm2422_vm0, %v2712_v16, 0.0  ;;  %v5233_v25 = vsub.f32 %v5008_v58, %v2556_v47  ;;  %v2517_v33 = vadd.f32 %v5122_v60, %v5116_v3  ;;  %v5241_v50 = vsub.f32 %v5018_v42, %v2557_v28 }
 0x2a7   : > { %2727 = vadd.xlane.f32.xlu0 %v2726_v62  ;;  %v2572_v5 = vmul.f32 %v5221_v22, %v5221_v22  ;;  %v2723_v24 = vsel %vm2422_vm0, %v2713_v9, 0.0  ;;  %v2573_v26 = vmul.f32 %v5227_v2, %v5227_v2  ;;  %v2518_v62 = vadd.f32 %v5124_v41, %v5118_v12  ;;  %v5467_v9 = vld [vmem:[#allocation5_spill] sm:$0xff] }
 0x2a8   : > { %v2549_v58 = vadd.f32 %v2539_v38, %v2517_v33  ;;  %v2620_v32 = vmul.f32 %v5233_v25, %v5233_v25  ;;  %v5249_v3 = vsub.f32 %v5057_v51, %v2556_v47  ;;  %v2621_v42 = vmul.f32 %v5241_v50, %v5241_v50  ;;  %v5468_v33 = vld [vmem:[#allocation3_spill] sm:$0xff] }
 0x2a9   : > { %2730 = vadd.xlane.f32.xlu1 %v2729_v20  ;;  %v2588_v37 = vsel %vm2422_vm0, %v2572_v5, 0.0  ;;  %v2550_v60 = vadd.f32 %v2542_v4, %v2518_v62  ;;  %v2591_v1 = vsel %vm2422_vm0, %v2573_v26, 0.0  ;;  %v5255_v12 = vsub.f32 %v5064_v21, %v2557_v28  ;;  %v5469_v4 = vld [vmem:[#allocation6_spill] sm:$0xff] }
 0x2aa   : > { %v2558_v41 = vmul.f32 0.0625, %v2549_v58  ;;  %v2636_v20 = vsel %vm2422_vm0, %v2620_v32, 0.0  ;;  %v2668_v8 = vmul.f32 %v5249_v3, %v5249_v3  ;;  %v5261_v51 = vsub.f32 %v5091_v45, %v2556_v47 }
 0x2ab   : > { %2577 = vadd.xlane.f32.xlu0 %v2576_v46  ;;  %v2559_v39 = vmul.f32 0.0625, %v2550_v60  ;;  %v2639_v31 = vsel %vm2422_vm0, %v2621_v42, 0.0  ;;  %v2669_v59 = vmul.f32 %v5255_v12, %v5255_v12  ;;  %v5267_v21 = vsub.f32 %v5099_v6, %v2557_v28  ;;  %v5465_v28 = vld [vmem:[#allocation13_spill] sm:$0xff] }
 0x2ac   : > { %v2684_v46 = vsel %vm2422_vm0, %v2668_v8, 0.0  ;;  %v2716_v48 = vmul.f32 %v5261_v51, %v5261_v51  ;;  %v5273_v34 = vsub.f32 %v4935_v19, %v2558_v41 }
 0x2ad   : > { %2580 = vadd.xlane.f32.xlu1 %v2579_v23  ;;  %v2687_v45 = vsel %vm2422_vm0, %v2669_v59, 0.0  ;;  %v2717_v23 = vmul.f32 %v5267_v21, %v5267_v21  ;;  %v5279_v14 = vsub.f32 %v4947_v57, %v2559_v39  ;;  %v5315_v58 = vsub.f32 %v5469_v4, %v2559_v39 }
 0x2ae   : > { %v2732_v6 = vsel %vm2422_vm0, %v2716_v48, 0.0  ;;  %v2574_v47 = vmul.f32 %v5273_v34, %v5273_v34 }
 0x2af   : > { %2625 = vadd.xlane.f32.xlu0 %v2624_v44  ;;  %v5285_v44 = vsub.f32 %v4999_v18, %v2558_v41  ;;  %v2735_v19 = vsel %vm2422_vm0, %v2717_v23, 0.0  ;;  %v2575_v52 = vmul.f32 %v5279_v14, %v5279_v14 }
 0x2b0   : > { %v2594_v57 = vsel %vm2422_vm0, %v2574_v47, 0.0 }
 0x2b1   : > { %2628 = vadd.xlane.f32.xlu1 %v2627_v53  ;;  %v5291_v53 = vsub.f32 %v5465_v28, %v2559_v39  ;;  %v2622_v10 = vmul.f32 %v5285_v44, %v5285_v44  ;;  %v2597_v18 = vsel %vm2422_vm0, %v2575_v52, 0.0 }
 0x2b3   : > { %2673 = vadd.xlane.f32.xlu0 %v2672_v0  ;;  %v5466_v0 = vld [vmem:[#allocation2_spill] sm:$0xff]  ;;  %v2642_v5 = vsel %vm2422_vm0, %v2622_v10, 0.0 }
 0x2b4   : > { %v5297_v16 = vsub.f32 %v5466_v0, %v2558_v41 }
 0x2b5   : > { %2676 = vadd.xlane.f32.xlu1 %v2675_v63  ;;  %v2623_v63 = vmul.f32 %v5291_v53, %v5291_v53 }
 0x2b6   : > { %v2670_v38 = vmul.f32 %v5297_v16, %v5297_v16 }
 0x2b7   : > { %2721 = vadd.xlane.f32.xlu0 %v2720_v54  ;;  %v5303_v54 = vsub.f32 %v5467_v9, %v2559_v39  ;;  %v2645_v26 = vsel %vm2422_vm0, %v2623_v63, 0.0 }
 0x2b9   : > { %2724 = vadd.xlane.f32.xlu1 %v2723_v24  ;;  %v5309_v24 = vsub.f32 %v5468_v33, %v2558_v41  ;;  %v2671_v62 = vmul.f32 %v5303_v54, %v5303_v54 }
 0x2bb   : > { %2589 = vadd.xlane.f32.xlu0 %v2588_v37  ;;  %v2690_v37 = vsel %vm2422_vm0, %v2670_v38, 0.0  ;;  %v2718_v32 = vmul.f32 %v5309_v24, %v5309_v24  ;;  %v2693_v60 = vsel %vm2422_vm0, %v2671_v62, 0.0 }
 0x2bd   : > { %2592 = vadd.xlane.f32.xlu1 %v2591_v1  ;;  %v2719_v1 = vmul.f32 %v5315_v58, %v5315_v58  ;;  %v2738_v42 = vsel %vm2422_vm0, %v2718_v32, 0.0 }
 0x2bf   : > { %2637 = vadd.xlane.f32.xlu0 %v2636_v20  ;;  %v2741_v41 = vsel %vm2422_vm0, %v2719_v1, 0.0 }
 0x2c1   : > { %2640 = vadd.xlane.f32.xlu1 %v2639_v31 }
 0x2c3   : > { %2685 = vadd.xlane.f32.xlu0 %v2684_v46 }
 0x2c5   : > { %2688 = vadd.xlane.f32.xlu1 %v2687_v45 }
 0x2c7   : > { %2733 = vadd.xlane.f32.xlu0 %v2732_v6 }
 0x2c9   : > { %2736 = vadd.xlane.f32.xlu1 %v2735_v19 }
 0x2cb   : > { %2595 = vadd.xlane.f32.xlu0 %v2594_v57 }
 0x2cd   : > { %2598 = vadd.xlane.f32.xlu1 %v2597_v18 }
 0x2cf   : > { %2643 = vadd.xlane.f32.xlu0 %v2642_v5 }
 0x2d1   : > { %2646 = vadd.xlane.f32.xlu1 %v2645_v26 }
 0x2d3   : > { %2691 = vadd.xlane.f32.xlu0 %v2690_v37 }
 0x2d5   : > { %2694 = vadd.xlane.f32.xlu1 %v2693_v60 }
 0x2d7   : > { %2739 = vadd.xlane.f32.xlu0 %v2738_v42 }
 0x2d9   : > { %2742 = vadd.xlane.f32.xlu1 %v2741_v41 }
 0x324   : > { %v2584_v20 = vpop.xlane.xlu0 %2583 }
 0x326   : > { %v2587_v8 = vpop.xlane.xlu1 %2586 }
 0x328   : > { %v2632_v39 = vpop.xlane.xlu0 %2631 }
 0x329   : > { %v2650_v46 = vadd.f32 %v2632_v39, %v2584_v20 }
 0x32a   : > { %v2635_v31 = vpop.xlane.xlu1 %2634 }
 0x32b   : > { %v2651_v45 = vadd.f32 %v2635_v31, %v2587_v8 }
 0x32c   : > { %v2680_v59 = vpop.xlane.xlu0 %2679 }
 0x32d   : > { %v2698_v23 = vadd.f32 %v2680_v59, %v2650_v46 }
 0x32e   : > { %v2683_v48 = vpop.xlane.xlu1 %2682 }
 0x32f   : > { %v2699_v47 = vadd.f32 %v2683_v48, %v2651_v45 }
 0x330   : > { %v2728_v6 = vpop.xlane.xlu0 %2727 }
 0x331   : > { %v2746_v19 = vadd.f32 %v2728_v6, %v2698_v23 }
 0x332   : > { %v2731_v52 = vpop.xlane.xlu1 %2730 }
 0x333   : > { %v2754_v28 = vmul.f32 0.0625, %v2746_v19  ;;  %v2747_v57 = vadd.f32 %v2731_v52, %v2699_v47 }
 0x334   : > { %v2578_v10 = vpop.xlane.xlu0 %2577 }
 0x335   : > { %v2762_v0 = vadd.f32 1e-05, %v2754_v28  ;;  %v2755_v18 = vmul.f32 0.0625, %v2747_v57 }
 0x336   : > { %v2581_v63 = vpop.xlane.xlu1 %2580 }
 0x337   : > { %4011 = vrsqrt.f32 %v2762_v0  ;;  %v2763_v9 = vadd.f32 1e-05, %v2755_v18 }
 0x338   : > { %v2626_v5 = vpop.xlane.xlu0 %2625 }
 0x339   : > { %4013 = vrsqrt.f32 %v2763_v9  ;;  %v2648_v26 = vadd.f32 %v2626_v5, %v2578_v10 }
 0x33a   : > { %v2629_v38 = vpop.xlane.xlu1 %2628 }
 0x33b   : > { %v2649_v4 = vadd.f32 %v2629_v38, %v2581_v63 }
 0x33c   : > { %v2674_v33 = vpop.xlane.xlu0 %2673 }
 0x33d   : > { %v2696_v37 = vadd.f32 %v2674_v33, %v2648_v26 }
 0x33e   : > { %v2677_v62 = vpop.xlane.xlu1 %2676 }
 0x33f   : > { %v2697_v60 = vadd.f32 %v2677_v62, %v2649_v4 }
 0x340   : > { %v2722_v32 = vpop.xlane.xlu0 %2721 }
 0x341   : > { %v2744_v1 = vadd.f32 %v2722_v32, %v2696_v37 }
 0x342   : > { %v2725_v42 = vpop.xlane.xlu1 %2724 }
 0x343   : > { %v2752_v41 = vmul.f32 0.0625, %v2744_v1  ;;  %v2745_v20 = vadd.f32 %v2725_v42, %v2697_v60 }
 0x344   : > { %v4012_v8 = vpop.eup %4011  ;;  %v2590_v39 = vpop.xlane.xlu0 %2589 }
 0x345   : > { %v2778_v31 = vmul.f32 %v4012_v8, %v5127_v15  ;;  %v2810_v59 = vmul.f32 %v4012_v8, %v5130_v56  ;;  %v2842_v46 = vmul.f32 %v4012_v8, %v5146_v30  ;;  %v2874_v48 = vmul.f32 %v4012_v8, %v5158_v13 }
 0x346   : > { %v4014_v45 = vpop.eup %4013  ;;  %v2760_v23 = vadd.f32 1e-05, %v2752_v41  ;;  %v2753_v6 = vmul.f32 0.0625, %v2745_v20  ;;  %v2593_v47 = vpop.xlane.xlu1 %2592 }
 0x347   : > { %v2786_v19 = vmul.f32 0.1, %v2778_v31  ;;  %v2818_v52 = vmul.f32 0.1, %v2810_v59  ;;  %v2850_v28 = vmul.f32 0.1, %v2842_v46  ;;  %v2779_v57 = vmul.f32 %v4014_v45, %v5135_v29 }
 0x348   : > { %v2882_v56 = vmul.f32 0.1, %v2874_v48  ;;  %v2811_v15 = vmul.f32 %v4014_v45, %v5138_v49  ;;  %v2843_v30 = vmul.f32 %v4014_v45, %v5152_v40  ;;  %v2875_v13 = vmul.f32 %v4014_v45, %v5164_v11  ;;  %v2638_v10 = vpop.xlane.xlu0 %2637 }
 0x349   : > { %v2794_v0 = vmax.f32 %v2778_v31, %v2786_v19  ;;  %v2826_v18 = vmax.f32 %v2810_v59, %v2818_v52  ;;  %v2858_v29 = vmax.f32 %v2842_v46, %v2850_v28  ;;  %v2787_v63 = vmul.f32 0.1, %v2779_v57 }
 0x34a   : > { %v2890_v9 = vmax.f32 %v2874_v48, %v2882_v56  ;;  %v2819_v5 = vmul.f32 0.1, %v2811_v15  ;;  %v2851_v38 = vmul.f32 0.1, %v2843_v30  ;;  %v2883_v33 = vmul.f32 0.1, %v2875_v13  ;;  %v2641_v26 = vpop.xlane.xlu1 %2640 }
 0x34b   : > { %2802 = vst.msk [vmem:[%s5334_s10 + $0x10] sm:$0xff] %vm2422_vm0, %v2794_v0  ;;  %2834 = vst.msk [vmem:[%s5334_s10 + $0x50] sm:$0xff] %vm2422_vm0, %v2826_v18  ;;  %v2795_v49 = vmax.f32 %v2779_v57, %v2787_v63  ;;  %4015 = vrsqrt.f32 %v2760_v23  ;;  %v2761_v40 = vadd.f32 1e-05, %v2753_v6  ;;  %v2652_v32 = vadd.f32 %v2638_v10, %v2590_v39 }
 0x34c   : > { %2866 = vst.msk [vmem:[%s5334_s10 + $0x90] sm:$0xff] %vm2422_vm0, %v2858_v29  ;;  %2898 = vst.msk [vmem:[%s5334_s10 + $0xd0] sm:$0xff] %vm2422_vm0, %v2890_v9  ;;  %v2827_v11 = vmax.f32 %v2811_v15, %v2819_v5  ;;  %v2859_v62 = vmax.f32 %v2843_v30, %v2851_v38  ;;  %v2891_v4 = vmax.f32 %v2875_v13, %v2883_v33  ;;  %v2686_v37 = vpop.xlane.xlu0 %2685 }
 0x34d   : > { %2803 = vst.msk [vmem:[%s5334_s10 + $0x18] sm:$0xff] %vm2422_vm0, %v2795_v49  ;;  %4017 = vrsqrt.f32 %v2761_v40  ;;  %v2653_v1 = vadd.f32 %v2641_v26, %v2593_v47  ;;  %v2700_v42 = vadd.f32 %v2686_v37, %v2652_v32 }
 0x34e   : > { %2835 = vst.msk [vmem:[%s5334_s10 + $0x58] sm:$0xff] %vm2422_vm0, %v2827_v11  ;;  %2867 = vst.msk [vmem:[%s5334_s10 + $0x98] sm:$0xff] %vm2422_vm0, %v2859_v62  ;;  %v2689_v60 = vpop.xlane.xlu1 %2688 }
 0x34f   : > { %2899 = vst.msk [vmem:[%s5334_s10 + $0xd8] sm:$0xff] %vm2422_vm0, %v2891_v4  ;;  %v2701_v20 = vadd.f32 %v2689_v60, %v2653_v1 }
 0x350   : > { %v2734_v41 = vpop.xlane.xlu0 %2733 }
 0x351   : > { %v2748_v8 = vadd.f32 %v2734_v41, %v2700_v42 }
 0x352   : > { %v2737_v31 = vpop.xlane.xlu1 %2736 }
 0x353   : > { %v2756_v59 = vmul.f32 0.0625, %v2748_v8  ;;  %v2749_v46 = vadd.f32 %v2737_v31, %v2701_v20 }
 0x354   : > { %v2596_v48 = vpop.xlane.xlu0 %2595 }
 0x355   : > { %v2764_v45 = vadd.f32 1e-05, %v2756_v59  ;;  %v2757_v23 = vmul.f32 0.0625, %v2749_v46 }
 0x356   : > { %v2599_v6 = vpop.xlane.xlu1 %2598 }
 0x357   : > { %4019 = vrsqrt.f32 %v2764_v45  ;;  %v2765_v39 = vadd.f32 1e-05, %v2757_v23 }
 0x358   : > { %v4016_v19 = vpop.eup %4015  ;;  %v2644_v52 = vpop.xlane.xlu0 %2643 }
 0x359   : > { %v2776_v28 = vmul.f32 %v4016_v19, %v5170_v36  ;;  %v2808_v57 = vmul.f32 %v4016_v19, %v5183_v43  ;;  %v2840_v47 = vmul.f32 %v4016_v19, %v5197_v35  ;;  %v2872_v56 = vmul.f32 %v4016_v19, %v5209_v17 }
 0x35a   : > { %v4018_v15 = vpop.eup %4017  ;;  %4021 = vrsqrt.f32 %v2765_v39  ;;  %v2654_v30 = vadd.f32 %v2644_v52, %v2596_v48  ;;  %v2647_v13 = vpop.xlane.xlu1 %2646 }
 0x35b   : > { %v2784_v10 = vmul.f32 0.1, %v2776_v28  ;;  %v2816_v0 = vmul.f32 0.1, %v2808_v57  ;;  %v2848_v18 = vmul.f32 0.1, %v2840_v47  ;;  %v2777_v29 = vmul.f32 %v4018_v15, %v5176_v7 }
 0x35c   : > { %v2880_v63 = vmul.f32 0.1, %v2872_v56  ;;  %v2809_v36 = vmul.f32 %v4018_v15, %v5191_v27  ;;  %v2841_v43 = vmul.f32 %v4018_v15, %v5203_v55  ;;  %v2873_v35 = vmul.f32 %v4018_v15, %v5215_v61  ;;  %v2692_v17 = vpop.xlane.xlu0 %2691 }
 0x35d   : > { %v2792_v9 = vmax.f32 %v2776_v28, %v2784_v10  ;;  %v2824_v5 = vmax.f32 %v2808_v57, %v2816_v0  ;;  %v2856_v38 = vmax.f32 %v2840_v47, %v2848_v18  ;;  %v2785_v33 = vmul.f32 0.1, %v2777_v29 }
 0x35e   : > { %v2888_v26 = vmax.f32 %v2872_v56, %v2880_v63  ;;  %v2817_v49 = vmul.f32 0.1, %v2809_v36  ;;  %v2849_v40 = vmul.f32 0.1, %v2841_v43  ;;  %v2881_v7 = vmul.f32 0.1, %v2873_v35  ;;  %v2695_v11 = vpop.xlane.xlu1 %2694 }
 0x35f   : > { %2800 = vst.msk [vmem:[%s5334_s10] sm:$0xff] %vm2422_vm0, %v2792_v9  ;;  %2832 = vst.msk [vmem:[%s5334_s10 + $0x40] sm:$0xff] %vm2422_vm0, %v2824_v5  ;;  %v2793_v27 = vmax.f32 %v2777_v29, %v2785_v33  ;;  %v2655_v55 = vadd.f32 %v2647_v13, %v2599_v6  ;;  %v2702_v61 = vadd.f32 %v2692_v17, %v2654_v30 }
 0x360   : > { %2864 = vst.msk [vmem:[%s5334_s10 + $0x80] sm:$0xff] %vm2422_vm0, %v2856_v38  ;;  %2896 = vst.msk [vmem:[%s5334_s10 + $0xc0] sm:$0xff] %vm2422_vm0, %v2888_v26  ;;  %v2825_v62 = vmax.f32 %v2809_v36, %v2817_v49  ;;  %v2857_v4 = vmax.f32 %v2841_v43, %v2849_v40  ;;  %v2889_v37 = vmax.f32 %v2873_v35, %v2881_v7  ;;  %v2740_v32 = vpop.xlane.xlu0 %2739 }
 0x361   : > { %2801 = vst.msk [vmem:[%s5334_s10 + $0x8] sm:$0xff] %vm2422_vm0, %v2793_v27  ;;  %v2703_v60 = vadd.f32 %v2695_v11, %v2655_v55  ;;  %v2750_v1 = vadd.f32 %v2740_v32, %v2702_v61 }
 0x362   : > { %2833 = vst.msk [vmem:[%s5334_s10 + $0x48] sm:$0xff] %vm2422_vm0, %v2825_v62  ;;  %2865 = vst.msk [vmem:[%s5334_s10 + $0x88] sm:$0xff] %vm2422_vm0, %v2857_v4  ;;  %v2743_v42 = vpop.xlane.xlu1 %2742 }
 0x363   : > { %2897 = vst.msk [vmem:[%s5334_s10 + $0xc8] sm:$0xff] %vm2422_vm0, %v2889_v37  ;;  %v2758_v41 = vmul.f32 0.0625, %v2750_v1  ;;  %v2751_v20 = vadd.f32 %v2743_v42, %v2703_v60 }
 0x364   : > { %v4020_v8 = vpop.eup %4019 }
 0x365   : > { %v2780_v31 = vmul.f32 %v4020_v8, %v5221_v22  ;;  %v2812_v59 = vmul.f32 %v4020_v8, %v5233_v25  ;;  %v2844_v46 = vmul.f32 %v4020_v8, %v5249_v3  ;;  %v2876_v48 = vmul.f32 %v4020_v8, %v5261_v51 }
 0x366   : > { %v2766_v45 = vadd.f32 1e-05, %v2758_v41  ;;  %v2759_v23 = vmul.f32 0.0625, %v2751_v20 }
 0x367   : > { %v4022_v6 = vpop.eup %4021  ;;  %v2788_v39 = vmul.f32 0.1, %v2780_v31  ;;  %v2820_v19 = vmul.f32 0.1, %v2812_v59  ;;  %v2852_v52 = vmul.f32 0.1, %v2844_v46 }
 0x368   : > { %v2884_v28 = vmul.f32 0.1, %v2876_v48  ;;  %v2781_v57 = vmul.f32 %v4022_v6, %v5227_v2  ;;  %v2813_v22 = vmul.f32 %v4022_v6, %v5241_v50  ;;  %v2845_v25 = vmul.f32 %v4022_v6, %v5255_v12 }
 0x369   : > { %v2796_v3 = vmax.f32 %v2780_v31, %v2788_v39  ;;  %v2828_v47 = vmax.f32 %v2812_v59, %v2820_v19  ;;  %v2860_v51 = vmax.f32 %v2844_v46, %v2852_v52  ;;  %v2877_v56 = vmul.f32 %v4022_v6, %v5267_v21 }
 0x36a   : > { %v2892_v15 = vmax.f32 %v2876_v48, %v2884_v28  ;;  %v2789_v30 = vmul.f32 0.1, %v2781_v57  ;;  %v2821_v13 = vmul.f32 0.1, %v2813_v22  ;;  %v2853_v10 = vmul.f32 0.1, %v2845_v25 }
 0x36b   : > { %2804 = vst.msk [vmem:[%s5334_s10 + $0x20] sm:$0xff] %vm2422_vm0, %v2796_v3  ;;  %2836 = vst.msk [vmem:[%s5334_s10 + $0x60] sm:$0xff] %vm2422_vm0, %v2828_v47  ;;  %v2885_v2 = vmul.f32 0.1, %v2877_v56  ;;  %4023 = vrsqrt.f32 %v2766_v45  ;;  %v2767_v50 = vadd.f32 1e-05, %v2759_v23 }
 0x36c   : > { %2868 = vst.msk [vmem:[%s5334_s10 + $0xa0] sm:$0xff] %vm2422_vm0, %v2860_v51  ;;  %2900 = vst.msk [vmem:[%s5334_s10 + $0xe0] sm:$0xff] %vm2422_vm0, %v2892_v15  ;;  %v2797_v12 = vmax.f32 %v2781_v57, %v2789_v30  ;;  %v2829_v21 = vmax.f32 %v2813_v22, %v2821_v13  ;;  %v2861_v0 = vmax.f32 %v2845_v25, %v2853_v10 }
 0x36d   : > { %v2893_v18 = vmax.f32 %v2877_v56, %v2885_v2  ;;  %4025 = vrsqrt.f32 %v2767_v50 }
 0x36e   : > { %2805 = vst.msk [vmem:[%s5334_s10 + $0x28] sm:$0xff] %vm2422_vm0, %v2797_v12  ;;  %2837 = vst.msk [vmem:[%s5334_s10 + $0x68] sm:$0xff] %vm2422_vm0, %v2829_v21 }
 0x36f   : > { %2869 = vst.msk [vmem:[%s5334_s10 + $0xa8] sm:$0xff] %vm2422_vm0, %v2861_v0  ;;  %2901 = vst.msk [vmem:[%s5334_s10 + $0xe8] sm:$0xff] %vm2422_vm0, %v2893_v18 }
 0x378   : > { %v4024_v29 = vpop.eup %4023 }
 0x379   : > { %v2782_v63 = vmul.f32 %v4024_v29, %v5273_v34  ;;  %v2814_v36 = vmul.f32 %v4024_v29, %v5285_v44  ;;  %v2846_v43 = vmul.f32 %v4024_v29, %v5297_v16  ;;  %v2878_v35 = vmul.f32 %v4024_v29, %v5309_v24 }
 0x37a   : > { %v4026_v17 = vpop.eup %4025 }
 0x37b   : > { %v2790_v9 = vmul.f32 0.1, %v2782_v63  ;;  %v2822_v5 = vmul.f32 0.1, %v2814_v36  ;;  %v2854_v38 = vmul.f32 0.1, %v2846_v43  ;;  %v2783_v33 = vmul.f32 %v4026_v17, %v5279_v14 }
 0x37c   : > { %v2886_v26 = vmul.f32 0.1, %v2878_v35  ;;  %v2815_v49 = vmul.f32 %v4026_v17, %v5291_v53  ;;  %v2847_v34 = vmul.f32 %v4026_v17, %v5303_v54  ;;  %v2879_v44 = vmul.f32 %v4026_v17, %v5315_v58 }
 0x37d   : > { %v2798_v16 = vmax.f32 %v2782_v63, %v2790_v9  ;;  %v2830_v24 = vmax.f32 %v2814_v36, %v2822_v5  ;;  %v2862_v40 = vmax.f32 %v2846_v43, %v2854_v38  ;;  %v2791_v7 = vmul.f32 0.1, %v2783_v33 }
 0x37e   : > { %v2894_v11 = vmax.f32 %v2878_v35, %v2886_v26  ;;  %v2823_v27 = vmul.f32 0.1, %v2815_v49  ;;  %v2855_v55 = vmul.f32 0.1, %v2847_v34  ;;  %v2887_v14 = vmul.f32 0.1, %v2879_v44 }
 0x37f   : > { %2806 = vst.msk [vmem:[%s5334_s10 + $0x30] sm:$0xff] %vm2422_vm0, %v2798_v16  ;;  %2838 = vst.msk [vmem:[%s5334_s10 + $0x70] sm:$0xff] %vm2422_vm0, %v2830_v24  ;;  %v2799_v53 = vmax.f32 %v2783_v33, %v2791_v7 }
 0x380   : > { %2870 = vst.msk [vmem:[%s5334_s10 + $0xb0] sm:$0xff] %vm2422_vm0, %v2862_v40  ;;  %2902 = vst.msk [vmem:[%s5334_s10 + $0xf0] sm:$0xff] %vm2422_vm0, %v2894_v11  ;;  %v2831_v54 = vmax.f32 %v2815_v49, %v2823_v27  ;;  %v2863_v58 = vmax.f32 %v2847_v34, %v2855_v55  ;;  %v2895_v61 = vmax.f32 %v2879_v44, %v2887_v14 }
 0x381   : > { %2807 = vst.msk [vmem:[%s5334_s10 + $0x38] sm:$0xff] %vm2422_vm0, %v2799_v53 }
 0x382   : > { %2839 = vst.msk [vmem:[%s5334_s10 + $0x78] sm:$0xff] %vm2422_vm0, %v2831_v54  ;;  %2871 = vst.msk [vmem:[%s5334_s10 + $0xb8] sm:$0xff] %vm2422_vm0, %v2863_v58 }
 0x383   : > { %2903 = vst.msk [vmem:[%s5334_s10 + $0xf8] sm:$0xff] %vm2422_vm0, %v2895_v61 }
 0x384 PF: > { %s12_s9 = sadd.s32 1, %s4033_s9  }
 0x385   : > { %p9_p4 = scmp.ge.s32.totalorder %s12_s9, 4  }
 0x387   :  { %11 = sbr.rel (!%p9_p4) target bundleno = 1 (0x1), region = 58 }

// kernel: attr_encoder_forward.16
= control target key start
LH: loop header
LB: loop body
LE: loop exit
PB: predicated region body
PF: predicated region fallthrough
CT: control target
= control target key end

     0   :  { %s2642_s9 = smov 0   ;;  %s3316_s0 = inlined_call_operand.vmem [shape: bf16[128,1152], index: 0, kind: input, shape index: {}]   ;;  %s3317_s1 = inlined_call_operand.vmem [shape: bf16[2,1152,16], index: 1, kind: input, shape index: {}]   ;;  %s3318_s2 = inlined_call_operand.vmem [shape: f32[2,128,16], index: 2, kind: output, shape index: {}]  }
   0x1 LB: > { %s1951_s10 = sadd.s32 4294967295, %s2625_s9   ;;  %p1955_p0 = scmp.ge.s32.totalorder %s2625_s9, 1  ;;  %s2625_s9 = sphi %s2642_s9, %s12_s9  }
   0x2   : > { %p112_p1 = scmp.lt.s32.totalorder %s2625_s9, 3 }
   0x4   : > { %p113_p2 = pnand %p1955_p0, %p112_p1 }
   0x6   : > { %116 = sbr.rel (%p113_p2) target bundleno = 748 (0x2ec), region = 28 }
   0xb   : > { %p134_p3 = scmp.lt.s32.totalorder %s1951_s10, 1  ;;  %v2469_v0 = vld [vmem:[%s3316_s0 + $0x4] ss:$36 sps:$4 sm:$0xff]   ;;  %v2472_v1 = vld [vmem:[%s3316_s0 + $0xc] ss:$36 sps:$4 sm:$0xff]   ;;  %vm1654_vm0 = vcmask 130048  }
   0xc   : > { %1201 = vmatprep.mubr.bf16.mxu0 %v2469_v0  ;;  %1298 = vmatprep.mubr.bf16.mxu1 %v2472_v1  ;;  %v2467_v32 = vld [vmem:[%s3316_s0] ss:$36 sps:$4 sm:$0xff]   ;;  %v2470_v34 = vld [vmem:[%s3316_s0 + $0x8] ss:$36 sps:$4 sm:$0xff]   ;;  %v2479_v38 = vld [vmem:[%s3316_s0 + $0x54] ss:$36 sps:$4 sm:$0xff]  }
   0xd   : > { %s3340_s10 = smov (!%p134_p3, %s1951_s10), 1  ;;  %v2477_v36 = vld [vmem:[%s3316_s0 + $0x4c] ss:$36 sps:$4 sm:$0xff]   ;;  %v2487_v48 = vld [vmem:[%s3316_s0 + $0x94] ss:$36 sps:$4 sm:$0xff]  }
   0xe   : > { %s2426_s15 = smul.u32 576, %s3340_s10  ;;  %v2481_v43 = vld [vmem:[%s3316_s0 + $0x48] ss:$36 sps:$4 sm:$0xff]   ;;  %v2482_v47 = vld [vmem:[%s3316_s0 + $0x50] ss:$36 sps:$4 sm:$0xff]   ;;  %s2105_s4 = sshll.u32 %s3340_s10, 7 }
   0xf   : > { %v2489_v49 = vld [vmem:[%s3316_s0 + $0x9c] ss:$36 sps:$4 sm:$0xff]   ;;  %v2491_v54 = vld [vmem:[%s3316_s0 + $0x90] ss:$36 sps:$4 sm:$0xff]   ;;  %v2499_v57 = vld [vmem:[%s3316_s0 + $0xe4] ss:$36 sps:$4 sm:$0xff]   ;;  %s3271_s6 = scalar_lea.vmem %s3318_s2, %s2105_s4 }
  0x10   : > { %s2662_s18 = scalar_lea.vmem %s3317_s1, %s2426_s15  ;;  %v2492_v55 = vld [vmem:[%s3316_s0 + $0x98] ss:$36 sps:$4 sm:$0xff]   ;;  %v2502_v63 = vld [vmem:[%s3316_s0 + $0xe0] ss:$36 sps:$4 sm:$0xff]   ;;  %v2509_v1 = vld [vmem:[%s3316_s0 + $0x12c] ss:$36 sps:$4 sm:$0xff]  }
  0x11   : > { %v2435_v2 = vld [vmem:[%s2662_s18 + $0x78] sm:$0xff]   ;;  %v2439_v6 = vld [vmem:[%s2662_s18 + $0x70] sm:$0xff]   ;;  %v2443_v10 = vld [vmem:[%s2662_s18 + $0x68] sm:$0xff]  }
  0x12   : > { %v2436_v3 = vld [vmem:[%s2662_s18 + $0xf8] sm:$0xff]   ;;  %2106 = vmatprep.subr.bf16.mxu0 %v2435_v2  ;;  %v2440_v7 = vld [vmem:[%s2662_s18 + $0xf0] sm:$0xff]   ;;  %v2444_v11 = vld [vmem:[%s2662_s18 + $0xe8] sm:$0xff]  }
  0x13   : > { %v2437_v4 = vld [vmem:[%s2662_s18 + $0x38] sm:$0xff]   ;;  %2170 = vmatprep.subr.bf16.mxu1 %v2436_v3  ;;  %v2441_v8 = vld [vmem:[%s2662_s18 + $0x30] sm:$0xff]   ;;  %v2445_v12 = vld [vmem:[%s2662_s18 + $0x28] sm:$0xff]  }
  0x14   : > { %v2438_v5 = vld [vmem:[%s2662_s18 + $0xb8] sm:$0xff]   ;;  %2107 = vmatpush3.bf16.msra.mxu0 %v2437_v4  ;;  %v2442_v9 = vld [vmem:[%s2662_s18 + $0xb0] sm:$0xff]   ;;  %v2446_v13 = vld [vmem:[%s2662_s18 + $0xa8] sm:$0xff]  }
  0x15   : > { %2171 = vmatpush3.bf16.msra.mxu1 %v2438_v5  ;;  %2108 = vmatprep.subr.bf16.mxu0 %v2439_v6  ;;  %v2447_v14 = vld [vmem:[%s2662_s18 + $0x60] sm:$0xff]   ;;  %v2451_v18 = vld [vmem:[%s2662_s18 + $0x58] sm:$0xff]   ;;  %v2455_v22 = vld [vmem:[%s2662_s18 + $0x50] sm:$0xff]  }
  0x16   : > { %2172 = vmatprep.subr.bf16.mxu1 %v2440_v7  ;;  %v2448_v15 = vld [vmem:[%s2662_s18 + $0xe0] sm:$0xff]   ;;  %v2452_v19 = vld [vmem:[%s2662_s18 + $0xd8] sm:$0xff]   ;;  %v2456_v23 = vld [vmem:[%s2662_s18 + $0xd0] sm:$0xff]  }
  0x17   : > { %v2449_v16 = vld [vmem:[%s2662_s18 + $0x20] sm:$0xff]   ;;  %v2453_v20 = vld [vmem:[%s2662_s18 + $0x18] sm:$0xff]   ;;  %v2457_v24 = vld [vmem:[%s2662_s18 + $0x10] sm:$0xff]  }
  0x18   : > { %2109 = vmatpush3.bf16.msra.mxu0 %v2441_v8  ;;  %v2450_v17 = vld [vmem:[%s2662_s18 + $0xa0] sm:$0xff]   ;;  %v2454_v21 = vld [vmem:[%s2662_s18 + $0x98] sm:$0xff]   ;;  %v2458_v25 = vld [vmem:[%s2662_s18 + $0x90] sm:$0xff]  }
  0x19   : > { %2173 = vmatpush3.bf16.msra.mxu1 %v2442_v9  ;;  %2110 = vmatprep.subr.bf16.mxu0 %v2443_v10  ;;  %v2459_v26 = vld [vmem:[%s2662_s18 + $0x48] sm:$0xff]   ;;  %v2463_v30 = vld [vmem:[%s2662_s18 + $0x40] sm:$0xff]   ;;  %v2473_v37 = vld [vmem:[%s2662_s18 + $0x178] sm:$0xff]  }
  0x1a   : > { %2174 = vmatprep.subr.bf16.mxu1 %v2444_v11  ;;  %v2460_v27 = vld [vmem:[%s2662_s18 + $0xc8] sm:$0xff]   ;;  %v2464_v31 = vld [vmem:[%s2662_s18 + $0xc0] sm:$0xff]   ;;  %v2474_v39 = vld [vmem:[%s2662_s18 + $0x1f8] sm:$0xff]  }
  0x1b   : > { %v2461_v28 = vld [vmem:[%s2662_s18 + $0x8] sm:$0xff]   ;;  %v2465_v33 = vld [vmem:[%s2662_s18] sm:$0xff]   ;;  %v2475_v40 = vld [vmem:[%s2662_s18 + $0x138] sm:$0xff]  }
  0x1c   : > { %2111 = vmatpush3.bf16.msra.mxu0 %v2445_v12  ;;  %v2462_v29 = vld [vmem:[%s2662_s18 + $0x88] sm:$0xff]   ;;  %v2466_v35 = vld [vmem:[%s2662_s18 + $0x80] sm:$0xff]   ;;  %v2476_v41 = vld [vmem:[%s2662_s18 + $0x1b8] sm:$0xff]  }
  0x1d   : > { %2175 = vmatpush3.bf16.msra.mxu1 %v2446_v13  ;;  %2112 = vmatprep.subr.bf16.mxu0 %v2447_v14  ;;  %v2483_v42 = vld [vmem:[%s2662_s18 + $0x170] sm:$0xff]   ;;  %v2493_v50 = vld [vmem:[%s2662_s18 + $0x168] sm:$0xff]   ;;  %v2497_v56 = vld [vmem:[%s3316_s0 + $0xdc] ss:$36 sps:$4 sm:$0xff]  }
  0x1e   : > { %2176 = vmatprep.subr.bf16.mxu1 %v2448_v15  ;;  %v2484_v44 = vld [vmem:[%s2662_s18 + $0x1f0] sm:$0xff]   ;;  %v2494_v51 = vld [vmem:[%s2662_s18 + $0x1e8] sm:$0xff]   ;;  %v2503_v58 = vld [vmem:[%s2662_s18 + $0x160] sm:$0xff]  }
  0x1f   : > { %v2485_v45 = vld [vmem:[%s2662_s18 + $0x130] sm:$0xff]   ;;  %v2495_v52 = vld [vmem:[%s2662_s18 + $0x128] sm:$0xff]   ;;  %v2504_v59 = vld [vmem:[%s2662_s18 + $0x1e0] sm:$0xff]  }
  0x20   : > { %2113 = vmatpush3.bf16.msra.mxu0 %v2449_v16  ;;  %v2486_v46 = vld [vmem:[%s2662_s18 + $0x1b0] sm:$0xff]   ;;  %v2496_v53 = vld [vmem:[%s2662_s18 + $0x1a8] sm:$0xff]   ;;  %v2505_v60 = vld [vmem:[%s2662_s18 + $0x120] sm:$0xff]  }
  0x21   : > { %2177 = vmatpush3.bf16.msra.mxu1 %v2450_v17  ;;  %2114 = vmatprep.subr.bf16.mxu0 %v2451_v18  ;;  %v2506_v61 = vld [vmem:[%s2662_s18 + $0x1a0] sm:$0xff]   ;;  %v2501_v62 = vld [vmem:[%s3316_s0 + $0xd8] ss:$36 sps:$4 sm:$0xff]   ;;  %v2523_v7 = vld [vmem:[%s2662_s18 + $0x150] sm:$0xff]  }
  0x22   : > { %2178 = vmatprep.subr.bf16.mxu1 %v2452_v19  ;;  %v2507_v0 = vld [vmem:[%s3316_s0 + $0x124] ss:$36 sps:$4 sm:$0xff]   ;;  %v2513_v2 = vld [vmem:[%s2662_s18 + $0x158] sm:$0xff]   ;;  %v2517_v9 = vld [vmem:[%s3316_s0 + $0x16c] ss:$36 sps:$4 sm:$0xff]  }
  0x23   : > { %v2514_v3 = vld [vmem:[%s2662_s18 + $0x1d8] sm:$0xff]   ;;  %v2511_v6 = vld [vmem:[%s3316_s0 + $0x120] ss:$36 sps:$4 sm:$0xff]   ;;  %v2512_v8 = vld [vmem:[%s3316_s0 + $0x128] ss:$36 sps:$4 sm:$0xff]  }
  0x24   : > { %2115 = vmatpush3.bf16.msra.mxu0 %v2453_v20  ;;  %v2515_v4 = vld [vmem:[%s2662_s18 + $0x118] sm:$0xff]   ;;  %v2524_v10 = vld [vmem:[%s2662_s18 + $0x1d0] sm:$0xff]   ;;  %v2533_v14 = vld [vmem:[%s2662_s18 + $0x148] sm:$0xff]  }
  0x25   : > { %2179 = vmatpush3.bf16.msra.mxu1 %v2454_v21  ;;  %2116 = vmatprep.subr.bf16.mxu0 %v2455_v22  ;;  %v2516_v5 = vld [vmem:[%s2662_s18 + $0x198] sm:$0xff]   ;;  %v2525_v11 = vld [vmem:[%s2662_s18 + $0x110] sm:$0xff]   ;;  %v2521_v15 = vld [vmem:[%s3316_s0 + $0x168] ss:$36 sps:$4 sm:$0xff]  }
  0x26   : > { %2180 = vmatprep.subr.bf16.mxu1 %v2456_v23  ;;  %v2526_v12 = vld [vmem:[%s2662_s18 + $0x190] sm:$0xff]   ;;  %v2534_v16 = vld [vmem:[%s2662_s18 + $0x1c8] sm:$0xff]   ;;  %v2529_v21 = vld [vmem:[%s3316_s0 + $0x1bc] ss:$36 sps:$4 sm:$0xff]  }
  0x27   : > { %v2519_v13 = vld [vmem:[%s3316_s0 + $0x174] ss:$36 sps:$4 sm:$0xff]   ;;  %v2535_v18 = vld [vmem:[%s2662_s18 + $0x108] sm:$0xff]   ;;  %v2543_v22 = vld [vmem:[%s2662_s18 + $0x140] sm:$0xff]  }
  0x28   : > { %2117 = vmatpush3.bf16.msra.mxu0 %v2457_v24  ;;  %v2522_v17 = vld [vmem:[%s3316_s0 + $0x170] ss:$36 sps:$4 sm:$0xff]   ;;  %v2536_v19 = vld [vmem:[%s2662_s18 + $0x188] sm:$0xff]   ;;  %v2544_v23 = vld [vmem:[%s2662_s18 + $0x1c0] sm:$0xff]  }
  0x29   : > { %2181 = vmatpush3.bf16.msra.mxu1 %v2458_v25  ;;  %2118 = vmatprep.subr.bf16.mxu0 %v2459_v26  ;;  %v2527_v20 = vld [vmem:[%s3316_s0 + $0x1b4] ss:$36 sps:$4 sm:$0xff]   ;;  %v2545_v24 = vld [vmem:[%s2662_s18 + $0x100] sm:$0xff]  }
  0x2a   : > { %2182 = vmatprep.subr.bf16.mxu1 %v2460_v27  ;;  %v2546_v25 = vld [vmem:[%s2662_s18 + $0x180] sm:$0xff]   ;;  %v2531_v26 = vld [vmem:[%s3316_s0 + $0x1b0] ss:$36 sps:$4 sm:$0xff]   ;;  %v2532_v27 = vld [vmem:[%s3316_s0 + $0x1b8] ss:$36 sps:$4 sm:$0xff]  }
  0x2c   : > { %2119 = vmatpush3.bf16.msra.mxu0 %v2461_v28  ;;  %v2537_v28 = vld [vmem:[%s3316_s0 + $0x1fc] ss:$36 sps:$4 sm:$0xff]  }
  0x2d   : > { %2183 = vmatpush3.bf16.msra.mxu1 %v2462_v29  ;;  %2120 = vmatprep.subr.bf16.mxu0 %v2463_v30  ;;  %v2539_v29 = vld [vmem:[%s3316_s0 + $0x204] ss:$36 sps:$4 sm:$0xff]   ;;  %v2553_v30 = vld [vmem:[%s2662_s18 + $0x238] sm:$0xff]  }
  0x2e   : > { %2184 = vmatprep.subr.bf16.mxu1 %v2464_v31  ;;  %v2541_v31 = vld [vmem:[%s3316_s0 + $0x1f8] ss:$36 sps:$4 sm:$0xff]  }
  0x30   : > { %2121 = vmatpush3.bf16.msra.mxu0 %v2465_v33  ;;  %v2549_v33 = vld [vmem:[%s3316_s0 + $0x14] ss:$36 sps:$4 sm:$0xff]  }
  0x31   : > { %2185 = vmatpush3.bf16.msra.mxu1 %v2466_v35  ;;  %2234 = vmatprep.subr.bf16.mxu0 %v2473_v37  ;;  %v2547_v35 = vld [vmem:[%s3316_s0 + $0x10] ss:$36 sps:$4 sm:$0xff]   ;;  %v2554_v37 = vld [vmem:[%s3316_s0 + $0x5c] ss:$36 sps:$4 sm:$0xff]  }
  0x32   : > { %2298 = vmatprep.subr.bf16.mxu1 %v2474_v39  ;;  %v2560_v39 = vld [vmem:[%s2662_s18 + $0x230] sm:$0xff]  }
  0x33   : > { %1202 = vmatmul.mubr.bf16.vlgmr.msra.gmra.mxu0 %v2467_v32  ;;  %v2542_v32 = vld [vmem:[%s3316_s0 + $0x200] ss:$36 sps:$4 sm:$0xff]  }
  0x34   : > { %1299 = vmatmul.mubr.bf16.vlgmr.msra.gmra.mxu1 %v2470_v34  ;;  %2235 = vmatpush3.bf16.msra.mxu0 %v2475_v40  ;;  %v2552_v34 = vld [vmem:[%s3316_s0 + $0x1c] ss:$36 sps:$4 sm:$0xff]   ;;  %v2567_v40 = vld [vmem:[%s2662_s18 + $0x228] sm:$0xff]  }
  0x35   : > { %2299 = vmatpush3.bf16.msra.mxu1 %v2476_v41  ;;  %1209 = vmatprep.mubr.bf16.mxu0 %v2477_v36  ;;  %v2550_v36 = vld [vmem:[%s3316_s0 + $0x18] ss:$36 sps:$4 sm:$0xff]  }
  0x36   : > { %1306 = vmatprep.mubr.bf16.mxu1 %v2479_v38  ;;  %2236 = vmatprep.subr.bf16.mxu0 %v2483_v42  ;;  %v2556_v38 = vld [vmem:[%s3316_s0 + $0x64] ss:$36 sps:$4 sm:$0xff]   ;;  %v2558_v41 = vld [vmem:[%s3316_s0 + $0x58] ss:$36 sps:$4 sm:$0xff]  }
  0x37   : > { %2300 = vmatprep.subr.bf16.mxu1 %v2484_v44  ;;  %v2559_v42 = vld [vmem:[%s3316_s0 + $0x60] ss:$36 sps:$4 sm:$0xff]   ;;  %v2563_v44 = vld [vmem:[%s3316_s0 + $0xac] ss:$36 sps:$4 sm:$0xff]  }
  0x38   : > { %2237 = vmatpush3.bf16.msra.mxu0 %v2485_v45  ;;  %v2574_v45 = vld [vmem:[%s2662_s18 + $0x220] sm:$0xff]  }
  0x39   : > { %2301 = vmatpush3.bf16.msra.mxu1 %v2486_v46  ;;  %2238 = vmatprep.subr.bf16.mxu0 %v2493_v50  ;;  %v2565_v46 = vld [vmem:[%s3316_s0 + $0xa0] ss:$36 sps:$4 sm:$0xff]   ;;  %v2570_v50 = vld [vmem:[%s3316_s0 + $0xf4] ss:$36 sps:$4 sm:$0xff]  }
  0x3a   : > { %2302 = vmatprep.subr.bf16.mxu1 %v2494_v51  ;;  %v2588_v51 = vld [vmem:[%s2662_s18 + $0x210] sm:$0xff]  }
  0x3b   : > { %1210 = vmatmul.mubr.bf16.gmra.mxu0 %v2481_v43  ;;  %v2561_v43 = vld [vmem:[%s3316_s0 + $0xa4] ss:$36 sps:$4 sm:$0xff]  }
  0x3c   : > { %1307 = vmatmul.mubr.bf16.gmra.mxu1 %v2482_v47  ;;  %1217 = vmatprep.mubr.bf16.mxu0 %v2487_v48  ;;  %v2581_v47 = vld [vmem:[%s2662_s18 + $0x218] sm:$0xff]   ;;  %v2566_v48 = vld [vmem:[%s3316_s0 + $0xa8] ss:$36 sps:$4 sm:$0xff]  }
  0x3d   : > { %1314 = vmatprep.mubr.bf16.mxu1 %v2489_v49  ;;  %2239 = vmatpush3.bf16.msra.mxu0 %v2495_v52  ;;  %v2568_v49 = vld [vmem:[%s3316_s0 + $0xec] ss:$36 sps:$4 sm:$0xff]  }
  0x3e   : > { %2303 = vmatpush3.bf16.msra.mxu1 %v2496_v53  ;;  %2240 = vmatprep.subr.bf16.mxu0 %v2503_v58  ;;  %v2595_v52 = vld [vmem:[%s2662_s18 + $0x208] sm:$0xff]   ;;  %v2579_v58 = vld [vmem:[%s3316_s0 + $0x130] ss:$36 sps:$4 sm:$0xff]  }
  0x3f   : > { %2304 = vmatprep.subr.bf16.mxu1 %v2504_v59  ;;  %v2572_v53 = vld [vmem:[%s3316_s0 + $0xe8] ss:$36 sps:$4 sm:$0xff]   ;;  %v2580_v59 = vld [vmem:[%s3316_s0 + $0x138] ss:$36 sps:$4 sm:$0xff]  }
  0x41   : > { %2241 = vmatpush3.bf16.msra.mxu0 %v2505_v60  ;;  %v2582_v60 = vld [vmem:[%s3316_s0 + $0x17c] ss:$36 sps:$4 sm:$0xff]  }
  0x42   : > { %2305 = vmatpush3.bf16.msra.mxu1 %v2506_v61  ;;  %2242 = vmatprep.subr.bf16.mxu0 %v2513_v2  ;;  %v2584_v61 = vld [vmem:[%s3316_s0 + $0x184] ss:$36 sps:$4 sm:$0xff]  }
  0x43   : > { %1218 = vmatmul.mubr.bf16.gmra.mxu0 %v2491_v54  ;;  %2306 = vmatprep.subr.bf16.mxu1 %v2514_v3  ;;  %v2573_v54 = vld [vmem:[%s3316_s0 + $0xf0] ss:$36 sps:$4 sm:$0xff]   ;;  %v2593_v2 = vld [vmem:[%s3316_s0 + $0x1c0] ss:$36 sps:$4 sm:$0xff]   ;;  %v2594_v3 = vld [vmem:[%s3316_s0 + $0x1c8] ss:$36 sps:$4 sm:$0xff]  }
  0x44   : > { %1315 = vmatmul.mubr.bf16.gmra.mxu1 %v2492_v55  ;;  %1225 = vmatprep.mubr.bf16.mxu0 %v2497_v56  ;;  %v2575_v55 = vld [vmem:[%s3316_s0 + $0x134] ss:$36 sps:$4 sm:$0xff]   ;;  %v2577_v56 = vld [vmem:[%s3316_s0 + $0x13c] ss:$36 sps:$4 sm:$0xff]  }
  0x45   : > { %1322 = vmatprep.mubr.bf16.mxu1 %v2499_v57  ;;  %2243 = vmatpush3.bf16.msra.mxu0 %v2515_v4  ;;  %v2602_v57 = vld [vmem:[%s2662_s18 + $0x200] sm:$0xff]   ;;  %v2596_v4 = vld [vmem:[%s3316_s0 + $0x20c] ss:$36 sps:$4 sm:$0xff]  }
  0x46   : > { %2307 = vmatpush3.bf16.msra.mxu1 %v2516_v5  ;;  %2244 = vmatprep.subr.bf16.mxu0 %v2523_v7  ;;  %v2598_v5 = vld [vmem:[%s3316_s0 + $0x214] ss:$36 sps:$4 sm:$0xff]  }
  0x47   : > { %2308 = vmatprep.subr.bf16.mxu1 %v2524_v10  ;;  %v2601_v7 = vld [vmem:[%s3316_s0 + $0x210] ss:$36 sps:$4 sm:$0xff]   ;;  %v2605_v10 = vld [vmem:[%s3316_s0 + $0x68] ss:$36 sps:$4 sm:$0xff]  }
  0x49   : > { %2245 = vmatpush3.bf16.msra.mxu0 %v2525_v11  ;;  %v2606_v11 = vld [vmem:[%s3316_s0 + $0x188] ss:$36 sps:$4 sm:$0xff]  }
  0x4a   : > { %2309 = vmatpush3.bf16.msra.mxu1 %v2526_v12  ;;  %2246 = vmatprep.subr.bf16.mxu0 %v2533_v14  ;;  %v2607_v12 = vld [vmem:[%s3316_s0 + $0xb0] ss:$36 sps:$4 sm:$0xff]   ;;  %v2609_v14 = vld [vmem:[%s3316_s0 + $0xf8] ss:$36 sps:$4 sm:$0xff]  }
  0x4b   : > { %1226 = vmatmul.mubr.bf16.gmra.mxu0 %v2501_v62  ;;  %2310 = vmatprep.subr.bf16.mxu1 %v2534_v16  ;;  %v2586_v62 = vld [vmem:[%s3316_s0 + $0x178] ss:$36 sps:$4 sm:$0xff]  }
  0x4c   : > { %1323 = vmatmul.mubr.bf16.gmra.mxu1 %v2502_v63  ;;  %1233 = vmatprep.mubr.bf16.mxu0 %v2507_v0  ;;  %v2587_v63 = vld [vmem:[%s3316_s0 + $0x180] ss:$36 sps:$4 sm:$0xff]  }
  0x4d   : > { %1330 = vmatprep.mubr.bf16.mxu1 %v2509_v1  ;;  %2247 = vmatpush3.bf16.msra.mxu0 %v2535_v18  ;;  %v2589_v0 = vld [vmem:[%s3316_s0 + $0x1c4] ss:$36 sps:$4 sm:$0xff]   ;;  %v2591_v1 = vld [vmem:[%s3316_s0 + $0x1cc] ss:$36 sps:$4 sm:$0xff]  }
  0x4e   : > { %2311 = vmatpush3.bf16.msra.mxu1 %v2536_v19  ;;  %2248 = vmatprep.subr.bf16.mxu0 %v2543_v22 }
  0x4f   : > { %2312 = vmatprep.subr.bf16.mxu1 %v2544_v23 }
  0x51   : > { %2249 = vmatpush3.bf16.msra.mxu0 %v2545_v24 }
  0x52   : > { %2313 = vmatpush3.bf16.msra.mxu1 %v2546_v25  ;;  %2378 = vmatprep.subr.bf16.mxu0 %v2553_v30 }
  0x53   : > { %1234 = vmatmul.mubr.bf16.gmra.mxu0 %v2511_v6  ;;  %2410 = vmatprep.subr.bf16.mxu1 %v2553_v30  ;;  %v2600_v6 = vld [vmem:[%s3316_s0 + $0x208] ss:$36 sps:$4 sm:$0xff]  }
  0x54   : > { %1331 = vmatmul.mubr.bf16.gmra.mxu1 %v2512_v8  ;;  %1241 = vmatprep.mubr.bf16.mxu0 %v2517_v9  ;;  %v2603_v8 = vld [vmem:[%s3316_s0 + $0x20] ss:$36 sps:$4 sm:$0xff]  }
  0x55   : > { %1338 = vmatprep.mubr.bf16.mxu1 %v2519_v13  ;;  %v2604_v9 = vld [vmem:[%s3316_s0 + $0x140] ss:$36 sps:$4 sm:$0xff]   ;;  %v2608_v13 = vld [vmem:[%s3316_s0 + $0x1d0] ss:$36 sps:$4 sm:$0xff]  }
  0x5b   : > { %1242 = vmatmul.mubr.bf16.gmra.mxu0 %v2521_v15  ;;  %v2610_v15 = vld [vmem:[%s3316_s0 + $0x218] ss:$36 sps:$4 sm:$0xff]  }
  0x5c   : > { %1339 = vmatmul.mubr.bf16.gmra.mxu1 %v2522_v17  ;;  %1249 = vmatprep.mubr.bf16.mxu0 %v2527_v20 }
  0x5d   : > { %1346 = vmatprep.mubr.bf16.mxu1 %v2529_v21 }
  0x63   : > { %1250 = vmatmul.mubr.bf16.gmra.mxu0 %v2531_v26 }
  0x64   : > { %1347 = vmatmul.mubr.bf16.gmra.mxu1 %v2532_v27  ;;  %1257 = vmatprep.mubr.bf16.mxu0 %v2537_v28 }
  0x65   : > { %1354 = vmatprep.mubr.bf16.mxu1 %v2539_v29 }
  0x6b   : > { %1258 = vmatmul.mubr.bf16.gmra.mxu0 %v2541_v31 }
  0x6c   : > { %1355 = vmatmul.mubr.bf16.gmra.mxu1 %v2542_v32  ;;  %1395 = vmatprep.mubr.bf16.mxu0 %v2549_v33 }
  0x6d   : > { %1492 = vmatprep.mubr.bf16.mxu1 %v2552_v34 }
  0x73   : > { %1396 = vmatmul.mubr.bf16.vlgmr.msra.gmra.mxu0 %v2547_v35 }
  0x74   : > { %1493 = vmatmul.mubr.bf16.vlgmr.msra.gmra.mxu1 %v2550_v36  ;;  %2379 = vmatpush3.bf16.msra.mxu0 %v2553_v30 }
  0x75   : > { %2418 = vmatpush3.bf16.msra.mxu1 %v2553_v30  ;;  %1403 = vmatprep.mubr.bf16.mxu0 %v2554_v37 }
  0x76   : > { %1500 = vmatprep.mubr.bf16.mxu1 %v2556_v38  ;;  %2380 = vmatprep.subr.bf16.mxu0 %v2560_v39 }
  0x77   : > { %2411 = vmatprep.subr.bf16.mxu1 %v2560_v39 }
  0x78   : > { %2381 = vmatpush3.bf16.msra.mxu0 %v2560_v39 }
  0x79   : > { %2419 = vmatpush3.bf16.msra.mxu1 %v2560_v39  ;;  %2382 = vmatprep.subr.bf16.mxu0 %v2567_v40 }
  0x7a   : > { %2412 = vmatprep.subr.bf16.mxu1 %v2567_v40 }
  0x7b   : > { %1404 = vmatmul.mubr.bf16.gmra.mxu0 %v2558_v41 }
  0x7c   : > { %1501 = vmatmul.mubr.bf16.gmra.mxu1 %v2559_v42  ;;  %1411 = vmatprep.mubr.bf16.mxu0 %v2561_v43 }
  0x7d   : > { %1508 = vmatprep.mubr.bf16.mxu1 %v2563_v44  ;;  %2383 = vmatpush3.bf16.msra.mxu0 %v2567_v40 }
  0x7e   : > { %2420 = vmatpush3.bf16.msra.mxu1 %v2567_v40  ;;  %2384 = vmatprep.subr.bf16.mxu0 %v2574_v45 }
  0x7f   : > { %2413 = vmatprep.subr.bf16.mxu1 %v2574_v45 }
  0x81   : > { %2385 = vmatpush3.bf16.msra.mxu0 %v2574_v45 }
  0x82   : > { %2421 = vmatpush3.bf16.msra.mxu1 %v2574_v45  ;;  %2386 = vmatprep.subr.bf16.mxu0 %v2581_v47 }
  0x83   : > { %1412 = vmatmul.mubr.bf16.gmra.mxu0 %v2565_v46  ;;  %2414 = vmatprep.subr.bf16.mxu1 %v2581_v47 }
  0x84   : > { %1509 = vmatmul.mubr.bf16.gmra.mxu1 %v2566_v48  ;;  %1419 = vmatprep.mubr.bf16.mxu0 %v2568_v49 }
  0x85   : > { %1516 = vmatprep.mubr.bf16.mxu1 %v2570_v50  ;;  %2387 = vmatpush3.bf16.msra.mxu0 %v2581_v47 }
  0x86   : > { %2422 = vmatpush3.bf16.msra.mxu1 %v2581_v47  ;;  %2388 = vmatprep.subr.bf16.mxu0 %v2588_v51 }
  0x87   : > { %2415 = vmatprep.subr.bf16.mxu1 %v2588_v51 }
  0x89   : > { %2389 = vmatpush3.bf16.msra.mxu0 %v2588_v51 }
  0x8a   : > { %2423 = vmatpush3.bf16.msra.mxu1 %v2588_v51  ;;  %2390 = vmatprep.subr.bf16.mxu0 %v2595_v52 }
  0x8b   : > { %1420 = vmatmul.mubr.bf16.gmra.mxu0 %v2572_v53  ;;  %2416 = vmatprep.subr.bf16.mxu1 %v2595_v52 }
  0x8c   : > { %1517 = vmatmul.mubr.bf16.gmra.mxu1 %v2573_v54  ;;  %1427 = vmatprep.mubr.bf16.mxu0 %v2575_v55 }
  0x8d   : > { %1524 = vmatprep.mubr.bf16.mxu1 %v2577_v56  ;;  %2391 = vmatpush3.bf16.msra.mxu0 %v2595_v52 }
  0x8e   : > { %2424 = vmatpush3.bf16.msra.mxu1 %v2595_v52  ;;  %2392 = vmatprep.subr.bf16.mxu0 %v2602_v57 }
  0x8f   : > { %2417 = vmatprep.subr.bf16.mxu1 %v2602_v57 }
  0x91   : > { %2393 = vmatpush3.bf16.msra.mxu0 %v2602_v57 }
  0x92   : > { %2425 = vmatpush3.bf16.msra.mxu1 %v2602_v57 }
  0x93   : > { %1428 = vmatmul.mubr.bf16.gmra.mxu0 %v2579_v58 }
  0x94   : > { %1525 = vmatmul.mubr.bf16.gmra.mxu1 %v2580_v59  ;;  %1435 = vmatprep.mubr.bf16.mxu0 %v2582_v60 }
  0x95   : > { %1532 = vmatprep.mubr.bf16.mxu1 %v2584_v61 }
  0x9b   : > { %1436 = vmatmul.mubr.bf16.gmra.mxu0 %v2586_v62 }
  0x9c   : > { %1533 = vmatmul.mubr.bf16.gmra.mxu1 %v2587_v63  ;;  %1443 = vmatprep.mubr.bf16.mxu0 %v2589_v0 }
  0x9d   : > { %1540 = vmatprep.mubr.bf16.mxu1 %v2591_v1 }
  0xa3   : > { %1444 = vmatmul.mubr.bf16.gmra.mxu0 %v2593_v2 }
  0xa4   : > { %1541 = vmatmul.mubr.bf16.gmra.mxu1 %v2594_v3  ;;  %1451 = vmatprep.mubr.bf16.mxu0 %v2596_v4 }
  0xa5   : > { %1548 = vmatprep.mubr.bf16.mxu1 %v2598_v5 }
  0xab   : > { %1452 = vmatmul.mubr.bf16.gmra.mxu0 %v2600_v6 }
  0xac   : > { %1549 = vmatmul.mubr.bf16.gmra.mxu1 %v2601_v7  ;;  %2394 = vmatprep.mubr.bf16.mxu0 %v2603_v8 }
  0xad   : > { %2402 = vmatprep.mubr.bf16.mxu1 %v2604_v9 }
  0xb3   : > { %2395 = vmatmul.mubr.bf16.vlgmr.msra.gmra.mxu0 %v2605_v10 }
  0xb4   : > { %2403 = vmatmul.mubr.bf16.vlgmr.msra.gmra.mxu1 %v2606_v11  ;;  %2398 = vmatprep.mubr.bf16.mxu0 %v2607_v12 }
  0xb5   : > { %2406 = vmatprep.mubr.bf16.mxu1 %v2608_v13 }
  0xbb   : > { %2399 = vmatmul.mubr.bf16.gmra.mxu0 %v2609_v14 }
  0xbc   : > { %2407 = vmatmul.mubr.bf16.gmra.mxu1 %v2610_v15 }
  0xf3   : > { %v2122_v16 = vpop.f32.mrf.mxu0 }
  0xf4   : > { %v2186_v17 = vpop.f32.mrf.mxu1 }
  0xf5   : > { %v2123_v18 = vpop.f32.mrf.mxu0 }
  0xf6   : > { %v2124_v19 = vadd.f32 %v2123_v18, %v2122_v16  ;;  %v2187_v20 = vpop.f32.mrf.mxu1 }
  0xf7   : > { %v2188_v21 = vadd.f32 %v2187_v20, %v2186_v17  ;;  %v2125_v22 = vpop.f32.mrf.mxu0 }
  0xf8   : > { %v2189_v23 = vpop.f32.mrf.mxu1 }
  0xf9   : > { %v2946_v24 = vadd.f32 %v2188_v21, %v2124_v19  ;;  %v2126_v25 = vpop.f32.mrf.mxu0 }
  0xfa   : > { %v2127_v26 = vadd.f32 %v2126_v25, %v2125_v22  ;;  %v2190_v27 = vpop.f32.mrf.mxu1 }
  0xfb   : > { %v2191_v28 = vadd.f32 %v2190_v27, %v2189_v23  ;;  %v2128_v29 = vpop.f32.mrf.mxu0 }
  0xfc   : > { %v2192_v30 = vpop.f32.mrf.mxu1 }
  0xfd   : > { %v2948_v31 = vadd.f32 %v2191_v28, %v2127_v26  ;;  %v2129_v32 = vpop.f32.mrf.mxu0 }
  0xfe   : > { %v2130_v33 = vadd.f32 %v2129_v32, %v2128_v29  ;;  %v2193_v34 = vpop.f32.mrf.mxu1 }
  0xff   : > { %v2194_v35 = vadd.f32 %v2193_v34, %v2192_v30  ;;  %v2131_v36 = vpop.f32.mrf.mxu0 }
 0x100   : > { %v2195_v37 = vpop.f32.mrf.mxu1 }
 0x101   : > { %v2950_v38 = vadd.f32 %v2194_v35, %v2130_v33  ;;  %v2132_v39 = vpop.f32.mrf.mxu0 }
 0x102   : > { %v2133_v40 = vadd.f32 %v2132_v39, %v2131_v36  ;;  %v2196_v41 = vpop.f32.mrf.mxu1 }
 0x103   : > { %v2197_v42 = vadd.f32 %v2196_v41, %v2195_v37  ;;  %v2134_v43 = vpop.f32.mrf.mxu0 }
 0x104   : > { %v2198_v44 = vpop.f32.mrf.mxu1 }
 0x105   : > { %v2952_v45 = vadd.f32 %v2197_v42, %v2133_v40  ;;  %v2135_v46 = vpop.f32.mrf.mxu0 }
 0x106   : > { %v2136_v47 = vadd.f32 %v2135_v46, %v2134_v43  ;;  %v2199_v48 = vpop.f32.mrf.mxu1 }
 0x107   : > { %v2200_v49 = vadd.f32 %v2199_v48, %v2198_v44  ;;  %v2137_v50 = vpop.f32.mrf.mxu0 }
 0x108   : > { %v2201_v51 = vpop.f32.mrf.mxu1 }
 0x109   : > { %v2954_v52 = vadd.f32 %v2200_v49, %v2136_v47  ;;  %v2138_v53 = vpop.f32.mrf.mxu0 }
 0x10a   : > { %v2139_v54 = vadd.f32 %v2138_v53, %v2137_v50  ;;  %v2202_v55 = vpop.f32.mrf.mxu1 }
 0x10b   : > { %v2203_v56 = vadd.f32 %v2202_v55, %v2201_v51  ;;  %v2140_v57 = vpop.f32.mrf.mxu0 }
 0x10c   : > { %v2204_v58 = vpop.f32.mrf.mxu1 }
 0x10d   : > { %v2956_v59 = vadd.f32 %v2203_v56, %v2139_v54  ;;  %v2141_v60 = vpop.f32.mrf.mxu0 }
 0x10e   : > { %v2142_v61 = vadd.f32 %v2141_v60, %v2140_v57  ;;  %v2205_v62 = vpop.f32.mrf.mxu1 }
 0x10f   : > { %v2206_v63 = vadd.f32 %v2205_v62, %v2204_v58  ;;  %v2143_v0 = vpop.f32.mrf.mxu0 }
 0x110   : > { %v2207_v1 = vpop.f32.mrf.mxu1 }
 0x111   : > { %v2958_v2 = vadd.f32 %v2206_v63, %v2142_v61  ;;  %v2144_v3 = vpop.f32.mrf.mxu0 }
 0x112   : > { %v2145_v4 = vadd.f32 %v2144_v3, %v2143_v0  ;;  %v2208_v5 = vpop.f32.mrf.mxu1 }
 0x113   : > { %v2209_v6 = vadd.f32 %v2208_v5, %v2207_v1  ;;  %v2146_v7 = vpop.f32.mrf.mxu0 }
 0x114   : > { %v2210_v8 = vpop.f32.mrf.mxu1 }
 0x115   : > { %v2960_v9 = vadd.f32 %v2209_v6, %v2145_v4  ;;  %v2147_v10 = vpop.f32.mrf.mxu0 }
 0x116   : > { %v2148_v11 = vadd.f32 %v2147_v10, %v2146_v7  ;;  %v2211_v12 = vpop.f32.mrf.mxu1 }
 0x117   : > { %v2212_v13 = vadd.f32 %v2211_v12, %v2210_v8  ;;  %v2149_v14 = vpop.f32.mrf.mxu0 }
 0x118   : > { %v2213_v15 = vpop.f32.mrf.mxu1 }
 0x119   : > { %v2962_v16 = vadd.f32 %v2212_v13, %v2148_v11  ;;  %v2150_v17 = vpop.f32.mrf.mxu0 }
 0x11a   : > { %v2151_v18 = vadd.f32 %v2150_v17, %v2149_v14  ;;  %v2214_v19 = vpop.f32.mrf.mxu1 }
 0x11b   : > { %v2215_v20 = vadd.f32 %v2214_v19, %v2213_v15  ;;  %v2152_v21 = vpop.f32.mrf.mxu0 }
 0x11c   : > { %v2216_v22 = vpop.f32.mrf.mxu1 }
 0x11d   : > { %v2964_v23 = vadd.f32 %v2215_v20, %v2151_v18  ;;  %v2153_v25 = vpop.f32.mrf.mxu0 }
 0x11e   : > { %v2154_v26 = vadd.f32 %v2153_v25, %v2152_v21  ;;  %v2217_v27 = vpop.f32.mrf.mxu1 }
 0x11f   : > { %v2218_v28 = vadd.f32 %v2217_v27, %v2216_v22  ;;  %v2155_v29 = vpop.f32.mrf.mxu0 }
 0x120   : > { %v2219_v30 = vpop.f32.mrf.mxu1 }
 0x121   : > { %v2966_v32 = vadd.f32 %v2218_v28, %v2154_v26  ;;  %v2156_v33 = vpop.f32.mrf.mxu0 }
 0x122   : > { %v2157_v34 = vadd.f32 %v2156_v33, %v2155_v29  ;;  %v2220_v35 = vpop.f32.mrf.mxu1 }
 0x123   : > { %v2221_v36 = vadd.f32 %v2220_v35, %v2219_v30  ;;  %v2158_v37 = vpop.f32.mrf.mxu0 }
 0x124   : > { %v2222_v39 = vpop.f32.mrf.mxu1 }
 0x125   : > { %v2968_v40 = vadd.f32 %v2221_v36, %v2157_v34  ;;  %v2159_v41 = vpop.f32.mrf.mxu0 }
 0x126   : > { %v2160_v42 = vadd.f32 %v2159_v41, %v2158_v37  ;;  %v2223_v43 = vpop.f32.mrf.mxu1 }
 0x127   : > { %v2224_v44 = vadd.f32 %v2223_v43, %v2222_v39  ;;  %v2161_v46 = vpop.f32.mrf.mxu0 }
 0x128   : > { %v2225_v47 = vpop.f32.mrf.mxu1 }
 0x129   : > { %v2970_v48 = vadd.f32 %v2224_v44, %v2160_v42  ;;  %v2162_v49 = vpop.f32.mrf.mxu0 }
 0x12a   : > { %v2163_v50 = vadd.f32 %v2162_v49, %v2161_v46  ;;  %v2226_v51 = vpop.f32.mrf.mxu1 }
 0x12b   : > { %3319 = vst [vmem:[#allocation2_spill] sm:$0xff] %v2970_v48  ;;  %v2227_v53 = vadd.f32 %v2226_v51, %v2225_v47  ;;  %v2164_v54 = vpop.f32.mrf.mxu0 }
 0x12c   : > { %v2228_v55 = vpop.f32.mrf.mxu1 }
 0x12d   : > { %v2972_v56 = vadd.f32 %v2227_v53, %v2163_v50  ;;  %v2165_v57 = vpop.f32.mrf.mxu0 }
 0x12e   : > { %v2166_v58 = vadd.f32 %v2165_v57, %v2164_v54  ;;  %v2229_v60 = vpop.f32.mrf.mxu1 }
 0x12f   : > { %v2230_v61 = vadd.f32 %v2229_v60, %v2228_v55  ;;  %v2167_v62 = vpop.f32.mrf.mxu0 }
 0x130   : > { %v2231_v63 = vpop.f32.mrf.mxu1 }
 0x131   : > { %v2974_v0 = vadd.f32 %v2230_v61, %v2166_v58  ;;  %v2168_v1 = vpop.f32.mrf.mxu0 }
 0x132   : > { %v2169_v3 = vadd.f32 %v2168_v1, %v2167_v62  ;;  %v2232_v4 = vpop.f32.mrf.mxu1 }
 0x133   : > { %3320 = vst [vmem:[#allocation3_spill] sm:$0xff] %v2974_v0  ;;  %v2233_v5 = vadd.f32 %v2232_v4, %v2231_v63  ;;  %v2250_v6 = vpop.f32.mrf.mxu0 }
 0x134   : > { %v2314_v7 = vpop.f32.mrf.mxu1 }
 0x135   : > { %v2976_v8 = vadd.f32 %v2233_v5, %v2169_v3  ;;  %v2251_v10 = vpop.f32.mrf.mxu0 }
 0x136   : > { %v2252_v11 = vadd.f32 %v2251_v10, %v2250_v6  ;;  %v2315_v12 = vpop.f32.mrf.mxu1 }
 0x137   : > { %3321 = vst [vmem:[#allocation4_spill] sm:$0xff] %v2976_v8  ;;  %v2253_v13 = vpop.f32.mrf.mxu0  ;;  %v2316_v15 = vadd.f32 %v2315_v12, %v2314_v7 }
 0x138   : > { %v1398_v14 = vadd.f32 %v2252_v11, %v2946_v24  ;;  %v2317_v17 = vpop.f32.mrf.mxu1 }
 0x139   : > { %v2254_v18 = vpop.f32.mrf.mxu0 }
 0x13a   : > { %v2255_v19 = vadd.f32 %v2254_v18, %v2253_v13  ;;  %v2318_v20 = vpop.f32.mrf.mxu1  ;;  %v2979_v21 = vadd.f32 %v2316_v15, %v1398_v14 }
 0x13b   : > { %v2319_v22 = vadd.f32 %v2318_v20, %v2317_v17  ;;  %v2256_v25 = vpop.f32.mrf.mxu0 }
 0x13c   : > { %v1401_v26 = vadd.f32 %v2255_v19, %v2948_v31  ;;  %v2320_v27 = vpop.f32.mrf.mxu1 }
 0x13d   : > { %v2257_v28 = vpop.f32.mrf.mxu0 }
 0x13e   : > { %v2321_v29 = vpop.f32.mrf.mxu1  ;;  %v2982_v30 = vadd.f32 %v2319_v22, %v1401_v26 }
 0x13f   : > { %v2259_v33 = vpop.f32.mrf.mxu0  ;;  %v2322_v48 = vadd.f32 %v2321_v29, %v2320_v27 }
 0x140   : > { %v2984_v34 = vpop.f32.mrf.mxu1 }
 0x141   : > { %v2260_v24 = vpop.f32.mrf.mxu0 }
 0x142   : > { %v2986_v35 = vpop.f32.mrf.mxu1 }
 0x143   : > { %v2262_v36 = vpop.f32.mrf.mxu0 }
 0x144   : > { %v2326_v37 = vpop.f32.mrf.mxu1 }
 0x145   : > { %v2263_v39 = vpop.f32.mrf.mxu0 }
 0x146   : > { %v2264_v41 = vadd.f32 %v2263_v39, %v2262_v36  ;;  %v2327_v42 = vpop.f32.mrf.mxu1  ;;  %v2258_v39 = vadd.f32 %v2257_v28, %v2256_v25 }
 0x147   : > { %v2988_v43 = vpop.f32.mrf.mxu0  ;;  %v2328_v44 = vadd.f32 %v2327_v42, %v2326_v37 }
 0x148   : > { %v1414_v31 = vadd.f32 %v2264_v41, %v2954_v52  ;;  %v2991_v46 = vpop.f32.mrf.mxu1  ;;  %v1406_v8 = vadd.f32 %v2258_v39, %v2950_v38 }
 0x149   : > { %v2993_v47 = vpop.f32.mrf.mxu0 }
 0x14a   : > { %v2995_v49 = vpop.f32.mrf.mxu1  ;;  %v2997_v50 = vadd.f32 %v2328_v44, %v1414_v31  ;;  %v1503_v38 = vadd.f32 %v2322_v48, %v1406_v8 }
 0x14b   : > { %v2999_v51 = vpop.f32.mrf.mxu0 }
 0x14c   : > { %3322 = vst [vmem:[#allocation5_spill] sm:$0xff] %v2997_v50  ;;  %v3001_v53 = vpop.f32.mrf.mxu1  ;;  %v2261_v50 = vadd.f32 %v2260_v24, %v2259_v33 }
 0x14d   : > { %v3003_v54 = vpop.f32.mrf.mxu0 }
 0x14e   : > { %v3005_v55 = vpop.f32.mrf.mxu1 }
 0x14f   : > { %v3007_v57 = vpop.f32.mrf.mxu0 }
 0x150   : > { %v3009_v52 = vpop.f32.mrf.mxu1 }
 0x151   : > { %v3011_v58 = vpop.f32.mrf.mxu0 }
 0x152   : > { %v3013_v60 = vpop.f32.mrf.mxu1 }
 0x153   : > { %v2274_v61 = vpop.f32.mrf.mxu0 }
 0x154   : > { %v2338_v62 = vpop.f32.mrf.mxu1 }
 0x155   : > { %v2275_v63 = vpop.f32.mrf.mxu0 }
 0x156   : > { %v2339_v1 = vpop.f32.mrf.mxu1 }
 0x157   : > { %v2277_v3 = vpop.f32.mrf.mxu0 }
 0x158   : > { %v3015_v4 = vpop.f32.mrf.mxu1 }
 0x159   : > { %v2278_v5 = vpop.f32.mrf.mxu0 }
 0x15a   : > { %v3017_v6 = vpop.f32.mrf.mxu1  ;;  %v2279_v39 = vadd.f32 %v2278_v5, %v2277_v3 }
 0x15b   : > { %v2280_v7 = vpop.f32.mrf.mxu0 }
 0x15c   : > { %v2344_v10 = vpop.f32.mrf.mxu1  ;;  %v1433_v3 = vadd.f32 %v2279_v39, %v2964_v23 }
 0x15d   : > { %v2281_v11 = vpop.f32.mrf.mxu0 }
 0x15e   : > { %v2345_v12 = vpop.f32.mrf.mxu1  ;;  %v2282_v42 = vadd.f32 %v2281_v11, %v2280_v7  ;;  %v2276_v7 = vadd.f32 %v2275_v63, %v2274_v61 }
 0x15f   : > { %v2283_v13 = vpop.f32.mrf.mxu0  ;;  %v2346_v11 = vadd.f32 %v2345_v12, %v2344_v10 }
 0x160   : > { %v2347_v14 = vpop.f32.mrf.mxu1  ;;  %v1430_v63 = vadd.f32 %v2276_v7, %v2962_v16  ;;  %v2273_v16 = vadd.f32 %v3011_v58, %v3007_v57 }
 0x161   : > { %v2284_v15 = vpop.f32.mrf.mxu0 }
 0x162   : > { %v2348_v17 = vpop.f32.mrf.mxu1  ;;  %v2285_v25 = vadd.f32 %v2284_v15, %v2283_v13  ;;  %v2340_v13 = vadd.f32 %v2339_v1, %v2338_v62  ;;  %v2270_v62 = vadd.f32 %v3003_v54, %v2999_v51  ;;  %v2267_v51 = vadd.f32 %v2993_v47, %v2988_v43 }
 0x163   : > { %v3019_v18 = vpop.f32.mrf.mxu0  ;;  %v1425_v54 = vadd.f32 %v2273_v16, %v2960_v9 }
 0x164   : > { %v3021_v19 = vpop.f32.mrf.mxu1  ;;  %v1441_v27 = vadd.f32 %v2285_v25, %v2968_v40 }
 0x165   : > { %3323 = vst [vmem:[#allocation6_spill] sm:$0xff] %v3021_v19  ;;  %v3023_v20 = vpop.f32.mrf.mxu0  ;;  %v1438_v19 = vadd.f32 %v2282_v42, %v2966_v32  ;;  %v2325_v32 = vadd.f32 %v2986_v35, %v2984_v34 }
 0x166   : > { %v3025_v22 = vpop.f32.mrf.mxu1  ;;  %v2288_v39 = vadd.f32 %v3023_v20, %v3019_v18 }
 0x167   : > { %3324 = vst [vmem:[#allocation7_spill] sm:$0xff] %v3025_v22  ;;  %v3027_v26 = vpop.f32.mrf.mxu0  ;;  %v1535_v24 = vadd.f32 %v2346_v11, %v1438_v19  ;;  %v2337_v11 = vadd.f32 %v3013_v60, %v3009_v52 }
 0x168   : > { %v3029_v36 = vpop.f32.mrf.mxu1 }
 0x169   : > { %3325 = vst [vmem:[#allocation8_spill] sm:$0xff] %v3029_v36  ;;  %v3031_v37 = vpop.f32.mrf.mxu0  ;;  %v1522_v60 = vadd.f32 %v2337_v11, %v1425_v54 }
 0x16a   : > { %v3033_v41 = vpop.f32.mrf.mxu1  ;;  %v2291_v52 = vadd.f32 %v3031_v37, %v3027_v26 }
 0x16b   : > { %3326 = vst [vmem:[#allocation9_spill] sm:$0xff] %v3033_v41  ;;  %v3035_v31 = vpop.f32.mrf.mxu0 }
 0x16c   : > { %v3037_v44 = vpop.f32.mrf.mxu1  ;;  %v1449_v37 = vadd.f32 %v2291_v52, %v2972_v56 }
 0x16d   : > { %3327 = vst [vmem:[#allocation10_spill] sm:$0xff] %v3037_v44  ;;  %v3039_v0 = vpop.f32.mrf.mxu0  ;;  %v1409_v44 = vadd.f32 %v2261_v50, %v2952_v45  ;;  %v2349_v50 = vadd.f32 %v2348_v17, %v2347_v14  ;;  %v2343_v17 = vadd.f32 %v3017_v6, %v3015_v4  ;;  %v1422_v6 = vadd.f32 %v2270_v62, %v2958_v2 }
 0x16e   : > { %3328 = vst [vmem:[#allocation11_spill] sm:$0xff] %v3039_v0  ;;  %v3042_v22 = vpop.f32.mrf.mxu1  ;;  %v3334_v56 = vld [vmem:[#allocation7_spill] sm:$0xff] }
 0x16f   : > { %v3045_v36 = vpop.f32.mrf.mxu0  ;;  %v1506_v48 = vadd.f32 %v2325_v32, %v1409_v44  ;;  %v1538_v14 = vadd.f32 %v2349_v50, %v1441_v27  ;;  %v1530_v25 = vadd.f32 %v2343_v17, %v1433_v3  ;;  %v1417_v32 = vadd.f32 %v2267_v51, %v2956_v59  ;;  %v3335_v3 = vld [vmem:[#allocation5_spill] sm:$0xff] }
 0x170   : > { %v3047_v28 = vpop.f32.mrf.mxu1 }
 0x171   : > { %v3049_v41 = vpop.f32.mrf.mxu0 }
 0x172   : > { %v3052_v0 = vpop.f32.mrf.mxu1  ;;  %v2297_v18 = vadd.f32 %v3049_v41, %v3045_v36 }
 0x173   : > { %v2396_v33 = vpop.f32.mrf.mxu0 }
 0x174   : > { %v3057_v29 = vadd.f32 %v2396_v33, %v1503_v38  ;;  %v2404_v61 = vpop.f32.mrf.mxu1 }
 0x175   : > { %v3060_v10 = vadd.f32 %v2404_v61, %v1535_v24  ;;  %v1591_v45 = vpop.f32.mrf.mxu0  ;;  %v2334_v24 = vadd.f32 %v3005_v55, %v3001_v53 }
 0x176   : > { %v1623_v12 = vpop.f32.mrf.mxu1  ;;  %v1661_v8 = vsel %vm1654_vm0, %v3057_v29, 0.0  ;;  %v3065_v34 = vadd.f32 %v1591_v45, %v2979_v21  ;;  %v1527_v21 = vadd.f32 %v2340_v13, %v1430_v63  ;;  %v3330_v45 = vld [vmem:[#allocation11_spill] sm:$0xff] }
 0x177   : > { %v2397_v35 = vpop.f32.mrf.mxu0  ;;  %v1693_v40 = vsel %vm1654_vm0, %v3060_v10, 0.0  ;;  %1662 = vadd.xlane.f32.xlu1 %v1661_v8  ;;  %v1519_v53 = vadd.f32 %v2334_v24, %v1422_v6  ;;  %v2294_v50 = vadd.f32 %v3330_v45, %v3035_v31  ;;  %v3336_v31 = vld [vmem:[#allocation4_spill] sm:$0xff] }
 0x178   : > { %v3072_v5 = vadd.f32 %v2397_v35, %v1506_v48  ;;  %v2405_v15 = vpop.f32.mrf.mxu1  ;;  %1694 = vadd.xlane.f32.xlu0 %v1693_v40  ;;  %v3082_v23 = vadd.f32 %v1623_v12, %v1527_v21  ;;  %v1655_v44 = vsel %vm1654_vm0, %v3065_v34, 0.0  ;;  %v3331_v12 = vld [vmem:[#allocation8_spill] sm:$0xff]  ;;  %v3332_v48 = vld [vmem:[#allocation9_spill] sm:$0xff]  ;;  %v3333_v40 = vld [vmem:[#allocation6_spill] sm:$0xff] }
 0x179   : > { %v1594_v1 = vpop.f32.mrf.mxu0  ;;  %v3078_v19 = vadd.f32 %v2405_v15, %v1538_v14  ;;  %v2355_v8 = vadd.f32 %v3332_v48, %v3331_v12  ;;  %v2352_v16 = vadd.f32 %v3334_v56, %v3333_v40  ;;  %v1457_v15 = vadd.f32 %v2297_v18, %v3336_v31  ;;  %v3337_v21 = vld [vmem:[#allocation3_spill] sm:$0xff] }
 0x17a   : > { %v1626_v42 = vpop.f32.mrf.mxu1  ;;  %v1664_v57 = vsel %vm1654_vm0, %v3072_v5, 0.0  ;;  %v3099_v43 = vadd.f32 %v1594_v1, %v2982_v30  ;;  %v1687_v2 = vsel %vm1654_vm0, %v3082_v23, 0.0  ;;  %v2331_v30 = vadd.f32 %v2995_v49, %v2991_v46  ;;  %v3329_v46 = vld [vmem:[#allocation2_spill] sm:$0xff] }
 0x17b   : > { %v2400_v58 = vpop.f32.mrf.mxu0  ;;  %1665 = vadd.xlane.f32.xlu1 %v1664_v57  ;;  %v3092_v38 = vadd.f32 %v1626_v42, %v1530_v25  ;;  %v1696_v33 = vsel %vm1654_vm0, %v3078_v19, 0.0  ;;  %v1446_v49 = vadd.f32 %v2288_v39, %v3329_v46  ;;  %v1546_v62 = vadd.f32 %v2355_v8, %v1449_v37 }
 0x17c   : > { %v2408_v4 = vpop.f32.mrf.mxu1  ;;  %1656 = vadd.xlane.f32.xlu0 %v1655_v44  ;;  %v3114_v61 = vadd.f32 %v2400_v58, %v1519_v53  ;;  %v1658_v26 = vsel %vm1654_vm0, %v3099_v43, 0.0  ;;  %v1514_v20 = vadd.f32 %v2331_v30, %v1417_v32  ;;  %v1454_v1 = vadd.f32 %v2294_v50, %v3337_v21  ;;  %v3338_v44 = vld [vmem:[#allocation10_spill] sm:$0xff] }
 0x17d   : > { %v1607_v7 = vpop.f32.mrf.mxu0  ;;  %v1690_v27 = vsel %vm1654_vm0, %v3092_v38, 0.0  ;;  %v1543_v17 = vadd.f32 %v2352_v16, %v1446_v49  ;;  %v2361_v42 = vadd.f32 %v3052_v0, %v3047_v28  ;;  %v2358_v51 = vadd.f32 %v3042_v22, %v3338_v44 }
 0x17e   : > { %v1639_v9 = vpop.f32.mrf.mxu1  ;;  %v3133_v36 = vadd.f32 %v1607_v7, %v3335_v3  ;;  %v1677_v14 = vsel %vm1654_vm0, %v3114_v61, 0.0 }
 0x17f   : > { %v2401_v47 = vpop.f32.mrf.mxu0  ;;  %1697 = vadd.xlane.f32.xlu1 %v1696_v33  ;;  %v3147_v54 = vadd.f32 %v1639_v9, %v1543_v17  ;;  %v1554_v6 = vadd.f32 %v2361_v42, %v1457_v15  ;;  %v1551_v7 = vadd.f32 %v2358_v51, %v1454_v1 }
 0x180   : > { %1688 = vadd.xlane.f32.xlu0 %v1687_v2  ;;  %v3110_v55 = vadd.f32 %v2401_v47, %v1522_v60  ;;  %v2409_v59 = vpop.f32.mrf.mxu1  ;;  %v1671_v25 = vsel %vm1654_vm0, %v3133_v36, 0.0 }
 0x181   : > { %v1610_v63 = vpop.f32.mrf.mxu0  ;;  %v3151_v11 = vadd.f32 %v2409_v59, %v1554_v6  ;;  %v3155_v28 = vadd.f32 %v2408_v4, %v1551_v7  ;;  %v1703_v22 = vsel %vm1654_vm0, %v3147_v54, 0.0 }
 0x182   : > { %v3126_v13 = vadd.f32 %v1610_v63, %v1514_v20  ;;  %v1680_v35 = vsel %vm1654_vm0, %v3110_v55, 0.0  ;;  %v1642_v41 = vpop.f32.mrf.mxu1 }
 0x183   : > { %1691 = vadd.xlane.f32.xlu1 %v1690_v27  ;;  %v3141_v57 = vadd.f32 %v1642_v41, %v1546_v62  ;;  %v1712_v33 = vsel %vm1654_vm0, %v3151_v11, 0.0  ;;  %v1709_v24 = vsel %vm1654_vm0, %v3155_v28, 0.0 }
 0x184   : > { %1659 = vadd.xlane.f32.xlu0 %v1658_v26  ;;  %v1674_v58 = vsel %vm1654_vm0, %v3126_v13, 0.0 }
 0x185   : > { %v1706_v0 = vsel %vm1654_vm0, %v3141_v57, 0.0 }
 0x187   : > { %1681 = vadd.xlane.f32.xlu1 %v1680_v35 }
 0x188   : > { %1678 = vadd.xlane.f32.xlu0 %v1677_v14 }
 0x18b   : > { %1675 = vadd.xlane.f32.xlu1 %v1674_v58 }
 0x18c   : > { %1672 = vadd.xlane.f32.xlu0 %v1671_v25 }
 0x18f   : > { %1707 = vadd.xlane.f32.xlu1 %v1706_v0 }
 0x190   : > { %1704 = vadd.xlane.f32.xlu0 %v1703_v22 }
 0x193   : > { %1713 = vadd.xlane.f32.xlu1 %v1712_v33 }
 0x194   : > { %1710 = vadd.xlane.f32.xlu0 %v1709_v24 }
 0x200   : > { %v1663_v9 = vpop.xlane.xlu1 %1662 }
 0x201   : > { %v1695_v47 = vpop.xlane.xlu0 %1694 }
 0x204   : > { %v1666_v2 = vpop.xlane.xlu1 %1665 }
 0x205   : > { %v1657_v32 = vpop.xlane.xlu0 %1656 }
 0x208   : > { %v1698_v52 = vpop.xlane.xlu1 %1697 }
 0x209   : > { %v1689_v4 = vpop.xlane.xlu0 %1688 }
 0x20c   : > { %v1692_v60 = vpop.xlane.xlu1 %1691 }
 0x20d   : > { %v1660_v39 = vpop.xlane.xlu0 %1659 }
 0x210   : > { %v1682_v53 = vpop.xlane.xlu1 %1681 }
 0x211   : > { %v1679_v30 = vpop.xlane.xlu0 %1678  ;;  %v1686_v63 = vadd.f32 %v1682_v53, %v1666_v2 }
 0x212   : > { %v1685_v26 = vadd.f32 %v1679_v30, %v1663_v9 }
 0x213   : > { %v1702_v49 = vadd.f32 %v1698_v52, %v1686_v63 }
 0x214   : > { %v1676_v27 = vpop.xlane.xlu1 %1675  ;;  %v1701_v50 = vadd.f32 %v1695_v47, %v1685_v26 }
 0x215   : > { %v1673_v59 = vpop.xlane.xlu0 %1672  ;;  %v1684_v18 = vadd.f32 %v1676_v27, %v1660_v39 }
 0x216   : > { %v1683_v46 = vadd.f32 %v1673_v59, %v1657_v32 }
 0x217   : > { %v1700_v12 = vadd.f32 %v1692_v60, %v1684_v18 }
 0x218   : > { %v1708_v37 = vpop.xlane.xlu1 %1707  ;;  %v1699_v35 = vadd.f32 %v1689_v4, %v1683_v46 }
 0x219   : > { %v1705_v20 = vpop.xlane.xlu0 %1704  ;;  %v1716_v3 = vadd.f32 %v1708_v37, %v1700_v12 }
 0x21a   : > { %v1715_v31 = vadd.f32 %v1705_v20, %v1699_v35 }
 0x21b   : > { %v1721_v17 = vmul.f32 0.015625, %v1716_v3 }
 0x21c   : > { %v1714_v45 = vpop.xlane.xlu1 %1713 }
 0x21d   : > { %v1718_v48 = vadd.f32 %v1714_v45, %v1702_v49  ;;  %v1711_v8 = vpop.xlane.xlu0 %1710  ;;  %v3195_v6 = vsub.f32 %v3099_v43, %v1721_v17  ;;  %v3207_v33 = vsub.f32 %v3126_v13, %v1721_v17  ;;  %v3219_v2 = vsub.f32 %v3092_v38, %v1721_v17 }
 0x21e   : > { %v1717_v40 = vadd.f32 %v1711_v8, %v1701_v50  ;;  %v3231_v60 = vsub.f32 %v3141_v57, %v1721_v17 }
 0x21f   : > { %v1723_v56 = vmul.f32 0.015625, %v1718_v48  ;;  %v1729_v22 = vmul.f32 %v3195_v6, %v3195_v6  ;;  %v1753_v47 = vmul.f32 %v3207_v33, %v3207_v33  ;;  %v1777_v4 = vmul.f32 %v3219_v2, %v3219_v2 }
 0x220   : > { %v1722_v16 = vmul.f32 0.015625, %v1717_v40  ;;  %v1801_v30 = vmul.f32 %v3231_v60, %v3231_v60 }
 0x221   : > { %v3164_v41 = vsub.f32 %v3072_v5, %v1723_v56  ;;  %v3167_v14 = vsub.f32 %v3110_v55, %v1723_v56  ;;  %v3183_v42 = vsub.f32 %v3078_v19, %v1723_v56  ;;  %v3243_v27 = vsub.f32 %v3151_v11, %v1723_v56 }
 0x222   : > { %v3170_v15 = vsub.f32 %v3057_v29, %v1722_v16  ;;  %v3173_v62 = vsub.f32 %v3114_v61, %v1722_v16  ;;  %v1720_v29 = vmul.f32 0.015625, %v1715_v31  ;;  %v3189_v44 = vsub.f32 %v3060_v10, %v1722_v16 }
 0x223   : > { %v1731_v21 = vmul.f32 %v3164_v41, %v3164_v41  ;;  %v1755_v55 = vmul.f32 %v3167_v14, %v3167_v14  ;;  %v1779_v25 = vmul.f32 %v3183_v42, %v3183_v42  ;;  %v3249_v63 = vsub.f32 %v3155_v28, %v1722_v16 }
 0x224   : > { %v1730_v1 = vmul.f32 %v3170_v15, %v3170_v15  ;;  %v1754_v58 = vmul.f32 %v3173_v62, %v3173_v62  ;;  %v1778_v7 = vmul.f32 %v3189_v44, %v3189_v44  ;;  %v3201_v0 = vsub.f32 %v3065_v34, %v1720_v29 }
 0x225   : > { %v1741_v5 = vsel %vm1654_vm0, %v1731_v21, 0.0  ;;  %v1765_v51 = vsel %vm1654_vm0, %v1755_v55, 0.0  ;;  %v1789_v10 = vsel %vm1654_vm0, %v1779_v25, 0.0  ;;  %v3213_v9 = vsub.f32 %v3133_v36, %v1720_v29 }
 0x226   : > { %1742 = vadd.xlane.f32.xlu1 %v1741_v5  ;;  %v1738_v61 = vsel %vm1654_vm0, %v1730_v1, 0.0  ;;  %v1762_v19 = vsel %vm1654_vm0, %v1754_v58, 0.0  ;;  %v1786_v43 = vsel %vm1654_vm0, %v1778_v7, 0.0  ;;  %v1728_v24 = vmul.f32 %v3201_v0, %v3201_v0 }
 0x227   : > { %1739 = vadd.xlane.f32.xlu0 %v1738_v61  ;;  %v1735_v34 = vsel %vm1654_vm0, %v1729_v22, 0.0  ;;  %v1752_v32 = vmul.f32 %v3213_v9, %v3213_v9  ;;  %v3225_v52 = vsub.f32 %v3082_v23, %v1720_v29  ;;  %v1759_v36 = vsel %vm1654_vm0, %v1753_v47, 0.0 }
 0x228   : > { %v1732_v13 = vsel %vm1654_vm0, %v1728_v24, 0.0  ;;  %v3237_v53 = vsub.f32 %v3147_v54, %v1720_v29  ;;  %v1783_v23 = vsel %vm1654_vm0, %v1777_v4, 0.0  ;;  %v1807_v54 = vsel %vm1654_vm0, %v1801_v30, 0.0 }
 0x229   : > { %v1756_v38 = vsel %vm1654_vm0, %v1752_v32, 0.0  ;;  %v1776_v39 = vmul.f32 %v3225_v52, %v3225_v52  ;;  %v1803_v26 = vmul.f32 %v3243_v27, %v3243_v27  ;;  %v1802_v11 = vmul.f32 %v3249_v63, %v3249_v63 }
 0x22a   : > { %1766 = vadd.xlane.f32.xlu1 %v1765_v51  ;;  %v1800_v59 = vmul.f32 %v3237_v53, %v3237_v53 }
 0x22b   : > { %1763 = vadd.xlane.f32.xlu0 %v1762_v19  ;;  %v1780_v57 = vsel %vm1654_vm0, %v1776_v39, 0.0  ;;  %v1813_v18 = vsel %vm1654_vm0, %v1803_v26, 0.0  ;;  %v1810_v20 = vsel %vm1654_vm0, %v1802_v11, 0.0 }
 0x22c   : > { %v1804_v37 = vsel %vm1654_vm0, %v1800_v59, 0.0 }
 0x22e   : > { %1790 = vadd.xlane.f32.xlu1 %v1789_v10 }
 0x22f   : > { %1787 = vadd.xlane.f32.xlu0 %v1786_v43 }
 0x232   : > { %1736 = vadd.xlane.f32.xlu1 %v1735_v34 }
 0x233   : > { %1733 = vadd.xlane.f32.xlu0 %v1732_v13 }
 0x236   : > { %1760 = vadd.xlane.f32.xlu1 %v1759_v36 }
 0x237   : > { %1757 = vadd.xlane.f32.xlu0 %v1756_v38 }
 0x23a   : > { %1784 = vadd.xlane.f32.xlu1 %v1783_v23 }
 0x23b   : > { %1781 = vadd.xlane.f32.xlu0 %v1780_v57 }
 0x23e   : > { %1808 = vadd.xlane.f32.xlu1 %v1807_v54 }
 0x23f   : > { %1805 = vadd.xlane.f32.xlu0 %v1804_v37 }
 0x242   : > { %1814 = vadd.xlane.f32.xlu1 %v1813_v18 }
 0x243   : > { %1811 = vadd.xlane.f32.xlu0 %v1810_v20 }
 0x2af   : > { %v1743_v28 = vpop.xlane.xlu1 %1742 }
 0x2b0   : > { %v1740_v46 = vpop.xlane.xlu0 %1739 }
 0x2b3   : > { %v1767_v49 = vpop.xlane.xlu1 %1766 }
 0x2b4   : > { %v1764_v45 = vpop.xlane.xlu0 %1763  ;;  %v1771_v5 = vadd.f32 %v1767_v49, %v1743_v28 }
 0x2b5   : > { %v1770_v61 = vadd.f32 %v1764_v45, %v1740_v46 }
 0x2b7   : > { %v1791_v50 = vpop.xlane.xlu1 %1790 }
 0x2b8   : > { %v1788_v12 = vpop.xlane.xlu0 %1787  ;;  %v1795_v51 = vadd.f32 %v1791_v50, %v1771_v5 }
 0x2b9   : > { %v1794_v19 = vadd.f32 %v1788_v12, %v1770_v61 }
 0x2bb   : > { %v1737_v48 = vpop.xlane.xlu1 %1736 }
 0x2bc   : > { %v1734_v8 = vpop.xlane.xlu0 %1733 }
 0x2bf   : > { %v1761_v35 = vpop.xlane.xlu1 %1760 }
 0x2c0   : > { %v1758_v40 = vpop.xlane.xlu0 %1757  ;;  %v1769_v16 = vadd.f32 %v1761_v35, %v1737_v48 }
 0x2c1   : > { %v1768_v31 = vadd.f32 %v1758_v40, %v1734_v8 }
 0x2c3   : > { %v1785_v56 = vpop.xlane.xlu1 %1784 }
 0x2c4   : > { %v1782_v3 = vpop.xlane.xlu0 %1781  ;;  %v1793_v21 = vadd.f32 %v1785_v56, %v1769_v16 }
 0x2c5   : > { %v1792_v1 = vadd.f32 %v1782_v3, %v1768_v31 }
 0x2c7   : > { %v1809_v17 = vpop.xlane.xlu1 %1808 }
 0x2c8   : > { %v1817_v55 = vadd.f32 %v1809_v17, %v1793_v21  ;;  %v1806_v29 = vpop.xlane.xlu0 %1805 }
 0x2c9   : > { %v1816_v58 = vadd.f32 %v1806_v29, %v1792_v1 }
 0x2ca   : > { %v1821_v25 = vmul.f32 0.015625, %v1817_v55 }
 0x2cb   : > { %v1820_v7 = vmul.f32 0.015625, %v1816_v58  ;;  %v1815_v10 = vpop.xlane.xlu1 %1814 }
 0x2cc   : > { %v1825_v22 = vadd.f32 1e-05, %v1821_v25  ;;  %v1819_v43 = vadd.f32 %v1815_v10, %v1795_v51  ;;  %v1812_v24 = vpop.xlane.xlu0 %1811 }
 0x2cd   : > { %v1824_v34 = vadd.f32 1e-05, %v1820_v7  ;;  %v1818_v47 = vadd.f32 %v1812_v24, %v1794_v19 }
 0x2ce   : > { %2611 = vrsqrt.f32 %v1825_v22  ;;  %v1823_v13 = vmul.f32 0.015625, %v1819_v43 }
 0x2cf   : > { %2613 = vrsqrt.f32 %v1824_v34  ;;  %v1822_v32 = vmul.f32 0.015625, %v1818_v47 }
 0x2d0   : > { %v1827_v36 = vadd.f32 1e-05, %v1823_v13 }
 0x2d1   : > { %v1826_v4 = vadd.f32 1e-05, %v1822_v32 }
 0x2d2   : > { %2615 = vrsqrt.f32 %v1827_v36 }
 0x2d3   : > { %2617 = vrsqrt.f32 %v1826_v4 }
 0x2db   : > { %v2612_v38 = vpop.eup %2611 }
 0x2dc   : > { %v2614_v39 = vpop.eup %2613  ;;  %v1833_v23 = vmul.f32 %v2612_v38, %v3195_v6  ;;  %v1849_v30 = vmul.f32 %v2612_v38, %v3207_v33  ;;  %v1865_v57 = vmul.f32 %v2612_v38, %v3219_v2  ;;  %v1881_v59 = vmul.f32 %v2612_v38, %v3231_v60 }
 0x2dd   : > { %v1832_v54 = vmul.f32 %v2614_v39, %v3201_v0  ;;  %v1848_v26 = vmul.f32 %v2614_v39, %v3213_v9  ;;  %v1864_v37 = vmul.f32 %v2614_v39, %v3225_v52  ;;  %v1880_v11 = vmul.f32 %v2614_v39, %v3237_v53 }
 0x2de   : > { %v1837_v18 = vmul.f32 0.1, %v1833_v23  ;;  %v1853_v20 = vmul.f32 0.1, %v1849_v30  ;;  %v1869_v28 = vmul.f32 0.1, %v1865_v57 }
 0x2df   : > { %v2616_v46 = vpop.eup %2615  ;;  %v1885_v6 = vmul.f32 0.1, %v1881_v59  ;;  %v1836_v0 = vmul.f32 0.1, %v1832_v54  ;;  %v1852_v33 = vmul.f32 0.1, %v1848_v26 }
 0x2e0   : > { %v2618_v9 = vpop.eup %2617  ;;  %v1841_v2 = vmax.f32 %v1833_v23, %v1837_v18  ;;  %v1857_v52 = vmax.f32 %v1849_v30, %v1853_v20  ;;  %v1873_v60 = vmax.f32 %v1865_v57, %v1869_v28  ;;  %v1868_v53 = vmul.f32 0.1, %v1864_v37 }
 0x2e1   : > { %v1889_v49 = vmax.f32 %v1881_v59, %v1885_v6  ;;  %v1840_v45 = vmax.f32 %v1832_v54, %v1836_v0  ;;  %v1856_v50 = vmax.f32 %v1848_v26, %v1852_v33  ;;  %v1884_v12 = vmul.f32 0.1, %v1880_v11 }
 0x2e2   : > { %1845 = vst.msk [vmem:[%s3271_s6 + $0x8] sm:$0xff] %vm1654_vm0, %v1841_v2  ;;  %1861 = vst.msk [vmem:[%s3271_s6 + $0x28] sm:$0xff] %vm1654_vm0, %v1857_v52  ;;  %v1872_v48 = vmax.f32 %v1864_v37, %v1868_v53  ;;  %v1835_v8 = vmul.f32 %v2616_v46, %v3164_v41  ;;  %v1851_v35 = vmul.f32 %v2616_v46, %v3167_v14 }
 0x2e3   : > { %1877 = vst.msk [vmem:[%s3271_s6 + $0x48] sm:$0xff] %vm1654_vm0, %v1873_v60  ;;  %v1867_v40 = vmul.f32 %v2616_v46, %v3183_v42  ;;  %1893 = vst.msk [vmem:[%s3271_s6 + $0x68] sm:$0xff] %vm1654_vm0, %v1889_v49  ;;  %v1888_v56 = vmax.f32 %v1880_v11, %v1884_v12  ;;  %v1883_v16 = vmul.f32 %v2616_v46, %v3243_v27 }
 0x2e4   : > { %1844 = vst.msk [vmem:[%s3271_s6] sm:$0xff] %vm1654_vm0, %v1840_v45  ;;  %1860 = vst.msk [vmem:[%s3271_s6 + $0x20] sm:$0xff] %vm1654_vm0, %v1856_v50  ;;  %v1834_v3 = vmul.f32 %v2618_v9, %v3170_v15  ;;  %v1850_v31 = vmul.f32 %v2618_v9, %v3173_v62  ;;  %v1839_v41 = vmul.f32 0.1, %v1835_v8  ;;  %v1855_v21 = vmul.f32 0.1, %v1851_v35 }
 0x2e5   : > { %1876 = vst.msk [vmem:[%s3271_s6 + $0x40] sm:$0xff] %vm1654_vm0, %v1872_v48  ;;  %v1871_v14 = vmul.f32 0.1, %v1867_v40  ;;  %v1866_v42 = vmul.f32 %v2618_v9, %v3189_v44  ;;  %1892 = vst.msk [vmem:[%s3271_s6 + $0x60] sm:$0xff] %vm1654_vm0, %v1888_v56  ;;  %v1887_v1 = vmul.f32 0.1, %v1883_v16  ;;  %v1882_v15 = vmul.f32 %v2618_v9, %v3249_v63 }
 0x2e6   : > { %v1838_v17 = vmul.f32 0.1, %v1834_v3  ;;  %v1854_v27 = vmul.f32 0.1, %v1850_v31  ;;  %v1843_v62 = vmax.f32 %v1835_v8, %v1839_v41  ;;  %v1859_v5 = vmax.f32 %v1851_v35, %v1855_v21 }
 0x2e7   : > { %v1875_v55 = vmax.f32 %v1867_v40, %v1871_v14  ;;  %v1870_v29 = vmul.f32 0.1, %v1866_v42  ;;  %v1891_v61 = vmax.f32 %v1883_v16, %v1887_v1  ;;  %v1886_v51 = vmul.f32 0.1, %v1882_v15 }
 0x2e8   : > { %v1842_v58 = vmax.f32 %v1834_v3, %v1838_v17  ;;  %v1858_v44 = vmax.f32 %v1850_v31, %v1854_v27  ;;  %1847 = vst.msk [vmem:[%s3271_s6 + $0x18] sm:$0xff] %vm1654_vm0, %v1843_v62  ;;  %1863 = vst.msk [vmem:[%s3271_s6 + $0x38] sm:$0xff] %vm1654_vm0, %v1859_v5 }
 0x2e9   : > { %1879 = vst.msk [vmem:[%s3271_s6 + $0x58] sm:$0xff] %vm1654_vm0, %v1875_v55  ;;  %v1874_v25 = vmax.f32 %v1866_v42, %v1870_v29  ;;  %1895 = vst.msk [vmem:[%s3271_s6 + $0x78] sm:$0xff] %vm1654_vm0, %v1891_v61  ;;  %v1890_v63 = vmax.f32 %v1882_v15, %v1886_v51 }
 0x2ea   : > { %1846 = vst.msk [vmem:[%s3271_s6 + $0x10] sm:$0xff] %vm1654_vm0, %v1842_v58  ;;  %1862 = vst.msk [vmem:[%s3271_s6 + $0x30] sm:$0xff] %vm1654_vm0, %v1858_v44 }
 0x2eb   : > { %1878 = vst.msk [vmem:[%s3271_s6 + $0x50] sm:$0xff] %vm1654_vm0, %v1874_v25  ;;  %1894 = vst.msk [vmem:[%s3271_s6 + $0x70] sm:$0xff] %vm1654_vm0, %v1890_v63 }
 0x2ec PF: > { %s12_s9 = sadd.s32 1, %s2625_s9  }
 0x2ed   : > { %p9_p4 = scmp.ge.s32.totalorder %s12_s9, 4  }
 0x2ef   :  { %11 = sbr.rel (!%p9_p4) target bundleno = 1 (0x1), region = 58 }

// kernel: attr_encoder_forward.17
= control target key start
LH: loop header
LB: loop body
LE: loop exit
PB: predicated region body
PF: predicated region fallthrough
CT: control target
= control target key end

     0   :  { %s1224_s9 = smov 0   ;;  %s1375_s0 = inlined_call_operand.vmem [shape: bf16[64,576], index: 0, kind: input, shape index: {}]   ;;  %s1376_s1 = inlined_call_operand.vmem [shape: bf16[2,576,64], index: 1, kind: input, shape index: {}]   ;;  %s1377_s2 = inlined_call_operand.vmem [shape: f32[2,64,64], index: 2, kind: output, shape index: {}]  }
   0x1 LB: > { %s941_s10 = sadd.s32 4294967295, %s1207_s9   ;;  %p945_p0 = scmp.ge.s32.totalorder %s1207_s9, 1  ;;  %s1207_s9 = sphi %s1224_s9, %s12_s9  }
   0x2   : > { %p112_p1 = scmp.lt.s32.totalorder %s1207_s9, 3 }
   0x4   : > { %p113_p2 = pnand %p945_p0, %p112_p1 }
   0x5   : > { %p134_p3 = scmp.lt.s32.totalorder (!%p113_p2), %s941_s10, 1 }
   0x6   : > { %116 = sbr.rel (%p113_p2) target bundleno = 618 (0x26a), region = 28 }
   0xb   : > { %v1167_v0 = vld [vmem:[%s1375_s0 + $0x4] ss:$20 sps:$4 sm:$0xff]   ;;  %s1379_s10 = smov (!%p134_p3, %s941_s10), 1  ;;  %v1170_v1 = vld [vmem:[%s1375_s0 + $0xc] ss:$20 sps:$4 sm:$0xff]   ;;  %vm557_vm0 = vcmask 523264  }
   0xc   : > { %602 = vmatprep.mubr.bf16.mxu0 %v1167_v0  ;;  %s1124_s15 = smul.u32 288, %s1379_s10  ;;  %667 = vmatprep.mubr.bf16.mxu1 %v1170_v1  ;;  %v1165_v32 = vld [vmem:[%s1375_s0] ss:$20 sps:$4 sm:$0xff]   ;;  %v1168_v34 = vld [vmem:[%s1375_s0 + $0x8] ss:$20 sps:$4 sm:$0xff]   ;;  %s1011_s29 = sshll.u32 %s1379_s10, 6 }
   0xd   : > { %v1172_v37 = vld [vmem:[%s1375_s0 + $0x2c] ss:$20 sps:$4 sm:$0xff]   ;;  %v1174_v38 = vld [vmem:[%s1375_s0 + $0x34] ss:$20 sps:$4 sm:$0xff]   ;;  %v1177_v42 = vld [vmem:[%s1375_s0 + $0x30] ss:$20 sps:$4 sm:$0xff]   ;;  %s143_s4 = scalar_lea.vmem %s1377_s2, %s1011_s29 }
   0xe   : > { %s1244_s18 = scalar_lea.vmem %s1376_s1, %s1124_s15  ;;  %v1176_v41 = vld [vmem:[%s1375_s0 + $0x28] ss:$20 sps:$4 sm:$0xff]   ;;  %v1183_v46 = vld [vmem:[%s1375_s0 + $0x50] ss:$20 sps:$4 sm:$0xff]   ;;  %v1184_v47 = vld [vmem:[%s1375_s0 + $0x58] ss:$20 sps:$4 sm:$0xff]  }
   0xf   : > { %v1133_v2 = vld [vmem:[%s1244_s18 + $0x78] sm:$0xff]   ;;  %v1137_v6 = vld [vmem:[%s1244_s18 + $0x70] sm:$0xff]   ;;  %v1141_v10 = vld [vmem:[%s1244_s18 + $0x68] sm:$0xff]  }
  0x10   : > { %v1134_v3 = vld [vmem:[%s1244_s18 + $0xf8] sm:$0xff]   ;;  %1012 = vmatprep.subr.bf16.mxu0 %v1133_v2  ;;  %v1138_v7 = vld [vmem:[%s1244_s18 + $0xf0] sm:$0xff]   ;;  %v1142_v11 = vld [vmem:[%s1244_s18 + $0xe8] sm:$0xff]  }
  0x11   : > { %v1135_v4 = vld [vmem:[%s1244_s18 + $0x38] sm:$0xff]   ;;  %1052 = vmatprep.subr.bf16.mxu1 %v1134_v3  ;;  %v1139_v8 = vld [vmem:[%s1244_s18 + $0x30] sm:$0xff]   ;;  %v1143_v12 = vld [vmem:[%s1244_s18 + $0x28] sm:$0xff]  }
  0x12   : > { %v1136_v5 = vld [vmem:[%s1244_s18 + $0xb8] sm:$0xff]   ;;  %1013 = vmatpush3.bf16.msra.mxu0 %v1135_v4  ;;  %v1140_v9 = vld [vmem:[%s1244_s18 + $0xb0] sm:$0xff]   ;;  %v1144_v13 = vld [vmem:[%s1244_s18 + $0xa8] sm:$0xff]  }
  0x13   : > { %1053 = vmatpush3.bf16.msra.mxu1 %v1136_v5  ;;  %1014 = vmatprep.subr.bf16.mxu0 %v1137_v6  ;;  %v1145_v14 = vld [vmem:[%s1244_s18 + $0x60] sm:$0xff]   ;;  %v1149_v18 = vld [vmem:[%s1244_s18 + $0x58] sm:$0xff]   ;;  %v1153_v22 = vld [vmem:[%s1244_s18 + $0x50] sm:$0xff]  }
  0x14   : > { %1054 = vmatprep.subr.bf16.mxu1 %v1138_v7  ;;  %v1146_v15 = vld [vmem:[%s1244_s18 + $0xe0] sm:$0xff]   ;;  %v1150_v19 = vld [vmem:[%s1244_s18 + $0xd8] sm:$0xff]   ;;  %v1154_v23 = vld [vmem:[%s1244_s18 + $0xd0] sm:$0xff]  }
  0x15   : > { %v1147_v16 = vld [vmem:[%s1244_s18 + $0x20] sm:$0xff]   ;;  %v1151_v20 = vld [vmem:[%s1244_s18 + $0x18] sm:$0xff]   ;;  %v1155_v24 = vld [vmem:[%s1244_s18 + $0x10] sm:$0xff]  }
  0x16   : > { %1015 = vmatpush3.bf16.msra.mxu0 %v1139_v8  ;;  %v1148_v17 = vld [vmem:[%s1244_s18 + $0xa0] sm:$0xff]   ;;  %v1152_v21 = vld [vmem:[%s1244_s18 + $0x98] sm:$0xff]   ;;  %v1156_v25 = vld [vmem:[%s1244_s18 + $0x90] sm:$0xff]  }
  0x17   : > { %1055 = vmatpush3.bf16.msra.mxu1 %v1140_v9  ;;  %1016 = vmatprep.subr.bf16.mxu0 %v1141_v10  ;;  %v1157_v26 = vld [vmem:[%s1244_s18 + $0x48] sm:$0xff]   ;;  %v1161_v30 = vld [vmem:[%s1244_s18 + $0x40] sm:$0xff]   ;;  %v1171_v36 = vld [vmem:[%s1244_s18 + $0x118] sm:$0xff]  }
  0x18   : > { %1056 = vmatprep.subr.bf16.mxu1 %v1142_v11  ;;  %v1158_v27 = vld [vmem:[%s1244_s18 + $0xc8] sm:$0xff]   ;;  %v1162_v31 = vld [vmem:[%s1244_s18 + $0xc0] sm:$0xff]   ;;  %v1178_v39 = vld [vmem:[%s1244_s18 + $0x110] sm:$0xff]  }
  0x19   : > { %v1159_v28 = vld [vmem:[%s1244_s18 + $0x8] sm:$0xff]   ;;  %v1163_v33 = vld [vmem:[%s1244_s18] sm:$0xff]   ;;  %v1181_v44 = vld [vmem:[%s1375_s0 + $0x5c] ss:$20 sps:$4 sm:$0xff]  }
  0x1a   : > { %1017 = vmatpush3.bf16.msra.mxu0 %v1143_v12  ;;  %v1160_v29 = vld [vmem:[%s1244_s18 + $0x88] sm:$0xff]   ;;  %v1164_v35 = vld [vmem:[%s1244_s18 + $0x80] sm:$0xff]   ;;  %v1186_v48 = vld [vmem:[%s1375_s0 + $0x7c] ss:$20 sps:$4 sm:$0xff]  }
  0x1b   : > { %1057 = vmatpush3.bf16.msra.mxu1 %v1144_v13  ;;  %1018 = vmatprep.subr.bf16.mxu0 %v1145_v14  ;;  %v1185_v40 = vld [vmem:[%s1244_s18 + $0x108] sm:$0xff]   ;;  %v1192_v45 = vld [vmem:[%s1244_s18 + $0x100] sm:$0xff]  }
  0x1c   : > { %1058 = vmatprep.subr.bf16.mxu1 %v1146_v15  ;;  %v1179_v43 = vld [vmem:[%s1375_s0 + $0x54] ss:$20 sps:$4 sm:$0xff]   ;;  %v1188_v49 = vld [vmem:[%s1375_s0 + $0x84] ss:$20 sps:$4 sm:$0xff]  }
  0x1d   : > { %v1190_v50 = vld [vmem:[%s1375_s0 + $0x78] ss:$20 sps:$4 sm:$0xff]   ;;  %v1191_v51 = vld [vmem:[%s1375_s0 + $0x80] ss:$20 sps:$4 sm:$0xff]   ;;  %v1193_v52 = vld [vmem:[%s1375_s0 + $0x10] ss:$20 sps:$4 sm:$0xff]  }
  0x1e   : > { %1019 = vmatpush3.bf16.msra.mxu0 %v1147_v16  ;;  %v1194_v53 = vld [vmem:[%s1375_s0 + $0x60] ss:$20 sps:$4 sm:$0xff]   ;;  %v1195_v54 = vld [vmem:[%s1375_s0 + $0x38] ss:$20 sps:$4 sm:$0xff]   ;;  %v1196_v55 = vld [vmem:[%s1375_s0 + $0x88] ss:$20 sps:$4 sm:$0xff]  }
  0x1f   : > { %1059 = vmatpush3.bf16.msra.mxu1 %v1148_v17  ;;  %1020 = vmatprep.subr.bf16.mxu0 %v1149_v18 }
  0x20   : > { %1060 = vmatprep.subr.bf16.mxu1 %v1150_v19 }
  0x22   : > { %1021 = vmatpush3.bf16.msra.mxu0 %v1151_v20 }
  0x23   : > { %1061 = vmatpush3.bf16.msra.mxu1 %v1152_v21  ;;  %1022 = vmatprep.subr.bf16.mxu0 %v1153_v22 }
  0x24   : > { %1062 = vmatprep.subr.bf16.mxu1 %v1154_v23 }
  0x26   : > { %1023 = vmatpush3.bf16.msra.mxu0 %v1155_v24 }
  0x27   : > { %1063 = vmatpush3.bf16.msra.mxu1 %v1156_v25  ;;  %1024 = vmatprep.subr.bf16.mxu0 %v1157_v26 }
  0x28   : > { %1064 = vmatprep.subr.bf16.mxu1 %v1158_v27 }
  0x2a   : > { %1025 = vmatpush3.bf16.msra.mxu0 %v1159_v28 }
  0x2b   : > { %1065 = vmatpush3.bf16.msra.mxu1 %v1160_v29  ;;  %1026 = vmatprep.subr.bf16.mxu0 %v1161_v30 }
  0x2c   : > { %1066 = vmatprep.subr.bf16.mxu1 %v1162_v31 }
  0x2e   : > { %1027 = vmatpush3.bf16.msra.mxu0 %v1163_v33 }
  0x2f   : > { %1067 = vmatpush3.bf16.msra.mxu1 %v1164_v35  ;;  %1100 = vmatprep.subr.bf16.mxu0 %v1171_v36 }
  0x30   : > { %1116 = vmatprep.subr.bf16.mxu1 %v1171_v36 }
  0x31   : > { %603 = vmatmul.mubr.bf16.vlgmr.msra.gmra.mxu0 %v1165_v32 }
  0x32   : > { %668 = vmatmul.mubr.bf16.vlgmr.msra.gmra.mxu1 %v1168_v34  ;;  %1101 = vmatpush3.bf16.msra.mxu0 %v1171_v36 }
  0x33   : > { %1120 = vmatpush3.bf16.msra.mxu1 %v1171_v36  ;;  %610 = vmatprep.mubr.bf16.mxu0 %v1172_v37 }
  0x34   : > { %675 = vmatprep.mubr.bf16.mxu1 %v1174_v38  ;;  %1102 = vmatprep.subr.bf16.mxu0 %v1178_v39 }
  0x35   : > { %1117 = vmatprep.subr.bf16.mxu1 %v1178_v39 }
  0x36   : > { %1103 = vmatpush3.bf16.msra.mxu0 %v1178_v39 }
  0x37   : > { %1121 = vmatpush3.bf16.msra.mxu1 %v1178_v39  ;;  %1104 = vmatprep.subr.bf16.mxu0 %v1185_v40 }
  0x38   : > { %1118 = vmatprep.subr.bf16.mxu1 %v1185_v40 }
  0x39   : > { %611 = vmatmul.mubr.bf16.gmra.mxu0 %v1176_v41 }
  0x3a   : > { %676 = vmatmul.mubr.bf16.gmra.mxu1 %v1177_v42  ;;  %618 = vmatprep.mubr.bf16.mxu0 %v1179_v43 }
  0x3b   : > { %683 = vmatprep.mubr.bf16.mxu1 %v1181_v44  ;;  %1105 = vmatpush3.bf16.msra.mxu0 %v1185_v40 }
  0x3c   : > { %1122 = vmatpush3.bf16.msra.mxu1 %v1185_v40  ;;  %1106 = vmatprep.subr.bf16.mxu0 %v1192_v45 }
  0x3d   : > { %1119 = vmatprep.subr.bf16.mxu1 %v1192_v45 }
  0x3f   : > { %1107 = vmatpush3.bf16.msra.mxu0 %v1192_v45 }
  0x40   : > { %1123 = vmatpush3.bf16.msra.mxu1 %v1192_v45 }
  0x41   : > { %619 = vmatmul.mubr.bf16.gmra.mxu0 %v1183_v46 }
  0x42   : > { %684 = vmatmul.mubr.bf16.gmra.mxu1 %v1184_v47  ;;  %626 = vmatprep.mubr.bf16.mxu0 %v1186_v48 }
  0x43   : > { %691 = vmatprep.mubr.bf16.mxu1 %v1188_v49 }
  0x49   : > { %627 = vmatmul.mubr.bf16.gmra.mxu0 %v1190_v50 }
  0x4a   : > { %692 = vmatmul.mubr.bf16.gmra.mxu1 %v1191_v51  ;;  %1108 = vmatprep.mubr.msk.bf16.mxu0 %vm557_vm0, %v1193_v52 }
  0x4b   : > { %1112 = vmatprep.mubr.msk.bf16.mxu1 %vm557_vm0, %v1194_v53 }
  0x51   : > { %1109 = vmatmul.mubr.msk.bf16.vlgmr.msra.gmra.mxu0 %vm557_vm0, %v1195_v54 }
  0x52   : > { %1113 = vmatmul.mubr.msk.bf16.vlgmr.msra.gmra.mxu1 %vm557_vm0, %v1196_v55 }
  0xf1   : > { %v1028_v56 = vpop.f32.mrf.mxu0 }
  0xf2   : > { %v1068_v57 = vpop.f32.mrf.mxu1 }
  0xf3   : > { %v1029_v58 = vpop.f32.mrf.mxu0 }
  0xf4   : > { %v1069_v59 = vpop.f32.mrf.mxu1  ;;  %v1030_v23 = vadd.f32 %v1029_v58, %v1028_v56 }
  0xf5   : > { %v1031_v60 = vpop.f32.mrf.mxu0  ;;  %v1070_v24 = vadd.f32 %v1069_v59, %v1068_v57 }
  0xf6   : > { %v1071_v61 = vpop.f32.mrf.mxu1 }
  0xf7   : > { %v1032_v62 = vpop.f32.mrf.mxu0  ;;  %v670_v36 = vadd.f32 %v1070_v24, %v1030_v23 }
  0xf8   : > { %v1072_v63 = vpop.f32.mrf.mxu1  ;;  %v1033_v37 = vadd.f32 %v1032_v62, %v1031_v60 }
  0xf9   : > { %v1034_v0 = vpop.f32.mrf.mxu0  ;;  %v1073_v38 = vadd.f32 %v1072_v63, %v1071_v61 }
  0xfa   : > { %v1074_v1 = vpop.f32.mrf.mxu1 }
  0xfb   : > { %v1035_v2 = vpop.f32.mrf.mxu0  ;;  %v673_v58 = vadd.f32 %v1073_v38, %v1033_v37 }
  0xfc   : > { %v1075_v3 = vpop.f32.mrf.mxu1  ;;  %v1036_v18 = vadd.f32 %v1035_v2, %v1034_v0 }
  0xfd   : > { %v1037_v4 = vpop.f32.mrf.mxu0  ;;  %v1076_v19 = vadd.f32 %v1075_v3, %v1074_v1 }
  0xfe   : > { %v1077_v5 = vpop.f32.mrf.mxu1 }
  0xff   : > { %v1038_v6 = vpop.f32.mrf.mxu0  ;;  %v678_v27 = vadd.f32 %v1076_v19, %v1036_v18 }
 0x100   : > { %v1078_v7 = vpop.f32.mrf.mxu1  ;;  %v1039_v28 = vadd.f32 %v1038_v6, %v1037_v4 }
 0x101   : > { %v1040_v8 = vpop.f32.mrf.mxu0  ;;  %v1079_v29 = vadd.f32 %v1078_v7, %v1077_v5 }
 0x102   : > { %v1080_v9 = vpop.f32.mrf.mxu1 }
 0x103   : > { %v1041_v10 = vpop.f32.mrf.mxu0  ;;  %v681_v45 = vadd.f32 %v1079_v29, %v1039_v28 }
 0x104   : > { %v1081_v11 = vpop.f32.mrf.mxu1  ;;  %v1042_v30 = vadd.f32 %v1041_v10, %v1040_v8 }
 0x105   : > { %v1043_v12 = vpop.f32.mrf.mxu0  ;;  %v1082_v31 = vadd.f32 %v1081_v11, %v1080_v9 }
 0x106   : > { %v1083_v13 = vpop.f32.mrf.mxu1 }
 0x107   : > { %v1044_v14 = vpop.f32.mrf.mxu0  ;;  %v686_v43 = vadd.f32 %v1082_v31, %v1042_v30 }
 0x108   : > { %v1084_v15 = vpop.f32.mrf.mxu1  ;;  %v1045_v39 = vadd.f32 %v1044_v14, %v1043_v12 }
 0x109   : > { %v1046_v16 = vpop.f32.mrf.mxu0  ;;  %v1085_v40 = vadd.f32 %v1084_v15, %v1083_v13 }
 0x10a   : > { %v1086_v17 = vpop.f32.mrf.mxu1 }
 0x10b   : > { %v1047_v20 = vpop.f32.mrf.mxu0  ;;  %v689_v55 = vadd.f32 %v1085_v40, %v1045_v39 }
 0x10c   : > { %v1087_v21 = vpop.f32.mrf.mxu1  ;;  %v1048_v56 = vadd.f32 %v1047_v20, %v1046_v16 }
 0x10d   : > { %v1049_v22 = vpop.f32.mrf.mxu0  ;;  %v1088_v57 = vadd.f32 %v1087_v21, %v1086_v17 }
 0x10e   : > { %v1089_v25 = vpop.f32.mrf.mxu1 }
 0x10f   : > { %v1050_v26 = vpop.f32.mrf.mxu0  ;;  %v694_v1 = vadd.f32 %v1088_v57, %v1048_v56 }
 0x110   : > { %v1090_v32 = vpop.f32.mrf.mxu1  ;;  %v1051_v47 = vadd.f32 %v1050_v26, %v1049_v22 }
 0x111   : > { %v1110_v33 = vpop.f32.mrf.mxu0  ;;  %v1091_v49 = vadd.f32 %v1090_v32, %v1089_v25 }
 0x112   : > { %v1340_v34 = vadd.f32 %v1110_v33, %v678_v27  ;;  %v1114_v35 = vpop.f32.mrf.mxu1 }
 0x113   : > { %v734_v41 = vpop.f32.mrf.mxu0  ;;  %v697_v62 = vadd.f32 %v1091_v49, %v1051_v47  ;;  %v759_v4 = vadd.f32 %v1114_v35, %v694_v1 }
 0x114   : > { %v735_v42 = vadd.f32 %v734_v41, %v670_v36  ;;  %v750_v44 = vpop.f32.mrf.mxu1  ;;  %v773_v46 = vsel %vm557_vm0, %v1340_v34, 0.0 }
 0x115   : > { %v1111_v48 = vpop.f32.mrf.mxu0  ;;  %774 = vadd.xlane.f32.xlu1 %v773_v46  ;;  %v751_v50 = vadd.f32 %v750_v44, %v686_v43  ;;  %v789_v7 = vsel %vm557_vm0, %v759_v4, 0.0 }
 0x116   : > { %v746_v51 = vadd.f32 %v1111_v48, %v681_v45  ;;  %v1115_v52 = vpop.f32.mrf.mxu1  ;;  %v765_v53 = vsel %vm557_vm0, %v735_v42, 0.0 }
 0x117   : > { %v737_v54 = vpop.f32.mrf.mxu0  ;;  %766 = vadd.xlane.f32.xlu0 %v765_v53  ;;  %v781_v0 = vsel %vm557_vm0, %v751_v50, 0.0  ;;  %v762_v2 = vadd.f32 %v1115_v52, %v697_v62 }
 0x118   : > { %v753_v59 = vpop.f32.mrf.mxu1  ;;  %v776_v60 = vsel %vm557_vm0, %v746_v51, 0.0  ;;  %v738_v63 = vadd.f32 %v737_v54, %v673_v58 }
 0x119   : > { %v754_v61 = vadd.f32 %v753_v59, %v689_v55  ;;  %777 = vadd.xlane.f32.xlu1 %v776_v60  ;;  %v792_v6 = vsel %vm557_vm0, %v762_v2, 0.0 }
 0x11a   : > { %v768_v5 = vsel %vm557_vm0, %v738_v63, 0.0 }
 0x11b   : > { %782 = vadd.xlane.f32.xlu0 %v781_v0  ;;  %v784_v3 = vsel %vm557_vm0, %v754_v61, 0.0 }
 0x11d   : > { %785 = vadd.xlane.f32.xlu1 %v784_v3 }
 0x11f   : > { %769 = vadd.xlane.f32.xlu0 %v768_v5 }
 0x121   : > { %793 = vadd.xlane.f32.xlu1 %v792_v6 }
 0x123   : > { %790 = vadd.xlane.f32.xlu0 %v789_v7 }
 0x19e   : > { %v775_v8 = vpop.xlane.xlu1 %774 }
 0x1a0   : > { %v767_v9 = vpop.xlane.xlu0 %766 }
 0x1a1   : > { %v779_v14 = vadd.f32 %v775_v8, %v767_v9 }
 0x1a2   : > { %v778_v10 = vpop.xlane.xlu1 %777 }
 0x1a4   : > { %v783_v11 = vpop.xlane.xlu0 %782 }
 0x1a5   : > { %v787_v16 = vadd.f32 %v783_v11, %v779_v14 }
 0x1a6   : > { %v786_v12 = vpop.xlane.xlu1 %785 }
 0x1a8   : > { %v770_v13 = vpop.xlane.xlu0 %769 }
 0x1a9   : > { %v780_v15 = vadd.f32 %v778_v10, %v770_v13 }
 0x1aa   : > { %v794_v18 = vpop.xlane.xlu1 %793 }
 0x1ab   : > { %v788_v17 = vadd.f32 %v786_v12, %v780_v15 }
 0x1ac   : > { %v791_v19 = vpop.xlane.xlu0 %790 }
 0x1ad   : > { %v796_v20 = vadd.f32 %v794_v18, %v788_v17  ;;  %v795_v21 = vadd.f32 %v791_v19, %v787_v16 }
 0x1af   : > { %v799_v22 = vmul.f32 0.00390625, %v796_v20  ;;  %v798_v23 = vmul.f32 0.00390625, %v795_v21 }
 0x1b1   : > { %v801_v24 = vsub.f32 %v738_v63, %v799_v22  ;;  %v800_v25 = vsub.f32 %v735_v42, %v798_v23  ;;  %v813_v26 = vsub.f32 %v746_v51, %v799_v22  ;;  %v812_v27 = vsub.f32 %v1340_v34, %v798_v23 }
 0x1b2   : > { %v825_v30 = vsub.f32 %v754_v61, %v799_v22  ;;  %v824_v31 = vsub.f32 %v751_v50, %v798_v23  ;;  %v837_v37 = vsub.f32 %v762_v2, %v799_v22  ;;  %v836_v38 = vsub.f32 %v759_v4, %v798_v23 }
 0x1b3   : > { %v803_v28 = vmul.f32 %v801_v24, %v801_v24  ;;  %v802_v29 = vmul.f32 %v800_v25, %v800_v25  ;;  %v815_v35 = vmul.f32 %v813_v26, %v813_v26  ;;  %v814_v36 = vmul.f32 %v812_v27, %v812_v27 }
 0x1b4   : > { %v827_v41 = vmul.f32 %v825_v30, %v825_v30  ;;  %v826_v34 = vmul.f32 %v824_v31, %v824_v31  ;;  %v839_v44 = vmul.f32 %v837_v37, %v837_v37  ;;  %v838_v45 = vmul.f32 %v836_v38, %v836_v38 }
 0x1b5   : > { %v807_v32 = vsel %vm557_vm0, %v803_v28, 0.0  ;;  %v804_v33 = vsel %vm557_vm0, %v802_v29, 0.0  ;;  %v819_v39 = vsel %vm557_vm0, %v815_v35, 0.0  ;;  %v816_v40 = vsel %vm557_vm0, %v814_v36, 0.0 }
 0x1b6   : > { %808 = vadd.xlane.f32.xlu1 %v807_v32  ;;  %805 = vadd.xlane.f32.xlu0 %v804_v33  ;;  %v831_v42 = vsel %vm557_vm0, %v827_v41, 0.0  ;;  %v828_v43 = vsel %vm557_vm0, %v826_v34, 0.0  ;;  %v843_v46 = vsel %vm557_vm0, %v839_v44, 0.0  ;;  %v840_v47 = vsel %vm557_vm0, %v838_v45, 0.0 }
 0x1ba   : > { %820 = vadd.xlane.f32.xlu1 %v819_v39  ;;  %817 = vadd.xlane.f32.xlu0 %v816_v40 }
 0x1be   : > { %832 = vadd.xlane.f32.xlu1 %v831_v42  ;;  %829 = vadd.xlane.f32.xlu0 %v828_v43 }
 0x1c2   : > { %844 = vadd.xlane.f32.xlu1 %v843_v46  ;;  %841 = vadd.xlane.f32.xlu0 %v840_v47 }
 0x23f   : > { %v809_v48 = vpop.xlane.xlu1 %808  ;;  %v806_v49 = vpop.xlane.xlu0 %805 }
 0x243   : > { %v821_v50 = vpop.xlane.xlu1 %820  ;;  %v818_v51 = vpop.xlane.xlu0 %817 }
 0x244   : > { %v823_v54 = vadd.f32 %v821_v50, %v809_v48  ;;  %v822_v55 = vadd.f32 %v818_v51, %v806_v49 }
 0x247   : > { %v833_v52 = vpop.xlane.xlu1 %832  ;;  %v830_v53 = vpop.xlane.xlu0 %829 }
 0x248   : > { %v835_v56 = vadd.f32 %v833_v52, %v823_v54  ;;  %v834_v57 = vadd.f32 %v830_v53, %v822_v55 }
 0x24b   : > { %v845_v58 = vpop.xlane.xlu1 %844  ;;  %v842_v59 = vpop.xlane.xlu0 %841 }
 0x24c   : > { %v847_v60 = vadd.f32 %v845_v58, %v835_v56  ;;  %v846_v61 = vadd.f32 %v842_v59, %v834_v57 }
 0x24e   : > { %v849_v62 = vmul.f32 0.00390625, %v847_v60  ;;  %v848_v63 = vmul.f32 0.00390625, %v846_v61 }
 0x250   : > { %v851_v0 = vadd.f32 1e-05, %v849_v62  ;;  %v850_v1 = vadd.f32 1e-05, %v848_v63 }
 0x252   : > { %1197 = vrsqrt.f32 %v851_v0 }
 0x253   : > { %1199 = vrsqrt.f32 %v850_v1 }
 0x25f   : > { %v1198_v2 = vpop.eup %1197 }
 0x260   : > { %v1200_v3 = vpop.eup %1199  ;;  %v855_v4 = vmul.f32 %v1198_v2, %v801_v24  ;;  %v863_v5 = vmul.f32 %v1198_v2, %v813_v26  ;;  %v871_v6 = vmul.f32 %v1198_v2, %v825_v30  ;;  %v879_v7 = vmul.f32 %v1198_v2, %v837_v37 }
 0x261   : > { %v854_v8 = vmul.f32 %v1200_v3, %v800_v25  ;;  %v862_v9 = vmul.f32 %v1200_v3, %v812_v27  ;;  %v870_v10 = vmul.f32 %v1200_v3, %v824_v31  ;;  %v878_v11 = vmul.f32 %v1200_v3, %v836_v38 }
 0x262   : > { %v857_v12 = vmul.f32 0.1, %v855_v4  ;;  %v865_v13 = vmul.f32 0.1, %v863_v5  ;;  %v873_v14 = vmul.f32 0.1, %v871_v6 }
 0x263   : > { %v881_v15 = vmul.f32 0.1, %v879_v7  ;;  %v856_v16 = vmul.f32 0.1, %v854_v8  ;;  %v864_v17 = vmul.f32 0.1, %v862_v9 }
 0x264   : > { %v859_v18 = vmax.f32 %v855_v4, %v857_v12  ;;  %v867_v19 = vmax.f32 %v863_v5, %v865_v13  ;;  %v875_v20 = vmax.f32 %v871_v6, %v873_v14  ;;  %v872_v21 = vmul.f32 0.1, %v870_v10 }
 0x265   : > { %v883_v22 = vmax.f32 %v879_v7, %v881_v15  ;;  %v858_v23 = vmax.f32 %v854_v8, %v856_v16  ;;  %v866_v24 = vmax.f32 %v862_v9, %v864_v17  ;;  %v880_v25 = vmul.f32 0.1, %v878_v11 }
 0x266   : > { %861 = vst.msk [vmem:[%s143_s4 + $0x8] sm:$0xff] %vm557_vm0, %v859_v18  ;;  %869 = vst.msk [vmem:[%s143_s4 + $0x18] sm:$0xff] %vm557_vm0, %v867_v19  ;;  %v874_v26 = vmax.f32 %v870_v10, %v872_v21 }
 0x267   : > { %877 = vst.msk [vmem:[%s143_s4 + $0x28] sm:$0xff] %vm557_vm0, %v875_v20  ;;  %885 = vst.msk [vmem:[%s143_s4 + $0x38] sm:$0xff] %vm557_vm0, %v883_v22  ;;  %v882_v27 = vmax.f32 %v878_v11, %v880_v25 }
 0x268   : > { %860 = vst.msk [vmem:[%s143_s4] sm:$0xff] %vm557_vm0, %v858_v23  ;;  %868 = vst.msk [vmem:[%s143_s4 + $0x10] sm:$0xff] %vm557_vm0, %v866_v24 }
 0x269   : > { %876 = vst.msk [vmem:[%s143_s4 + $0x20] sm:$0xff] %vm557_vm0, %v874_v26  ;;  %884 = vst.msk [vmem:[%s143_s4 + $0x30] sm:$0xff] %vm557_vm0, %v882_v27 }
 0x26a PF: > { %s12_s9 = sadd.s32 1, %s1207_s9  }
 0x26b   : > { %p9_p4 = scmp.ge.s32.totalorder %s12_s9, 4  }
 0x26d   :  { %11 = sbr.rel (!%p9_p4) target bundleno = 1 (0x1), region = 58 }

// kernel: attr_encoder_forward.18
= control target key start
LH: loop header
LB: loop body
LE: loop exit
PB: predicated region body
PF: predicated region fallthrough
CT: control target
= control target key end

     0   :  { %s805_s9 = smov 0   ;;  %s884_s0 = inlined_call_operand.vmem [shape: bf16[32,288], index: 0, kind: input, shape index: {}]   ;;  %s885_s1 = inlined_call_operand.vmem [shape: bf16[2,288,256], index: 1, kind: input, shape index: {}]   ;;  %s886_s2 = inlined_call_operand.vmem [shape: f32[2,32,256], index: 2, kind: output, shape index: {}]  }
   0x1 LB: > { %s652_s10 = sadd.s32 4294967295, %s787_s9   ;;  %p656_p0 = scmp.ge.s32.totalorder %s787_s9, 1  ;;  %s787_s9 = sphi %s805_s9, %s12_s9  }
   0x2   : > { %p112_p1 = scmp.lt.s32.totalorder %s787_s9, 3 }
   0x4   : > { %p113_p2 = pnand %p656_p0, %p112_p1 }
   0x5   : > { %p134_p3 = scmp.lt.s32.totalorder (!%p113_p2), %s652_s10, 1 }
   0x6   : > { %116 = sbr.rel (%p113_p2) target bundleno = 613 (0x265), region = 28 }
   0xb   : > { %v789_v0 = vmov 0   ;;  %s888_s10 = smov (!%p134_p3, %s652_s10), 1  ;;  %v774_v1 = vld [vmem:[%s884_s0 + $0x4] ss:$12 sps:$4 sm:$0xff]   ;;  %v768_v21 = vld [vmem:[%s884_s0 + $0x8] ss:$12 sps:$4 sm:$0xff]  }
   0xc   : > { %491 = vmatprep.mubr.bf16.mxu1 %v789_v0  ;;  %s707_s13 = smul.u32 288, %s888_s10  ;;  %438 = vmatprep.mubr.bf16.mxu0 %v774_v1  ;;  %vm399_vm0 = vcmask 261120   ;;  %v775_v26 = vld [vmem:[%s884_s0 + $0x20] ss:$12 sps:$4 sm:$0xff]   ;;  %v776_v41 = vld [vmem:[%s884_s0 + $0x1c] ss:$12 sps:$4 sm:$0xff]  }
   0xd   : > { %v772_v40 = vld [vmem:[%s884_s0] ss:$12 sps:$4 sm:$0xff]   ;;  %v778_v42 = vld [vmem:[%s884_s0 + $0x18] ss:$12 sps:$4 sm:$0xff]   ;;  %s706_s27 = sshll.u32 %s888_s10, 6 }
   0xe   : > { %s822_s16 = scalar_lea.vmem %s885_s1, %s707_s13  ;;  %s143_s30 = scalar_lea.vmem %s886_s2, %s706_s27 }
   0xf   : > { %v717_v2 = vld [vmem:[%s822_s16 + $0x74] ss:$8 sps:$4 sm:$0xff]   ;;  %v719_v3 = vld [vmem:[%s822_s16 + $0x70] ss:$8 sps:$4 sm:$0xff]   ;;  %v720_v4 = vld [vmem:[%s822_s16 + $0x64] ss:$8 sps:$4 sm:$0xff]  }
  0x10   : > { %406 = vmatprep.subr.bf16.mxu0 %v717_v2  ;;  %v722_v5 = vld [vmem:[%s822_s16 + $0x60] ss:$8 sps:$4 sm:$0xff]   ;;  %v723_v6 = vld [vmem:[%s822_s16 + $0x54] ss:$8 sps:$4 sm:$0xff]   ;;  %v725_v7 = vld [vmem:[%s822_s16 + $0x50] ss:$8 sps:$4 sm:$0xff]  }
  0x11   : > { %407 = vmatpush1.bf16.msra.mxu0 %v719_v3  ;;  %v726_v8 = vld [vmem:[%s822_s16 + $0x44] ss:$8 sps:$4 sm:$0xff]   ;;  %v728_v9 = vld [vmem:[%s822_s16 + $0x40] ss:$8 sps:$4 sm:$0xff]   ;;  %v729_v10 = vld [vmem:[%s822_s16 + $0x34] ss:$8 sps:$4 sm:$0xff]  }
  0x12   : > { %408 = vmatprep.subr.bf16.mxu0 %v720_v4  ;;  %v731_v11 = vld [vmem:[%s822_s16 + $0x30] ss:$8 sps:$4 sm:$0xff]   ;;  %v732_v12 = vld [vmem:[%s822_s16 + $0x24] ss:$8 sps:$4 sm:$0xff]   ;;  %v756_v13 = vld [vmem:[%s822_s16 + $0x114] ss:$8 sps:$4 sm:$0xff]  }
  0x13   : > { %v758_v14 = vld [vmem:[%s822_s16 + $0x110] ss:$8 sps:$4 sm:$0xff]   ;;  %v734_v15 = vld [vmem:[%s822_s16 + $0x20] ss:$8 sps:$4 sm:$0xff]   ;;  %v735_v16 = vld [vmem:[%s822_s16 + $0x14] ss:$8 sps:$4 sm:$0xff]   ;;  %471 = vmatprep.subr.bf16.mxu1 %v756_v13 }
  0x14   : > { %v762_v17 = vld [vmem:[%s822_s16 + $0x104] ss:$8 sps:$4 sm:$0xff]   ;;  %472 = vmatpush1.bf16.msra.mxu1 %v758_v14  ;;  %v764_v18 = vld [vmem:[%s822_s16 + $0x100] ss:$8 sps:$4 sm:$0xff]   ;;  %v737_v19 = vld [vmem:[%s822_s16 + $0x10] ss:$8 sps:$4 sm:$0xff]  }
  0x15   : > { %409 = vmatpush1.bf16.msra.mxu0 %v722_v5  ;;  %473 = vmatprep.subr.bf16.mxu1 %v762_v17  ;;  %v738_v20 = vld [vmem:[%s822_s16 + $0x4] ss:$8 sps:$4 sm:$0xff]   ;;  %v740_v22 = vld [vmem:[%s822_s16] ss:$8 sps:$4 sm:$0xff]   ;;  %v741_v23 = vld [vmem:[%s822_s16 + $0xf4] ss:$8 sps:$4 sm:$0xff]  }
  0x16   : > { %410 = vmatprep.subr.bf16.mxu0 %v723_v6  ;;  %v743_v24 = vld [vmem:[%s822_s16 + $0xf0] ss:$8 sps:$4 sm:$0xff]   ;;  %v744_v25 = vld [vmem:[%s822_s16 + $0xe4] ss:$8 sps:$4 sm:$0xff]   ;;  %v746_v27 = vld [vmem:[%s822_s16 + $0xe0] ss:$8 sps:$4 sm:$0xff]  }
  0x17   : > { %v747_v28 = vld [vmem:[%s822_s16 + $0xd4] ss:$8 sps:$4 sm:$0xff]   ;;  %v749_v29 = vld [vmem:[%s822_s16 + $0xd0] ss:$8 sps:$4 sm:$0xff]   ;;  %v750_v30 = vld [vmem:[%s822_s16 + $0xc4] ss:$8 sps:$4 sm:$0xff]  }
  0x18   : > { %474 = vmatpush1.bf16.msra.mxu1 %v764_v18  ;;  %v752_v31 = vld [vmem:[%s822_s16 + $0xc0] ss:$8 sps:$4 sm:$0xff]   ;;  %v753_v32 = vld [vmem:[%s822_s16 + $0xb4] ss:$8 sps:$4 sm:$0xff]   ;;  %v755_v33 = vld [vmem:[%s822_s16 + $0xb0] ss:$8 sps:$4 sm:$0xff]  }
  0x19   : > { %411 = vmatpush1.bf16.msra.mxu0 %v725_v7  ;;  %v759_v34 = vld [vmem:[%s822_s16 + $0xa4] ss:$8 sps:$4 sm:$0xff]   ;;  %v761_v35 = vld [vmem:[%s822_s16 + $0xa0] ss:$8 sps:$4 sm:$0xff]   ;;  %v765_v36 = vld [vmem:[%s822_s16 + $0x94] ss:$8 sps:$4 sm:$0xff]  }
  0x1a   : > { %412 = vmatprep.subr.bf16.mxu0 %v726_v8  ;;  %v767_v37 = vld [vmem:[%s822_s16 + $0x90] ss:$8 sps:$4 sm:$0xff]   ;;  %v769_v38 = vld [vmem:[%s822_s16 + $0x84] ss:$8 sps:$4 sm:$0xff]   ;;  %v771_v39 = vld [vmem:[%s822_s16 + $0x80] ss:$8 sps:$4 sm:$0xff]  }
  0x1b   : > { %702 = vmatmul.mubr.msk.bf16.vlgmr.msra.gmra.mxu1 %vm399_vm0, %v768_v21 }
  0x1c   : > { %501 = vmatprep.mubr.bf16.mxu1 %v789_v0 }
  0x1d   : > { %413 = vmatpush1.bf16.msra.mxu0 %v728_v9 }
  0x1e   : > { %414 = vmatprep.subr.bf16.mxu0 %v729_v10 }
  0x21   : > { %415 = vmatpush1.bf16.msra.mxu0 %v731_v11 }
  0x22   : > { %416 = vmatprep.subr.bf16.mxu0 %v732_v12 }
  0x23   : > { %703 = vmatmul.mubr.msk.bf16.gmra.mxu1 %vm399_vm0, %v775_v26 }
  0x25   : > { %417 = vmatpush1.bf16.msra.mxu0 %v734_v15 }
  0x26   : > { %418 = vmatprep.subr.bf16.mxu0 %v735_v16 }
  0x29   : > { %419 = vmatpush1.bf16.msra.mxu0 %v737_v19 }
  0x2a   : > { %420 = vmatprep.subr.bf16.mxu0 %v738_v20 }
  0x2d   : > { %421 = vmatpush1.bf16.msra.mxu0 %v740_v22 }
  0x2e   : > { %422 = vmatprep.subr.bf16.mxu0 %v741_v23 }
  0x31   : > { %423 = vmatpush2.bf16.msra.mxu0 %v743_v24 }
  0x32   : > { %424 = vmatprep.subr.bf16.mxu0 %v744_v25 }
  0x35   : > { %425 = vmatpush2.bf16.msra.mxu0 %v746_v27 }
  0x36   : > { %426 = vmatprep.subr.bf16.mxu0 %v747_v28 }
  0x39   : > { %427 = vmatpush2.bf16.msra.mxu0 %v749_v29 }
  0x3a   : > { %428 = vmatprep.subr.bf16.mxu0 %v750_v30 }
  0x3d   : > { %429 = vmatpush2.bf16.msra.mxu0 %v752_v31 }
  0x3e   : > { %430 = vmatprep.subr.bf16.mxu0 %v753_v32 }
  0x41   : > { %431 = vmatpush2.bf16.msra.mxu0 %v755_v33 }
  0x42   : > { %432 = vmatprep.subr.bf16.mxu0 %v759_v34 }
  0x45   : > { %433 = vmatpush2.bf16.msra.mxu0 %v761_v35 }
  0x46   : > { %434 = vmatprep.subr.bf16.mxu0 %v765_v36 }
  0x49   : > { %435 = vmatpush2.bf16.msra.mxu0 %v767_v37 }
  0x4a   : > { %436 = vmatprep.subr.bf16.mxu0 %v769_v38 }
  0x4d   : > { %437 = vmatpush2.bf16.msra.mxu0 %v771_v39 }
  0x50   : > { %439 = vmatmul.mubr.bf16.vlgmr.msra.gmra.mxu0 %v772_v40 }
  0x51   : > { %448 = vmatprep.mubr.bf16.mxu0 %v776_v41 }
  0x58   : > { %449 = vmatmul.mubr.bf16.gmra.mxu0 %v778_v42 }
  0xdb   : > { %v493_v43 = vpop.f32.mrf.mxu1 }
  0xdd   : > { %v495_v44 = vpop.f32.mrf.mxu1 }
  0xdf   : > { %v497_v45 = vpop.f32.mrf.mxu1 }
  0xe1   : > { %v499_v46 = vpop.f32.mrf.mxu1 }
  0xe3   : > { %v503_v49 = vpop.f32.mrf.mxu1 }
  0xe5   : > { %v505_v54 = vpop.f32.mrf.mxu1 }
  0xe7   : > { %v507_v60 = vpop.f32.mrf.mxu1 }
  0xe9   : > { %v509_v2 = vpop.f32.mrf.mxu1 }
 0x110   : > { %v440_v47 = vpop.f32.mrf.mxu0 }
 0x111   : > { %v494_v50 = vadd.f32 %v493_v43, %v440_v47 }
 0x112   : > { %v442_v48 = vpop.f32.mrf.mxu0 }
 0x113   : > { %v496_v51 = vadd.f32 %v495_v44, %v442_v48 }
 0x114   : > { %v444_v52 = vpop.f32.mrf.mxu0 }
 0x115   : > { %v512_v53 = vadd.f32 %v496_v51, %v494_v50  ;;  %v498_v56 = vadd.f32 %v497_v45, %v444_v52 }
 0x116   : > { %v446_v55 = vpop.f32.mrf.mxu0 }
 0x117   : > { %v500_v57 = vadd.f32 %v499_v46, %v446_v55  ;;  %513 = vadd.xlane.f32.xlu0 %v512_v53 }
 0x118   : > { %v450_v58 = vpop.f32.mrf.mxu0 }
 0x119   : > { %v516_v59 = vadd.f32 %v500_v57, %v498_v56  ;;  %v504_v62 = vadd.f32 %v503_v49, %v450_v58 }
 0x11a   : > { %v452_v61 = vpop.f32.mrf.mxu0 }
 0x11b   : > { %v506_v63 = vadd.f32 %v505_v54, %v452_v61  ;;  %517 = vadd.xlane.f32.xlu0 %v516_v59 }
 0x11c   : > { %v454_v0 = vpop.f32.mrf.mxu0 }
 0x11d   : > { %v520_v1 = vadd.f32 %v506_v63, %v504_v62  ;;  %v508_v4 = vadd.f32 %v507_v60, %v454_v0 }
 0x11e   : > { %v456_v3 = vpop.f32.mrf.mxu0 }
 0x11f   : > { %v510_v5 = vadd.f32 %v509_v2, %v456_v3  ;;  %521 = vadd.xlane.f32.xlu1 %v520_v1 }
 0x121   : > { %v524_v6 = vadd.f32 %v510_v5, %v508_v4 }
 0x123   : > { %525 = vadd.xlane.f32.xlu1 %v524_v6 }
 0x1a0   : > { %v514_v7 = vpop.xlane.xlu0 %513 }
 0x1a4   : > { %v518_v8 = vpop.xlane.xlu0 %517 }
 0x1a5   : > { %v519_v10 = vadd.f32 %v518_v8, %v514_v7 }
 0x1a8   : > { %v522_v9 = vpop.xlane.xlu1 %521 }
 0x1a9   : > { %v523_v11 = vadd.f32 %v522_v9, %v519_v10 }
 0x1ac   : > { %v526_v12 = vpop.xlane.xlu1 %525 }
 0x1ad   : > { %v527_v13 = vadd.f32 %v526_v12, %v523_v11 }
 0x1af   : > { %v529_v14 = vmul.f32 0.0009765625, %v527_v13 }
 0x1b1   : > { %v538_v15 = vsub.f32 %v498_v56, %v529_v14  ;;  %v539_v16 = vsub.f32 %v500_v57, %v529_v14  ;;  %v530_v17 = vsub.f32 %v494_v50, %v529_v14  ;;  %v531_v18 = vsub.f32 %v496_v51, %v529_v14 }
 0x1b2   : > { %v554_v19 = vsub.f32 %v508_v4, %v529_v14  ;;  %v555_v20 = vsub.f32 %v510_v5, %v529_v14  ;;  %v546_v21 = vsub.f32 %v504_v62, %v529_v14  ;;  %v547_v22 = vsub.f32 %v506_v63, %v529_v14 }
 0x1b3   : > { %v540_v23 = vmul.f32 %v538_v15, %v538_v15  ;;  %v541_v24 = vmul.f32 %v539_v16, %v539_v16  ;;  %v532_v25 = vmul.f32 %v530_v17, %v530_v17  ;;  %v533_v26 = vmul.f32 %v531_v18, %v531_v18 }
 0x1b4   : > { %v556_v27 = vmul.f32 %v554_v19, %v554_v19  ;;  %v557_v28 = vmul.f32 %v555_v20, %v555_v20  ;;  %v548_v31 = vmul.f32 %v546_v21, %v546_v21  ;;  %v549_v32 = vmul.f32 %v547_v22, %v547_v22 }
 0x1b5   : > { %v542_v29 = vadd.f32 %v541_v24, %v540_v23  ;;  %v534_v30 = vadd.f32 %v533_v26, %v532_v25 }
 0x1b6   : > { %v558_v33 = vadd.f32 %v557_v28, %v556_v27  ;;  %v550_v34 = vadd.f32 %v549_v32, %v548_v31 }
 0x1b7   : > { %543 = vadd.xlane.f32.xlu1 %v542_v29  ;;  %535 = vadd.xlane.f32.xlu0 %v534_v30 }
 0x1bb   : > { %559 = vadd.xlane.f32.xlu1 %v558_v33  ;;  %551 = vadd.xlane.f32.xlu0 %v550_v34 }
 0x240   : > { %v544_v35 = vpop.xlane.xlu1 %543  ;;  %v536_v36 = vpop.xlane.xlu0 %535 }
 0x241   : > { %v545_v37 = vadd.f32 %v544_v35, %v536_v36 }
 0x244   : > { %v552_v38 = vpop.xlane.xlu0 %551  ;;  %v560_v40 = vpop.xlane.xlu1 %559 }
 0x245   : > { %v553_v39 = vadd.f32 %v552_v38, %v545_v37 }
 0x247   : > { %v561_v41 = vadd.f32 %v560_v40, %v553_v39 }
 0x249   : > { %v562_v42 = vmul.f32 0.0009765625, %v561_v41 }
 0x24b   : > { %v563_v43 = vadd.f32 1e-05, %v562_v42 }
 0x24d   : > { %779 = vrsqrt.f32 %v563_v43 }
 0x25a   : > { %v780_v44 = vpop.eup %779 }
 0x25b   : > { %v565_v45 = vmul.f32 %v780_v44, %v530_v17  ;;  %v566_v46 = vmul.f32 %v780_v44, %v531_v18  ;;  %v573_v47 = vmul.f32 %v780_v44, %v538_v15  ;;  %v574_v48 = vmul.f32 %v780_v44, %v539_v16 }
 0x25c   : > { %v581_v49 = vmul.f32 %v780_v44, %v546_v21  ;;  %v582_v50 = vmul.f32 %v780_v44, %v547_v22  ;;  %v589_v51 = vmul.f32 %v780_v44, %v554_v19  ;;  %v590_v52 = vmul.f32 %v780_v44, %v555_v20 }
 0x25d   : > { %v567_v53 = vmul.f32 0.1, %v565_v45  ;;  %v568_v54 = vmul.f32 0.1, %v566_v46  ;;  %v575_v55 = vmul.f32 0.1, %v573_v47 }
 0x25e   : > { %v576_v56 = vmul.f32 0.1, %v574_v48  ;;  %v583_v57 = vmul.f32 0.1, %v581_v49  ;;  %v584_v58 = vmul.f32 0.1, %v582_v50 }
 0x25f   : > { %v569_v59 = vmax.f32 %v565_v45, %v567_v53  ;;  %v570_v60 = vmax.f32 %v566_v46, %v568_v54  ;;  %v577_v61 = vmax.f32 %v573_v47, %v575_v55  ;;  %v591_v62 = vmul.f32 0.1, %v589_v51 }
 0x260   : > { %v578_v63 = vmax.f32 %v574_v48, %v576_v56  ;;  %v585_v0 = vmax.f32 %v581_v49, %v583_v57  ;;  %v586_v1 = vmax.f32 %v582_v50, %v584_v58  ;;  %v592_v2 = vmul.f32 0.1, %v590_v52 }
 0x261   : > { %571 = vst [vmem:[%s143_s30] sm:$0xff] %v569_v59  ;;  %572 = vst [vmem:[%s143_s30 + $0x8] sm:$0xff] %v570_v60  ;;  %v593_v3 = vmax.f32 %v589_v51, %v591_v62 }
 0x262   : > { %579 = vst [vmem:[%s143_s30 + $0x10] sm:$0xff] %v577_v61  ;;  %580 = vst [vmem:[%s143_s30 + $0x18] sm:$0xff] %v578_v63  ;;  %v594_v4 = vmax.f32 %v590_v52, %v592_v2 }
 0x263   : > { %587 = vst [vmem:[%s143_s30 + $0x20] sm:$0xff] %v585_v0  ;;  %588 = vst [vmem:[%s143_s30 + $0x28] sm:$0xff] %v586_v1 }
 0x264   : > { %595 = vst [vmem:[%s143_s30 + $0x30] sm:$0xff] %v593_v3  ;;  %596 = vst [vmem:[%s143_s30 + $0x38] sm:$0xff] %v594_v4 }
 0x265 PF: > { %s12_s9 = sadd.s32 1, %s787_s9  }
 0x266   : > { %p9_p4 = scmp.ge.s32.totalorder %s12_s9, 4  }
 0x268   :  { %11 = sbr.rel (!%p9_p4) target bundleno = 1 (0x1), region = 58 }

// kernel: attr_encoder_forward.19
= control target key start
LH: loop header
LB: loop body
LE: loop exit
PB: predicated region body
PF: predicated region fallthrough
CT: control target
= control target key end

     0   :  { %8 = vsyncpa [#allocation3], 0  ;;  %s3562_s0 = inlined_call_operand.vmem [shape: bf16[32,64], index: 0, kind: input, shape index: {}]   ;;  %s3563_s1 = inlined_call_operand.vmem [shape: bf16[64,32], index: 1, kind: input, shape index: {}]   ;;  %s3564_s2 = inlined_call_operand.vmem [shape: bf16[2,512,32], index: 2, kind: input, shape index: {}]   ;;  %s3565_s3 = inlined_call_operand.hbm [shape: f32[2,16,64,64], index: 3, kind: output, shape index: {}]  }
   0x1   :  { %10 = vsyncpa [#allocation3 + $0x1], 0  ;;  %s2950_s12 = smov 0   ;;  %s2952_s13 = smov 0  }
   0x2   :  { %s2954_s14 = smov 0   ;;  %s2956_s15 = smov 0  }
   0x3 LB: > { %s2971_s16 = sadd.s32 4294967295, %s2925_s15   ;;  %s2128_s17 = sadd.s32 4294967294, %s2925_s15   ;;  %s2925_s15 = sphi %s2956_s15, %s3571_s15   ;;  %s2921_s14 = sphi %s2954_s14, %s3570_s14   ;;  %s2917_s13 = sphi %s2952_s13, %s3569_s13   ;;  %s2913_s12 = sphi %s2950_s12, %s3568_s12  }
   0x4   : > { %s2975_s18 = sadd.s32 1, %s2925_s15   ;;  %s91_s19 = sadd.s32 1, %s2921_s14 }
   0x5   : > { %s88_s20 = ssub.s32 %s2925_s15, %s2975_s18  ;;  %p101_p0 = scmp.ne.s32.totalorder %s2921_s14, %s2917_s13 }
   0x6   : > { %p89_p1 = scmp.eq.s32.totalorder %s88_s20, 0  ;;  %p102_p2 = scmp.eq.s32.totalorder %s2971_s16, 1 }
   0x7   : > { %p107_p3 = scmp.ne.s32.totalorder %s2917_s13, %s2913_s12  ;;  %p108_p4 = scmp.eq.s32.totalorder %s2128_s17, 1 }
   0x8   : > { %s2986_s21 = scalar_select %p89_p1, %s2921_s14, %s91_s19  }
   0x9   : > { %p2988_p5 = por %p102_p2, %p101_p0  ;;  %p2992_p6 = por %p108_p4, %p107_p3 }
   0xa   : > { %p2131_p7 = scmp.ge.s32.totalorder %s2925_s15, 1  ;;  %p140_p8 = scmp.lt.s32.totalorder %s2925_s15, 3 }
   0xc   : > { %p141_p9 = pnand %p2131_p7, %p140_p8 }
   0xd   : > { %p164_p10 = scmp.lt.s32.totalorder (!%p141_p9), %s2971_s16, 1  ;;  %s161_s20 = sand.u32 (!%p141_p9), 1, %s2917_s13  }
   0xe   : > { %144 = sbr.rel (%p141_p9) target bundleno = 632 (0x278), region = 32  ;;  %s2132_s24 = sshll.u32 (!%p141_p9), %s161_s20, 10 }
   0xf   : > { %s3253_s25 = scalar_lea.vmem (!%p141_p9), [#allocation2], %s2132_s24  ;;  %s2395_s26 = sshll.u32 (!%p141_p9), %s2971_s16, 14 }
  0x10   : > { %s2066_s27 = sshll.u32 (!%p141_p9), %s3253_s25, 4  ;;  %s3512_s30 = scalar_lea.hbm (!%p141_p9), %s3565_s3, %s2395_s26  ;;  %s3514_s27 = int_to_ptr.vmem [resolvable:$true] %s2066_s27 }
  0x11   : > { %s2865_s4 = scalar_lea.vmem (!%p141_p9), %s3514_s27, 16384 }
  0x12   : > { %p2866_p11 = scmp.ne.s32.totalorder (!%p141_p9), %s3514_s27, %s2865_s4 }
  0x13   : > { %v2827_v0 = vld [vmem:[%s3562_s0 + $0x8] sm:$0xff]   ;;  %v2828_v1 = vld [vmem:[%s3562_s0] sm:$0xff]   ;;  %s165_s28 = scalar_select %p164_p10, %s2971_s16, 1  ;;  %vm410_vm0 = vcmask 261120   ;;  %v3092_v45 = vld [vmem:[%s3563_s1 + $0x10] sm:$0xff]   ;;  %vm933_vm1 = vcmask 523264  }
  0x14   : > { %2526 = vmatprep.subr.bf16.mxu0 %v2827_v0  ;;  %v3057_v24 = vld [vmem:[%s3563_s1] sm:$0xff]   ;;  %v3087_v43 = vld [vmem:[%s3563_s1 + $0x8] sm:$0xff]   ;;  %v3101_v51 = vld [vmem:[%s3563_s1 + $0x18] sm:$0xff]   ;;  %s3522_s16 = scalar_lea.sflag [#allocation3], %s161_s20  ;;  %p2867_p12 = pnand %p2866_p11, %p2988_p5 }
  0x15   : > { %2527 = vmatpush3.bf16.msra.mxu0 %v2827_v0  ;;  %s2394_s29 = sshll.u32 %s165_s28, 8  ;;  %2598 = vmatprep.mubr.msk.bf16.mxu1 %vm410_vm0, %v3057_v24 }
  0x16   : > { %2528 = vmatprep.subr.bf16.mxu0 %v2828_v1  ;;  %s3009_s5 = scalar_lea.vmem %s3564_s2, %s2394_s29  ;;  %p2868_p13 = pneg %p2867_p12 }
  0x17   : > { %v2829_v2 = vld [vmem:[%s3009_s5] sm:$0xff]   ;;  %v2830_v3 = vld [vmem:[%s3009_s5 + $0x8] sm:$0xff]   ;;  %v2831_v4 = vld [vmem:[%s3009_s5 + $0x10] sm:$0xff]  }
  0x18   : > { %2530 = vmatprep.mubr.msk.bf16.mxu0 %vm410_vm0, %v2829_v2  ;;  %v2832_v5 = vld [vmem:[%s3009_s5 + $0x18] sm:$0xff]   ;;  %v2833_v6 = vld [vmem:[%s3009_s5 + $0x20] sm:$0xff]   ;;  %v2834_v7 = vld [vmem:[%s3009_s5 + $0x28] sm:$0xff]  }
  0x19   : > { %2529 = vmatpush3.bf16.msra.mxu0 %v2828_v1  ;;  %v2835_v8 = vld [vmem:[%s3009_s5 + $0x30] sm:$0xff]   ;;  %v2836_v9 = vld [vmem:[%s3009_s5 + $0x38] sm:$0xff]   ;;  %v2837_v10 = vld [vmem:[%s3009_s5 + $0x40] sm:$0xff]  }
  0x1a   : > { %v2838_v11 = vld [vmem:[%s3009_s5 + $0x48] sm:$0xff]   ;;  %v2839_v12 = vld [vmem:[%s3009_s5 + $0x50] sm:$0xff]   ;;  %v2840_v13 = vld [vmem:[%s3009_s5 + $0x58] sm:$0xff]  }
  0x1b   : > { %v2841_v14 = vld [vmem:[%s3009_s5 + $0x60] sm:$0xff]   ;;  %v2842_v15 = vld [vmem:[%s3009_s5 + $0x68] sm:$0xff]   ;;  %v2843_v16 = vld [vmem:[%s3009_s5 + $0x70] sm:$0xff]  }
  0x1c   : > { %2531 = vmatmul.mubr.msk.bf16.vlgmr.msra.gmra.mxu0 %vm410_vm0, %v2830_v3  ;;  %v2844_v17 = vld [vmem:[%s3009_s5 + $0x78] sm:$0xff]   ;;  %v2845_v18 = vld [vmem:[%s3009_s5 + $0x80] sm:$0xff]   ;;  %v2846_v19 = vld [vmem:[%s3009_s5 + $0x88] sm:$0xff]  }
  0x1d   : > { %2534 = vmatprep.mubr.msk.bf16.mxu0 %vm410_vm0, %v2831_v4  ;;  %v2847_v20 = vld [vmem:[%s3009_s5 + $0x90] sm:$0xff]   ;;  %v2848_v21 = vld [vmem:[%s3009_s5 + $0x98] sm:$0xff]   ;;  %v2849_v22 = vld [vmem:[%s3009_s5 + $0xa0] sm:$0xff]  }
  0x1e   : > { %v2850_v23 = vld [vmem:[%s3009_s5 + $0xa8] sm:$0xff]   ;;  %v2851_v25 = vld [vmem:[%s3009_s5 + $0xb0] sm:$0xff]   ;;  %v2852_v26 = vld [vmem:[%s3009_s5 + $0xb8] sm:$0xff]  }
  0x1f   : > { %v2853_v27 = vld [vmem:[%s3009_s5 + $0xc0] sm:$0xff]   ;;  %v2854_v28 = vld [vmem:[%s3009_s5 + $0xc8] sm:$0xff]   ;;  %v2855_v29 = vld [vmem:[%s3009_s5 + $0xd0] sm:$0xff]  }
  0x20   : > { %v2856_v30 = vld [vmem:[%s3009_s5 + $0xd8] sm:$0xff]   ;;  %v2857_v31 = vld [vmem:[%s3009_s5 + $0xe0] sm:$0xff]   ;;  %v2859_v32 = vld [vmem:[%s3009_s5 + $0xe8] sm:$0xff]  }
  0x21   : > { %v2861_v33 = vld [vmem:[%s3009_s5 + $0xf0] sm:$0xff]   ;;  %v2863_v34 = vld [vmem:[%s3009_s5 + $0xf8] sm:$0xff]   ;;  %s2927_s5 = smov [#allocation2]  }
  0x22   : > { %s2869_s6 = sshll.u32 %s2927_s5, 4  ;;  %s2870_s6 = int_to_ptr.vmem [resolvable:$false] %s2869_s6 }
  0x23   : > { %s2871_s7 = scalar_lea.vmem %s2870_s6, 32768  ;;  %p2872_p0 = scmp.lt.s32.totalorder %s3514_s27, %s2870_s6 }
  0x24   : > { %2535 = vmatmul.mubr.msk.bf16.gmra.mxu0 %vm410_vm0, %v2832_v5  ;;  %p2873_p1 = scmp.lt.s32.totalorder %s2871_s7, %s2865_s4 }
  0x25   : > { %2538 = vmatprep.mubr.msk.bf16.mxu0 %vm410_vm0, %v2833_v6 }
  0x26   : > { %p2874_p2 = por %p2873_p1, %p2872_p0 }
  0x28   : > { %p2875_p3 = pnand %p2874_p2, %p2868_p13 }
  0x2c   : > { %2539 = vmatmul.mubr.msk.bf16.gmra.mxu0 %vm410_vm0, %v2834_v7 }
  0x2d   : > { %2542 = vmatprep.mubr.msk.bf16.mxu0 %vm410_vm0, %v2835_v8 }
  0x34   : > { %2543 = vmatmul.mubr.msk.bf16.gmra.mxu0 %vm410_vm0, %v2836_v9 }
  0x35   : > { %2546 = vmatprep.mubr.msk.bf16.mxu0 %vm410_vm0, %v2837_v10 }
  0x3c   : > { %2547 = vmatmul.mubr.msk.bf16.gmra.mxu0 %vm410_vm0, %v2838_v11 }
  0x3d   : > { %2550 = vmatprep.mubr.msk.bf16.mxu0 %vm410_vm0, %v2839_v12 }
  0x44   : > { %2551 = vmatmul.mubr.msk.bf16.gmra.mxu0 %vm410_vm0, %v2840_v13 }
  0x45   : > { %2554 = vmatprep.mubr.msk.bf16.mxu0 %vm410_vm0, %v2841_v14 }
  0x4c   : > { %2555 = vmatmul.mubr.msk.bf16.gmra.mxu0 %vm410_vm0, %v2842_v15 }
  0x4d   : > { %2558 = vmatprep.mubr.msk.bf16.mxu0 %vm410_vm0, %v2843_v16 }
  0x54   : > { %2559 = vmatmul.mubr.msk.bf16.gmra.mxu0 %vm410_vm0, %v2844_v17 }
  0x55   : > { %2562 = vmatprep.mubr.msk.bf16.mxu0 %vm410_vm0, %v2845_v18 }
  0x5c   : > { %2563 = vmatmul.mubr.msk.bf16.gmra.mxu0 %vm410_vm0, %v2846_v19 }
  0x5d   : > { %2566 = vmatprep.mubr.msk.bf16.mxu0 %vm410_vm0, %v2847_v20 }
  0x64   : > { %2567 = vmatmul.mubr.msk.bf16.gmra.mxu0 %vm410_vm0, %v2848_v21 }
  0x65   : > { %2570 = vmatprep.mubr.msk.bf16.mxu0 %vm410_vm0, %v2849_v22 }
  0x6c   : > { %2571 = vmatmul.mubr.msk.bf16.gmra.mxu0 %vm410_vm0, %v2850_v23 }
  0x6d   : > { %2574 = vmatprep.mubr.msk.bf16.mxu0 %vm410_vm0, %v2851_v25 }
  0x74   : > { %2575 = vmatmul.mubr.msk.bf16.gmra.mxu0 %vm410_vm0, %v2852_v26 }
  0x75   : > { %2578 = vmatprep.mubr.msk.bf16.mxu0 %vm410_vm0, %v2853_v27 }
  0x7c   : > { %2579 = vmatmul.mubr.msk.bf16.gmra.mxu0 %vm410_vm0, %v2854_v28 }
  0x7d   : > { %2582 = vmatprep.mubr.msk.bf16.mxu0 %vm410_vm0, %v2855_v29 }
  0x84   : > { %2583 = vmatmul.mubr.msk.bf16.gmra.mxu0 %vm410_vm0, %v2856_v30 }
  0x85   : > { %2586 = vmatprep.mubr.msk.bf16.mxu0 %vm410_vm0, %v2857_v31 }
  0x8c   : > { %2587 = vmatmul.mubr.msk.bf16.gmra.mxu0 %vm410_vm0, %v2859_v32 }
  0x8d   : > { %2590 = vmatprep.mubr.msk.bf16.mxu0 %vm410_vm0, %v2861_v33 }
  0x94   : > { %2591 = vmatmul.mubr.msk.bf16.gmra.mxu0 %vm410_vm0, %v2863_v34 }
  0x95   : > { %2694 = vmatprep.mubr.msk.bf16.mxu0 %vm410_vm0, %v3057_v24 }
  0xdc   : > { %v2532_v35 = vpop.f32.mrf.mxu0 }
  0xde   : > { %v541_v36 = vpop.f32.mrf.mxu0 }
  0xe0   : > { %v2533_v37 = vpop.f32.mrf.mxu0 }
  0xe1   : > { %v797_v38 = vpack.c.bf16 %v2533_v37, %v2532_v35 }
  0xe2   : > { %v544_v39 = vpop.f32.mrf.mxu0 }
  0xe3   : > { %v796_v40 = vpack.c.bf16 %v544_v39, %v541_v36  ;;  %2594 = vmatprep.subr.bf16.mxu1 %v797_v38 }
  0xe4   : > { %v2536_v41 = vpop.f32.mrf.mxu0  ;;  %2595 = vmatpush3.bf16.msra.mxu1 %v797_v38 }
  0xe5   : > { %2596 = vmatprep.subr.bf16.mxu1 %v796_v40 }
  0xe6   : > { %v557_v42 = vpop.f32.mrf.mxu0 }
  0xe8   : > { %v2537_v44 = vpop.f32.mrf.mxu0  ;;  %2597 = vmatpush3.bf16.msra.mxu1 %v796_v40 }
  0xe9   : > { %v799_v46 = vpack.c.bf16 %v2537_v44, %v2536_v41 }
  0xea   : > { %v560_v47 = vpop.f32.mrf.mxu0 }
  0xeb   : > { %v798_v48 = vpack.c.bf16 %v560_v47, %v557_v42  ;;  %2599 = vmatmul.mubr.msk.bf16.vlgmr.msra.gmra.mxu1 %vm410_vm0, %v3087_v43  ;;  %2606 = vmatprep.subr.bf16.mxu1 %v799_v46 }
  0xec   : > { %v2540_v49 = vpop.f32.mrf.mxu0  ;;  %2607 = vmatpush3.bf16.msra.mxu1 %v799_v46  ;;  %2602 = vmatprep.mubr.msk.bf16.mxu1 %vm410_vm0, %v3092_v45 }
  0xed   : > { %2608 = vmatprep.subr.bf16.mxu1 %v798_v48 }
  0xee   : > { %v573_v50 = vpop.f32.mrf.mxu0 }
  0xf0   : > { %v2541_v52 = vpop.f32.mrf.mxu0  ;;  %2609 = vmatpush3.bf16.msra.mxu1 %v798_v48 }
  0xf1   : > { %v801_v53 = vpack.c.bf16 %v2541_v52, %v2540_v49 }
  0xf2   : > { %v576_v54 = vpop.f32.mrf.mxu0 }
  0xf3   : > { %2603 = vmatmul.mubr.msk.bf16.gmra.mxu1 %vm410_vm0, %v3101_v51  ;;  %2618 = vmatprep.subr.bf16.mxu1 %v801_v53  ;;  %v800_v58 = vpack.c.bf16 %v576_v54, %v573_v50 }
  0xf4   : > { %v2544_v55 = vpop.f32.mrf.mxu0  ;;  %2610 = vmatprep.mubr.msk.bf16.mxu1 %vm410_vm0, %v3057_v24 }
  0xf6   : > { %v589_v56 = vpop.f32.mrf.mxu0 }
  0xf8   : > { %v2545_v57 = vpop.f32.mrf.mxu0 }
  0xf9   : > { %v803_v61 = vpack.c.bf16 %v2545_v57, %v2544_v55 }
  0xfa   : > { %v592_v59 = vpop.f32.mrf.mxu0 }
  0xfb   : > { %2611 = vmatmul.mubr.msk.bf16.vlgmr.msra.gmra.mxu1 %vm410_vm0, %v3087_v43  ;;  %v802_v4 = vpack.c.bf16 %v592_v59, %v589_v56 }
  0xfc   : > { %2619 = vmatpush3.bf16.msra.mxu1 %v801_v53  ;;  %v2548_v60 = vpop.f32.mrf.mxu0  ;;  %2614 = vmatprep.mubr.msk.bf16.mxu1 %vm410_vm0, %v3092_v45 }
  0xfd   : > { %2620 = vmatprep.subr.bf16.mxu1 %v800_v58 }
  0xfe   : > { %v605_v62 = vpop.f32.mrf.mxu0 }
 0x100   : > { %2621 = vmatpush3.bf16.msra.mxu1 %v800_v58  ;;  %v2549_v63 = vpop.f32.mrf.mxu0 }
 0x101   : > { %2630 = vmatprep.subr.bf16.mxu1 %v803_v61  ;;  %v805_v7 = vpack.c.bf16 %v2549_v63, %v2548_v60 }
 0x102   : > { %v608_v0 = vpop.f32.mrf.mxu0 }
 0x103   : > { %2615 = vmatmul.mubr.msk.bf16.gmra.mxu1 %vm410_vm0, %v3101_v51  ;;  %v804_v14 = vpack.c.bf16 %v608_v0, %v605_v62 }
 0x104   : > { %v2552_v1 = vpop.f32.mrf.mxu0  ;;  %2622 = vmatprep.mubr.msk.bf16.mxu1 %vm410_vm0, %v3057_v24 }
 0x106   : > { %v621_v2 = vpop.f32.mrf.mxu0 }
 0x108   : > { %v2553_v3 = vpop.f32.mrf.mxu0 }
 0x109   : > { %v807_v17 = vpack.c.bf16 %v2553_v3, %v2552_v1 }
 0x10a   : > { %v624_v5 = vpop.f32.mrf.mxu0 }
 0x10b   : > { %2623 = vmatmul.mubr.msk.bf16.vlgmr.msra.gmra.mxu1 %vm410_vm0, %v3087_v43  ;;  %v806_v27 = vpack.c.bf16 %v624_v5, %v621_v2 }
 0x10c   : > { %2631 = vmatpush3.bf16.msra.mxu1 %v803_v61  ;;  %v2556_v6 = vpop.f32.mrf.mxu0  ;;  %2626 = vmatprep.mubr.msk.bf16.mxu1 %vm410_vm0, %v3092_v45 }
 0x10d   : > { %2632 = vmatprep.subr.bf16.mxu1 %v802_v4 }
 0x10e   : > { %v637_v8 = vpop.f32.mrf.mxu0 }
 0x110   : > { %2633 = vmatpush3.bf16.msra.mxu1 %v802_v4  ;;  %v2557_v9 = vpop.f32.mrf.mxu0 }
 0x111   : > { %2642 = vmatprep.subr.bf16.mxu1 %v805_v7  ;;  %v809_v30 = vpack.c.bf16 %v2557_v9, %v2556_v6 }
 0x112   : > { %v640_v10 = vpop.f32.mrf.mxu0 }
 0x113   : > { %2627 = vmatmul.mubr.msk.bf16.gmra.mxu1 %vm410_vm0, %v3101_v51  ;;  %v808_v39 = vpack.c.bf16 %v640_v10, %v637_v8 }
 0x114   : > { %v2560_v11 = vpop.f32.mrf.mxu0  ;;  %2634 = vmatprep.mubr.msk.bf16.mxu1 %vm410_vm0, %v3057_v24 }
 0x116   : > { %v3123_v12 = vpop.f32.mrf.mxu0 }
 0x118   : > { %v2561_v13 = vpop.f32.mrf.mxu0 }
 0x119   : > { %v811_v42 = vpack.c.bf16 %v2561_v13, %v2560_v11 }
 0x11a   : > { %v3125_v15 = vpop.f32.mrf.mxu0 }
 0x11b   : > { %2635 = vmatmul.mubr.msk.bf16.vlgmr.msra.gmra.mxu1 %vm410_vm0, %v3087_v43  ;;  %v810_v54 = vpack.c.bf16 %v3125_v15, %v3123_v12 }
 0x11c   : > { %2643 = vmatpush3.bf16.msra.mxu1 %v805_v7  ;;  %v2564_v16 = vpop.f32.mrf.mxu0  ;;  %2638 = vmatprep.mubr.msk.bf16.mxu1 %vm410_vm0, %v3092_v45 }
 0x11d   : > { %2644 = vmatprep.subr.bf16.mxu1 %v804_v14 }
 0x11e   : > { %v669_v18 = vpop.f32.mrf.mxu0 }
 0x120   : > { %2645 = vmatpush3.bf16.msra.mxu1 %v804_v14  ;;  %v2565_v19 = vpop.f32.mrf.mxu0 }
 0x121   : > { %v813_v20 = vpack.c.bf16 %v2565_v19, %v2564_v16  ;;  %2654 = vmatprep.subr.bf16.mxu1 %v807_v17 }
 0x122   : > { %v672_v21 = vpop.f32.mrf.mxu0 }
 0x123   : > { %v812_v22 = vpack.c.bf16 %v672_v21, %v669_v18  ;;  %2639 = vmatmul.mubr.msk.bf16.gmra.mxu1 %vm410_vm0, %v3101_v51  ;;  %2690 = vmatprep.subr.bf16.mxu0 %v813_v20 }
 0x124   : > { %2691 = vmatpush3.bf16.msra.mxu0 %v813_v20  ;;  %2646 = vmatprep.mubr.msk.bf16.mxu1 %vm410_vm0, %v3057_v24  ;;  %v3135_v23 = vpop.f32.mrf.mxu0 }
 0x125   : > { %2692 = vmatprep.subr.bf16.mxu0 %v812_v22 }
 0x126   : > { %v3137_v25 = vpop.f32.mrf.mxu0 }
 0x128   : > { %2693 = vmatpush3.bf16.msra.mxu0 %v812_v22  ;;  %v3139_v26 = vpop.f32.mrf.mxu0 }
 0x129   : > { %v815_v57 = vpack.c.bf16 %v3139_v26, %v3135_v23 }
 0x12a   : > { %v3141_v28 = vpop.f32.mrf.mxu0 }
 0x12b   : > { %2647 = vmatmul.mubr.msk.bf16.vlgmr.msra.gmra.mxu1 %vm410_vm0, %v3087_v43  ;;  %2695 = vmatmul.mubr.msk.bf16.vlgmr.msra.gmra.mxu0 %vm410_vm0, %v3087_v43  ;;  %v814_v63 = vpack.c.bf16 %v3141_v28, %v3137_v25 }
 0x12c   : > { %2655 = vmatpush3.bf16.msra.mxu1 %v807_v17  ;;  %2650 = vmatprep.mubr.msk.bf16.mxu1 %vm410_vm0, %v3092_v45  ;;  %v2572_v29 = vpop.f32.mrf.mxu0 }
 0x12d   : > { %2656 = vmatprep.subr.bf16.mxu1 %v806_v27  ;;  %2698 = vmatprep.mubr.msk.bf16.mxu0 %vm410_vm0, %v3092_v45 }
 0x12e   : > { %v701_v31 = vpop.f32.mrf.mxu0 }
 0x130   : > { %2657 = vmatpush3.bf16.msra.mxu1 %v806_v27  ;;  %v2573_v32 = vpop.f32.mrf.mxu0 }
 0x131   : > { %2666 = vmatprep.subr.bf16.mxu1 %v809_v30  ;;  %v817_v33 = vpack.c.bf16 %v2573_v32, %v2572_v29 }
 0x132   : > { %v704_v34 = vpop.f32.mrf.mxu0 }
 0x133   : > { %2651 = vmatmul.mubr.msk.bf16.gmra.mxu1 %vm410_vm0, %v3101_v51  ;;  %v816_v35 = vpack.c.bf16 %v704_v34, %v701_v31  ;;  %2714 = vmatprep.subr.bf16.mxu0 %v817_v33 }
 0x134   : > { %2658 = vmatprep.mubr.msk.bf16.mxu1 %vm410_vm0, %v3057_v24  ;;  %v3155_v36 = vpop.f32.mrf.mxu0  ;;  %2715 = vmatpush3.bf16.msra.mxu0 %v817_v33 }
 0x135   : > { %2716 = vmatprep.subr.bf16.mxu0 %v816_v35  ;;  %2699 = vmatmul.mubr.msk.bf16.gmra.mxu0 %vm410_vm0, %v3101_v51 }
 0x136   : > { %v3159_v37 = vpop.f32.mrf.mxu0  ;;  %2718 = vmatprep.mubr.msk.bf16.mxu0 %vm410_vm0, %v3057_v24 }
 0x138   : > { %v2577_v38 = vpop.f32.mrf.mxu0  ;;  %2717 = vmatpush3.bf16.msra.mxu0 %v816_v35 }
 0x139   : > { %v819_v0 = vpack.c.bf16 %v2577_v38, %v3155_v36 }
 0x13a   : > { %v3163_v40 = vpop.f32.mrf.mxu0 }
 0x13b   : > { %2659 = vmatmul.mubr.msk.bf16.vlgmr.msra.gmra.mxu1 %vm410_vm0, %v3087_v43  ;;  %v818_v1 = vpack.c.bf16 %v3163_v40, %v3159_v37 }
 0x13c   : > { %2667 = vmatpush3.bf16.msra.mxu1 %v809_v30  ;;  %2662 = vmatprep.mubr.msk.bf16.mxu1 %vm410_vm0, %v3092_v45  ;;  %v2580_v41 = vpop.f32.mrf.mxu0 }
 0x13d   : > { %2668 = vmatprep.subr.bf16.mxu1 %v808_v39  ;;  %2719 = vmatmul.mubr.msk.bf16.vlgmr.msra.gmra.mxu0 %vm410_vm0, %v3087_v43 }
 0x13e   : > { %v733_v44 = vpop.f32.mrf.mxu0  ;;  %2722 = vmatprep.mubr.msk.bf16.mxu0 %vm410_vm0, %v3092_v45 }
 0x140   : > { %2669 = vmatpush3.bf16.msra.mxu1 %v808_v39  ;;  %v2581_v46 = vpop.f32.mrf.mxu0 }
 0x141   : > { %2678 = vmatprep.subr.bf16.mxu1 %v811_v42  ;;  %v821_v47 = vpack.c.bf16 %v2581_v46, %v2580_v41 }
 0x142   : > { %v736_v48 = vpop.f32.mrf.mxu0 }
 0x143   : > { %2663 = vmatmul.mubr.msk.bf16.gmra.mxu1 %vm410_vm0, %v3101_v51  ;;  %v820_v49 = vpack.c.bf16 %v736_v48, %v733_v44  ;;  %2738 = vmatprep.subr.bf16.mxu0 %v821_v47 }
 0x144   : > { %2670 = vmatprep.mubr.msk.bf16.mxu1 %vm410_vm0, %v3057_v24  ;;  %v2584_v50 = vpop.f32.mrf.mxu0  ;;  %2739 = vmatpush3.bf16.msra.mxu0 %v821_v47 }
 0x145   : > { %2740 = vmatprep.subr.bf16.mxu0 %v820_v49  ;;  %2723 = vmatmul.mubr.msk.bf16.gmra.mxu0 %vm410_vm0, %v3101_v51 }
 0x146   : > { %v749_v52 = vpop.f32.mrf.mxu0  ;;  %2742 = vmatprep.mubr.msk.bf16.mxu0 %vm410_vm0, %v3057_v24 }
 0x148   : > { %v2585_v53 = vpop.f32.mrf.mxu0  ;;  %2741 = vmatpush3.bf16.msra.mxu0 %v820_v49 }
 0x149   : > { %v823_v2 = vpack.c.bf16 %v2585_v53, %v2584_v50 }
 0x14a   : > { %v752_v55 = vpop.f32.mrf.mxu0 }
 0x14b   : > { %2671 = vmatmul.mubr.msk.bf16.vlgmr.msra.gmra.mxu1 %vm410_vm0, %v3087_v43  ;;  %v822_v5 = vpack.c.bf16 %v752_v55, %v749_v52 }
 0x14c   : > { %2679 = vmatpush3.bf16.msra.mxu1 %v811_v42  ;;  %2674 = vmatprep.mubr.msk.bf16.mxu1 %vm410_vm0, %v3092_v45  ;;  %v2588_v56 = vpop.f32.mrf.mxu0 }
 0x14d   : > { %2680 = vmatprep.subr.bf16.mxu1 %v810_v54  ;;  %2743 = vmatmul.mubr.msk.bf16.vlgmr.msra.gmra.mxu0 %vm410_vm0, %v3087_v43 }
 0x14e   : > { %v765_v58 = vpop.f32.mrf.mxu0  ;;  %2746 = vmatprep.mubr.msk.bf16.mxu0 %vm410_vm0, %v3092_v45 }
 0x150   : > { %2681 = vmatpush3.bf16.msra.mxu1 %v810_v54  ;;  %v2589_v59 = vpop.f32.mrf.mxu0 }
 0x151   : > { %2702 = vmatprep.subr.bf16.mxu1 %v815_v57  ;;  %v825_v60 = vpack.c.bf16 %v2589_v59, %v2588_v56 }
 0x152   : > { %v768_v61 = vpop.f32.mrf.mxu0 }
 0x153   : > { %2675 = vmatmul.mubr.msk.bf16.gmra.mxu1 %vm410_vm0, %v3101_v51  ;;  %v824_v62 = vpack.c.bf16 %v768_v61, %v765_v58  ;;  %2762 = vmatprep.subr.bf16.mxu0 %v825_v60 }
 0x154   : > { %2682 = vmatprep.mubr.msk.bf16.mxu1 %vm410_vm0, %v3057_v24  ;;  %2763 = vmatpush3.bf16.msra.mxu0 %v825_v60  ;;  %v2592_v3 = vpop.f32.mrf.mxu0 }
 0x155   : > { %2764 = vmatprep.subr.bf16.mxu0 %v824_v62  ;;  %2747 = vmatmul.mubr.msk.bf16.gmra.mxu0 %vm410_vm0, %v3101_v51 }
 0x156   : > { %2766 = vmatprep.mubr.msk.bf16.mxu0 %vm410_vm0, %v3057_v24  ;;  %v781_v4 = vpop.f32.mrf.mxu0 }
 0x158   : > { %2765 = vmatpush3.bf16.msra.mxu0 %v824_v62  ;;  %v2593_v6 = vpop.f32.mrf.mxu0 }
 0x159   : > { %v827_v7 = vpack.c.bf16 %v2593_v6, %v2592_v3 }
 0x15a   : > { %v784_v8 = vpop.f32.mrf.mxu0 }
 0x15b   : > { %2683 = vmatmul.mubr.msk.bf16.vlgmr.msra.gmra.mxu1 %vm410_vm0, %v3087_v43  ;;  %v826_v9 = vpack.c.bf16 %v784_v8, %v781_v4 }
 0x15c   : > { %2703 = vmatpush3.bf16.msra.mxu1 %v815_v57  ;;  %2686 = vmatprep.mubr.msk.bf16.mxu1 %vm410_vm0, %v3092_v45 }
 0x15d   : > { %2704 = vmatprep.subr.bf16.mxu1 %v814_v63  ;;  %2767 = vmatmul.mubr.msk.bf16.vlgmr.msra.gmra.mxu0 %vm410_vm0, %v3087_v43 }
 0x15e   : > { %2770 = vmatprep.mubr.msk.bf16.mxu0 %vm410_vm0, %v3092_v45 }
 0x160   : > { %2705 = vmatpush3.bf16.msra.mxu1 %v814_v63 }
 0x161   : > { %2726 = vmatprep.subr.bf16.mxu1 %v819_v0 }
 0x163   : > { %2687 = vmatmul.mubr.msk.bf16.gmra.mxu1 %vm410_vm0, %v3101_v51 }
 0x164   : > { %2706 = vmatprep.mubr.msk.bf16.mxu1 %vm410_vm0, %v3057_v24 }
 0x165   : > { %2771 = vmatmul.mubr.msk.bf16.gmra.mxu0 %vm410_vm0, %v3101_v51 }
 0x16b   : > { %2707 = vmatmul.mubr.msk.bf16.vlgmr.msra.gmra.mxu1 %vm410_vm0, %v3087_v43 }
 0x16c   : > { %2727 = vmatpush3.bf16.msra.mxu1 %v819_v0  ;;  %2710 = vmatprep.mubr.msk.bf16.mxu1 %vm410_vm0, %v3092_v45 }
 0x16d   : > { %2728 = vmatprep.subr.bf16.mxu1 %v818_v1 }
 0x170   : > { %2729 = vmatpush3.bf16.msra.mxu1 %v818_v1 }
 0x171   : > { %2750 = vmatprep.subr.bf16.mxu1 %v823_v2 }
 0x173   : > { %2711 = vmatmul.mubr.msk.bf16.gmra.mxu1 %vm410_vm0, %v3101_v51 }
 0x174   : > { %2730 = vmatprep.mubr.msk.bf16.mxu1 %vm410_vm0, %v3057_v24 }
 0x17b   : > { %2731 = vmatmul.mubr.msk.bf16.vlgmr.msra.gmra.mxu1 %vm410_vm0, %v3087_v43 }
 0x17c   : > { %2751 = vmatpush3.bf16.msra.mxu1 %v823_v2  ;;  %2734 = vmatprep.mubr.msk.bf16.mxu1 %vm410_vm0, %v3092_v45 }
 0x17d   : > { %2752 = vmatprep.subr.bf16.mxu1 %v822_v5 }
 0x180   : > { %2753 = vmatpush3.bf16.msra.mxu1 %v822_v5 }
 0x181   : > { %2774 = vmatprep.subr.bf16.mxu1 %v827_v7 }
 0x183   : > { %2735 = vmatmul.mubr.msk.bf16.gmra.mxu1 %vm410_vm0, %v3101_v51 }
 0x184   : > { %2754 = vmatprep.mubr.msk.bf16.mxu1 %vm410_vm0, %v3057_v24 }
 0x18b   : > { %2755 = vmatmul.mubr.msk.bf16.vlgmr.msra.gmra.mxu1 %vm410_vm0, %v3087_v43 }
 0x18c   : > { %2775 = vmatpush3.bf16.msra.mxu1 %v827_v7  ;;  %2758 = vmatprep.mubr.msk.bf16.mxu1 %vm410_vm0, %v3092_v45 }
 0x18d   : > { %2776 = vmatprep.subr.bf16.mxu1 %v826_v9 }
 0x190   : > { %2777 = vmatpush3.bf16.msra.mxu1 %v826_v9 }
 0x193   : > { %2759 = vmatmul.mubr.msk.bf16.gmra.mxu1 %vm410_vm0, %v3101_v51 }
 0x194   : > { %2778 = vmatprep.mubr.msk.bf16.mxu1 %vm410_vm0, %v3057_v24 }
 0x19b   : > { %2779 = vmatmul.mubr.msk.bf16.vlgmr.msra.gmra.mxu1 %vm410_vm0, %v3087_v43 }
 0x19c   : > { %2782 = vmatprep.mubr.msk.bf16.mxu1 %vm410_vm0, %v3092_v45 }
 0x1a3   : > { %2783 = vmatmul.mubr.msk.bf16.gmra.mxu1 %vm410_vm0, %v3101_v51 }
 0x1ab   : > { %v2600_v10 = vpop.f32.mrf.mxu1 }
 0x1ac   : > { %936 = vst.msk [vmem:[%s3253_s25 + $0x10] sm:$0xff] %vm933_vm1, %v2600_v10 }
 0x1ad   : > { %v902_v24 = vpop.f32.mrf.mxu1 }
 0x1ae   : > { %934 = vst.msk [vmem:[%s3253_s25] sm:$0xff] %vm933_vm1, %v902_v24 }
 0x1af   : > { %v2601_v43 = vpop.f32.mrf.mxu1 }
 0x1b0   : > { %937 = vst.msk [vmem:[%s3253_s25 + $0x18] sm:$0xff] %vm933_vm1, %v2601_v43 }
 0x1b1   : > { %v905_v45 = vpop.f32.mrf.mxu1 }
 0x1b2   : > { %935 = vst.msk [vmem:[%s3253_s25 + $0x8] sm:$0xff] %vm933_vm1, %v905_v45 }
 0x1b3   : > { %v2604_v51 = vpop.f32.mrf.mxu1 }
 0x1b4   : > { %940 = vst.msk [vmem:[%s3253_s25 + $0x30] sm:$0xff] %vm933_vm1, %v2604_v51 }
 0x1b5   : > { %v918_v11 = vpop.f32.mrf.mxu1 }
 0x1b6   : > { %938 = vst.msk [vmem:[%s3253_s25 + $0x20] sm:$0xff] %vm933_vm1, %v918_v11 }
 0x1b7   : > { %v2605_v12 = vpop.f32.mrf.mxu1 }
 0x1b8   : > { %941 = vst.msk [vmem:[%s3253_s25 + $0x38] sm:$0xff] %vm933_vm1, %v2605_v12 }
 0x1b9   : > { %v921_v13 = vpop.f32.mrf.mxu1 }
 0x1ba   : > { %939 = vst.msk [vmem:[%s3253_s25 + $0x28] sm:$0xff] %vm933_vm1, %v921_v13 }
 0x1bb   : > { %v2612_v14 = vpop.f32.mrf.mxu1 }
 0x1bc   : > { %2215 = vst.msk [vmem:[%s3253_s25 + $0x50] sm:$0xff] %vm933_vm1, %v2612_v14 }
 0x1bd   : > { %v976_v15 = vpop.f32.mrf.mxu1 }
 0x1be   : > { %2213 = vst.msk [vmem:[%s3253_s25 + $0x40] sm:$0xff] %vm933_vm1, %v976_v15 }
 0x1bf   : > { %v2613_v16 = vpop.f32.mrf.mxu1 }
 0x1c0   : > { %2216 = vst.msk [vmem:[%s3253_s25 + $0x58] sm:$0xff] %vm933_vm1, %v2613_v16 }
 0x1c1   : > { %v979_v17 = vpop.f32.mrf.mxu1 }
 0x1c2   : > { %2214 = vst.msk [vmem:[%s3253_s25 + $0x48] sm:$0xff] %vm933_vm1, %v979_v17 }
 0x1c3   : > { %v2616_v18 = vpop.f32.mrf.mxu1 }
 0x1c4   : > { %2219 = vst.msk [vmem:[%s3253_s25 + $0x70] sm:$0xff] %vm933_vm1, %v2616_v18 }
 0x1c5   : > { %v992_v19 = vpop.f32.mrf.mxu1 }
 0x1c6   : > { %2217 = vst.msk [vmem:[%s3253_s25 + $0x60] sm:$0xff] %vm933_vm1, %v992_v19 }
 0x1c7   : > { %v2617_v20 = vpop.f32.mrf.mxu1 }
 0x1c8   : > { %2220 = vst.msk [vmem:[%s3253_s25 + $0x78] sm:$0xff] %vm933_vm1, %v2617_v20 }
 0x1c9   : > { %v995_v21 = vpop.f32.mrf.mxu1 }
 0x1ca   : > { %2218 = vst.msk [vmem:[%s3253_s25 + $0x68] sm:$0xff] %vm933_vm1, %v995_v21 }
 0x1cb   : > { %v2624_v22 = vpop.f32.mrf.mxu1 }
 0x1cc   : > { %2227 = vst.msk [vmem:[%s3253_s25 + $0x90] sm:$0xff] %vm933_vm1, %v2624_v22 }
 0x1cd   : > { %v1050_v23 = vpop.f32.mrf.mxu1 }
 0x1ce   : > { %2225 = vst.msk [vmem:[%s3253_s25 + $0x80] sm:$0xff] %vm933_vm1, %v1050_v23 }
 0x1cf   : > { %v2625_v25 = vpop.f32.mrf.mxu1 }
 0x1d0   : > { %2228 = vst.msk [vmem:[%s3253_s25 + $0x98] sm:$0xff] %vm933_vm1, %v2625_v25 }
 0x1d1   : > { %v1053_v26 = vpop.f32.mrf.mxu1 }
 0x1d2   : > { %2226 = vst.msk [vmem:[%s3253_s25 + $0x88] sm:$0xff] %vm933_vm1, %v1053_v26 }
 0x1d3   : > { %v2628_v27 = vpop.f32.mrf.mxu1 }
 0x1d4   : > { %2231 = vst.msk [vmem:[%s3253_s25 + $0xb0] sm:$0xff] %vm933_vm1, %v2628_v27 }
 0x1d5   : > { %v1066_v28 = vpop.f32.mrf.mxu1 }
 0x1d6   : > { %2229 = vst.msk [vmem:[%s3253_s25 + $0xa0] sm:$0xff] %vm933_vm1, %v1066_v28 }
 0x1d7   : > { %v2629_v29 = vpop.f32.mrf.mxu1 }
 0x1d8   : > { %2232 = vst.msk [vmem:[%s3253_s25 + $0xb8] sm:$0xff] %vm933_vm1, %v2629_v29 }
 0x1d9   : > { %v1069_v30 = vpop.f32.mrf.mxu1 }
 0x1da   : > { %2230 = vst.msk [vmem:[%s3253_s25 + $0xa8] sm:$0xff] %vm933_vm1, %v1069_v30 }
 0x1db   : > { %v2636_v31 = vpop.f32.mrf.mxu1 }
 0x1dc   : > { %2239 = vst.msk [vmem:[%s3253_s25 + $0xd0] sm:$0xff] %vm933_vm1, %v2636_v31 }
 0x1dd   : > { %v1124_v32 = vpop.f32.mrf.mxu1 }
 0x1de   : > { %2237 = vst.msk [vmem:[%s3253_s25 + $0xc0] sm:$0xff] %vm933_vm1, %v1124_v32 }
 0x1df   : > { %v2637_v33 = vpop.f32.mrf.mxu1 }
 0x1e0   : > { %2240 = vst.msk [vmem:[%s3253_s25 + $0xd8] sm:$0xff] %vm933_vm1, %v2637_v33 }
 0x1e1   : > { %v1127_v34 = vpop.f32.mrf.mxu1 }
 0x1e2   : > { %2238 = vst.msk [vmem:[%s3253_s25 + $0xc8] sm:$0xff] %vm933_vm1, %v1127_v34 }
 0x1e3   : > { %v2640_v35 = vpop.f32.mrf.mxu1 }
 0x1e4   : > { %2243 = vst.msk [vmem:[%s3253_s25 + $0xf0] sm:$0xff] %vm933_vm1, %v2640_v35 }
 0x1e5   : > { %v1140_v36 = vpop.f32.mrf.mxu1 }
 0x1e6   : > { %2241 = vst.msk [vmem:[%s3253_s25 + $0xe0] sm:$0xff] %vm933_vm1, %v1140_v36 }
 0x1e7   : > { %v2641_v37 = vpop.f32.mrf.mxu1 }
 0x1e8   : > { %2244 = vst.msk [vmem:[%s3253_s25 + $0xf8] sm:$0xff] %vm933_vm1, %v2641_v37 }
 0x1e9   : > { %v1143_v38 = vpop.f32.mrf.mxu1 }
 0x1ea   : > { %2242 = vst.msk [vmem:[%s3253_s25 + $0xe8] sm:$0xff] %vm933_vm1, %v1143_v38 }
 0x1eb   : > { %v2648_v39 = vpop.f32.mrf.mxu1  ;;  %v2696_v40 = vpop.f32.mrf.mxu0 }
 0x1ec   : > { %2251 = vst.msk [vmem:[%s3253_s25 + $0x110] sm:$0xff] %vm933_vm1, %v2648_v39  ;;  %2299 = vst.msk [vmem:[%s3253_s25 + $0x210] sm:$0xff] %vm933_vm1, %v2696_v40 }
 0x1ed   : > { %v1198_v41 = vpop.f32.mrf.mxu1  ;;  %v1494_v42 = vpop.f32.mrf.mxu0 }
 0x1ee   : > { %2249 = vst.msk [vmem:[%s3253_s25 + $0x100] sm:$0xff] %vm933_vm1, %v1198_v41  ;;  %2297 = vst.msk [vmem:[%s3253_s25 + $0x200] sm:$0xff] %vm933_vm1, %v1494_v42 }
 0x1ef   : > { %v2649_v44 = vpop.f32.mrf.mxu1  ;;  %v2697_v46 = vpop.f32.mrf.mxu0 }
 0x1f0   : > { %2252 = vst.msk [vmem:[%s3253_s25 + $0x118] sm:$0xff] %vm933_vm1, %v2649_v44  ;;  %2300 = vst.msk [vmem:[%s3253_s25 + $0x218] sm:$0xff] %vm933_vm1, %v2697_v46 }
 0x1f1   : > { %v1201_v47 = vpop.f32.mrf.mxu1  ;;  %v1497_v48 = vpop.f32.mrf.mxu0 }
 0x1f2   : > { %2250 = vst.msk [vmem:[%s3253_s25 + $0x108] sm:$0xff] %vm933_vm1, %v1201_v47  ;;  %2298 = vst.msk [vmem:[%s3253_s25 + $0x208] sm:$0xff] %vm933_vm1, %v1497_v48 }
 0x1f3   : > { %v2652_v49 = vpop.f32.mrf.mxu1 }
 0x1f4   : > { %2255 = vst.msk [vmem:[%s3253_s25 + $0x130] sm:$0xff] %vm933_vm1, %v2652_v49 }
 0x1f5   : > { %v1214_v50 = vpop.f32.mrf.mxu1  ;;  %v2700_v52 = vpop.f32.mrf.mxu0 }
 0x1f6   : > { %2253 = vst.msk [vmem:[%s3253_s25 + $0x120] sm:$0xff] %vm933_vm1, %v1214_v50  ;;  %2303 = vst.msk [vmem:[%s3253_s25 + $0x230] sm:$0xff] %vm933_vm1, %v2700_v52 }
 0x1f7   : > { %v2653_v53 = vpop.f32.mrf.mxu1  ;;  %v1510_v54 = vpop.f32.mrf.mxu0 }
 0x1f8   : > { %2256 = vst.msk [vmem:[%s3253_s25 + $0x138] sm:$0xff] %vm933_vm1, %v2653_v53  ;;  %2301 = vst.msk [vmem:[%s3253_s25 + $0x220] sm:$0xff] %vm933_vm1, %v1510_v54 }
 0x1f9   : > { %v1217_v55 = vpop.f32.mrf.mxu1  ;;  %v2701_v56 = vpop.f32.mrf.mxu0 }
 0x1fa   : > { %2254 = vst.msk [vmem:[%s3253_s25 + $0x128] sm:$0xff] %vm933_vm1, %v1217_v55  ;;  %2304 = vst.msk [vmem:[%s3253_s25 + $0x238] sm:$0xff] %vm933_vm1, %v2701_v56 }
 0x1fb   : > { %v2660_v57 = vpop.f32.mrf.mxu1  ;;  %v1513_v58 = vpop.f32.mrf.mxu0 }
 0x1fc   : > { %2263 = vst.msk [vmem:[%s3253_s25 + $0x150] sm:$0xff] %vm933_vm1, %v2660_v57  ;;  %2302 = vst.msk [vmem:[%s3253_s25 + $0x228] sm:$0xff] %vm933_vm1, %v1513_v58 }
 0x1fd   : > { %v1272_v59 = vpop.f32.mrf.mxu1  ;;  %v2720_v60 = vpop.f32.mrf.mxu0 }
 0x1fe   : > { %2261 = vst.msk [vmem:[%s3253_s25 + $0x140] sm:$0xff] %vm933_vm1, %v1272_v59  ;;  %2323 = vst.msk [vmem:[%s3253_s25 + $0x290] sm:$0xff] %vm933_vm1, %v2720_v60 }
 0x1ff   : > { %v2661_v61 = vpop.f32.mrf.mxu1  ;;  %v1642_v62 = vpop.f32.mrf.mxu0 }
 0x200   : > { %2264 = vst.msk [vmem:[%s3253_s25 + $0x158] sm:$0xff] %vm933_vm1, %v2661_v61  ;;  %2321 = vst.msk [vmem:[%s3253_s25 + $0x280] sm:$0xff] %vm933_vm1, %v1642_v62 }
 0x201   : > { %v1275_v63 = vpop.f32.mrf.mxu1  ;;  %v2721_v0 = vpop.f32.mrf.mxu0 }
 0x202   : > { %2262 = vst.msk [vmem:[%s3253_s25 + $0x148] sm:$0xff] %vm933_vm1, %v1275_v63  ;;  %2324 = vst.msk [vmem:[%s3253_s25 + $0x298] sm:$0xff] %vm933_vm1, %v2721_v0 }
 0x203   : > { %v2664_v1 = vpop.f32.mrf.mxu1  ;;  %v1645_v2 = vpop.f32.mrf.mxu0 }
 0x204   : > { %2267 = vst.msk [vmem:[%s3253_s25 + $0x170] sm:$0xff] %vm933_vm1, %v2664_v1  ;;  %2322 = vst.msk [vmem:[%s3253_s25 + $0x288] sm:$0xff] %vm933_vm1, %v1645_v2 }
 0x205   : > { %v1288_v3 = vpop.f32.mrf.mxu1  ;;  %v2724_v4 = vpop.f32.mrf.mxu0 }
 0x206   : > { %2265 = vst.msk [vmem:[%s3253_s25 + $0x160] sm:$0xff] %vm933_vm1, %v1288_v3  ;;  %2327 = vst.msk [vmem:[%s3253_s25 + $0x2b0] sm:$0xff] %vm933_vm1, %v2724_v4 }
 0x207   : > { %v2665_v5 = vpop.f32.mrf.mxu1  ;;  %v1658_v6 = vpop.f32.mrf.mxu0 }
 0x208   : > { %2268 = vst.msk [vmem:[%s3253_s25 + $0x178] sm:$0xff] %vm933_vm1, %v2665_v5  ;;  %2325 = vst.msk [vmem:[%s3253_s25 + $0x2a0] sm:$0xff] %vm933_vm1, %v1658_v6 }
 0x209   : > { %v1291_v7 = vpop.f32.mrf.mxu1  ;;  %v2725_v8 = vpop.f32.mrf.mxu0 }
 0x20a   : > { %2266 = vst.msk [vmem:[%s3253_s25 + $0x168] sm:$0xff] %vm933_vm1, %v1291_v7  ;;  %2328 = vst.msk [vmem:[%s3253_s25 + $0x2b8] sm:$0xff] %vm933_vm1, %v2725_v8 }
 0x20b   : > { %v2672_v9 = vpop.f32.mrf.mxu1  ;;  %v1661_v10 = vpop.f32.mrf.mxu0 }
 0x20c   : > { %2275 = vst.msk [vmem:[%s3253_s25 + $0x190] sm:$0xff] %vm933_vm1, %v2672_v9  ;;  %2326 = vst.msk [vmem:[%s3253_s25 + $0x2a8] sm:$0xff] %vm933_vm1, %v1661_v10 }
 0x20d   : > { %v1346_v24 = vpop.f32.mrf.mxu1  ;;  %v2744_v43 = vpop.f32.mrf.mxu0 }
 0x20e   : > { %2273 = vst.msk [vmem:[%s3253_s25 + $0x180] sm:$0xff] %vm933_vm1, %v1346_v24  ;;  %2347 = vst.msk [vmem:[%s3253_s25 + $0x310] sm:$0xff] %vm933_vm1, %v2744_v43 }
 0x20f   : > { %v2673_v45 = vpop.f32.mrf.mxu1  ;;  %v1790_v51 = vpop.f32.mrf.mxu0 }
 0x210   : > { %2276 = vst.msk [vmem:[%s3253_s25 + $0x198] sm:$0xff] %vm933_vm1, %v2673_v45  ;;  %2345 = vst.msk [vmem:[%s3253_s25 + $0x300] sm:$0xff] %vm933_vm1, %v1790_v51 }
 0x211   : > { %v1349_v11 = vpop.f32.mrf.mxu1  ;;  %v2745_v12 = vpop.f32.mrf.mxu0 }
 0x212   : > { %2274 = vst.msk [vmem:[%s3253_s25 + $0x188] sm:$0xff] %vm933_vm1, %v1349_v11  ;;  %2348 = vst.msk [vmem:[%s3253_s25 + $0x318] sm:$0xff] %vm933_vm1, %v2745_v12 }
 0x213   : > { %v2676_v13 = vpop.f32.mrf.mxu1  ;;  %v1793_v14 = vpop.f32.mrf.mxu0 }
 0x214   : > { %2279 = vst.msk [vmem:[%s3253_s25 + $0x1b0] sm:$0xff] %vm933_vm1, %v2676_v13  ;;  %2346 = vst.msk [vmem:[%s3253_s25 + $0x308] sm:$0xff] %vm933_vm1, %v1793_v14 }
 0x215   : > { %v1362_v15 = vpop.f32.mrf.mxu1  ;;  %v2748_v16 = vpop.f32.mrf.mxu0 }
 0x216   : > { %2277 = vst.msk [vmem:[%s3253_s25 + $0x1a0] sm:$0xff] %vm933_vm1, %v1362_v15  ;;  %2351 = vst.msk [vmem:[%s3253_s25 + $0x330] sm:$0xff] %vm933_vm1, %v2748_v16 }
 0x217   : > { %v2677_v17 = vpop.f32.mrf.mxu1  ;;  %v1806_v18 = vpop.f32.mrf.mxu0 }
 0x218   : > { %2280 = vst.msk [vmem:[%s3253_s25 + $0x1b8] sm:$0xff] %vm933_vm1, %v2677_v17  ;;  %2349 = vst.msk [vmem:[%s3253_s25 + $0x320] sm:$0xff] %vm933_vm1, %v1806_v18 }
 0x219   : > { %v1365_v19 = vpop.f32.mrf.mxu1  ;;  %v2749_v20 = vpop.f32.mrf.mxu0 }
 0x21a   : > { %2278 = vst.msk [vmem:[%s3253_s25 + $0x1a8] sm:$0xff] %vm933_vm1, %v1365_v19  ;;  %2352 = vst.msk [vmem:[%s3253_s25 + $0x338] sm:$0xff] %vm933_vm1, %v2749_v20 }
 0x21b   : > { %v2684_v21 = vpop.f32.mrf.mxu1  ;;  %v1809_v22 = vpop.f32.mrf.mxu0 }
 0x21c   : > { %2287 = vst.msk [vmem:[%s3253_s25 + $0x1d0] sm:$0xff] %vm933_vm1, %v2684_v21  ;;  %2350 = vst.msk [vmem:[%s3253_s25 + $0x328] sm:$0xff] %vm933_vm1, %v1809_v22 }
 0x21d   : > { %v1420_v23 = vpop.f32.mrf.mxu1  ;;  %v2768_v25 = vpop.f32.mrf.mxu0 }
 0x21e   : > { %2285 = vst.msk [vmem:[%s3253_s25 + $0x1c0] sm:$0xff] %vm933_vm1, %v1420_v23  ;;  %2371 = vst.msk [vmem:[%s3253_s25 + $0x390] sm:$0xff] %vm933_vm1, %v2768_v25 }
 0x21f   : > { %v2685_v26 = vpop.f32.mrf.mxu1  ;;  %v1938_v27 = vpop.f32.mrf.mxu0 }
 0x220   : > { %2288 = vst.msk [vmem:[%s3253_s25 + $0x1d8] sm:$0xff] %vm933_vm1, %v2685_v26  ;;  %2369 = vst.msk [vmem:[%s3253_s25 + $0x380] sm:$0xff] %vm933_vm1, %v1938_v27 }
 0x221   : > { %v1423_v28 = vpop.f32.mrf.mxu1  ;;  %v2769_v29 = vpop.f32.mrf.mxu0 }
 0x222   : > { %2286 = vst.msk [vmem:[%s3253_s25 + $0x1c8] sm:$0xff] %vm933_vm1, %v1423_v28  ;;  %2372 = vst.msk [vmem:[%s3253_s25 + $0x398] sm:$0xff] %vm933_vm1, %v2769_v29 }
 0x223   : > { %v2688_v30 = vpop.f32.mrf.mxu1  ;;  %v1941_v31 = vpop.f32.mrf.mxu0 }
 0x224   : > { %2291 = vst.msk [vmem:[%s3253_s25 + $0x1f0] sm:$0xff] %vm933_vm1, %v2688_v30  ;;  %2370 = vst.msk [vmem:[%s3253_s25 + $0x388] sm:$0xff] %vm933_vm1, %v1941_v31 }
 0x225   : > { %v1436_v32 = vpop.f32.mrf.mxu1  ;;  %v2772_v33 = vpop.f32.mrf.mxu0 }
 0x226   : > { %2289 = vst.msk [vmem:[%s3253_s25 + $0x1e0] sm:$0xff] %vm933_vm1, %v1436_v32  ;;  %2375 = vst.msk [vmem:[%s3253_s25 + $0x3b0] sm:$0xff] %vm933_vm1, %v2772_v33 }
 0x227   : > { %v2689_v34 = vpop.f32.mrf.mxu1  ;;  %v1954_v35 = vpop.f32.mrf.mxu0 }
 0x228   : > { %2292 = vst.msk [vmem:[%s3253_s25 + $0x1f8] sm:$0xff] %vm933_vm1, %v2689_v34  ;;  %2373 = vst.msk [vmem:[%s3253_s25 + $0x3a0] sm:$0xff] %vm933_vm1, %v1954_v35 }
 0x229   : > { %v1439_v36 = vpop.f32.mrf.mxu1  ;;  %v2773_v37 = vpop.f32.mrf.mxu0 }
 0x22a   : > { %2290 = vst.msk [vmem:[%s3253_s25 + $0x1e8] sm:$0xff] %vm933_vm1, %v1439_v36  ;;  %2376 = vst.msk [vmem:[%s3253_s25 + $0x3b8] sm:$0xff] %vm933_vm1, %v2773_v37 }
 0x22b   : > { %v2708_v38 = vpop.f32.mrf.mxu1  ;;  %v1957_v39 = vpop.f32.mrf.mxu0 }
 0x22c   : > { %2311 = vst.msk [vmem:[%s3253_s25 + $0x250] sm:$0xff] %vm933_vm1, %v2708_v38  ;;  %2374 = vst.msk [vmem:[%s3253_s25 + $0x3a8] sm:$0xff] %vm933_vm1, %v1957_v39 }
 0x22d   : > { %v1568_v40 = vpop.f32.mrf.mxu1 }
 0x22e   : > { %2309 = vst.msk [vmem:[%s3253_s25 + $0x240] sm:$0xff] %vm933_vm1, %v1568_v40 }
 0x22f   : > { %v2709_v41 = vpop.f32.mrf.mxu1 }
 0x230   : > { %2312 = vst.msk [vmem:[%s3253_s25 + $0x258] sm:$0xff] %vm933_vm1, %v2709_v41 }
 0x231   : > { %v1571_v42 = vpop.f32.mrf.mxu1 }
 0x232   : > { %2310 = vst.msk [vmem:[%s3253_s25 + $0x248] sm:$0xff] %vm933_vm1, %v1571_v42 }
 0x233   : > { %v2712_v44 = vpop.f32.mrf.mxu1 }
 0x234   : > { %2315 = vst.msk [vmem:[%s3253_s25 + $0x270] sm:$0xff] %vm933_vm1, %v2712_v44 }
 0x235   : > { %v1584_v46 = vpop.f32.mrf.mxu1 }
 0x236   : > { %2313 = vst.msk [vmem:[%s3253_s25 + $0x260] sm:$0xff] %vm933_vm1, %v1584_v46 }
 0x237   : > { %v2713_v47 = vpop.f32.mrf.mxu1 }
 0x238   : > { %2316 = vst.msk [vmem:[%s3253_s25 + $0x278] sm:$0xff] %vm933_vm1, %v2713_v47 }
 0x239   : > { %v1587_v48 = vpop.f32.mrf.mxu1 }
 0x23a   : > { %2314 = vst.msk [vmem:[%s3253_s25 + $0x268] sm:$0xff] %vm933_vm1, %v1587_v48 }
 0x23b   : > { %v2732_v49 = vpop.f32.mrf.mxu1 }
 0x23c   : > { %2335 = vst.msk [vmem:[%s3253_s25 + $0x2d0] sm:$0xff] %vm933_vm1, %v2732_v49 }
 0x23d   : > { %v1716_v50 = vpop.f32.mrf.mxu1 }
 0x23e   : > { %2333 = vst.msk [vmem:[%s3253_s25 + $0x2c0] sm:$0xff] %vm933_vm1, %v1716_v50 }
 0x23f   : > { %v2733_v52 = vpop.f32.mrf.mxu1 }
 0x240   : > { %2336 = vst.msk [vmem:[%s3253_s25 + $0x2d8] sm:$0xff] %vm933_vm1, %v2733_v52 }
 0x241   : > { %v1719_v53 = vpop.f32.mrf.mxu1 }
 0x242   : > { %2334 = vst.msk [vmem:[%s3253_s25 + $0x2c8] sm:$0xff] %vm933_vm1, %v1719_v53 }
 0x243   : > { %v2736_v54 = vpop.f32.mrf.mxu1 }
 0x244   : > { %2339 = vst.msk [vmem:[%s3253_s25 + $0x2f0] sm:$0xff] %vm933_vm1, %v2736_v54 }
 0x245   : > { %v1732_v55 = vpop.f32.mrf.mxu1 }
 0x246   : > { %2337 = vst.msk [vmem:[%s3253_s25 + $0x2e0] sm:$0xff] %vm933_vm1, %v1732_v55 }
 0x247   : > { %v2737_v56 = vpop.f32.mrf.mxu1 }
 0x248   : > { %2340 = vst.msk [vmem:[%s3253_s25 + $0x2f8] sm:$0xff] %vm933_vm1, %v2737_v56 }
 0x249   : > { %v1735_v57 = vpop.f32.mrf.mxu1 }
 0x24a   : > { %2338 = vst.msk [vmem:[%s3253_s25 + $0x2e8] sm:$0xff] %vm933_vm1, %v1735_v57 }
 0x24b   : > { %v2756_v58 = vpop.f32.mrf.mxu1 }
 0x24c   : > { %2359 = vst.msk [vmem:[%s3253_s25 + $0x350] sm:$0xff] %vm933_vm1, %v2756_v58 }
 0x24d   : > { %v1864_v59 = vpop.f32.mrf.mxu1 }
 0x24e   : > { %2357 = vst.msk [vmem:[%s3253_s25 + $0x340] sm:$0xff] %vm933_vm1, %v1864_v59 }
 0x24f   : > { %v2757_v60 = vpop.f32.mrf.mxu1 }
 0x250   : > { %2360 = vst.msk [vmem:[%s3253_s25 + $0x358] sm:$0xff] %vm933_vm1, %v2757_v60 }
 0x251   : > { %v1867_v61 = vpop.f32.mrf.mxu1 }
 0x252   : > { %2358 = vst.msk [vmem:[%s3253_s25 + $0x348] sm:$0xff] %vm933_vm1, %v1867_v61 }
 0x253   : > { %v2760_v62 = vpop.f32.mrf.mxu1 }
 0x254   : > { %2363 = vst.msk [vmem:[%s3253_s25 + $0x370] sm:$0xff] %vm933_vm1, %v2760_v62 }
 0x255   : > { %v1880_v63 = vpop.f32.mrf.mxu1 }
 0x256   : > { %2361 = vst.msk [vmem:[%s3253_s25 + $0x360] sm:$0xff] %vm933_vm1, %v1880_v63 }
 0x257   : > { %v2761_v0 = vpop.f32.mrf.mxu1 }
 0x258   : > { %2364 = vst.msk [vmem:[%s3253_s25 + $0x378] sm:$0xff] %vm933_vm1, %v2761_v0 }
 0x259   : > { %v1883_v1 = vpop.f32.mrf.mxu1 }
 0x25a   : > { %2362 = vst.msk [vmem:[%s3253_s25 + $0x368] sm:$0xff] %vm933_vm1, %v1883_v1 }
 0x25b   : > { %v2780_v2 = vpop.f32.mrf.mxu1 }
 0x25c   : > { %2383 = vst.msk [vmem:[%s3253_s25 + $0x3d0] sm:$0xff] %vm933_vm1, %v2780_v2 }
 0x25d   : > { %v2012_v3 = vpop.f32.mrf.mxu1 }
 0x25e   : > { %2381 = vst.msk [vmem:[%s3253_s25 + $0x3c0] sm:$0xff] %vm933_vm1, %v2012_v3 }
 0x25f   : > { %v2781_v4 = vpop.f32.mrf.mxu1 }
 0x260   : > { %2384 = vst.msk [vmem:[%s3253_s25 + $0x3d8] sm:$0xff] %vm933_vm1, %v2781_v4 }
 0x261   : > { %v2015_v5 = vpop.f32.mrf.mxu1 }
 0x262   : > { %2382 = vst.msk [vmem:[%s3253_s25 + $0x3c8] sm:$0xff] %vm933_vm1, %v2015_v5 }
 0x263   : > { %v2784_v6 = vpop.f32.mrf.mxu1 }
 0x264   : > { %2387 = vst.msk [vmem:[%s3253_s25 + $0x3f0] sm:$0xff] %vm933_vm1, %v2784_v6 }
 0x265   : > { %v2028_v7 = vpop.f32.mrf.mxu1 }
 0x266   : > { %2385 = vst.msk [vmem:[%s3253_s25 + $0x3e0] sm:$0xff] %vm933_vm1, %v2028_v7 }
 0x267   : > { %v2785_v8 = vpop.f32.mrf.mxu1 }
 0x268   : > { %2388 = vst.msk [vmem:[%s3253_s25 + $0x3f8] sm:$0xff] %vm933_vm1, %v2785_v8 }
 0x269   : > { %v2031_v9 = vpop.f32.mrf.mxu1 }
 0x26a   : > { %2386 = vst.msk [vmem:[%s3253_s25 + $0x3e8] sm:$0xff] %vm933_vm1, %v2031_v9 }
 0x26b   : > { %2878 = shalt.err (!%p2875_p3)
}
 0x26c   : > { %s2879_s8 = scalar_lea.hbm %s3512_s30, 16384  ;;  %s2883_s11 = scalar_lea.hbm %s3565_s3, 32768 }
 0x26d   : > { %p2880_p4 = scmp.ne.s32.totalorder %s3512_s30, %s2879_s8  ;;  %p2884_p9 = scmp.lt.s32.totalorder %s3512_s30, %s3565_s3 }
 0x26e   : > { %p2885_p10 = scmp.lt.s32.totalorder %s2883_s11, %s2879_s8 }
 0x26f   : > { %p2881_p7 = pnand %p2880_p4, %p2988_p5 }
 0x270   : > { %p2886_p11 = por %p2885_p10, %p2884_p9 }
 0x271   : > { %p2882_p8 = pneg %p2881_p7 }
 0x273   : > { %p2887_p12 = pnand %p2886_p11, %p2882_p8 }
 0x275   : > { %2890 = shalt.err (!%p2887_p12)
}
 0x276   : > { %s2928_s20 = smov 128   ;;  %s2929_s24 = smov 8  }
 0x277   : > { %2786 = dma.vmem_to_hbm [thread:$0]  (%p2988_p5), %s3514_s27, 16384, %s3512_s30, %s3522_s16, %s2928_s20, %s2928_s20, %s2929_s24  }
 0x278 PF: > { %p2792_p13 = scmp.ge.s32.totalorder %s2925_s15, 2  ;;  %s2081_s25 = sand.u32 1, %s2913_s12  }
 0x279   : > { %s2082_s26 = scalar_lea.sflag [#allocation3], %s2081_s25 }
 0x27a   : > { %p2789_p0 = pnand %p2792_p13, %p2992_p6 }
 0x27c   : > { %p2790_p1 = pneg %p2789_p0 }
 0x27e   : > { %2908 = dma.done.wait (%p2790_p1), %s2082_s26, 16384  }
 0x27f   : > { %2910 = vsyncadd (%p2790_p1), %s2082_s26, 4294950912  ;;  %p13_p2 = scmp.ge.s32.totalorder %s2975_s18, 4   ;;  %s3568_s12 = smov %s2917_s13 }
 0x280   : > { %s3569_s13 = smov %s2921_s14  ;;  %s3570_s14 = smov %s2986_s21 }
 0x281   : > { %s3571_s15 = smov %s2975_s18  ;;  %15 = sbr.rel (!%p13_p2) target bundleno = 3 (0x3), region = 82 }
 0x286   :  { %2087 = vsyncpa [#allocation3], 1 }
 0x287   :  { %2089 = vsyncpa [#allocation3 + $0x1], 1 }

</bundles_post_ra>
